<compile_context>
chip_gen: v6e
topology: v6e:2x2x1
jax: 0.10.0
libtpu: 0.0.40
codegen_flags: <defaults>
</compile_context>

<pallas_src>
import math

import jax
import jax.numpy as jnp
from jax.experimental import pallas as pl
from jax.experimental.pallas import tpu as pltpu

D_MODEL = 32
N_HEADS = 4
DIM_FF = 64
N_LAYERS = 2
MAX_SEQ_LEN = 64
LN_EPS = 1e-5            # torch.nn.LayerNorm default eps


def _layer_norm(x, gamma, beta):
    # gamma/beta are (1, D); broadcast against (B, S, D) implicitly.
    mean = jnp.mean(x, axis=-1, keepdims=True)
    var = jnp.mean(jnp.square(x - mean), axis=-1, keepdims=True)
    return (x - mean) * jax.lax.rsqrt(var + LN_EPS) * gamma + beta


def fused_encoder_kernel(payload_ref, starter_ref, pe_ref,
                         wq_ref, bq_ref, wk_ref, bk_ref, wv_ref, bv_ref,
                         wo_ref, bo_ref,
                         g1_ref, be1_ref, w1_ref, bb1_ref, w2_ref, bb2_ref,
                         g2_ref, be2_ref, gn_ref, bn_ref,
                         out_ref):
    """Starter/PE compose + n_layers post-norm nn.TransformerEncoderLayer + final LN, fused.

    Eval mode: dropout = identity.  Layer params are stacked on a leading (n_layers,) axis;
    attention weights are additionally pre-split per head -> no lane slicing in the kernel.
    """
    payload = payload_ref[...].astype(jnp.float32)          # (TB, T, D)
    TB, T, D = payload.shape
    S = T + 1
    n_layers, n_heads, _, dh = wq_ref.shape
    scale = 1.0 / math.sqrt(dh)

    # ---- compose x = [starter; payload] + positional encoding entirely in VMEM ----
    # out_ref doubles as the composition buffer (f32 output, so no precision loss);
    # dropout after PE is identity in eval.
    out_ref[:, 0:1, :] = (jnp.broadcast_to(starter_ref[...], (TB, 1, D))
                          + pe_ref[0:1, :]).astype(out_ref.dtype)
    out_ref[:, 1:S, :] = (payload + pe_ref[1:S, :]).astype(out_ref.dtype)
    x = out_ref[...].astype(jnp.float32)                    # (TB, S, D)

    # TODO(synk): use_after_mask / use_src_key_padding_mask paths not exercised (config
    # flags are False); seq_lens therefore does not mask padded key positions.

    for l in range(n_layers):                                # static unrolled layer loop
        # ---- multi-head self-attention; heads live in the (pre-split) weights, so there
        #      is no lane slicing of activations and no lane concat of head contexts ----
        attn = None
        for h in range(n_heads):                             # static loop over heads
            q = jnp.einsum('bsd,de->bse', x, wq_ref[l, h],
                           preferred_element_type=jnp.float32) + bq_ref[l, h]
            k = jnp.einsum('bsd,de->bse', x, wk_ref[l, h],
                           preferred_element_type=jnp.float32) + bk_ref[l, h]
            v = jnp.einsum('bsd,de->bse', x, wv_ref[l, h],
                           preferred_element_type=jnp.float32) + bv_ref[l, h]
            s = jnp.einsum('bqe,bke->bqk', q * scale, k,     # scale q == scaling scores
                           preferred_element_type=jnp.float32)
            s = s - jnp.max(s, axis=-1, keepdims=True)
            p = jnp.exp(s)
            p = p * pl.reciprocal(jnp.sum(p, axis=-1, keepdims=True), approx=True)
            ctx = jnp.einsum('bqk,bke->bqe', p, v,
                             preferred_element_type=jnp.float32)
            # per-head block of W_out; summing heads == concat(heads) @ W_out
            h_out = jnp.einsum('bqe,ed->bqd', ctx, wo_ref[l, h],
                               preferred_element_type=jnp.float32)
            attn = h_out if attn is None else attn + h_out
        attn = attn + bo_ref[l]

        x = _layer_norm(x + attn, g1_ref[l], be1_ref[l])

        # ---- feed-forward (linear -> ReLU -> linear) ----
        # TODO(synk): at production batch sizes, inspect lowering (pl.lower_as_mlir) and
        # flatten (B,S,D)->(B*S,D) for these projections if they become B looped vmatmuls.
        h1 = jnp.einsum('bsd,df->bsf', x, w1_ref[l],
                        preferred_element_type=jnp.float32) + bb1_ref[l]
        h1 = jnp.maximum(h1, 0.0)
        ff = jnp.einsum('bsf,fd->bsd', h1, w2_ref[l],
                        preferred_element_type=jnp.float32) + bb2_ref[l]

        x = _layer_norm(x + ff, g2_ref[l], be2_ref[l])

    # ---- final LayerNorm of nn.TransformerEncoder (enc_norm) ----
    # TODO(synk): if profiling shows vst/vld slot saturation at production B, present a
    # lane-dense (TILE_B, S*D) output layout and slice back outside the kernel.
    out_ref[...] = _layer_norm(x, gn_ref[...], bn_ref[...]).astype(out_ref.dtype)


def make_positional_encoding(max_len, d_model):
    # Exactly mirrors PositionalEncoding.__init__ buffer construction.
    position = jnp.arange(max_len, dtype=jnp.float32)[:, None]
    div_term = jnp.exp(jnp.arange(0, d_model, 2, dtype=jnp.float32)
                       * (-math.log(10000.0) / d_model))
    pe = jnp.zeros((max_len, d_model), jnp.float32)
    pe = pe.at[:, 0::2].set(jnp.sin(position * div_term))
    pe = pe.at[:, 1::2].set(jnp.cos(position * div_term))
    return pe                                      # (max_len, d_model); broadcast over batch


def init_params(key):
    keys = jax.random.split(key, 2)
    starter = jax.random.normal(keys[0], (1, 1, D_MODEL), jnp.float32)

    def init_layer(k):
        ks = jax.random.split(k, 6)
        s = 1.0 / math.sqrt(D_MODEL)
        return dict(
            # weights pre-transposed for the x @ W convention
            # (w_in == in_proj_weight.T, columns ordered [q | k | v])
            w_in=jax.random.normal(ks[0], (D_MODEL, 3 * D_MODEL), jnp.float32) * s,
            b_in=jnp.zeros((1, 3 * D_MODEL), jnp.float32),
            w_out=jax.random.normal(ks[1], (D_MODEL, D_MODEL), jnp.float32) * s,
            b_out=jnp.zeros((1, D_MODEL), jnp.float32),
            g1=jnp.ones((1, D_MODEL), jnp.float32),
            be1=jnp.zeros((1, D_MODEL), jnp.float32),
            w1=jax.random.normal(ks[2], (D_MODEL, DIM_FF), jnp.float32) * s,
            bb1=jax.random.normal(ks[3], (1, DIM_FF), jnp.float32) * 0.01,
            w2=jax.random.normal(ks[4], (DIM_FF, D_MODEL), jnp.float32)
               * (1.0 / math.sqrt(DIM_FF)),
            bb2=jax.random.normal(ks[5], (1, D_MODEL), jnp.float32) * 0.01,
            g2=jnp.ones((1, D_MODEL), jnp.float32),
            be2=jnp.zeros((1, D_MODEL), jnp.float32),
        )

    # nn.TransformerEncoder deep-copies enc_layer -> all layers start with identical
    # initial weights; mirror that.  (Trained/loaded weights must still be stacked
    # per-layer by prepare_params, not re-broadcast from layer 0.)
    layer_params = init_layer(keys[1])
    return dict(
        starter=starter,
        layers=[layer_params for _ in range(N_LAYERS)],
        enc_norm_g=jnp.ones((1, D_MODEL), jnp.float32),
        enc_norm_b=jnp.zeros((1, D_MODEL), jnp.float32),
        pe=make_positional_encoding(MAX_SEQ_LEN, D_MODEL),
    )


def prepare_params(params):
    """One-time preprocessing (keep OUT of the per-call path):
    stack per-layer params along a leading (N_LAYERS,) axis and pre-split the attention
    in/out projections per head, so the kernel never slices lanes."""
    layers = params['layers']
    L = len(layers)
    dh = D_MODEL // N_HEADS
    st = {k: jnp.stack([lp[k] for lp in layers], axis=0) for k in layers[0]}

    def split_heads_in(idx):
        # columns [idx*D:(idx+1)*D] of w_in are the q/k/v projection; split per head.
        w = st['w_in'][:, :, idx * D_MODEL:(idx + 1) * D_MODEL]     # (L, D, D)
        b = st['b_in'][:, :, idx * D_MODEL:(idx + 1) * D_MODEL]     # (L, 1, D)
        w4 = w.reshape(L, D_MODEL, N_HEADS, dh).transpose(0, 2, 1, 3)   # (L, H, D, dh)
        b4 = b.reshape(L, 1, N_HEADS, dh).transpose(0, 2, 1, 3)         # (L, H, 1, dh)
        return w4, b4

    wq, bq = split_heads_in(0)
    wk, bk = split_heads_in(1)
    wv, bv = split_heads_in(2)
    # ctx rows of W_out are head-major -> simple reshape gives per-head (dh, D) blocks.
    wo = st['w_out'].reshape(L, N_HEADS, dh, D_MODEL)                   # (L, H, dh, D)

    return dict(
        starter=params['starter'], pe=params['pe'],
        wq=wq, bq=bq, wk=wk, bk=bk, wv=wv, bv=bv,
        wo=wo, bo=st['b_out'],
        g1=st['g1'], be1=st['be1'], w1=st['w1'], bb1=st['bb1'],
        w2=st['w2'], bb2=st['bb2'], g2=st['g2'], be2=st['be2'],
        gn=params['enc_norm_g'], bn=params['enc_norm_b'],
    )


def _pick_tile_b(B):
    if B <= 8:
        return B
    for t in (8, 4, 2, 1):
        if B % t == 0:
            return t
    return 1


@jax.jit
def transformer_seq_encoder_forward(payload, seq_lens, prep):
    """TransformerSeqEncoder.forward; payload: (B, T, D); returns (out(B,T+1,D), seq_lens)."""
    B, T, D = payload.shape
    S = T + 1
    tile_b = _pick_tile_b(B)
    grid = (B // tile_b,)

    weight_args = (prep['starter'], prep['pe'],
                   prep['wq'], prep['bq'], prep['wk'], prep['bk'],
                   prep['wv'], prep['bv'], prep['wo'], prep['bo'],
                   prep['g1'], prep['be1'], prep['w1'], prep['bb1'],
                   prep['w2'], prep['bb2'], prep['g2'], prep['be2'],
                   prep['gn'], prep['bn'])

    def resident(arr):
        # full-array block, constant index map -> stays VMEM-resident across grid steps
        zeros = (0,) * arr.ndim
        return pl.BlockSpec(arr.shape, lambda b: zeros)

    in_specs = ([pl.BlockSpec((tile_b, T, D), lambda b: (b, 0, 0))]
                + [resident(a) for a in weight_args])

    out = pl.pallas_call(
        fused_encoder_kernel,
        out_shape=jax.ShapeDtypeStruct((B, S, D), payload.dtype),
        grid=grid,
        in_specs=in_specs,
        out_specs=pl.BlockSpec((tile_b, S, D), lambda b: (b, 0, 0)),
        compiler_params=pltpu.CompilerParams(
            dimension_semantics=("parallel",),          # shards batch tiles across TCs on v7x
            vmem_limit_bytes=32 * 1024 * 1024),
    )(payload, *weight_args)

    # (B, S, D); equivalent to torch.transpose(out, 0, 1) in our layout.
    return out, seq_lens                                # PaddedBatch(out, seq_lens)


if __name__ == "__main__":
    key = jax.random.PRNGKey(0)
    k_data, k_param = jax.random.split(key)
    B, T = 2, 8
    payload = jax.random.normal(k_data, (B, T, D_MODEL), jnp.float32)
    seq_lens = jnp.array([T, T - 3], dtype=jnp.int32)

    params = init_params(k_param)
    prep = prepare_params(params)       # stacking / head-splitting done once, outside the call path

    out, out_lens = transformer_seq_encoder_forward(payload, seq_lens, prep)
    out = jax.block_until_ready(out)

    assert out.shape == (B, T + 1, D_MODEL), out.shape
    assert bool(jnp.all(jnp.isfinite(out)))
    print("KERNEL_OK")
</pallas_src>

<mosaic_0001>
module attributes {stable_mosaic.version = 11 : i64} {
  func.func @fused_encoder_kernel(%arg0: i32, %arg1: memref<2x8x32xf32, #tpu.memory_space<vmem>>, %arg2: memref<1x1x32xf32, #tpu.memory_space<vmem>>, %arg3: memref<64x32xf32, #tpu.memory_space<vmem>>, %arg4: memref<2x4x32x8xf32, #tpu.memory_space<vmem>>, %arg5: memref<2x4x1x8xf32, #tpu.memory_space<vmem>>, %arg6: memref<2x4x32x8xf32, #tpu.memory_space<vmem>>, %arg7: memref<2x4x1x8xf32, #tpu.memory_space<vmem>>, %arg8: memref<2x4x32x8xf32, #tpu.memory_space<vmem>>, %arg9: memref<2x4x1x8xf32, #tpu.memory_space<vmem>>, %arg10: memref<2x4x8x32xf32, #tpu.memory_space<vmem>>, %arg11: memref<2x1x32xf32, #tpu.memory_space<vmem>>, %arg12: memref<2x1x32xf32, #tpu.memory_space<vmem>>, %arg13: memref<2x1x32xf32, #tpu.memory_space<vmem>>, %arg14: memref<2x32x64xf32, #tpu.memory_space<vmem>>, %arg15: memref<2x1x64xf32, #tpu.memory_space<vmem>>, %arg16: memref<2x64x32xf32, #tpu.memory_space<vmem>>, %arg17: memref<2x1x32xf32, #tpu.memory_space<vmem>>, %arg18: memref<2x1x32xf32, #tpu.memory_space<vmem>>, %arg19: memref<2x1x32xf32, #tpu.memory_space<vmem>>, %arg20: memref<1x32xf32, #tpu.memory_space<vmem>>, %arg21: memref<1x32xf32, #tpu.memory_space<vmem>>, %arg22: memref<2x9x32xf32, #tpu.memory_space<vmem>>) attributes {dimension_semantics = [#tpu.dimension_semantics<parallel>], iteration_bounds = array<i64: 1>, scalar_prefetch = 0 : i64, scratch_operands = 0 : i64, tpu.core_type = #tpu.core_type<tc>, window_params = [{transform_indices = @transform_0, window_bounds = array<i64: 2, 8, 32>}, {pipeline_mode = #tpu.pipeline_mode<synchronous>, transform_indices = @transform_1, window_bounds = array<i64: 1, 1, 32>}, {pipeline_mode = #tpu.pipeline_mode<synchronous>, transform_indices = @transform_2, window_bounds = array<i64: 64, 32>}, {pipeline_mode = #tpu.pipeline_mode<synchronous>, transform_indices = @transform_3, window_bounds = array<i64: 2, 4, 32, 8>}, {pipeline_mode = #tpu.pipeline_mode<synchronous>, transform_indices = @transform_4, window_bounds = array<i64: 2, 4, 1, 8>}, {pipeline_mode = #tpu.pipeline_mode<synchronous>, transform_indices = @transform_5, window_bounds = array<i64: 2, 4, 32, 8>}, {pipeline_mode = #tpu.pipeline_mode<synchronous>, transform_indices = @transform_6, window_bounds = array<i64: 2, 4, 1, 8>}, {pipeline_mode = #tpu.pipeline_mode<synchronous>, transform_indices = @transform_7, window_bounds = array<i64: 2, 4, 32, 8>}, {pipeline_mode = #tpu.pipeline_mode<synchronous>, transform_indices = @transform_8, window_bounds = array<i64: 2, 4, 1, 8>}, {pipeline_mode = #tpu.pipeline_mode<synchronous>, transform_indices = @transform_9, window_bounds = array<i64: 2, 4, 8, 32>}, {pipeline_mode = #tpu.pipeline_mode<synchronous>, transform_indices = @transform_10, window_bounds = array<i64: 2, 1, 32>}, {pipeline_mode = #tpu.pipeline_mode<synchronous>, transform_indices = @transform_11, window_bounds = array<i64: 2, 1, 32>}, {pipeline_mode = #tpu.pipeline_mode<synchronous>, transform_indices = @transform_12, window_bounds = array<i64: 2, 1, 32>}, {pipeline_mode = #tpu.pipeline_mode<synchronous>, transform_indices = @transform_13, window_bounds = array<i64: 2, 32, 64>}, {pipeline_mode = #tpu.pipeline_mode<synchronous>, transform_indices = @transform_14, window_bounds = array<i64: 2, 1, 64>}, {pipeline_mode = #tpu.pipeline_mode<synchronous>, transform_indices = @transform_15, window_bounds = array<i64: 2, 64, 32>}, {pipeline_mode = #tpu.pipeline_mode<synchronous>, transform_indices = @transform_16, window_bounds = array<i64: 2, 1, 32>}, {pipeline_mode = #tpu.pipeline_mode<synchronous>, transform_indices = @transform_17, window_bounds = array<i64: 2, 1, 32>}, {pipeline_mode = #tpu.pipeline_mode<synchronous>, transform_indices = @transform_18, window_bounds = array<i64: 2, 1, 32>}, {pipeline_mode = #tpu.pipeline_mode<synchronous>, transform_indices = @transform_19, window_bounds = array<i64: 1, 32>}, {pipeline_mode = #tpu.pipeline_mode<synchronous>, transform_indices = @transform_20, window_bounds = array<i64: 1, 32>}, {transform_indices = @transform_21, window_bounds = array<i64: 2, 9, 32>}]} {
    %c0 = arith.constant 0 : index
    %c0_0 = arith.constant 0 : index
    %c0_1 = arith.constant 0 : index
    %0 = vector.load %arg1[%c0, %c0_0, %c0_1] : memref<2x8x32xf32, #tpu.memory_space<vmem>>, vector<2x8x32xf32>
    %c0_2 = arith.constant 0 : index
    %c0_3 = arith.constant 0 : index
    %c0_4 = arith.constant 0 : index
    %1 = vector.load %arg2[%c0_2, %c0_3, %c0_4] : memref<1x1x32xf32, #tpu.memory_space<vmem>>, vector<1x1x32xf32>
    %2 = vector.shape_cast %1 : vector<1x1x32xf32> to vector<1x1x32xf32>
    %3 = vector.broadcast %2 : vector<1x1x32xf32> to vector<2x1x32xf32>
    %c0_5 = arith.constant 0 : index
    %c0_6 = arith.constant 0 : index
    %4 = vector.load %arg3[%c0_5, %c0_6] : memref<64x32xf32, #tpu.memory_space<vmem>>, vector<1x32xf32>
    %5 = vector.shape_cast %4 : vector<1x32xf32> to vector<1x1x32xf32>
    %6 = vector.broadcast %5 : vector<1x1x32xf32> to vector<2x1x32xf32>
    %7 = arith.addf %3, %6 : vector<2x1x32xf32>
    %c0_7 = arith.constant 0 : index
    %c0_8 = arith.constant 0 : index
    %c0_9 = arith.constant 0 : index
    %8 = vector.load %arg22[%c0_7, %c0_8, %c0_9] : memref<2x9x32xf32, #tpu.memory_space<vmem>>, vector<2x1x32xf32>
    tpu.vector_store %arg22[%c0_7, %c0_8, %c0_9], %7 {strides = array<i32>} : memref<2x9x32xf32, #tpu.memory_space<vmem>>, vector<2x1x32xf32>,
    %c1 = arith.constant 1 : index
    %c0_10 = arith.constant 0 : index
    %9 = vector.load %arg3[%c1, %c0_10] : memref<64x32xf32, #tpu.memory_space<vmem>>, vector<8x32xf32>
    %10 = vector.shape_cast %9 : vector<8x32xf32> to vector<1x8x32xf32>
    %11 = vector.broadcast %10 : vector<1x8x32xf32> to vector<2x8x32xf32>
    %12 = arith.addf %0, %11 : vector<2x8x32xf32>
    %c0_11 = arith.constant 0 : index
    %c1_12 = arith.constant 1 : index
    %c0_13 = arith.constant 0 : index
    %13 = vector.load %arg22[%c0_11, %c1_12, %c0_13] : memref<2x9x32xf32, #tpu.memory_space<vmem>>, vector<2x8x32xf32>
    tpu.vector_store %arg22[%c0_11, %c1_12, %c0_13], %12 {strides = array<i32>} : memref<2x9x32xf32, #tpu.memory_space<vmem>>, vector<2x8x32xf32>,
    %c0_14 = arith.constant 0 : index
    %c0_15 = arith.constant 0 : index
    %c0_16 = arith.constant 0 : index
    %14 = vector.load %arg22[%c0_14, %c0_15, %c0_16] : memref<2x9x32xf32, #tpu.memory_space<vmem>>, vector<2x9x32xf32>
    %c0_17 = arith.constant 0 : index
    %c0_18 = arith.constant 0 : index
    %c0_19 = arith.constant 0 : index
    %c0_20 = arith.constant 0 : index
    %15 = vector.load %arg4[%c0_17, %c0_18, %c0_19, %c0_20] : memref<2x4x32x8xf32, #tpu.memory_space<vmem>>, vector<1x1x32x8xf32>
    %16 = vector.shape_cast %15 : vector<1x1x32x8xf32> to vector<32x8xf32>
    "tpu.trace_start"() <{level = 10 : i32, message = "bsd,de->bse"}> : () -> ()
    %cst = arith.constant dense<0.000000e+00> : vector<2x9x8xf32>
    %17 = tpu.matmul %14, %16, %cst {dimension_numbers = #tpu.dot_dimension_numbers<[2], [0], [0, 1], [1], [0, 0, 0, 1, 1, 1], [], []>} : vector<2x9x32xf32>, vector<32x8xf32>, vector<2x9x8xf32> -> vector<2x9x8xf32>
    "tpu.trace_stop"() : () -> ()
    %c0_21 = arith.constant 0 : index
    %c0_22 = arith.constant 0 : index
    %c0_23 = arith.constant 0 : index
    %c0_24 = arith.constant 0 : index
    %18 = vector.load %arg5[%c0_21, %c0_22, %c0_23, %c0_24] : memref<2x4x1x8xf32, #tpu.memory_space<vmem>>, vector<1x1x1x8xf32>
    %19 = vector.shape_cast %18 : vector<1x1x1x8xf32> to vector<1x8xf32>
    %20 = vector.shape_cast %19 : vector<1x8xf32> to vector<1x1x8xf32>
    %21 = vector.broadcast %20 : vector<1x1x8xf32> to vector<2x9x8xf32>
    %22 = arith.addf %17, %21 : vector<2x9x8xf32>
    %c0_25 = arith.constant 0 : index
    %c0_26 = arith.constant 0 : index
    %c0_27 = arith.constant 0 : index
    %c0_28 = arith.constant 0 : index
    %23 = vector.load %arg6[%c0_25, %c0_26, %c0_27, %c0_28] : memref<2x4x32x8xf32, #tpu.memory_space<vmem>>, vector<1x1x32x8xf32>
    %24 = vector.shape_cast %23 : vector<1x1x32x8xf32> to vector<32x8xf32>
    "tpu.trace_start"() <{level = 10 : i32, message = "bsd,de->bse"}> : () -> ()
    %cst_29 = arith.constant dense<0.000000e+00> : vector<2x9x8xf32>
    %25 = tpu.matmul %14, %24, %cst_29 {dimension_numbers = #tpu.dot_dimension_numbers<[2], [0], [0, 1], [1], [0, 0, 0, 1, 1, 1], [], []>} : vector<2x9x32xf32>, vector<32x8xf32>, vector<2x9x8xf32> -> vector<2x9x8xf32>
    "tpu.trace_stop"() : () -> ()
    %c0_30 = arith.constant 0 : index
    %c0_31 = arith.constant 0 : index
    %c0_32 = arith.constant 0 : index
    %c0_33 = arith.constant 0 : index
    %26 = vector.load %arg7[%c0_30, %c0_31, %c0_32, %c0_33] : memref<2x4x1x8xf32, #tpu.memory_space<vmem>>, vector<1x1x1x8xf32>
    %27 = vector.shape_cast %26 : vector<1x1x1x8xf32> to vector<1x8xf32>
    %28 = vector.shape_cast %27 : vector<1x8xf32> to vector<1x1x8xf32>
    %29 = vector.broadcast %28 : vector<1x1x8xf32> to vector<2x9x8xf32>
    %30 = arith.addf %25, %29 : vector<2x9x8xf32>
    %c0_34 = arith.constant 0 : index
    %c0_35 = arith.constant 0 : index
    %c0_36 = arith.constant 0 : index
    %c0_37 = arith.constant 0 : index
    %31 = vector.load %arg8[%c0_34, %c0_35, %c0_36, %c0_37] : memref<2x4x32x8xf32, #tpu.memory_space<vmem>>, vector<1x1x32x8xf32>
    %32 = vector.shape_cast %31 : vector<1x1x32x8xf32> to vector<32x8xf32>
    "tpu.trace_start"() <{level = 10 : i32, message = "bsd,de->bse"}> : () -> ()
    %cst_38 = arith.constant dense<0.000000e+00> : vector<2x9x8xf32>
    %33 = tpu.matmul %14, %32, %cst_38 {dimension_numbers = #tpu.dot_dimension_numbers<[2], [0], [0, 1], [1], [0, 0, 0, 1, 1, 1], [], []>} : vector<2x9x32xf32>, vector<32x8xf32>, vector<2x9x8xf32> -> vector<2x9x8xf32>
    "tpu.trace_stop"() : () -> ()
    %c0_39 = arith.constant 0 : index
    %c0_40 = arith.constant 0 : index
    %c0_41 = arith.constant 0 : index
    %c0_42 = arith.constant 0 : index
    %34 = vector.load %arg9[%c0_39, %c0_40, %c0_41, %c0_42] : memref<2x4x1x8xf32, #tpu.memory_space<vmem>>, vector<1x1x1x8xf32>
    %35 = vector.shape_cast %34 : vector<1x1x1x8xf32> to vector<1x8xf32>
    %36 = vector.shape_cast %35 : vector<1x8xf32> to vector<1x1x8xf32>
    %37 = vector.broadcast %36 : vector<1x1x8xf32> to vector<2x9x8xf32>
    %38 = arith.addf %33, %37 : vector<2x9x8xf32>
    %cst_43 = arith.constant 0.353553385 : f32
    %39 = vector.broadcast %cst_43 : f32 to vector<2x9x8xf32>
    %40 = arith.mulf %22, %39 : vector<2x9x8xf32>
    "tpu.trace_start"() <{level = 10 : i32, message = "bqe,bke->bqk"}> : () -> ()
    %cst_44 = arith.constant dense<0.000000e+00> : vector<2x9x9xf32>
    %41 = tpu.matmul %40, %30, %cst_44 {dimension_numbers = #tpu.dot_dimension_numbers<[2], [2], [1], [1], [0, 0, 0, 1, 1, 1], [0], [0]>} : vector<2x9x8xf32>, vector<2x9x8xf32>, vector<2x9x9xf32> -> vector<2x9x9xf32>
    "tpu.trace_stop"() : () -> ()
    %cst_45 = arith.constant dense<0xFF800000> : vector<2x9xf32>
    %42 = vector.multi_reduction <maximumf>, %41, %cst_45 [2] : vector<2x9x9xf32> to vector<2x9xf32>
    %43 = vector.shape_cast %42 : vector<2x9xf32> to vector<2x9x1xf32>
    %44 = vector.broadcast %43 : vector<2x9x1xf32> to vector<2x9x9xf32>
    %45 = arith.subf %41, %44 : vector<2x9x9xf32>
    %46 = math.exp %45 : vector<2x9x9xf32>
    %cst_46 = arith.constant dense<0.000000e+00> : vector<2x9xf32>
    %47 = vector.multi_reduction <add>, %46, %cst_46 [2] : vector<2x9x9xf32> to vector<2x9xf32>
    %48 = vector.shape_cast %47 : vector<2x9xf32> to vector<2x9x1xf32>
    %49 = tpu.reciprocal %48 {approx = true} : vector<2x9x1xf32> -> vector<2x9x1xf32>
    %50 = vector.broadcast %49 : vector<2x9x1xf32> to vector<2x9x9xf32>
    %51 = arith.mulf %46, %50 : vector<2x9x9xf32>
    "tpu.trace_start"() <{level = 10 : i32, message = "bqk,bke->bqe"}> : () -> ()
    %cst_47 = arith.constant dense<0.000000e+00> : vector<2x9x8xf32>
    %52 = tpu.matmul %51, %38, %cst_47 {dimension_numbers = #tpu.dot_dimension_numbers<[2], [1], [1], [2], [0, 0, 0, 1, 1, 2], [0], [0]>} : vector<2x9x9xf32>, vector<2x9x8xf32>, vector<2x9x8xf32> -> vector<2x9x8xf32>
    "tpu.trace_stop"() : () -> ()
    %c0_48 = arith.constant 0 : index
    %c0_49 = arith.constant 0 : index
    %c0_50 = arith.constant 0 : index
    %c0_51 = arith.constant 0 : index
    %53 = vector.load %arg10[%c0_48, %c0_49, %c0_50, %c0_51] : memref<2x4x8x32xf32, #tpu.memory_space<vmem>>, vector<1x1x8x32xf32>
    %54 = vector.shape_cast %53 : vector<1x1x8x32xf32> to vector<8x32xf32>
    "tpu.trace_start"() <{level = 10 : i32, message = "bqe,ed->bqd"}> : () -> ()
    %cst_52 = arith.constant dense<0.000000e+00> : vector<2x9x32xf32>
    %55 = tpu.matmul %52, %54, %cst_52 {dimension_numbers = #tpu.dot_dimension_numbers<[2], [0], [0, 1], [1], [0, 0, 0, 1, 1, 1], [], []>} : vector<2x9x8xf32>, vector<8x32xf32>, vector<2x9x32xf32> -> vector<2x9x32xf32>
    "tpu.trace_stop"() : () -> ()
    %c0_53 = arith.constant 0 : index
    %c1_54 = arith.constant 1 : index
    %c0_55 = arith.constant 0 : index
    %c0_56 = arith.constant 0 : index
    %56 = vector.load %arg4[%c0_53, %c1_54, %c0_55, %c0_56] : memref<2x4x32x8xf32, #tpu.memory_space<vmem>>, vector<1x1x32x8xf32>
    %57 = vector.shape_cast %56 : vector<1x1x32x8xf32> to vector<32x8xf32>
    "tpu.trace_start"() <{level = 10 : i32, message = "bsd,de->bse"}> : () -> ()
    %cst_57 = arith.constant dense<0.000000e+00> : vector<2x9x8xf32>
    %58 = tpu.matmul %14, %57, %cst_57 {dimension_numbers = #tpu.dot_dimension_numbers<[2], [0], [0, 1], [1], [0, 0, 0, 1, 1, 1], [], []>} : vector<2x9x32xf32>, vector<32x8xf32>, vector<2x9x8xf32> -> vector<2x9x8xf32>
    "tpu.trace_stop"() : () -> ()
    %c0_58 = arith.constant 0 : index
    %c1_59 = arith.constant 1 : index
    %c0_60 = arith.constant 0 : index
    %c0_61 = arith.constant 0 : index
    %59 = vector.load %arg5[%c0_58, %c1_59, %c0_60, %c0_61] : memref<2x4x1x8xf32, #tpu.memory_space<vmem>>, vector<1x1x1x8xf32>
    %60 = vector.shape_cast %59 : vector<1x1x1x8xf32> to vector<1x8xf32>
    %61 = vector.shape_cast %60 : vector<1x8xf32> to vector<1x1x8xf32>
    %62 = vector.broadcast %61 : vector<1x1x8xf32> to vector<2x9x8xf32>
    %63 = arith.addf %58, %62 : vector<2x9x8xf32>
    %c0_62 = arith.constant 0 : index
    %c1_63 = arith.constant 1 : index
    %c0_64 = arith.constant 0 : index
    %c0_65 = arith.constant 0 : index
    %64 = vector.load %arg6[%c0_62, %c1_63, %c0_64, %c0_65] : memref<2x4x32x8xf32, #tpu.memory_space<vmem>>, vector<1x1x32x8xf32>
    %65 = vector.shape_cast %64 : vector<1x1x32x8xf32> to vector<32x8xf32>
    "tpu.trace_start"() <{level = 10 : i32, message = "bsd,de->bse"}> : () -> ()
    %cst_66 = arith.constant dense<0.000000e+00> : vector<2x9x8xf32>
    %66 = tpu.matmul %14, %65, %cst_66 {dimension_numbers = #tpu.dot_dimension_numbers<[2], [0], [0, 1], [1], [0, 0, 0, 1, 1, 1], [], []>} : vector<2x9x32xf32>, vector<32x8xf32>, vector<2x9x8xf32> -> vector<2x9x8xf32>
    "tpu.trace_stop"() : () -> ()
    %c0_67 = arith.constant 0 : index
    %c1_68 = arith.constant 1 : index
    %c0_69 = arith.constant 0 : index
    %c0_70 = arith.constant 0 : index
    %67 = vector.load %arg7[%c0_67, %c1_68, %c0_69, %c0_70] : memref<2x4x1x8xf32, #tpu.memory_space<vmem>>, vector<1x1x1x8xf32>
    %68 = vector.shape_cast %67 : vector<1x1x1x8xf32> to vector<1x8xf32>
    %69 = vector.shape_cast %68 : vector<1x8xf32> to vector<1x1x8xf32>
    %70 = vector.broadcast %69 : vector<1x1x8xf32> to vector<2x9x8xf32>
    %71 = arith.addf %66, %70 : vector<2x9x8xf32>
    %c0_71 = arith.constant 0 : index
    %c1_72 = arith.constant 1 : index
    %c0_73 = arith.constant 0 : index
    %c0_74 = arith.constant 0 : index
    %72 = vector.load %arg8[%c0_71, %c1_72, %c0_73, %c0_74] : memref<2x4x32x8xf32, #tpu.memory_space<vmem>>, vector<1x1x32x8xf32>
    %73 = vector.shape_cast %72 : vector<1x1x32x8xf32> to vector<32x8xf32>
    "tpu.trace_start"() <{level = 10 : i32, message = "bsd,de->bse"}> : () -> ()
    %cst_75 = arith.constant dense<0.000000e+00> : vector<2x9x8xf32>
    %74 = tpu.matmul %14, %73, %cst_75 {dimension_numbers = #tpu.dot_dimension_numbers<[2], [0], [0, 1], [1], [0, 0, 0, 1, 1, 1], [], []>} : vector<2x9x32xf32>, vector<32x8xf32>, vector<2x9x8xf32> -> vector<2x9x8xf32>
    "tpu.trace_stop"() : () -> ()
    %c0_76 = arith.constant 0 : index
    %c1_77 = arith.constant 1 : index
    %c0_78 = arith.constant 0 : index
    %c0_79 = arith.constant 0 : index
    %75 = vector.load %arg9[%c0_76, %c1_77, %c0_78, %c0_79] : memref<2x4x1x8xf32, #tpu.memory_space<vmem>>, vector<1x1x1x8xf32>
    %76 = vector.shape_cast %75 : vector<1x1x1x8xf32> to vector<1x8xf32>
    %77 = vector.shape_cast %76 : vector<1x8xf32> to vector<1x1x8xf32>
    %78 = vector.broadcast %77 : vector<1x1x8xf32> to vector<2x9x8xf32>
    %79 = arith.addf %74, %78 : vector<2x9x8xf32>
    %cst_80 = arith.constant 0.353553385 : f32
    %80 = vector.broadcast %cst_80 : f32 to vector<2x9x8xf32>
    %81 = arith.mulf %63, %80 : vector<2x9x8xf32>
    "tpu.trace_start"() <{level = 10 : i32, message = "bqe,bke->bqk"}> : () -> ()
    %cst_81 = arith.constant dense<0.000000e+00> : vector<2x9x9xf32>
    %82 = tpu.matmul %81, %71, %cst_81 {dimension_numbers = #tpu.dot_dimension_numbers<[2], [2], [1], [1], [0, 0, 0, 1, 1, 1], [0], [0]>} : vector<2x9x8xf32>, vector<2x9x8xf32>, vector<2x9x9xf32> -> vector<2x9x9xf32>
    "tpu.trace_stop"() : () -> ()
    %cst_82 = arith.constant dense<0xFF800000> : vector<2x9xf32>
    %83 = vector.multi_reduction <maximumf>, %82, %cst_82 [2] : vector<2x9x9xf32> to vector<2x9xf32>
    %84 = vector.shape_cast %83 : vector<2x9xf32> to vector<2x9x1xf32>
    %85 = vector.broadcast %84 : vector<2x9x1xf32> to vector<2x9x9xf32>
    %86 = arith.subf %82, %85 : vector<2x9x9xf32>
    %87 = math.exp %86 : vector<2x9x9xf32>
    %cst_83 = arith.constant dense<0.000000e+00> : vector<2x9xf32>
    %88 = vector.multi_reduction <add>, %87, %cst_83 [2] : vector<2x9x9xf32> to vector<2x9xf32>
    %89 = vector.shape_cast %88 : vector<2x9xf32> to vector<2x9x1xf32>
    %90 = tpu.reciprocal %89 {approx = true} : vector<2x9x1xf32> -> vector<2x9x1xf32>
    %91 = vector.broadcast %90 : vector<2x9x1xf32> to vector<2x9x9xf32>
    %92 = arith.mulf %87, %91 : vector<2x9x9xf32>
    "tpu.trace_start"() <{level = 10 : i32, message = "bqk,bke->bqe"}> : () -> ()
    %cst_84 = arith.constant dense<0.000000e+00> : vector<2x9x8xf32>
    %93 = tpu.matmul %92, %79, %cst_84 {dimension_numbers = #tpu.dot_dimension_numbers<[2], [1], [1], [2], [0, 0, 0, 1, 1, 2], [0], [0]>} : vector<2x9x9xf32>, vector<2x9x8xf32>, vector<2x9x8xf32> -> vector<2x9x8xf32>
    "tpu.trace_stop"() : () -> ()
    %c0_85 = arith.constant 0 : index
    %c1_86 = arith.constant 1 : index
    %c0_87 = arith.constant 0 : index
    %c0_88 = arith.constant 0 : index
    %94 = vector.load %arg10[%c0_85, %c1_86, %c0_87, %c0_88] : memref<2x4x8x32xf32, #tpu.memory_space<vmem>>, vector<1x1x8x32xf32>
    %95 = vector.shape_cast %94 : vector<1x1x8x32xf32> to vector<8x32xf32>
    "tpu.trace_start"() <{level = 10 : i32, message = "bqe,ed->bqd"}> : () -> ()
    %cst_89 = arith.constant dense<0.000000e+00> : vector<2x9x32xf32>
    %96 = tpu.matmul %93, %95, %cst_89 {dimension_numbers = #tpu.dot_dimension_numbers<[2], [0], [0, 1], [1], [0, 0, 0, 1, 1, 1], [], []>} : vector<2x9x8xf32>, vector<8x32xf32>, vector<2x9x32xf32> -> vector<2x9x32xf32>
    "tpu.trace_stop"() : () -> ()
    %97 = arith.addf %55, %96 : vector<2x9x32xf32>
    %c0_90 = arith.constant 0 : index
    %c2 = arith.constant 2 : index
    %c0_91 = arith.constant 0 : index
    %c0_92 = arith.constant 0 : index
    %98 = vector.load %arg4[%c0_90, %c2, %c0_91, %c0_92] : memref<2x4x32x8xf32, #tpu.memory_space<vmem>>, vector<1x1x32x8xf32>
    %99 = vector.shape_cast %98 : vector<1x1x32x8xf32> to vector<32x8xf32>
    "tpu.trace_start"() <{level = 10 : i32, message = "bsd,de->bse"}> : () -> ()
    %cst_93 = arith.constant dense<0.000000e+00> : vector<2x9x8xf32>
    %100 = tpu.matmul %14, %99, %cst_93 {dimension_numbers = #tpu.dot_dimension_numbers<[2], [0], [0, 1], [1], [0, 0, 0, 1, 1, 1], [], []>} : vector<2x9x32xf32>, vector<32x8xf32>, vector<2x9x8xf32> -> vector<2x9x8xf32>
    "tpu.trace_stop"() : () -> ()
    %c0_94 = arith.constant 0 : index
    %c2_95 = arith.constant 2 : index
    %c0_96 = arith.constant 0 : index
    %c0_97 = arith.constant 0 : index
    %101 = vector.load %arg5[%c0_94, %c2_95, %c0_96, %c0_97] : memref<2x4x1x8xf32, #tpu.memory_space<vmem>>, vector<1x1x1x8xf32>
    %102 = vector.shape_cast %101 : vector<1x1x1x8xf32> to vector<1x8xf32>
    %103 = vector.shape_cast %102 : vector<1x8xf32> to vector<1x1x8xf32>
    %104 = vector.broadcast %103 : vector<1x1x8xf32> to vector<2x9x8xf32>
    %105 = arith.addf %100, %104 : vector<2x9x8xf32>
    %c0_98 = arith.constant 0 : index
    %c2_99 = arith.constant 2 : index
    %c0_100 = arith.constant 0 : index
    %c0_101 = arith.constant 0 : index
    %106 = vector.load %arg6[%c0_98, %c2_99, %c0_100, %c0_101] : memref<2x4x32x8xf32, #tpu.memory_space<vmem>>, vector<1x1x32x8xf32>
    %107 = vector.shape_cast %106 : vector<1x1x32x8xf32> to vector<32x8xf32>
    "tpu.trace_start"() <{level = 10 : i32, message = "bsd,de->bse"}> : () -> ()
    %cst_102 = arith.constant dense<0.000000e+00> : vector<2x9x8xf32>
    %108 = tpu.matmul %14, %107, %cst_102 {dimension_numbers = #tpu.dot_dimension_numbers<[2], [0], [0, 1], [1], [0, 0, 0, 1, 1, 1], [], []>} : vector<2x9x32xf32>, vector<32x8xf32>, vector<2x9x8xf32> -> vector<2x9x8xf32>
    "tpu.trace_stop"() : () -> ()
    %c0_103 = arith.constant 0 : index
    %c2_104 = arith.constant 2 : index
    %c0_105 = arith.constant 0 : index
    %c0_106 = arith.constant 0 : index
    %109 = vector.load %arg7[%c0_103, %c2_104, %c0_105, %c0_106] : memref<2x4x1x8xf32, #tpu.memory_space<vmem>>, vector<1x1x1x8xf32>
    %110 = vector.shape_cast %109 : vector<1x1x1x8xf32> to vector<1x8xf32>
    %111 = vector.shape_cast %110 : vector<1x8xf32> to vector<1x1x8xf32>
    %112 = vector.broadcast %111 : vector<1x1x8xf32> to vector<2x9x8xf32>
    %113 = arith.addf %108, %112 : vector<2x9x8xf32>
    %c0_107 = arith.constant 0 : index
    %c2_108 = arith.constant 2 : index
    %c0_109 = arith.constant 0 : index
    %c0_110 = arith.constant 0 : index
    %114 = vector.load %arg8[%c0_107, %c2_108, %c0_109, %c0_110] : memref<2x4x32x8xf32, #tpu.memory_space<vmem>>, vector<1x1x32x8xf32>
    %115 = vector.shape_cast %114 : vector<1x1x32x8xf32> to vector<32x8xf32>
    "tpu.trace_start"() <{level = 10 : i32, message = "bsd,de->bse"}> : () -> ()
    %cst_111 = arith.constant dense<0.000000e+00> : vector<2x9x8xf32>
    %116 = tpu.matmul %14, %115, %cst_111 {dimension_numbers = #tpu.dot_dimension_numbers<[2], [0], [0, 1], [1], [0, 0, 0, 1, 1, 1], [], []>} : vector<2x9x32xf32>, vector<32x8xf32>, vector<2x9x8xf32> -> vector<2x9x8xf32>
    "tpu.trace_stop"() : () -> ()
    %c0_112 = arith.constant 0 : index
    %c2_113 = arith.constant 2 : index
    %c0_114 = arith.constant 0 : index
    %c0_115 = arith.constant 0 : index
    %117 = vector.load %arg9[%c0_112, %c2_113, %c0_114, %c0_115] : memref<2x4x1x8xf32, #tpu.memory_space<vmem>>, vector<1x1x1x8xf32>
    %118 = vector.shape_cast %117 : vector<1x1x1x8xf32> to vector<1x8xf32>
    %119 = vector.shape_cast %118 : vector<1x8xf32> to vector<1x1x8xf32>
    %120 = vector.broadcast %119 : vector<1x1x8xf32> to vector<2x9x8xf32>
    %121 = arith.addf %116, %120 : vector<2x9x8xf32>
    %cst_116 = arith.constant 0.353553385 : f32
    %122 = vector.broadcast %cst_116 : f32 to vector<2x9x8xf32>
    %123 = arith.mulf %105, %122 : vector<2x9x8xf32>
    "tpu.trace_start"() <{level = 10 : i32, message = "bqe,bke->bqk"}> : () -> ()
    %cst_117 = arith.constant dense<0.000000e+00> : vector<2x9x9xf32>
    %124 = tpu.matmul %123, %113, %cst_117 {dimension_numbers = #tpu.dot_dimension_numbers<[2], [2], [1], [1], [0, 0, 0, 1, 1, 1], [0], [0]>} : vector<2x9x8xf32>, vector<2x9x8xf32>, vector<2x9x9xf32> -> vector<2x9x9xf32>
    "tpu.trace_stop"() : () -> ()
    %cst_118 = arith.constant dense<0xFF800000> : vector<2x9xf32>
    %125 = vector.multi_reduction <maximumf>, %124, %cst_118 [2] : vector<2x9x9xf32> to vector<2x9xf32>
    %126 = vector.shape_cast %125 : vector<2x9xf32> to vector<2x9x1xf32>
    %127 = vector.broadcast %126 : vector<2x9x1xf32> to vector<2x9x9xf32>
    %128 = arith.subf %124, %127 : vector<2x9x9xf32>
    %129 = math.exp %128 : vector<2x9x9xf32>
    %cst_119 = arith.constant dense<0.000000e+00> : vector<2x9xf32>
    %130 = vector.multi_reduction <add>, %129, %cst_119 [2] : vector<2x9x9xf32> to vector<2x9xf32>
    %131 = vector.shape_cast %130 : vector<2x9xf32> to vector<2x9x1xf32>
    %132 = tpu.reciprocal %131 {approx = true} : vector<2x9x1xf32> -> vector<2x9x1xf32>
    %133 = vector.broadcast %132 : vector<2x9x1xf32> to vector<2x9x9xf32>
    %134 = arith.mulf %129, %133 : vector<2x9x9xf32>
    "tpu.trace_start"() <{level = 10 : i32, message = "bqk,bke->bqe"}> : () -> ()
    %cst_120 = arith.constant dense<0.000000e+00> : vector<2x9x8xf32>
    %135 = tpu.matmul %134, %121, %cst_120 {dimension_numbers = #tpu.dot_dimension_numbers<[2], [1], [1], [2], [0, 0, 0, 1, 1, 2], [0], [0]>} : vector<2x9x9xf32>, vector<2x9x8xf32>, vector<2x9x8xf32> -> vector<2x9x8xf32>
    "tpu.trace_stop"() : () -> ()
    %c0_121 = arith.constant 0 : index
    %c2_122 = arith.constant 2 : index
    %c0_123 = arith.constant 0 : index
    %c0_124 = arith.constant 0 : index
    %136 = vector.load %arg10[%c0_121, %c2_122, %c0_123, %c0_124] : memref<2x4x8x32xf32, #tpu.memory_space<vmem>>, vector<1x1x8x32xf32>
    %137 = vector.shape_cast %136 : vector<1x1x8x32xf32> to vector<8x32xf32>
    "tpu.trace_start"() <{level = 10 : i32, message = "bqe,ed->bqd"}> : () -> ()
    %cst_125 = arith.constant dense<0.000000e+00> : vector<2x9x32xf32>
    %138 = tpu.matmul %135, %137, %cst_125 {dimension_numbers = #tpu.dot_dimension_numbers<[2], [0], [0, 1], [1], [0, 0, 0, 1, 1, 1], [], []>} : vector<2x9x8xf32>, vector<8x32xf32>, vector<2x9x32xf32> -> vector<2x9x32xf32>
    "tpu.trace_stop"() : () -> ()
    %139 = arith.addf %97, %138 : vector<2x9x32xf32>
    %c0_126 = arith.constant 0 : index
    %c3 = arith.constant 3 : index
    %c0_127 = arith.constant 0 : index
    %c0_128 = arith.constant 0 : index
    %140 = vector.load %arg4[%c0_126, %c3, %c0_127, %c0_128] : memref<2x4x32x8xf32, #tpu.memory_space<vmem>>, vector<1x1x32x8xf32>
    %141 = vector.shape_cast %140 : vector<1x1x32x8xf32> to vector<32x8xf32>
    "tpu.trace_start"() <{level = 10 : i32, message = "bsd,de->bse"}> : () -> ()
    %cst_129 = arith.constant dense<0.000000e+00> : vector<2x9x8xf32>
    %142 = tpu.matmul %14, %141, %cst_129 {dimension_numbers = #tpu.dot_dimension_numbers<[2], [0], [0, 1], [1], [0, 0, 0, 1, 1, 1], [], []>} : vector<2x9x32xf32>, vector<32x8xf32>, vector<2x9x8xf32> -> vector<2x9x8xf32>
    "tpu.trace_stop"() : () -> ()
    %c0_130 = arith.constant 0 : index
    %c3_131 = arith.constant 3 : index
    %c0_132 = arith.constant 0 : index
    %c0_133 = arith.constant 0 : index
    %143 = vector.load %arg5[%c0_130, %c3_131, %c0_132, %c0_133] : memref<2x4x1x8xf32, #tpu.memory_space<vmem>>, vector<1x1x1x8xf32>
    %144 = vector.shape_cast %143 : vector<1x1x1x8xf32> to vector<1x8xf32>
    %145 = vector.shape_cast %144 : vector<1x8xf32> to vector<1x1x8xf32>
    %146 = vector.broadcast %145 : vector<1x1x8xf32> to vector<2x9x8xf32>
    %147 = arith.addf %142, %146 : vector<2x9x8xf32>
    %c0_134 = arith.constant 0 : index
    %c3_135 = arith.constant 3 : index
    %c0_136 = arith.constant 0 : index
    %c0_137 = arith.constant 0 : index
    %148 = vector.load %arg6[%c0_134, %c3_135, %c0_136, %c0_137] : memref<2x4x32x8xf32, #tpu.memory_space<vmem>>, vector<1x1x32x8xf32>
    %149 = vector.shape_cast %148 : vector<1x1x32x8xf32> to vector<32x8xf32>
    "tpu.trace_start"() <{level = 10 : i32, message = "bsd,de->bse"}> : () -> ()
    %cst_138 = arith.constant dense<0.000000e+00> : vector<2x9x8xf32>
    %150 = tpu.matmul %14, %149, %cst_138 {dimension_numbers = #tpu.dot_dimension_numbers<[2], [0], [0, 1], [1], [0, 0, 0, 1, 1, 1], [], []>} : vector<2x9x32xf32>, vector<32x8xf32>, vector<2x9x8xf32> -> vector<2x9x8xf32>
    "tpu.trace_stop"() : () -> ()
    %c0_139 = arith.constant 0 : index
    %c3_140 = arith.constant 3 : index
    %c0_141 = arith.constant 0 : index
    %c0_142 = arith.constant 0 : index
    %151 = vector.load %arg7[%c0_139, %c3_140, %c0_141, %c0_142] : memref<2x4x1x8xf32, #tpu.memory_space<vmem>>, vector<1x1x1x8xf32>
    %152 = vector.shape_cast %151 : vector<1x1x1x8xf32> to vector<1x8xf32>
    %153 = vector.shape_cast %152 : vector<1x8xf32> to vector<1x1x8xf32>
    %154 = vector.broadcast %153 : vector<1x1x8xf32> to vector<2x9x8xf32>
    %155 = arith.addf %150, %154 : vector<2x9x8xf32>
    %c0_143 = arith.constant 0 : index
    %c3_144 = arith.constant 3 : index
    %c0_145 = arith.constant 0 : index
    %c0_146 = arith.constant 0 : index
    %156 = vector.load %arg8[%c0_143, %c3_144, %c0_145, %c0_146] : memref<2x4x32x8xf32, #tpu.memory_space<vmem>>, vector<1x1x32x8xf32>
    %157 = vector.shape_cast %156 : vector<1x1x32x8xf32> to vector<32x8xf32>
    "tpu.trace_start"() <{level = 10 : i32, message = "bsd,de->bse"}> : () -> ()
    %cst_147 = arith.constant dense<0.000000e+00> : vector<2x9x8xf32>
    %158 = tpu.matmul %14, %157, %cst_147 {dimension_numbers = #tpu.dot_dimension_numbers<[2], [0], [0, 1], [1], [0, 0, 0, 1, 1, 1], [], []>} : vector<2x9x32xf32>, vector<32x8xf32>, vector<2x9x8xf32> -> vector<2x9x8xf32>
    "tpu.trace_stop"() : () -> ()
    %c0_148 = arith.constant 0 : index
    %c3_149 = arith.constant 3 : index
    %c0_150 = arith.constant 0 : index
    %c0_151 = arith.constant 0 : index
    %159 = vector.load %arg9[%c0_148, %c3_149, %c0_150, %c0_151] : memref<2x4x1x8xf32, #tpu.memory_space<vmem>>, vector<1x1x1x8xf32>
    %160 = vector.shape_cast %159 : vector<1x1x1x8xf32> to vector<1x8xf32>
    %161 = vector.shape_cast %160 : vector<1x8xf32> to vector<1x1x8xf32>
    %162 = vector.broadcast %161 : vector<1x1x8xf32> to vector<2x9x8xf32>
    %163 = arith.addf %158, %162 : vector<2x9x8xf32>
    %cst_152 = arith.constant 0.353553385 : f32
    %164 = vector.broadcast %cst_152 : f32 to vector<2x9x8xf32>
    %165 = arith.mulf %147, %164 : vector<2x9x8xf32>
    "tpu.trace_start"() <{level = 10 : i32, message = "bqe,bke->bqk"}> : () -> ()
    %cst_153 = arith.constant dense<0.000000e+00> : vector<2x9x9xf32>
    %166 = tpu.matmul %165, %155, %cst_153 {dimension_numbers = #tpu.dot_dimension_numbers<[2], [2], [1], [1], [0, 0, 0, 1, 1, 1], [0], [0]>} : vector<2x9x8xf32>, vector<2x9x8xf32>, vector<2x9x9xf32> -> vector<2x9x9xf32>
    "tpu.trace_stop"() : () -> ()
    %cst_154 = arith.constant dense<0xFF800000> : vector<2x9xf32>
    %167 = vector.multi_reduction <maximumf>, %166, %cst_154 [2] : vector<2x9x9xf32> to vector<2x9xf32>
    %168 = vector.shape_cast %167 : vector<2x9xf32> to vector<2x9x1xf32>
    %169 = vector.broadcast %168 : vector<2x9x1xf32> to vector<2x9x9xf32>
    %170 = arith.subf %166, %169 : vector<2x9x9xf32>
    %171 = math.exp %170 : vector<2x9x9xf32>
    %cst_155 = arith.constant dense<0.000000e+00> : vector<2x9xf32>
    %172 = vector.multi_reduction <add>, %171, %cst_155 [2] : vector<2x9x9xf32> to vector<2x9xf32>
    %173 = vector.shape_cast %172 : vector<2x9xf32> to vector<2x9x1xf32>
    %174 = tpu.reciprocal %173 {approx = true} : vector<2x9x1xf32> -> vector<2x9x1xf32>
    %175 = vector.broadcast %174 : vector<2x9x1xf32> to vector<2x9x9xf32>
    %176 = arith.mulf %171, %175 : vector<2x9x9xf32>
    "tpu.trace_start"() <{level = 10 : i32, message = "bqk,bke->bqe"}> : () -> ()
    %cst_156 = arith.constant dense<0.000000e+00> : vector<2x9x8xf32>
    %177 = tpu.matmul %176, %163, %cst_156 {dimension_numbers = #tpu.dot_dimension_numbers<[2], [1], [1], [2], [0, 0, 0, 1, 1, 2], [0], [0]>} : vector<2x9x9xf32>, vector<2x9x8xf32>, vector<2x9x8xf32> -> vector<2x9x8xf32>
    "tpu.trace_stop"() : () -> ()
    %c0_157 = arith.constant 0 : index
    %c3_158 = arith.constant 3 : index
    %c0_159 = arith.constant 0 : index
    %c0_160 = arith.constant 0 : index
    %178 = vector.load %arg10[%c0_157, %c3_158, %c0_159, %c0_160] : memref<2x4x8x32xf32, #tpu.memory_space<vmem>>, vector<1x1x8x32xf32>
    %179 = vector.shape_cast %178 : vector<1x1x8x32xf32> to vector<8x32xf32>
    "tpu.trace_start"() <{level = 10 : i32, message = "bqe,ed->bqd"}> : () -> ()
    %cst_161 = arith.constant dense<0.000000e+00> : vector<2x9x32xf32>
    %180 = tpu.matmul %177, %179, %cst_161 {dimension_numbers = #tpu.dot_dimension_numbers<[2], [0], [0, 1], [1], [0, 0, 0, 1, 1, 1], [], []>} : vector<2x9x8xf32>, vector<8x32xf32>, vector<2x9x32xf32> -> vector<2x9x32xf32>
    "tpu.trace_stop"() : () -> ()
    %181 = arith.addf %139, %180 : vector<2x9x32xf32>
    %c0_162 = arith.constant 0 : index
    %c0_163 = arith.constant 0 : index
    %c0_164 = arith.constant 0 : index
    %182 = vector.load %arg11[%c0_162, %c0_163, %c0_164] : memref<2x1x32xf32, #tpu.memory_space<vmem>>, vector<1x1x32xf32>
    %183 = vector.shape_cast %182 : vector<1x1x32xf32> to vector<1x32xf32>
    %184 = vector.shape_cast %183 : vector<1x32xf32> to vector<1x1x32xf32>
    %185 = vector.broadcast %184 : vector<1x1x32xf32> to vector<2x9x32xf32>
    %186 = arith.addf %181, %185 : vector<2x9x32xf32>
    %187 = arith.addf %14, %186 : vector<2x9x32xf32>
    %c0_165 = arith.constant 0 : index
    %c0_166 = arith.constant 0 : index
    %c0_167 = arith.constant 0 : index
    %188 = vector.load %arg12[%c0_165, %c0_166, %c0_167] : memref<2x1x32xf32, #tpu.memory_space<vmem>>, vector<1x1x32xf32>
    %189 = vector.shape_cast %188 : vector<1x1x32xf32> to vector<1x32xf32>
    %c0_168 = arith.constant 0 : index
    %c0_169 = arith.constant 0 : index
    %c0_170 = arith.constant 0 : index
    %190 = vector.load %arg13[%c0_168, %c0_169, %c0_170] : memref<2x1x32xf32, #tpu.memory_space<vmem>>, vector<1x1x32xf32>
    %191 = vector.shape_cast %190 : vector<1x1x32xf32> to vector<1x32xf32>
    %cst_171 = arith.constant dense<0.000000e+00> : vector<2x9xf32>
    %192 = vector.multi_reduction <add>, %187, %cst_171 [2] : vector<2x9x32xf32> to vector<2x9xf32>
    %193 = vector.shape_cast %192 : vector<2x9xf32> to vector<2x9x1xf32>
    %cst_172 = arith.constant 3.200000e+01 : f32
    %194 = vector.broadcast %cst_172 : f32 to vector<2x9x1xf32>
    %195 = arith.divf %193, %194 : vector<2x9x1xf32>
    %196 = vector.broadcast %195 : vector<2x9x1xf32> to vector<2x9x32xf32>
    %197 = arith.subf %187, %196 : vector<2x9x32xf32>
    %198 = arith.mulf %197, %197 : vector<2x9x32xf32>
    %cst_173 = arith.constant dense<0.000000e+00> : vector<2x9xf32>
    %199 = vector.multi_reduction <add>, %198, %cst_173 [2] : vector<2x9x32xf32> to vector<2x9xf32>
    %200 = vector.shape_cast %199 : vector<2x9xf32> to vector<2x9x1xf32>
    %cst_174 = arith.constant 3.200000e+01 : f32
    %201 = vector.broadcast %cst_174 : f32 to vector<2x9x1xf32>
    %202 = arith.divf %200, %201 : vector<2x9x1xf32>
    %203 = vector.broadcast %195 : vector<2x9x1xf32> to vector<2x9x32xf32>
    %204 = arith.subf %187, %203 : vector<2x9x32xf32>
    %cst_175 = arith.constant 9.99999974E-6 : f32
    %205 = vector.broadcast %cst_175 : f32 to vector<2x9x1xf32>
    %206 = arith.addf %202, %205 : vector<2x9x1xf32>
    %207 = math.rsqrt %206 : vector<2x9x1xf32>
    %208 = vector.broadcast %207 : vector<2x9x1xf32> to vector<2x9x32xf32>
    %209 = arith.mulf %204, %208 : vector<2x9x32xf32>
    %210 = vector.shape_cast %189 : vector<1x32xf32> to vector<1x1x32xf32>
    %211 = vector.broadcast %210 : vector<1x1x32xf32> to vector<2x9x32xf32>
    %212 = arith.mulf %209, %211 : vector<2x9x32xf32>
    %213 = vector.shape_cast %191 : vector<1x32xf32> to vector<1x1x32xf32>
    %214 = vector.broadcast %213 : vector<1x1x32xf32> to vector<2x9x32xf32>
    %215 = arith.addf %212, %214 : vector<2x9x32xf32>
    %c0_176 = arith.constant 0 : index
    %c0_177 = arith.constant 0 : index
    %c0_178 = arith.constant 0 : index
    %216 = vector.load %arg14[%c0_176, %c0_177, %c0_178] : memref<2x32x64xf32, #tpu.memory_space<vmem>>, vector<1x32x64xf32>
    %217 = vector.shape_cast %216 : vector<1x32x64xf32> to vector<32x64xf32>
    "tpu.trace_start"() <{level = 10 : i32, message = "bsd,df->bsf"}> : () -> ()
    %cst_179 = arith.constant dense<0.000000e+00> : vector<2x9x64xf32>
    %218 = tpu.matmul %215, %217, %cst_179 {dimension_numbers = #tpu.dot_dimension_numbers<[2], [0], [0, 1], [1], [0, 0, 0, 1, 1, 1], [], []>} : vector<2x9x32xf32>, vector<32x64xf32>, vector<2x9x64xf32> -> vector<2x9x64xf32>
    "tpu.trace_stop"() : () -> ()
    %c0_180 = arith.constant 0 : index
    %c0_181 = arith.constant 0 : index
    %c0_182 = arith.constant 0 : index
    %219 = vector.load %arg15[%c0_180, %c0_181, %c0_182] : memref<2x1x64xf32, #tpu.memory_space<vmem>>, vector<1x1x64xf32>
    %220 = vector.shape_cast %219 : vector<1x1x64xf32> to vector<1x64xf32>
    %221 = vector.shape_cast %220 : vector<1x64xf32> to vector<1x1x64xf32>
    %222 = vector.broadcast %221 : vector<1x1x64xf32> to vector<2x9x64xf32>
    %223 = arith.addf %218, %222 : vector<2x9x64xf32>
    %cst_183 = arith.constant 0.000000e+00 : f32
    %224 = vector.broadcast %cst_183 : f32 to vector<2x9x64xf32>
    %225 = arith.maximumf %223, %224 : vector<2x9x64xf32>
    %c0_184 = arith.constant 0 : index
    %c0_185 = arith.constant 0 : index
    %c0_186 = arith.constant 0 : index
    %226 = vector.load %arg16[%c0_184, %c0_185, %c0_186] : memref<2x64x32xf32, #tpu.memory_space<vmem>>, vector<1x64x32xf32>
    %227 = vector.shape_cast %226 : vector<1x64x32xf32> to vector<64x32xf32>
    "tpu.trace_start"() <{level = 10 : i32, message = "bsf,fd->bsd"}> : () -> ()
    %cst_187 = arith.constant dense<0.000000e+00> : vector<2x9x32xf32>
    %228 = tpu.matmul %225, %227, %cst_187 {dimension_numbers = #tpu.dot_dimension_numbers<[2], [0], [0, 1], [1], [0, 0, 0, 1, 1, 1], [], []>} : vector<2x9x64xf32>, vector<64x32xf32>, vector<2x9x32xf32> -> vector<2x9x32xf32>
    "tpu.trace_stop"() : () -> ()
    %c0_188 = arith.constant 0 : index
    %c0_189 = arith.constant 0 : index
    %c0_190 = arith.constant 0 : index
    %229 = vector.load %arg17[%c0_188, %c0_189, %c0_190] : memref<2x1x32xf32, #tpu.memory_space<vmem>>, vector<1x1x32xf32>
    %230 = vector.shape_cast %229 : vector<1x1x32xf32> to vector<1x32xf32>
    %231 = vector.shape_cast %230 : vector<1x32xf32> to vector<1x1x32xf32>
    %232 = vector.broadcast %231 : vector<1x1x32xf32> to vector<2x9x32xf32>
    %233 = arith.addf %228, %232 : vector<2x9x32xf32>
    %234 = arith.addf %215, %233 : vector<2x9x32xf32>
    %c0_191 = arith.constant 0 : index
    %c0_192 = arith.constant 0 : index
    %c0_193 = arith.constant 0 : index
    %235 = vector.load %arg18[%c0_191, %c0_192, %c0_193] : memref<2x1x32xf32, #tpu.memory_space<vmem>>, vector<1x1x32xf32>
    %236 = vector.shape_cast %235 : vector<1x1x32xf32> to vector<1x32xf32>
    %c0_194 = arith.constant 0 : index
    %c0_195 = arith.constant 0 : index
    %c0_196 = arith.constant 0 : index
    %237 = vector.load %arg19[%c0_194, %c0_195, %c0_196] : memref<2x1x32xf32, #tpu.memory_space<vmem>>, vector<1x1x32xf32>
    %238 = vector.shape_cast %237 : vector<1x1x32xf32> to vector<1x32xf32>
    %cst_197 = arith.constant dense<0.000000e+00> : vector<2x9xf32>
    %239 = vector.multi_reduction <add>, %234, %cst_197 [2] : vector<2x9x32xf32> to vector<2x9xf32>
    %240 = vector.shape_cast %239 : vector<2x9xf32> to vector<2x9x1xf32>
    %cst_198 = arith.constant 3.200000e+01 : f32
    %241 = vector.broadcast %cst_198 : f32 to vector<2x9x1xf32>
    %242 = arith.divf %240, %241 : vector<2x9x1xf32>
    %243 = vector.broadcast %242 : vector<2x9x1xf32> to vector<2x9x32xf32>
    %244 = arith.subf %234, %243 : vector<2x9x32xf32>
    %245 = arith.mulf %244, %244 : vector<2x9x32xf32>
    %cst_199 = arith.constant dense<0.000000e+00> : vector<2x9xf32>
    %246 = vector.multi_reduction <add>, %245, %cst_199 [2] : vector<2x9x32xf32> to vector<2x9xf32>
    %247 = vector.shape_cast %246 : vector<2x9xf32> to vector<2x9x1xf32>
    %cst_200 = arith.constant 3.200000e+01 : f32
    %248 = vector.broadcast %cst_200 : f32 to vector<2x9x1xf32>
    %249 = arith.divf %247, %248 : vector<2x9x1xf32>
    %250 = vector.broadcast %242 : vector<2x9x1xf32> to vector<2x9x32xf32>
    %251 = arith.subf %234, %250 : vector<2x9x32xf32>
    %cst_201 = arith.constant 9.99999974E-6 : f32
    %252 = vector.broadcast %cst_201 : f32 to vector<2x9x1xf32>
    %253 = arith.addf %249, %252 : vector<2x9x1xf32>
    %254 = math.rsqrt %253 : vector<2x9x1xf32>
    %255 = vector.broadcast %254 : vector<2x9x1xf32> to vector<2x9x32xf32>
    %256 = arith.mulf %251, %255 : vector<2x9x32xf32>
    %257 = vector.shape_cast %236 : vector<1x32xf32> to vector<1x1x32xf32>
    %258 = vector.broadcast %257 : vector<1x1x32xf32> to vector<2x9x32xf32>
    %259 = arith.mulf %256, %258 : vector<2x9x32xf32>
    %260 = vector.shape_cast %238 : vector<1x32xf32> to vector<1x1x32xf32>
    %261 = vector.broadcast %260 : vector<1x1x32xf32> to vector<2x9x32xf32>
    %262 = arith.addf %259, %261 : vector<2x9x32xf32>
    %c1_202 = arith.constant 1 : index
    %c0_203 = arith.constant 0 : index
    %c0_204 = arith.constant 0 : index
    %c0_205 = arith.constant 0 : index
    %263 = vector.load %arg4[%c1_202, %c0_203, %c0_204, %c0_205] : memref<2x4x32x8xf32, #tpu.memory_space<vmem>>, vector<1x1x32x8xf32>
    %264 = vector.shape_cast %263 : vector<1x1x32x8xf32> to vector<32x8xf32>
    "tpu.trace_start"() <{level = 10 : i32, message = "bsd,de->bse"}> : () -> ()
    %cst_206 = arith.constant dense<0.000000e+00> : vector<2x9x8xf32>
    %265 = tpu.matmul %262, %264, %cst_206 {dimension_numbers = #tpu.dot_dimension_numbers<[2], [0], [0, 1], [1], [0, 0, 0, 1, 1, 1], [], []>} : vector<2x9x32xf32>, vector<32x8xf32>, vector<2x9x8xf32> -> vector<2x9x8xf32>
    "tpu.trace_stop"() : () -> ()
    %c1_207 = arith.constant 1 : index
    %c0_208 = arith.constant 0 : index
    %c0_209 = arith.constant 0 : index
    %c0_210 = arith.constant 0 : index
    %266 = vector.load %arg5[%c1_207, %c0_208, %c0_209, %c0_210] : memref<2x4x1x8xf32, #tpu.memory_space<vmem>>, vector<1x1x1x8xf32>
    %267 = vector.shape_cast %266 : vector<1x1x1x8xf32> to vector<1x8xf32>
    %268 = vector.shape_cast %267 : vector<1x8xf32> to vector<1x1x8xf32>
    %269 = vector.broadcast %268 : vector<1x1x8xf32> to vector<2x9x8xf32>
    %270 = arith.addf %265, %269 : vector<2x9x8xf32>
    %c1_211 = arith.constant 1 : index
    %c0_212 = arith.constant 0 : index
    %c0_213 = arith.constant 0 : index
    %c0_214 = arith.constant 0 : index
    %271 = vector.load %arg6[%c1_211, %c0_212, %c0_213, %c0_214] : memref<2x4x32x8xf32, #tpu.memory_space<vmem>>, vector<1x1x32x8xf32>
    %272 = vector.shape_cast %271 : vector<1x1x32x8xf32> to vector<32x8xf32>
    "tpu.trace_start"() <{level = 10 : i32, message = "bsd,de->bse"}> : () -> ()
    %cst_215 = arith.constant dense<0.000000e+00> : vector<2x9x8xf32>
    %273 = tpu.matmul %262, %272, %cst_215 {dimension_numbers = #tpu.dot_dimension_numbers<[2], [0], [0, 1], [1], [0, 0, 0, 1, 1, 1], [], []>} : vector<2x9x32xf32>, vector<32x8xf32>, vector<2x9x8xf32> -> vector<2x9x8xf32>
    "tpu.trace_stop"() : () -> ()
    %c1_216 = arith.constant 1 : index
    %c0_217 = arith.constant 0 : index
    %c0_218 = arith.constant 0 : index
    %c0_219 = arith.constant 0 : index
    %274 = vector.load %arg7[%c1_216, %c0_217, %c0_218, %c0_219] : memref<2x4x1x8xf32, #tpu.memory_space<vmem>>, vector<1x1x1x8xf32>
    %275 = vector.shape_cast %274 : vector<1x1x1x8xf32> to vector<1x8xf32>
    %276 = vector.shape_cast %275 : vector<1x8xf32> to vector<1x1x8xf32>
    %277 = vector.broadcast %276 : vector<1x1x8xf32> to vector<2x9x8xf32>
    %278 = arith.addf %273, %277 : vector<2x9x8xf32>
    %c1_220 = arith.constant 1 : index
    %c0_221 = arith.constant 0 : index
    %c0_222 = arith.constant 0 : index
    %c0_223 = arith.constant 0 : index
    %279 = vector.load %arg8[%c1_220, %c0_221, %c0_222, %c0_223] : memref<2x4x32x8xf32, #tpu.memory_space<vmem>>, vector<1x1x32x8xf32>
    %280 = vector.shape_cast %279 : vector<1x1x32x8xf32> to vector<32x8xf32>
    "tpu.trace_start"() <{level = 10 : i32, message = "bsd,de->bse"}> : () -> ()
    %cst_224 = arith.constant dense<0.000000e+00> : vector<2x9x8xf32>
    %281 = tpu.matmul %262, %280, %cst_224 {dimension_numbers = #tpu.dot_dimension_numbers<[2], [0], [0, 1], [1], [0, 0, 0, 1, 1, 1], [], []>} : vector<2x9x32xf32>, vector<32x8xf32>, vector<2x9x8xf32> -> vector<2x9x8xf32>
    "tpu.trace_stop"() : () -> ()
    %c1_225 = arith.constant 1 : index
    %c0_226 = arith.constant 0 : index
    %c0_227 = arith.constant 0 : index
    %c0_228 = arith.constant 0 : index
    %282 = vector.load %arg9[%c1_225, %c0_226, %c0_227, %c0_228] : memref<2x4x1x8xf32, #tpu.memory_space<vmem>>, vector<1x1x1x8xf32>
    %283 = vector.shape_cast %282 : vector<1x1x1x8xf32> to vector<1x8xf32>
    %284 = vector.shape_cast %283 : vector<1x8xf32> to vector<1x1x8xf32>
    %285 = vector.broadcast %284 : vector<1x1x8xf32> to vector<2x9x8xf32>
    %286 = arith.addf %281, %285 : vector<2x9x8xf32>
    %cst_229 = arith.constant 0.353553385 : f32
    %287 = vector.broadcast %cst_229 : f32 to vector<2x9x8xf32>
    %288 = arith.mulf %270, %287 : vector<2x9x8xf32>
    "tpu.trace_start"() <{level = 10 : i32, message = "bqe,bke->bqk"}> : () -> ()
    %cst_230 = arith.constant dense<0.000000e+00> : vector<2x9x9xf32>
    %289 = tpu.matmul %288, %278, %cst_230 {dimension_numbers = #tpu.dot_dimension_numbers<[2], [2], [1], [1], [0, 0, 0, 1, 1, 1], [0], [0]>} : vector<2x9x8xf32>, vector<2x9x8xf32>, vector<2x9x9xf32> -> vector<2x9x9xf32>
    "tpu.trace_stop"() : () -> ()
    %cst_231 = arith.constant dense<0xFF800000> : vector<2x9xf32>
    %290 = vector.multi_reduction <maximumf>, %289, %cst_231 [2] : vector<2x9x9xf32> to vector<2x9xf32>
    %291 = vector.shape_cast %290 : vector<2x9xf32> to vector<2x9x1xf32>
    %292 = vector.broadcast %291 : vector<2x9x1xf32> to vector<2x9x9xf32>
    %293 = arith.subf %289, %292 : vector<2x9x9xf32>
    %294 = math.exp %293 : vector<2x9x9xf32>
    %cst_232 = arith.constant dense<0.000000e+00> : vector<2x9xf32>
    %295 = vector.multi_reduction <add>, %294, %cst_232 [2] : vector<2x9x9xf32> to vector<2x9xf32>
    %296 = vector.shape_cast %295 : vector<2x9xf32> to vector<2x9x1xf32>
    %297 = tpu.reciprocal %296 {approx = true} : vector<2x9x1xf32> -> vector<2x9x1xf32>
    %298 = vector.broadcast %297 : vector<2x9x1xf32> to vector<2x9x9xf32>
    %299 = arith.mulf %294, %298 : vector<2x9x9xf32>
    "tpu.trace_start"() <{level = 10 : i32, message = "bqk,bke->bqe"}> : () -> ()
    %cst_233 = arith.constant dense<0.000000e+00> : vector<2x9x8xf32>
    %300 = tpu.matmul %299, %286, %cst_233 {dimension_numbers = #tpu.dot_dimension_numbers<[2], [1], [1], [2], [0, 0, 0, 1, 1, 2], [0], [0]>} : vector<2x9x9xf32>, vector<2x9x8xf32>, vector<2x9x8xf32> -> vector<2x9x8xf32>
    "tpu.trace_stop"() : () -> ()
    %c1_234 = arith.constant 1 : index
    %c0_235 = arith.constant 0 : index
    %c0_236 = arith.constant 0 : index
    %c0_237 = arith.constant 0 : index
    %301 = vector.load %arg10[%c1_234, %c0_235, %c0_236, %c0_237] : memref<2x4x8x32xf32, #tpu.memory_space<vmem>>, vector<1x1x8x32xf32>
    %302 = vector.shape_cast %301 : vector<1x1x8x32xf32> to vector<8x32xf32>
    "tpu.trace_start"() <{level = 10 : i32, message = "bqe,ed->bqd"}> : () -> ()
    %cst_238 = arith.constant dense<0.000000e+00> : vector<2x9x32xf32>
    %303 = tpu.matmul %300, %302, %cst_238 {dimension_numbers = #tpu.dot_dimension_numbers<[2], [0], [0, 1], [1], [0, 0, 0, 1, 1, 1], [], []>} : vector<2x9x8xf32>, vector<8x32xf32>, vector<2x9x32xf32> -> vector<2x9x32xf32>
    "tpu.trace_stop"() : () -> ()
    %c1_239 = arith.constant 1 : index
    %c1_240 = arith.constant 1 : index
    %c0_241 = arith.constant 0 : index
    %c0_242 = arith.constant 0 : index
    %304 = vector.load %arg4[%c1_239, %c1_240, %c0_241, %c0_242] : memref<2x4x32x8xf32, #tpu.memory_space<vmem>>, vector<1x1x32x8xf32>
    %305 = vector.shape_cast %304 : vector<1x1x32x8xf32> to vector<32x8xf32>
    "tpu.trace_start"() <{level = 10 : i32, message = "bsd,de->bse"}> : () -> ()
    %cst_243 = arith.constant dense<0.000000e+00> : vector<2x9x8xf32>
    %306 = tpu.matmul %262, %305, %cst_243 {dimension_numbers = #tpu.dot_dimension_numbers<[2], [0], [0, 1], [1], [0, 0, 0, 1, 1, 1], [], []>} : vector<2x9x32xf32>, vector<32x8xf32>, vector<2x9x8xf32> -> vector<2x9x8xf32>
    "tpu.trace_stop"() : () -> ()
    %c1_244 = arith.constant 1 : index
    %c1_245 = arith.constant 1 : index
    %c0_246 = arith.constant 0 : index
    %c0_247 = arith.constant 0 : index
    %307 = vector.load %arg5[%c1_244, %c1_245, %c0_246, %c0_247] : memref<2x4x1x8xf32, #tpu.memory_space<vmem>>, vector<1x1x1x8xf32>
    %308 = vector.shape_cast %307 : vector<1x1x1x8xf32> to vector<1x8xf32>
    %309 = vector.shape_cast %308 : vector<1x8xf32> to vector<1x1x8xf32>
    %310 = vector.broadcast %309 : vector<1x1x8xf32> to vector<2x9x8xf32>
    %311 = arith.addf %306, %310 : vector<2x9x8xf32>
    %c1_248 = arith.constant 1 : index
    %c1_249 = arith.constant 1 : index
    %c0_250 = arith.constant 0 : index
    %c0_251 = arith.constant 0 : index
    %312 = vector.load %arg6[%c1_248, %c1_249, %c0_250, %c0_251] : memref<2x4x32x8xf32, #tpu.memory_space<vmem>>, vector<1x1x32x8xf32>
    %313 = vector.shape_cast %312 : vector<1x1x32x8xf32> to vector<32x8xf32>
    "tpu.trace_start"() <{level = 10 : i32, message = "bsd,de->bse"}> : () -> ()
    %cst_252 = arith.constant dense<0.000000e+00> : vector<2x9x8xf32>
    %314 = tpu.matmul %262, %313, %cst_252 {dimension_numbers = #tpu.dot_dimension_numbers<[2], [0], [0, 1], [1], [0, 0, 0, 1, 1, 1], [], []>} : vector<2x9x32xf32>, vector<32x8xf32>, vector<2x9x8xf32> -> vector<2x9x8xf32>
    "tpu.trace_stop"() : () -> ()
    %c1_253 = arith.constant 1 : index
    %c1_254 = arith.constant 1 : index
    %c0_255 = arith.constant 0 : index
    %c0_256 = arith.constant 0 : index
    %315 = vector.load %arg7[%c1_253, %c1_254, %c0_255, %c0_256] : memref<2x4x1x8xf32, #tpu.memory_space<vmem>>, vector<1x1x1x8xf32>
    %316 = vector.shape_cast %315 : vector<1x1x1x8xf32> to vector<1x8xf32>
    %317 = vector.shape_cast %316 : vector<1x8xf32> to vector<1x1x8xf32>
    %318 = vector.broadcast %317 : vector<1x1x8xf32> to vector<2x9x8xf32>
    %319 = arith.addf %314, %318 : vector<2x9x8xf32>
    %c1_257 = arith.constant 1 : index
    %c1_258 = arith.constant 1 : index
    %c0_259 = arith.constant 0 : index
    %c0_260 = arith.constant 0 : index
    %320 = vector.load %arg8[%c1_257, %c1_258, %c0_259, %c0_260] : memref<2x4x32x8xf32, #tpu.memory_space<vmem>>, vector<1x1x32x8xf32>
    %321 = vector.shape_cast %320 : vector<1x1x32x8xf32> to vector<32x8xf32>
    "tpu.trace_start"() <{level = 10 : i32, message = "bsd,de->bse"}> : () -> ()
    %cst_261 = arith.constant dense<0.000000e+00> : vector<2x9x8xf32>
    %322 = tpu.matmul %262, %321, %cst_261 {dimension_numbers = #tpu.dot_dimension_numbers<[2], [0], [0, 1], [1], [0, 0, 0, 1, 1, 1], [], []>} : vector<2x9x32xf32>, vector<32x8xf32>, vector<2x9x8xf32> -> vector<2x9x8xf32>
    "tpu.trace_stop"() : () -> ()
    %c1_262 = arith.constant 1 : index
    %c1_263 = arith.constant 1 : index
    %c0_264 = arith.constant 0 : index
    %c0_265 = arith.constant 0 : index
    %323 = vector.load %arg9[%c1_262, %c1_263, %c0_264, %c0_265] : memref<2x4x1x8xf32, #tpu.memory_space<vmem>>, vector<1x1x1x8xf32>
    %324 = vector.shape_cast %323 : vector<1x1x1x8xf32> to vector<1x8xf32>
    %325 = vector.shape_cast %324 : vector<1x8xf32> to vector<1x1x8xf32>
    %326 = vector.broadcast %325 : vector<1x1x8xf32> to vector<2x9x8xf32>
    %327 = arith.addf %322, %326 : vector<2x9x8xf32>
    %cst_266 = arith.constant 0.353553385 : f32
    %328 = vector.broadcast %cst_266 : f32 to vector<2x9x8xf32>
    %329 = arith.mulf %311, %328 : vector<2x9x8xf32>
    "tpu.trace_start"() <{level = 10 : i32, message = "bqe,bke->bqk"}> : () -> ()
    %cst_267 = arith.constant dense<0.000000e+00> : vector<2x9x9xf32>
    %330 = tpu.matmul %329, %319, %cst_267 {dimension_numbers = #tpu.dot_dimension_numbers<[2], [2], [1], [1], [0, 0, 0, 1, 1, 1], [0], [0]>} : vector<2x9x8xf32>, vector<2x9x8xf32>, vector<2x9x9xf32> -> vector<2x9x9xf32>
    "tpu.trace_stop"() : () -> ()
    %cst_268 = arith.constant dense<0xFF800000> : vector<2x9xf32>
    %331 = vector.multi_reduction <maximumf>, %330, %cst_268 [2] : vector<2x9x9xf32> to vector<2x9xf32>
    %332 = vector.shape_cast %331 : vector<2x9xf32> to vector<2x9x1xf32>
    %333 = vector.broadcast %332 : vector<2x9x1xf32> to vector<2x9x9xf32>
    %334 = arith.subf %330, %333 : vector<2x9x9xf32>
    %335 = math.exp %334 : vector<2x9x9xf32>
    %cst_269 = arith.constant dense<0.000000e+00> : vector<2x9xf32>
    %336 = vector.multi_reduction <add>, %335, %cst_269 [2] : vector<2x9x9xf32> to vector<2x9xf32>
    %337 = vector.shape_cast %336 : vector<2x9xf32> to vector<2x9x1xf32>
    %338 = tpu.reciprocal %337 {approx = true} : vector<2x9x1xf32> -> vector<2x9x1xf32>
    %339 = vector.broadcast %338 : vector<2x9x1xf32> to vector<2x9x9xf32>
    %340 = arith.mulf %335, %339 : vector<2x9x9xf32>
    "tpu.trace_start"() <{level = 10 : i32, message = "bqk,bke->bqe"}> : () -> ()
    %cst_270 = arith.constant dense<0.000000e+00> : vector<2x9x8xf32>
    %341 = tpu.matmul %340, %327, %cst_270 {dimension_numbers = #tpu.dot_dimension_numbers<[2], [1], [1], [2], [0, 0, 0, 1, 1, 2], [0], [0]>} : vector<2x9x9xf32>, vector<2x9x8xf32>, vector<2x9x8xf32> -> vector<2x9x8xf32>
    "tpu.trace_stop"() : () -> ()
    %c1_271 = arith.constant 1 : index
    %c1_272 = arith.constant 1 : index
    %c0_273 = arith.constant 0 : index
    %c0_274 = arith.constant 0 : index
    %342 = vector.load %arg10[%c1_271, %c1_272, %c0_273, %c0_274] : memref<2x4x8x32xf32, #tpu.memory_space<vmem>>, vector<1x1x8x32xf32>
    %343 = vector.shape_cast %342 : vector<1x1x8x32xf32> to vector<8x32xf32>
    "tpu.trace_start"() <{level = 10 : i32, message = "bqe,ed->bqd"}> : () -> ()
    %cst_275 = arith.constant dense<0.000000e+00> : vector<2x9x32xf32>
    %344 = tpu.matmul %341, %343, %cst_275 {dimension_numbers = #tpu.dot_dimension_numbers<[2], [0], [0, 1], [1], [0, 0, 0, 1, 1, 1], [], []>} : vector<2x9x8xf32>, vector<8x32xf32>, vector<2x9x32xf32> -> vector<2x9x32xf32>
    "tpu.trace_stop"() : () -> ()
    %345 = arith.addf %303, %344 : vector<2x9x32xf32>
    %c1_276 = arith.constant 1 : index
    %c2_277 = arith.constant 2 : index
    %c0_278 = arith.constant 0 : index
    %c0_279 = arith.constant 0 : index
    %346 = vector.load %arg4[%c1_276, %c2_277, %c0_278, %c0_279] : memref<2x4x32x8xf32, #tpu.memory_space<vmem>>, vector<1x1x32x8xf32>
    %347 = vector.shape_cast %346 : vector<1x1x32x8xf32> to vector<32x8xf32>
    "tpu.trace_start"() <{level = 10 : i32, message = "bsd,de->bse"}> : () -> ()
    %cst_280 = arith.constant dense<0.000000e+00> : vector<2x9x8xf32>
    %348 = tpu.matmul %262, %347, %cst_280 {dimension_numbers = #tpu.dot_dimension_numbers<[2], [0], [0, 1], [1], [0, 0, 0, 1, 1, 1], [], []>} : vector<2x9x32xf32>, vector<32x8xf32>, vector<2x9x8xf32> -> vector<2x9x8xf32>
    "tpu.trace_stop"() : () -> ()
    %c1_281 = arith.constant 1 : index
    %c2_282 = arith.constant 2 : index
    %c0_283 = arith.constant 0 : index
    %c0_284 = arith.constant 0 : index
    %349 = vector.load %arg5[%c1_281, %c2_282, %c0_283, %c0_284] : memref<2x4x1x8xf32, #tpu.memory_space<vmem>>, vector<1x1x1x8xf32>
    %350 = vector.shape_cast %349 : vector<1x1x1x8xf32> to vector<1x8xf32>
    %351 = vector.shape_cast %350 : vector<1x8xf32> to vector<1x1x8xf32>
    %352 = vector.broadcast %351 : vector<1x1x8xf32> to vector<2x9x8xf32>
    %353 = arith.addf %348, %352 : vector<2x9x8xf32>
    %c1_285 = arith.constant 1 : index
    %c2_286 = arith.constant 2 : index
    %c0_287 = arith.constant 0 : index
    %c0_288 = arith.constant 0 : index
    %354 = vector.load %arg6[%c1_285, %c2_286, %c0_287, %c0_288] : memref<2x4x32x8xf32, #tpu.memory_space<vmem>>, vector<1x1x32x8xf32>
    %355 = vector.shape_cast %354 : vector<1x1x32x8xf32> to vector<32x8xf32>
    "tpu.trace_start"() <{level = 10 : i32, message = "bsd,de->bse"}> : () -> ()
    %cst_289 = arith.constant dense<0.000000e+00> : vector<2x9x8xf32>
    %356 = tpu.matmul %262, %355, %cst_289 {dimension_numbers = #tpu.dot_dimension_numbers<[2], [0], [0, 1], [1], [0, 0, 0, 1, 1, 1], [], []>} : vector<2x9x32xf32>, vector<32x8xf32>, vector<2x9x8xf32> -> vector<2x9x8xf32>
    "tpu.trace_stop"() : () -> ()
    %c1_290 = arith.constant 1 : index
    %c2_291 = arith.constant 2 : index
    %c0_292 = arith.constant 0 : index
    %c0_293 = arith.constant 0 : index
    %357 = vector.load %arg7[%c1_290, %c2_291, %c0_292, %c0_293] : memref<2x4x1x8xf32, #tpu.memory_space<vmem>>, vector<1x1x1x8xf32>
    %358 = vector.shape_cast %357 : vector<1x1x1x8xf32> to vector<1x8xf32>
    %359 = vector.shape_cast %358 : vector<1x8xf32> to vector<1x1x8xf32>
    %360 = vector.broadcast %359 : vector<1x1x8xf32> to vector<2x9x8xf32>
    %361 = arith.addf %356, %360 : vector<2x9x8xf32>
    %c1_294 = arith.constant 1 : index
    %c2_295 = arith.constant 2 : index
    %c0_296 = arith.constant 0 : index
    %c0_297 = arith.constant 0 : index
    %362 = vector.load %arg8[%c1_294, %c2_295, %c0_296, %c0_297] : memref<2x4x32x8xf32, #tpu.memory_space<vmem>>, vector<1x1x32x8xf32>
    %363 = vector.shape_cast %362 : vector<1x1x32x8xf32> to vector<32x8xf32>
    "tpu.trace_start"() <{level = 10 : i32, message = "bsd,de->bse"}> : () -> ()
    %cst_298 = arith.constant dense<0.000000e+00> : vector<2x9x8xf32>
    %364 = tpu.matmul %262, %363, %cst_298 {dimension_numbers = #tpu.dot_dimension_numbers<[2], [0], [0, 1], [1], [0, 0, 0, 1, 1, 1], [], []>} : vector<2x9x32xf32>, vector<32x8xf32>, vector<2x9x8xf32> -> vector<2x9x8xf32>
    "tpu.trace_stop"() : () -> ()
    %c1_299 = arith.constant 1 : index
    %c2_300 = arith.constant 2 : index
    %c0_301 = arith.constant 0 : index
    %c0_302 = arith.constant 0 : index
    %365 = vector.load %arg9[%c1_299, %c2_300, %c0_301, %c0_302] : memref<2x4x1x8xf32, #tpu.memory_space<vmem>>, vector<1x1x1x8xf32>
    %366 = vector.shape_cast %365 : vector<1x1x1x8xf32> to vector<1x8xf32>
    %367 = vector.shape_cast %366 : vector<1x8xf32> to vector<1x1x8xf32>
    %368 = vector.broadcast %367 : vector<1x1x8xf32> to vector<2x9x8xf32>
    %369 = arith.addf %364, %368 : vector<2x9x8xf32>
    %cst_303 = arith.constant 0.353553385 : f32
    %370 = vector.broadcast %cst_303 : f32 to vector<2x9x8xf32>
    %371 = arith.mulf %353, %370 : vector<2x9x8xf32>
    "tpu.trace_start"() <{level = 10 : i32, message = "bqe,bke->bqk"}> : () -> ()
    %cst_304 = arith.constant dense<0.000000e+00> : vector<2x9x9xf32>
    %372 = tpu.matmul %371, %361, %cst_304 {dimension_numbers = #tpu.dot_dimension_numbers<[2], [2], [1], [1], [0, 0, 0, 1, 1, 1], [0], [0]>} : vector<2x9x8xf32>, vector<2x9x8xf32>, vector<2x9x9xf32> -> vector<2x9x9xf32>
    "tpu.trace_stop"() : () -> ()
    %cst_305 = arith.constant dense<0xFF800000> : vector<2x9xf32>
    %373 = vector.multi_reduction <maximumf>, %372, %cst_305 [2] : vector<2x9x9xf32> to vector<2x9xf32>
    %374 = vector.shape_cast %373 : vector<2x9xf32> to vector<2x9x1xf32>
    %375 = vector.broadcast %374 : vector<2x9x1xf32> to vector<2x9x9xf32>
    %376 = arith.subf %372, %375 : vector<2x9x9xf32>
    %377 = math.exp %376 : vector<2x9x9xf32>
    %cst_306 = arith.constant dense<0.000000e+00> : vector<2x9xf32>
    %378 = vector.multi_reduction <add>, %377, %cst_306 [2] : vector<2x9x9xf32> to vector<2x9xf32>
    %379 = vector.shape_cast %378 : vector<2x9xf32> to vector<2x9x1xf32>
    %380 = tpu.reciprocal %379 {approx = true} : vector<2x9x1xf32> -> vector<2x9x1xf32>
    %381 = vector.broadcast %380 : vector<2x9x1xf32> to vector<2x9x9xf32>
    %382 = arith.mulf %377, %381 : vector<2x9x9xf32>
    "tpu.trace_start"() <{level = 10 : i32, message = "bqk,bke->bqe"}> : () -> ()
    %cst_307 = arith.constant dense<0.000000e+00> : vector<2x9x8xf32>
    %383 = tpu.matmul %382, %369, %cst_307 {dimension_numbers = #tpu.dot_dimension_numbers<[2], [1], [1], [2], [0, 0, 0, 1, 1, 2], [0], [0]>} : vector<2x9x9xf32>, vector<2x9x8xf32>, vector<2x9x8xf32> -> vector<2x9x8xf32>
    "tpu.trace_stop"() : () -> ()
    %c1_308 = arith.constant 1 : index
    %c2_309 = arith.constant 2 : index
    %c0_310 = arith.constant 0 : index
    %c0_311 = arith.constant 0 : index
    %384 = vector.load %arg10[%c1_308, %c2_309, %c0_310, %c0_311] : memref<2x4x8x32xf32, #tpu.memory_space<vmem>>, vector<1x1x8x32xf32>
    %385 = vector.shape_cast %384 : vector<1x1x8x32xf32> to vector<8x32xf32>
    "tpu.trace_start"() <{level = 10 : i32, message = "bqe,ed->bqd"}> : () -> ()
    %cst_312 = arith.constant dense<0.000000e+00> : vector<2x9x32xf32>
    %386 = tpu.matmul %383, %385, %cst_312 {dimension_numbers = #tpu.dot_dimension_numbers<[2], [0], [0, 1], [1], [0, 0, 0, 1, 1, 1], [], []>} : vector<2x9x8xf32>, vector<8x32xf32>, vector<2x9x32xf32> -> vector<2x9x32xf32>
    "tpu.trace_stop"() : () -> ()
    %387 = arith.addf %345, %386 : vector<2x9x32xf32>
    %c1_313 = arith.constant 1 : index
    %c3_314 = arith.constant 3 : index
    %c0_315 = arith.constant 0 : index
    %c0_316 = arith.constant 0 : index
    %388 = vector.load %arg4[%c1_313, %c3_314, %c0_315, %c0_316] : memref<2x4x32x8xf32, #tpu.memory_space<vmem>>, vector<1x1x32x8xf32>
    %389 = vector.shape_cast %388 : vector<1x1x32x8xf32> to vector<32x8xf32>
    "tpu.trace_start"() <{level = 10 : i32, message = "bsd,de->bse"}> : () -> ()
    %cst_317 = arith.constant dense<0.000000e+00> : vector<2x9x8xf32>
    %390 = tpu.matmul %262, %389, %cst_317 {dimension_numbers = #tpu.dot_dimension_numbers<[2], [0], [0, 1], [1], [0, 0, 0, 1, 1, 1], [], []>} : vector<2x9x32xf32>, vector<32x8xf32>, vector<2x9x8xf32> -> vector<2x9x8xf32>
    "tpu.trace_stop"() : () -> ()
    %c1_318 = arith.constant 1 : index
    %c3_319 = arith.constant 3 : index
    %c0_320 = arith.constant 0 : index
    %c0_321 = arith.constant 0 : index
    %391 = vector.load %arg5[%c1_318, %c3_319, %c0_320, %c0_321] : memref<2x4x1x8xf32, #tpu.memory_space<vmem>>, vector<1x1x1x8xf32>
    %392 = vector.shape_cast %391 : vector<1x1x1x8xf32> to vector<1x8xf32>
    %393 = vector.shape_cast %392 : vector<1x8xf32> to vector<1x1x8xf32>
    %394 = vector.broadcast %393 : vector<1x1x8xf32> to vector<2x9x8xf32>
    %395 = arith.addf %390, %394 : vector<2x9x8xf32>
    %c1_322 = arith.constant 1 : index
    %c3_323 = arith.constant 3 : index
    %c0_324 = arith.constant 0 : index
    %c0_325 = arith.constant 0 : index
    %396 = vector.load %arg6[%c1_322, %c3_323, %c0_324, %c0_325] : memref<2x4x32x8xf32, #tpu.memory_space<vmem>>, vector<1x1x32x8xf32>
    %397 = vector.shape_cast %396 : vector<1x1x32x8xf32> to vector<32x8xf32>
    "tpu.trace_start"() <{level = 10 : i32, message = "bsd,de->bse"}> : () -> ()
    %cst_326 = arith.constant dense<0.000000e+00> : vector<2x9x8xf32>
    %398 = tpu.matmul %262, %397, %cst_326 {dimension_numbers = #tpu.dot_dimension_numbers<[2], [0], [0, 1], [1], [0, 0, 0, 1, 1, 1], [], []>} : vector<2x9x32xf32>, vector<32x8xf32>, vector<2x9x8xf32> -> vector<2x9x8xf32>
    "tpu.trace_stop"() : () -> ()
    %c1_327 = arith.constant 1 : index
    %c3_328 = arith.constant 3 : index
    %c0_329 = arith.constant 0 : index
    %c0_330 = arith.constant 0 : index
    %399 = vector.load %arg7[%c1_327, %c3_328, %c0_329, %c0_330] : memref<2x4x1x8xf32, #tpu.memory_space<vmem>>, vector<1x1x1x8xf32>
    %400 = vector.shape_cast %399 : vector<1x1x1x8xf32> to vector<1x8xf32>
    %401 = vector.shape_cast %400 : vector<1x8xf32> to vector<1x1x8xf32>
    %402 = vector.broadcast %401 : vector<1x1x8xf32> to vector<2x9x8xf32>
    %403 = arith.addf %398, %402 : vector<2x9x8xf32>
    %c1_331 = arith.constant 1 : index
    %c3_332 = arith.constant 3 : index
    %c0_333 = arith.constant 0 : index
    %c0_334 = arith.constant 0 : index
    %404 = vector.load %arg8[%c1_331, %c3_332, %c0_333, %c0_334] : memref<2x4x32x8xf32, #tpu.memory_space<vmem>>, vector<1x1x32x8xf32>
    %405 = vector.shape_cast %404 : vector<1x1x32x8xf32> to vector<32x8xf32>
    "tpu.trace_start"() <{level = 10 : i32, message = "bsd,de->bse"}> : () -> ()
    %cst_335 = arith.constant dense<0.000000e+00> : vector<2x9x8xf32>
    %406 = tpu.matmul %262, %405, %cst_335 {dimension_numbers = #tpu.dot_dimension_numbers<[2], [0], [0, 1], [1], [0, 0, 0, 1, 1, 1], [], []>} : vector<2x9x32xf32>, vector<32x8xf32>, vector<2x9x8xf32> -> vector<2x9x8xf32>
    "tpu.trace_stop"() : () -> ()
    %c1_336 = arith.constant 1 : index
    %c3_337 = arith.constant 3 : index
    %c0_338 = arith.constant 0 : index
    %c0_339 = arith.constant 0 : index
    %407 = vector.load %arg9[%c1_336, %c3_337, %c0_338, %c0_339] : memref<2x4x1x8xf32, #tpu.memory_space<vmem>>, vector<1x1x1x8xf32>
    %408 = vector.shape_cast %407 : vector<1x1x1x8xf32> to vector<1x8xf32>
    %409 = vector.shape_cast %408 : vector<1x8xf32> to vector<1x1x8xf32>
    %410 = vector.broadcast %409 : vector<1x1x8xf32> to vector<2x9x8xf32>
    %411 = arith.addf %406, %410 : vector<2x9x8xf32>
    %cst_340 = arith.constant 0.353553385 : f32
    %412 = vector.broadcast %cst_340 : f32 to vector<2x9x8xf32>
    %413 = arith.mulf %395, %412 : vector<2x9x8xf32>
    "tpu.trace_start"() <{level = 10 : i32, message = "bqe,bke->bqk"}> : () -> ()
    %cst_341 = arith.constant dense<0.000000e+00> : vector<2x9x9xf32>
    %414 = tpu.matmul %413, %403, %cst_341 {dimension_numbers = #tpu.dot_dimension_numbers<[2], [2], [1], [1], [0, 0, 0, 1, 1, 1], [0], [0]>} : vector<2x9x8xf32>, vector<2x9x8xf32>, vector<2x9x9xf32> -> vector<2x9x9xf32>
    "tpu.trace_stop"() : () -> ()
    %cst_342 = arith.constant dense<0xFF800000> : vector<2x9xf32>
    %415 = vector.multi_reduction <maximumf>, %414, %cst_342 [2] : vector<2x9x9xf32> to vector<2x9xf32>
    %416 = vector.shape_cast %415 : vector<2x9xf32> to vector<2x9x1xf32>
    %417 = vector.broadcast %416 : vector<2x9x1xf32> to vector<2x9x9xf32>
    %418 = arith.subf %414, %417 : vector<2x9x9xf32>
    %419 = math.exp %418 : vector<2x9x9xf32>
    %cst_343 = arith.constant dense<0.000000e+00> : vector<2x9xf32>
    %420 = vector.multi_reduction <add>, %419, %cst_343 [2] : vector<2x9x9xf32> to vector<2x9xf32>
    %421 = vector.shape_cast %420 : vector<2x9xf32> to vector<2x9x1xf32>
    %422 = tpu.reciprocal %421 {approx = true} : vector<2x9x1xf32> -> vector<2x9x1xf32>
    %423 = vector.broadcast %422 : vector<2x9x1xf32> to vector<2x9x9xf32>
    %424 = arith.mulf %419, %423 : vector<2x9x9xf32>
    "tpu.trace_start"() <{level = 10 : i32, message = "bqk,bke->bqe"}> : () -> ()
    %cst_344 = arith.constant dense<0.000000e+00> : vector<2x9x8xf32>
    %425 = tpu.matmul %424, %411, %cst_344 {dimension_numbers = #tpu.dot_dimension_numbers<[2], [1], [1], [2], [0, 0, 0, 1, 1, 2], [0], [0]>} : vector<2x9x9xf32>, vector<2x9x8xf32>, vector<2x9x8xf32> -> vector<2x9x8xf32>
    "tpu.trace_stop"() : () -> ()
    %c1_345 = arith.constant 1 : index
    %c3_346 = arith.constant 3 : index
    %c0_347 = arith.constant 0 : index
    %c0_348 = arith.constant 0 : index
    %426 = vector.load %arg10[%c1_345, %c3_346, %c0_347, %c0_348] : memref<2x4x8x32xf32, #tpu.memory_space<vmem>>, vector<1x1x8x32xf32>
    %427 = vector.shape_cast %426 : vector<1x1x8x32xf32> to vector<8x32xf32>
    "tpu.trace_start"() <{level = 10 : i32, message = "bqe,ed->bqd"}> : () -> ()
    %cst_349 = arith.constant dense<0.000000e+00> : vector<2x9x32xf32>
    %428 = tpu.matmul %425, %427, %cst_349 {dimension_numbers = #tpu.dot_dimension_numbers<[2], [0], [0, 1], [1], [0, 0, 0, 1, 1, 1], [], []>} : vector<2x9x8xf32>, vector<8x32xf32>, vector<2x9x32xf32> -> vector<2x9x32xf32>
    "tpu.trace_stop"() : () -> ()
    %429 = arith.addf %387, %428 : vector<2x9x32xf32>
    %c1_350 = arith.constant 1 : index
    %c0_351 = arith.constant 0 : index
    %c0_352 = arith.constant 0 : index
    %430 = vector.load %arg11[%c1_350, %c0_351, %c0_352] : memref<2x1x32xf32, #tpu.memory_space<vmem>>, vector<1x1x32xf32>
    %431 = vector.shape_cast %430 : vector<1x1x32xf32> to vector<1x32xf32>
    %432 = vector.shape_cast %431 : vector<1x32xf32> to vector<1x1x32xf32>
    %433 = vector.broadcast %432 : vector<1x1x32xf32> to vector<2x9x32xf32>
    %434 = arith.addf %429, %433 : vector<2x9x32xf32>
    %435 = arith.addf %262, %434 : vector<2x9x32xf32>
    %c1_353 = arith.constant 1 : index
    %c0_354 = arith.constant 0 : index
    %c0_355 = arith.constant 0 : index
    %436 = vector.load %arg12[%c1_353, %c0_354, %c0_355] : memref<2x1x32xf32, #tpu.memory_space<vmem>>, vector<1x1x32xf32>
    %437 = vector.shape_cast %436 : vector<1x1x32xf32> to vector<1x32xf32>
    %c1_356 = arith.constant 1 : index
    %c0_357 = arith.constant 0 : index
    %c0_358 = arith.constant 0 : index
    %438 = vector.load %arg13[%c1_356, %c0_357, %c0_358] : memref<2x1x32xf32, #tpu.memory_space<vmem>>, vector<1x1x32xf32>
    %439 = vector.shape_cast %438 : vector<1x1x32xf32> to vector<1x32xf32>
    %cst_359 = arith.constant dense<0.000000e+00> : vector<2x9xf32>
    %440 = vector.multi_reduction <add>, %435, %cst_359 [2] : vector<2x9x32xf32> to vector<2x9xf32>
    %441 = vector.shape_cast %440 : vector<2x9xf32> to vector<2x9x1xf32>
    %cst_360 = arith.constant 3.200000e+01 : f32
    %442 = vector.broadcast %cst_360 : f32 to vector<2x9x1xf32>
    %443 = arith.divf %441, %442 : vector<2x9x1xf32>
    %444 = vector.broadcast %443 : vector<2x9x1xf32> to vector<2x9x32xf32>
    %445 = arith.subf %435, %444 : vector<2x9x32xf32>
    %446 = arith.mulf %445, %445 : vector<2x9x32xf32>
    %cst_361 = arith.constant dense<0.000000e+00> : vector<2x9xf32>
    %447 = vector.multi_reduction <add>, %446, %cst_361 [2] : vector<2x9x32xf32> to vector<2x9xf32>
    %448 = vector.shape_cast %447 : vector<2x9xf32> to vector<2x9x1xf32>
    %cst_362 = arith.constant 3.200000e+01 : f32
    %449 = vector.broadcast %cst_362 : f32 to vector<2x9x1xf32>
    %450 = arith.divf %448, %449 : vector<2x9x1xf32>
    %451 = vector.broadcast %443 : vector<2x9x1xf32> to vector<2x9x32xf32>
    %452 = arith.subf %435, %451 : vector<2x9x32xf32>
    %cst_363 = arith.constant 9.99999974E-6 : f32
    %453 = vector.broadcast %cst_363 : f32 to vector<2x9x1xf32>
    %454 = arith.addf %450, %453 : vector<2x9x1xf32>
    %455 = math.rsqrt %454 : vector<2x9x1xf32>
    %456 = vector.broadcast %455 : vector<2x9x1xf32> to vector<2x9x32xf32>
    %457 = arith.mulf %452, %456 : vector<2x9x32xf32>
    %458 = vector.shape_cast %437 : vector<1x32xf32> to vector<1x1x32xf32>
    %459 = vector.broadcast %458 : vector<1x1x32xf32> to vector<2x9x32xf32>
    %460 = arith.mulf %457, %459 : vector<2x9x32xf32>
    %461 = vector.shape_cast %439 : vector<1x32xf32> to vector<1x1x32xf32>
    %462 = vector.broadcast %461 : vector<1x1x32xf32> to vector<2x9x32xf32>
    %463 = arith.addf %460, %462 : vector<2x9x32xf32>
    %c1_364 = arith.constant 1 : index
    %c0_365 = arith.constant 0 : index
    %c0_366 = arith.constant 0 : index
    %464 = vector.load %arg14[%c1_364, %c0_365, %c0_366] : memref<2x32x64xf32, #tpu.memory_space<vmem>>, vector<1x32x64xf32>
    %465 = vector.shape_cast %464 : vector<1x32x64xf32> to vector<32x64xf32>
    "tpu.trace_start"() <{level = 10 : i32, message = "bsd,df->bsf"}> : () -> ()
    %cst_367 = arith.constant dense<0.000000e+00> : vector<2x9x64xf32>
    %466 = tpu.matmul %463, %465, %cst_367 {dimension_numbers = #tpu.dot_dimension_numbers<[2], [0], [0, 1], [1], [0, 0, 0, 1, 1, 1], [], []>} : vector<2x9x32xf32>, vector<32x64xf32>, vector<2x9x64xf32> -> vector<2x9x64xf32>
    "tpu.trace_stop"() : () -> ()
    %c1_368 = arith.constant 1 : index
    %c0_369 = arith.constant 0 : index
    %c0_370 = arith.constant 0 : index
    %467 = vector.load %arg15[%c1_368, %c0_369, %c0_370] : memref<2x1x64xf32, #tpu.memory_space<vmem>>, vector<1x1x64xf32>
    %468 = vector.shape_cast %467 : vector<1x1x64xf32> to vector<1x64xf32>
    %469 = vector.shape_cast %468 : vector<1x64xf32> to vector<1x1x64xf32>
    %470 = vector.broadcast %469 : vector<1x1x64xf32> to vector<2x9x64xf32>
    %471 = arith.addf %466, %470 : vector<2x9x64xf32>
    %cst_371 = arith.constant 0.000000e+00 : f32
    %472 = vector.broadcast %cst_371 : f32 to vector<2x9x64xf32>
    %473 = arith.maximumf %471, %472 : vector<2x9x64xf32>
    %c1_372 = arith.constant 1 : index
    %c0_373 = arith.constant 0 : index
    %c0_374 = arith.constant 0 : index
    %474 = vector.load %arg16[%c1_372, %c0_373, %c0_374] : memref<2x64x32xf32, #tpu.memory_space<vmem>>, vector<1x64x32xf32>
    %475 = vector.shape_cast %474 : vector<1x64x32xf32> to vector<64x32xf32>
    "tpu.trace_start"() <{level = 10 : i32, message = "bsf,fd->bsd"}> : () -> ()
    %cst_375 = arith.constant dense<0.000000e+00> : vector<2x9x32xf32>
    %476 = tpu.matmul %473, %475, %cst_375 {dimension_numbers = #tpu.dot_dimension_numbers<[2], [0], [0, 1], [1], [0, 0, 0, 1, 1, 1], [], []>} : vector<2x9x64xf32>, vector<64x32xf32>, vector<2x9x32xf32> -> vector<2x9x32xf32>
    "tpu.trace_stop"() : () -> ()
    %c1_376 = arith.constant 1 : index
    %c0_377 = arith.constant 0 : index
    %c0_378 = arith.constant 0 : index
    %477 = vector.load %arg17[%c1_376, %c0_377, %c0_378] : memref<2x1x32xf32, #tpu.memory_space<vmem>>, vector<1x1x32xf32>
    %478 = vector.shape_cast %477 : vector<1x1x32xf32> to vector<1x32xf32>
    %479 = vector.shape_cast %478 : vector<1x32xf32> to vector<1x1x32xf32>
    %480 = vector.broadcast %479 : vector<1x1x32xf32> to vector<2x9x32xf32>
    %481 = arith.addf %476, %480 : vector<2x9x32xf32>
    %482 = arith.addf %463, %481 : vector<2x9x32xf32>
    %c1_379 = arith.constant 1 : index
    %c0_380 = arith.constant 0 : index
    %c0_381 = arith.constant 0 : index
    %483 = vector.load %arg18[%c1_379, %c0_380, %c0_381] : memref<2x1x32xf32, #tpu.memory_space<vmem>>, vector<1x1x32xf32>
    %484 = vector.shape_cast %483 : vector<1x1x32xf32> to vector<1x32xf32>
    %c1_382 = arith.constant 1 : index
    %c0_383 = arith.constant 0 : index
    %c0_384 = arith.constant 0 : index
    %485 = vector.load %arg19[%c1_382, %c0_383, %c0_384] : memref<2x1x32xf32, #tpu.memory_space<vmem>>, vector<1x1x32xf32>
    %486 = vector.shape_cast %485 : vector<1x1x32xf32> to vector<1x32xf32>
    %cst_385 = arith.constant dense<0.000000e+00> : vector<2x9xf32>
    %487 = vector.multi_reduction <add>, %482, %cst_385 [2] : vector<2x9x32xf32> to vector<2x9xf32>
    %488 = vector.shape_cast %487 : vector<2x9xf32> to vector<2x9x1xf32>
    %cst_386 = arith.constant 3.200000e+01 : f32
    %489 = vector.broadcast %cst_386 : f32 to vector<2x9x1xf32>
    %490 = arith.divf %488, %489 : vector<2x9x1xf32>
    %491 = vector.broadcast %490 : vector<2x9x1xf32> to vector<2x9x32xf32>
    %492 = arith.subf %482, %491 : vector<2x9x32xf32>
    %493 = arith.mulf %492, %492 : vector<2x9x32xf32>
    %cst_387 = arith.constant dense<0.000000e+00> : vector<2x9xf32>
    %494 = vector.multi_reduction <add>, %493, %cst_387 [2] : vector<2x9x32xf32> to vector<2x9xf32>
    %495 = vector.shape_cast %494 : vector<2x9xf32> to vector<2x9x1xf32>
    %cst_388 = arith.constant 3.200000e+01 : f32
    %496 = vector.broadcast %cst_388 : f32 to vector<2x9x1xf32>
    %497 = arith.divf %495, %496 : vector<2x9x1xf32>
    %498 = vector.broadcast %490 : vector<2x9x1xf32> to vector<2x9x32xf32>
    %499 = arith.subf %482, %498 : vector<2x9x32xf32>
    %cst_389 = arith.constant 9.99999974E-6 : f32
    %500 = vector.broadcast %cst_389 : f32 to vector<2x9x1xf32>
    %501 = arith.addf %497, %500 : vector<2x9x1xf32>
    %502 = math.rsqrt %501 : vector<2x9x1xf32>
    %503 = vector.broadcast %502 : vector<2x9x1xf32> to vector<2x9x32xf32>
    %504 = arith.mulf %499, %503 : vector<2x9x32xf32>
    %505 = vector.shape_cast %484 : vector<1x32xf32> to vector<1x1x32xf32>
    %506 = vector.broadcast %505 : vector<1x1x32xf32> to vector<2x9x32xf32>
    %507 = arith.mulf %504, %506 : vector<2x9x32xf32>
    %508 = vector.shape_cast %486 : vector<1x32xf32> to vector<1x1x32xf32>
    %509 = vector.broadcast %508 : vector<1x1x32xf32> to vector<2x9x32xf32>
    %510 = arith.addf %507, %509 : vector<2x9x32xf32>
    %c0_390 = arith.constant 0 : index
    %c0_391 = arith.constant 0 : index
    %511 = vector.load %arg20[%c0_390, %c0_391] : memref<1x32xf32, #tpu.memory_space<vmem>>, vector<1x32xf32>
    %c0_392 = arith.constant 0 : index
    %c0_393 = arith.constant 0 : index
    %512 = vector.load %arg21[%c0_392, %c0_393] : memref<1x32xf32, #tpu.memory_space<vmem>>, vector<1x32xf32>
    %cst_394 = arith.constant dense<0.000000e+00> : vector<2x9xf32>
    %513 = vector.multi_reduction <add>, %510, %cst_394 [2] : vector<2x9x32xf32> to vector<2x9xf32>
    %514 = vector.shape_cast %513 : vector<2x9xf32> to vector<2x9x1xf32>
    %cst_395 = arith.constant 3.200000e+01 : f32
    %515 = vector.broadcast %cst_395 : f32 to vector<2x9x1xf32>
    %516 = arith.divf %514, %515 : vector<2x9x1xf32>
    %517 = vector.broadcast %516 : vector<2x9x1xf32> to vector<2x9x32xf32>
    %518 = arith.subf %510, %517 : vector<2x9x32xf32>
    %519 = arith.mulf %518, %518 : vector<2x9x32xf32>
    %cst_396 = arith.constant dense<0.000000e+00> : vector<2x9xf32>
    %520 = vector.multi_reduction <add>, %519, %cst_396 [2] : vector<2x9x32xf32> to vector<2x9xf32>
    %521 = vector.shape_cast %520 : vector<2x9xf32> to vector<2x9x1xf32>
    %cst_397 = arith.constant 3.200000e+01 : f32
    %522 = vector.broadcast %cst_397 : f32 to vector<2x9x1xf32>
    %523 = arith.divf %521, %522 : vector<2x9x1xf32>
    %524 = vector.broadcast %516 : vector<2x9x1xf32> to vector<2x9x32xf32>
    %525 = arith.subf %510, %524 : vector<2x9x32xf32>
    %cst_398 = arith.constant 9.99999974E-6 : f32
    %526 = vector.broadcast %cst_398 : f32 to vector<2x9x1xf32>
    %527 = arith.addf %523, %526 : vector<2x9x1xf32>
    %528 = math.rsqrt %527 : vector<2x9x1xf32>
    %529 = vector.broadcast %528 : vector<2x9x1xf32> to vector<2x9x32xf32>
    %530 = arith.mulf %525, %529 : vector<2x9x32xf32>
    %531 = vector.shape_cast %511 : vector<1x32xf32> to vector<1x1x32xf32>
    %532 = vector.broadcast %531 : vector<1x1x32xf32> to vector<2x9x32xf32>
    %533 = arith.mulf %530, %532 : vector<2x9x32xf32>
    %534 = vector.shape_cast %512 : vector<1x32xf32> to vector<1x1x32xf32>
    %535 = vector.broadcast %534 : vector<1x1x32xf32> to vector<2x9x32xf32>
    %536 = arith.addf %533, %535 : vector<2x9x32xf32>
    %c0_399 = arith.constant 0 : index
    %c0_400 = arith.constant 0 : index
    %c0_401 = arith.constant 0 : index
    %537 = vector.load %arg22[%c0_399, %c0_400, %c0_401] : memref<2x9x32xf32, #tpu.memory_space<vmem>>, vector<2x9x32xf32>
    tpu.vector_store %arg22[%c0_399, %c0_400, %c0_401], %536 {strides = array<i32>} : memref<2x9x32xf32, #tpu.memory_space<vmem>>, vector<2x9x32xf32>,
    return
  }
  func.func @transform_0(%arg0: i32) -> (i32, i32, i32) {
    %c0_i32 = arith.constant 0 : i32
    %c0_i32_0 = arith.constant 0 : i32
    %c0_i32_1 = arith.constant 0 : i32
    return %arg0, %c0_i32, %c0_i32_0 : i32, i32, i32
  }
  func.func @transform_1(%arg0: i32) -> (i32, i32, i32) {
    %c0_i32 = arith.constant 0 : i32
    %c0_i32_0 = arith.constant 0 : i32
    %c0_i32_1 = arith.constant 0 : i32
    %c0_i32_2 = arith.constant 0 : i32
    return %c0_i32, %c0_i32_0, %c0_i32_1 : i32, i32, i32
  }
  func.func @transform_2(%arg0: i32) -> (i32, i32) {
    %c0_i32 = arith.constant 0 : i32
    %c0_i32_0 = arith.constant 0 : i32
    %c0_i32_1 = arith.constant 0 : i32
    return %c0_i32, %c0_i32_0 : i32, i32
  }
  func.func @transform_3(%arg0: i32) -> (i32, i32, i32, i32) {
    %c0_i32 = arith.constant 0 : i32
    %c0_i32_0 = arith.constant 0 : i32
    %c0_i32_1 = arith.constant 0 : i32
    %c0_i32_2 = arith.constant 0 : i32
    %c0_i32_3 = arith.constant 0 : i32
    return %c0_i32, %c0_i32_0, %c0_i32_1, %c0_i32_2 : i32, i32, i32, i32
  }
  func.func @transform_4(%arg0: i32) -> (i32, i32, i32, i32) {
    %c0_i32 = arith.constant 0 : i32
    %c0_i32_0 = arith.constant 0 : i32
    %c0_i32_1 = arith.constant 0 : i32
    %c0_i32_2 = arith.constant 0 : i32
    %c0_i32_3 = arith.constant 0 : i32
    return %c0_i32, %c0_i32_0, %c0_i32_1, %c0_i32_2 : i32, i32, i32, i32
  }
  func.func @transform_5(%arg0: i32) -> (i32, i32, i32, i32) {
    %c0_i32 = arith.constant 0 : i32
    %c0_i32_0 = arith.constant 0 : i32
    %c0_i32_1 = arith.constant 0 : i32
    %c0_i32_2 = arith.constant 0 : i32
    %c0_i32_3 = arith.constant 0 : i32
    return %c0_i32, %c0_i32_0, %c0_i32_1, %c0_i32_2 : i32, i32, i32, i32
  }
  func.func @transform_6(%arg0: i32) -> (i32, i32, i32, i32) {
    %c0_i32 = arith.constant 0 : i32
    %c0_i32_0 = arith.constant 0 : i32
    %c0_i32_1 = arith.constant 0 : i32
    %c0_i32_2 = arith.constant 0 : i32
    %c0_i32_3 = arith.constant 0 : i32
    return %c0_i32, %c0_i32_0, %c0_i32_1, %c0_i32_2 : i32, i32, i32, i32
  }
  func.func @transform_7(%arg0: i32) -> (i32, i32, i32, i32) {
    %c0_i32 = arith.constant 0 : i32
    %c0_i32_0 = arith.constant 0 : i32
    %c0_i32_1 = arith.constant 0 : i32
    %c0_i32_2 = arith.constant 0 : i32
    %c0_i32_3 = arith.constant 0 : i32
    return %c0_i32, %c0_i32_0, %c0_i32_1, %c0_i32_2 : i32, i32, i32, i32
  }
  func.func @transform_8(%arg0: i32) -> (i32, i32, i32, i32) {
    %c0_i32 = arith.constant 0 : i32
    %c0_i32_0 = arith.constant 0 : i32
    %c0_i32_1 = arith.constant 0 : i32
    %c0_i32_2 = arith.constant 0 : i32
    %c0_i32_3 = arith.constant 0 : i32
    return %c0_i32, %c0_i32_0, %c0_i32_1, %c0_i32_2 : i32, i32, i32, i32
  }
  func.func @transform_9(%arg0: i32) -> (i32, i32, i32, i32) {
    %c0_i32 = arith.constant 0 : i32
    %c0_i32_0 = arith.constant 0 : i32
    %c0_i32_1 = arith.constant 0 : i32
    %c0_i32_2 = arith.constant 0 : i32
    %c0_i32_3 = arith.constant 0 : i32
    return %c0_i32, %c0_i32_0, %c0_i32_1, %c0_i32_2 : i32, i32, i32, i32
  }
  func.func @transform_10(%arg0: i32) -> (i32, i32, i32) {
    %c0_i32 = arith.constant 0 : i32
    %c0_i32_0 = arith.constant 0 : i32
    %c0_i32_1 = arith.constant 0 : i32
    %c0_i32_2 = arith.constant 0 : i32
    return %c0_i32, %c0_i32_0, %c0_i32_1 : i32, i32, i32
  }
  func.func @transform_11(%arg0: i32) -> (i32, i32, i32) {
    %c0_i32 = arith.constant 0 : i32
    %c0_i32_0 = arith.constant 0 : i32
    %c0_i32_1 = arith.constant 0 : i32
    %c0_i32_2 = arith.constant 0 : i32
    return %c0_i32, %c0_i32_0, %c0_i32_1 : i32, i32, i32
  }
  func.func @transform_12(%arg0: i32) -> (i32, i32, i32) {
    %c0_i32 = arith.constant 0 : i32
    %c0_i32_0 = arith.constant 0 : i32
    %c0_i32_1 = arith.constant 0 : i32
    %c0_i32_2 = arith.constant 0 : i32
    return %c0_i32, %c0_i32_0, %c0_i32_1 : i32, i32, i32
  }
  func.func @transform_13(%arg0: i32) -> (i32, i32, i32) {
    %c0_i32 = arith.constant 0 : i32
    %c0_i32_0 = arith.constant 0 : i32
    %c0_i32_1 = arith.constant 0 : i32
    %c0_i32_2 = arith.constant 0 : i32
    return %c0_i32, %c0_i32_0, %c0_i32_1 : i32, i32, i32
  }
  func.func @transform_14(%arg0: i32) -> (i32, i32, i32) {
    %c0_i32 = arith.constant 0 : i32
    %c0_i32_0 = arith.constant 0 : i32
    %c0_i32_1 = arith.constant 0 : i32
    %c0_i32_2 = arith.constant 0 : i32
    return %c0_i32, %c0_i32_0, %c0_i32_1 : i32, i32, i32
  }
  func.func @transform_15(%arg0: i32) -> (i32, i32, i32) {
    %c0_i32 = arith.constant 0 : i32
    %c0_i32_0 = arith.constant 0 : i32
    %c0_i32_1 = arith.constant 0 : i32
    %c0_i32_2 = arith.constant 0 : i32
    return %c0_i32, %c0_i32_0, %c0_i32_1 : i32, i32, i32
  }
  func.func @transform_16(%arg0: i32) -> (i32, i32, i32) {
    %c0_i32 = arith.constant 0 : i32
    %c0_i32_0 = arith.constant 0 : i32
    %c0_i32_1 = arith.constant 0 : i32
    %c0_i32_2 = arith.constant 0 : i32
    return %c0_i32, %c0_i32_0, %c0_i32_1 : i32, i32, i32
  }
  func.func @transform_17(%arg0: i32) -> (i32, i32, i32) {
    %c0_i32 = arith.constant 0 : i32
    %c0_i32_0 = arith.constant 0 : i32
    %c0_i32_1 = arith.constant 0 : i32
    %c0_i32_2 = arith.constant 0 : i32
    return %c0_i32, %c0_i32_0, %c0_i32_1 : i32, i32, i32
  }
  func.func @transform_18(%arg0: i32) -> (i32, i32, i32) {
    %c0_i32 = arith.constant 0 : i32
    %c0_i32_0 = arith.constant 0 : i32
    %c0_i32_1 = arith.constant 0 : i32
    %c0_i32_2 = arith.constant 0 : i32
    return %c0_i32, %c0_i32_0, %c0_i32_1 : i32, i32, i32
  }
  func.func @transform_19(%arg0: i32) -> (i32, i32) {
    %c0_i32 = arith.constant 0 : i32
    %c0_i32_0 = arith.constant 0 : i32
    %c0_i32_1 = arith.constant 0 : i32
    return %c0_i32, %c0_i32_0 : i32, i32
  }
  func.func @transform_20(%arg0: i32) -> (i32, i32) {
    %c0_i32 = arith.constant 0 : i32
    %c0_i32_0 = arith.constant 0 : i32
    %c0_i32_1 = arith.constant 0 : i32
    return %c0_i32, %c0_i32_0 : i32, i32
  }
  func.func @transform_21(%arg0: i32) -> (i32, i32, i32) {
    %c0_i32 = arith.constant 0 : i32
    %c0_i32_0 = arith.constant 0 : i32
    %c0_i32_1 = arith.constant 0 : i32
    return %arg0, %c0_i32, %c0_i32_0 : i32, i32, i32
  }
}

</mosaic_0001>

<bundles_post_ra>
// kernel: transformer_seq_encoder_forward.1
= control target key start
LH: loop header
LB: loop body
LE: loop exit
PB: predicated region body
PF: predicated region fallthrough
CT: control target
= control target key end

     0   :  { %v25088_v0 = vmov 0.0   ;;  %vm73_vm0 = vcmask 253952   ;;  %v25089_v8 = vmov 1966171168   ;;  %v104_v10 = vlaneseq  ;;  %s29650_s3 = inlined_call_operand.vmem [shape: f32[2,4,32,8], index: 3, kind: input, shape index: {}]   ;;  %s29651_s5 = inlined_call_operand.vmem [shape: f32[2,4,32,8], index: 5, kind: input, shape index: {}]   ;;  %s29652_s0 = inlined_call_operand.vmem [shape: f32[2,8,32], index: 0, kind: input, shape index: {}]   ;;  %s29653_s1 = inlined_call_operand.vmem [shape: f32[1,1,32], index: 1, kind: input, shape index: {}]   ;;  %s29654_s2 = inlined_call_operand.vmem [shape: f32[64,32], index: 2, kind: input, shape index: {}]   ;;  %s29655_s21 = inlined_call_operand.vmem [shape: f32[2,9,32], index: 21, kind: output, shape index: {}]   ;;  %s29656_s4 = inlined_call_operand.vmem [shape: f32[2,4,1,8], index: 4, kind: input, shape index: {}]   ;;  %s29657_s6 = inlined_call_operand.vmem [shape: f32[2,4,1,8], index: 6, kind: input, shape index: {}]   ;;  %s29658_s7 = inlined_call_operand.vmem [shape: f32[2,4,32,8], index: 7, kind: input, shape index: {}]   ;;  %s29659_s8 = inlined_call_operand.vmem [shape: f32[2,4,1,8], index: 8, kind: input, shape index: {}]   ;;  %s29660_s9 = inlined_call_operand.vmem [shape: f32[2,4,8,32], index: 9, kind: input, shape index: {}]   ;;  %s29661_s10 = inlined_call_operand.vmem [shape: f32[2,1,32], index: 10, kind: input, shape index: {}]   ;;  %s29662_s13 = inlined_call_operand.vmem [shape: f32[2,32,64], index: 13, kind: input, shape index: {}]   ;;  %s29663_s11 = inlined_call_operand.vmem [shape: f32[2,1,32], index: 11, kind: input, shape index: {}]   ;;  %s29664_s12 = inlined_call_operand.vmem [shape: f32[2,1,32], index: 12, kind: input, shape index: {}]   ;;  %s29665_s15 = inlined_call_operand.vmem [shape: f32[2,64,32], index: 15, kind: input, shape index: {}]   ;;  %s29666_s14 = inlined_call_operand.vmem [shape: f32[2,1,64], index: 14, kind: input, shape index: {}]   ;;  %s29667_s16 = inlined_call_operand.vmem [shape: f32[2,1,32], index: 16, kind: input, shape index: {}]   ;;  %s29668_s17 = inlined_call_operand.vmem [shape: f32[2,1,32], index: 17, kind: input, shape index: {}]   ;;  %s29669_s18 = inlined_call_operand.vmem [shape: f32[2,1,32], index: 18, kind: input, shape index: {}]   ;;  %s29670_s19 = inlined_call_operand.vmem [shape: f32[1,32], index: 19, kind: input, shape index: {}]   ;;  %s29671_s20 = inlined_call_operand.vmem [shape: f32[1,32], index: 20, kind: input, shape index: {}]  }
   0x1   :  { %29677 = sst [smem:[#allocation2_spill]] %s29650_s3  ;;  %24105 = vmatprep.subr.mxu0 %v25088_v0  ;;  %24122 = vmatprep.subr.mxu1 %v25088_v0  ;;  %v102_v9 = vunpack.c.l.s4 %v25089_v8  ;;  %vm79_vm1 = vcmask 261120   ;;  %vm25090_vm2 = vmmov 0   ;;  %vm1640_vm3 = vcmask 64512  }
   0x2   :  { %29678 = sst [smem:[#allocation3_spill]] %s29651_s5  ;;  %v105_v21 = vshrl.u32 %v104_v10, 7  ;;  %24113 = vmatprep.mubr.msk.f32.mxu0 %vm25090_vm2, %v25088_v0  ;;  %24130 = vmatprep.mubr.msk.f32.mxu1 %vm25090_vm2, %v25088_v0  ;;  %vm1942_vm4 = vcmask 72704   ;;  %vm1946_vm5 = vcmask 65536   ;;  %vm2058_vm6 = vcmask 1040384  }
   0x3   :  { %29679 = sst [smem:[#allocation4_spill]] %s29652_s0  ;;  %v103_v20 = vunpack.c.0.s8 %v102_v9  ;;  %vm11196_vm7 = vcmask 523264  }
   0x4   :  { %29680 = sst [smem:[#allocation5_spill]] %s29653_s1 }
   0x5   :  { %29681 = sst [smem:[#allocation6_spill]] %s29654_s2  ;;  %v25269_v22 = vsub.s32 %v103_v20, %v105_v21 }
   0x6   :  { %29682 = sst [smem:[#allocation7_spill]] %s29655_s21 }
   0x7   :  { %s29683_s26 = sld [smem:[#allocation2_spill]] }
   0x8   :  { %s29684_s28 = sld [smem:[#allocation3_spill]] }
   0x9   :  { %s29685_s25 = sld [smem:[#allocation4_spill]] }
   0xa   :  { %s29686_s2 = sld [smem:[#allocation5_spill]] }
   0xb   :  { %s29687_s30 = sld [smem:[#allocation6_spill]] }
   0xc   :  { %s29688_s3 = sld [smem:[#allocation7_spill]] }
   0xd   :  { %v89_v1 = vld [vmem:[%s29683_s26 + $0x18] sm:$0xff]  ;;  %v88_v3 = vld [vmem:[%s29683_s26 + $0x10] sm:$0xff]  ;;  %v87_v5 = vld [vmem:[%s29683_s26 + $0x8] sm:$0xff] }
   0xe   :  { %v734_v2 = vld [vmem:[%s29684_s28 + $0x18] sm:$0xff]  ;;  %24106 = vmatpush3.msra.mxu0 %v89_v1  ;;  %v733_v4 = vld [vmem:[%s29684_s28 + $0x10] sm:$0xff]  ;;  %v732_v6 = vld [vmem:[%s29684_s28 + $0x8] sm:$0xff] }
   0xf   :  { %24123 = vmatpush3.msra.mxu1 %v734_v2  ;;  %24107 = vmatprep.subr.mxu0 %v25088_v0  ;;  %v68_v7 = vld [vmem:[%s29685_s25] sm:$0xff]  ;;  %v69_v17 = vld [vmem:[%s29685_s25 + $0x8] sm:$0xff] }
  0x10   :  { %24124 = vmatprep.subr.mxu1 %v25088_v0  ;;  %24108 = vmatpush3.msra.mxu0 %v88_v3  ;;  %v70_v11 = vld [vmem:[%s29686_s2] sm:$0x1] }
  0x11   :  { %24125 = vmatpush3.msra.mxu1 %v733_v4  ;;  %v71_v12 = vld [vmem:[%s29687_s30] sm:$0x1]  ;;  %v76_v13 = vld [vmem:[%s29687_s30 + $0x1] sm:$0xff]  ;;  %24109 = vmatprep.subr.mxu0 %v25088_v0 }
  0x12   :  { %24126 = vmatprep.subr.mxu1 %v25088_v0  ;;  %v86_v14 = vld [vmem:[%s29683_s26] sm:$0xff]  ;;  %v72_v15 = vadd.f32 %v71_v12, %v70_v11  ;;  %v77_v16 = vadd.f32 %v76_v13, %v68_v7  ;;  %24110 = vmatpush3.msra.mxu0 %v87_v5  ;;  %v78_v19 = vadd.f32 %v76_v13, %v69_v17 }
  0x13   :  { %24127 = vmatpush3.msra.mxu1 %v732_v6  ;;  %v731_v18 = vld [vmem:[%s29684_s28] sm:$0xff]  ;;  %24111 = vmatprep.subr.mxu0 %v25088_v0 }
  0x14   :  { %24128 = vmatprep.subr.mxu1 %v25088_v0  ;;  %74 = vst.msk [vmem:[%s29688_s3] sm:$0x1] %vm73_vm0, %v72_v15  ;;  %75 = vst.msk [vmem:[%s29688_s3 + $0x10] sm:$0x1] %vm73_vm0, %v72_v15  ;;  %24112 = vmatpush3.msra.mxu0 %v86_v14  ;;  %v23234_v17 = vld [vmem:[%s29656_s4] ss:$0 sm:$0xff] }
  0x15   :  { %80 = vst.msk [vmem:[%s29688_s3 + $0x1] sm:$0xff] %vm79_vm1, %v77_v16  ;;  %81 = vst.msk [vmem:[%s29688_s3 + $0x11] sm:$0xff] %vm79_vm1, %v78_v19  ;;  %24129 = vmatpush3.msra.mxu1 %v731_v18  ;;  %24139 = vmatprep.subr.mxu0 %v25088_v0  ;;  %v23242_v18 = vld [vmem:[%s29657_s6] ss:$0 sm:$0xff]  ;;  %v226_v19 = vcombine.high %v23234_v17, %v23234_v17  ;;  %v233_v21 = vrot.slane %v23234_v17, %v25269_v22 }
  0x16   :  { %v741_v20 = vcombine.high %v23242_v18, %v23242_v18 }
  0x1c   :  { %v82_v23 = vld [vmem:[%s29688_s3] sm:$0xff]  ;;  %v25086_v24 = vld.sshfl [vmem:[%s29688_s3 + $0x8] sm:$0x1 pattern:$0x75316420]  ;;  %v84_v27 = vld [vmem:[%s29688_s3 + $0x10] sm:$0xff] }
  0x1d   :  { %v100_v25 = vcombine.high %v82_v23, %v82_v23  ;;  %v107_v26 = vrot.slane %v82_v23, %v25269_v22  ;;  %v25087_v28 = vld.sshfl [vmem:[%s29688_s3 + $0x18] sm:$0x1 pattern:$0x75316420]  ;;  %v163_v29 = vcombine.high %v84_v27, %v84_v27  ;;  %v170_v30 = vrot.slane %v84_v27, %v25269_v22 }
  0x1e   :  { %v162_v34 = vrot.slane %v25086_v24, %v25269_v22  ;;  %v225_v41 = vrot.slane %v25087_v28, %v25269_v22  ;;  %v240_v23 = vrot.slane %v226_v19, %v25269_v22  ;;  %v748_v24 = vrot.slane %v23242_v18, %v25269_v22 }
  0x1f   :  { %v114_v31 = vrot.slane %v100_v25, %v25269_v22  ;;  %v115_v32 = vcombine.high %v107_v26, %v107_v26  ;;  %v123_v33 = vrot.slane %v107_v26, %v25269_v22  ;;  %v177_v35 = vrot.slane %v163_v29, %v25269_v22 }
  0x20   :  { %v178_v36 = vcombine.high %v170_v30, %v170_v30  ;;  %v186_v37 = vrot.slane %v170_v30, %v25269_v22  ;;  %v755_v25 = vrot.slane %v741_v20, %v25269_v22  ;;  %v241_v26 = vcombine.high %v233_v21, %v233_v21 }
  0x21   :  { %v116_v38 = vcombine.high %v114_v31, %v114_v31  ;;  %v130_v39 = vrot.slane %v114_v31, %v25269_v22  ;;  %v137_v40 = vrot.slane %v115_v32, %v25269_v22  ;;  %v179_v42 = vcombine.high %v177_v35, %v177_v35 }
  0x22   :  { %v193_v43 = vrot.slane %v177_v35, %v25269_v22  ;;  %v200_v44 = vrot.slane %v178_v36, %v25269_v22  ;;  %v208_v45 = vcombine.high %v186_v37, %v186_v37  ;;  %v324_v49 = vcombine.low %v162_v34, %v186_v37 }
  0x23   :  { %v144_v46 = vrot.slane %v116_v38, %v25269_v22  ;;  %v275_v47 = vcombine.low %v123_v33, %v137_v40  ;;  %v23235_v48 = vcombine.high %v123_v33, %v137_v40  ;;  %v207_v50 = vrot.slane %v179_v42, %v25269_v22 }
  0x24   :  { %v209_v51 = vcombine.high %v193_v43, %v193_v43  ;;  %v210_v52 = vcombine.high %v200_v44, %v200_v44  ;;  %v325_v53 = vcombine.low %v200_v44, %v208_v45  ;;  %v334_v60 = vrot.slane %v324_v49, %v25269_v22 }
  0x25   :  { %v277_v54 = vcombine.low %v130_v39, %v144_v46  ;;  %v23236_v55 = vcombine.high %v130_v39, %v144_v46  ;;  %v285_v56 = vrot.slane %v275_v47, %v25269_v22  ;;  %v292_v57 = vrot.slane %v23235_v48, %v25269_v22 }
  0x26   :  { %v326_v58 = vcombine.low %v210_v52, %v193_v43  ;;  %v327_v59 = vcombine.low %v207_v50, %v209_v51  ;;  %v341_v61 = vrot.slane %v325_v53, %v25269_v22  ;;  %v211_v2 = vcombine.high %v207_v50, %v207_v50 }
  0x27   :  { %v299_v62 = vrot.slane %v277_v54, %v25269_v22  ;;  %v306_v63 = vrot.slane %v23236_v55, %v25269_v22  ;;  %v307_v1 = vcombine.low %v285_v56, %v292_v57  ;;  %v242_v27 = vcombine.high %v240_v23, %v240_v23 }
  0x28   :  { %v348_v3 = vrot.slane %v326_v58, %v25269_v22  ;;  %v355_v4 = vrot.slane %v327_v59, %v25269_v22  ;;  %v356_v5 = vcombine.low %v334_v60, %v341_v61  ;;  %v373_v11 = vcombine.low %v211_v2, %v225_v41 }
  0x29   :  { %v308_v6 = vcombine.low %v299_v62, %v306_v63  ;;  %v315_v7 = vrot.slane %v307_v1, %v25269_v22  ;;  %v756_v28 = vcombine.high %v748_v24, %v748_v24  ;;  %v757_v29 = vcombine.high %v755_v25, %v755_v25 }
  0x2a   :  { %v357_v8 = vcombine.low %v348_v3, %v355_v4  ;;  %v364_v10 = vrot.slane %v356_v5, %v25269_v22  ;;  %v380_v15 = vrot.slane %v373_v11, %v25269_v22  ;;  %v25350_v30 = vrot.slane %v233_v21, %v25269_v22 }
  0x2b   :  { %v322_v9 = vrot.slane %v308_v6, %v25269_v22  ;;  %v256_v31 = vrot.slane %v240_v23, %v25269_v22  ;;  %v263_v32 = vrot.slane %v241_v26, %v25269_v22  ;;  %v25355_v33 = vrot.slane %v242_v27, %v25269_v22 }
  0x2c   :  { %v371_v12 = vrot.slane %v357_v8, %v25269_v22  ;;  %v25327_v16 = vrot.slane %v380_v15, %v25269_v22  ;;  %v25358_v34 = vrot.slane %v748_v24, %v25269_v22  ;;  %v771_v35 = vrot.slane %v755_v25, %v25269_v22 }
  0x2d   :  { %v25309_v13 = vcombine.low %v315_v7, %v322_v9  ;;  %v778_v36 = vrot.slane %v756_v28, %v25269_v22  ;;  %v25363_v37 = vrot.slane %v757_v29, %v25269_v22  ;;  %v388_v38 = vcombine.low %v25350_v30, %v263_v32 }
  0x2e   :  { %v25315_v14 = vcombine.low %v364_v10, %v371_v12  ;;  %v23237_v39 = vcombine.high %v25350_v30, %v263_v32  ;;  %v390_v40 = vcombine.low %v256_v31, %v25355_v33  ;;  %v23238_v41 = vcombine.high %v256_v31, %v25355_v33 }
  0x2f   :  { %24114 = vmatmul.mubr.msk.f32.vlgmr.msra.gmra.mxu0 %vm79_vm1, %v25309_v13  ;;  %24131 = vmatmul.mubr.msk.f32.vlgmr.msra.gmra.mxu1 %vm79_vm1, %v25309_v13  ;;  %v790_v42 = vcombine.low %v25358_v34, %v778_v36  ;;  %v23243_v43 = vcombine.high %v25358_v34, %v778_v36  ;;  %v792_v44 = vcombine.low %v771_v35, %v25363_v37 }
  0x30   :  { %24116 = vmatprep.mubr.msk.f32.mxu0 %vm25090_vm2, %v25088_v0  ;;  %24133 = vmatprep.mubr.msk.f32.mxu1 %vm25090_vm2, %v25088_v0  ;;  %v23244_v45 = vcombine.high %v771_v35, %v25363_v37  ;;  %v271_v46 = vcombine.high %v25350_v30, %v25350_v30  ;;  %v272_v47 = vcombine.high %v256_v31, %v256_v31 }
  0x31   :  { %v273_v48 = vcombine.high %v263_v32, %v263_v32  ;;  %v398_v49 = vrot.slane %v388_v38, %v25269_v22  ;;  %v405_v50 = vrot.slane %v23237_v39, %v25269_v22  ;;  %v412_v51 = vrot.slane %v390_v40, %v25269_v22 }
  0x32   :  { %v419_v52 = vrot.slane %v23238_v41, %v25269_v22  ;;  %v786_v53 = vcombine.high %v25358_v34, %v25358_v34  ;;  %v787_v54 = vcombine.high %v771_v35, %v771_v35  ;;  %v788_v55 = vcombine.high %v778_v36, %v778_v36 }
  0x33   :  { %24117 = vmatmul.mubr.msk.f32.gmra.mxu0 %vm79_vm1, %v25315_v14  ;;  %24134 = vmatmul.mubr.msk.f32.gmra.mxu1 %vm79_vm1, %v25315_v14  ;;  %v800_v56 = vrot.slane %v790_v42, %v25269_v22  ;;  %v807_v57 = vrot.slane %v23243_v43, %v25269_v22  ;;  %v814_v58 = vrot.slane %v792_v44, %v25269_v22 }
  0x34   :  { %24119 = vmatprep.mubr.msk.f32.mxu0 %vm25090_vm2, %v25088_v0  ;;  %24136 = vmatprep.mubr.msk.f32.mxu1 %vm25090_vm2, %v25088_v0  ;;  %v821_v59 = vrot.slane %v23244_v45, %v25269_v22  ;;  %v437_v60 = vcombine.low %v25350_v30, %v25350_v30  ;;  %v438_v61 = vcombine.low %v263_v32, %v271_v46 }
  0x35   :  { %v439_v62 = vcombine.low %v273_v48, %v256_v31  ;;  %v440_v63 = vcombine.low %v25355_v33, %v272_v47  ;;  %v839_v1 = vcombine.low %v25358_v34, %v25358_v34  ;;  %v840_v2 = vcombine.low %v778_v36, %v786_v53 }
  0x36   :  { %v841_v3 = vcombine.low %v788_v55, %v771_v35  ;;  %v842_v4 = vcombine.low %v25363_v37, %v787_v54  ;;  %v420_v5 = vcombine.low %v398_v49, %v405_v50  ;;  %v421_v6 = vcombine.low %v412_v51, %v419_v52 }
  0x37   :  { %24120 = vmatmul.mubr.msk.f32.gmra.mxu0 %vm79_vm1, %v25327_v16  ;;  %24137 = vmatmul.mubr.msk.f32.gmra.mxu1 %vm79_vm1, %v25327_v16  ;;  %v822_v7 = vcombine.low %v800_v56, %v807_v57  ;;  %v823_v8 = vcombine.low %v814_v58, %v821_v59  ;;  %v447_v9 = vrot.slane %v437_v60, %v25269_v22 }
  0x38   :  { %24147 = vmatprep.mubr.msk.f32.mxu0 %vm25090_vm2, %v25088_v0  ;;  %v454_v10 = vrot.slane %v438_v61, %v25269_v22  ;;  %v461_v11 = vrot.slane %v439_v62, %v25269_v22  ;;  %v468_v12 = vrot.slane %v440_v63, %v25269_v22  ;;  %v849_v15 = vrot.slane %v839_v1, %v25269_v22 }
  0x39   :  { %v856_v17 = vrot.slane %v840_v2, %v25269_v22  ;;  %v863_v18 = vrot.slane %v841_v3, %v25269_v22  ;;  %v870_v19 = vrot.slane %v842_v4, %v25269_v22  ;;  %v428_v20 = vrot.slane %v420_v5, %v25269_v22 }
  0x3a   :  { %v435_v21 = vrot.slane %v421_v6, %v25269_v22  ;;  %v830_v23 = vrot.slane %v822_v7, %v25269_v22  ;;  %v837_v24 = vrot.slane %v823_v8, %v25269_v22  ;;  %v469_v25 = vcombine.low %v447_v9, %v454_v10 }
  0x3b   :  { %v470_v26 = vcombine.low %v461_v11, %v468_v12  ;;  %v871_v27 = vcombine.low %v849_v15, %v856_v17  ;;  %v872_v28 = vcombine.low %v863_v18, %v870_v19  ;;  %v274_v29 = vcombine.high %v25355_v33, %v25355_v33 }
  0x3c   :  { %v436_v31 = vcombine.low %v428_v20, %v435_v21  ;;  %v838_v32 = vcombine.low %v830_v23, %v837_v24  ;;  %v477_v35 = vrot.slane %v469_v25, %v25269_v22  ;;  %v789_v38 = vcombine.high %v25363_v37, %v25363_v37 }
  0x3d   :  { %v484_v36 = vrot.slane %v470_v26, %v25269_v22  ;;  %v879_v41 = vrot.slane %v871_v27, %v25269_v22  ;;  %v886_v42 = vrot.slane %v872_v28, %v25269_v22  ;;  %v486_v43 = vcombine.low %v274_v29, %v25350_v30 }
  0x3e   :  { %v888_v48 = vcombine.low %v789_v38, %v25358_v34 }
  0x3f   :  { %v485_v47 = vcombine.low %v477_v35, %v484_v36  ;;  %v887_v53 = vcombine.low %v879_v41, %v886_v42  ;;  %v493_v55 = vrot.slane %v486_v43, %v25269_v22 }
  0x40   :  { %v895_v63 = vrot.slane %v888_v48, %v25269_v22 }
  0x42   :  { %v902_v43 = vrot.slane %v895_v63, %v25269_v22 }
  0xef   :  { %v576_v39 = vpop.f32.mrf.mxu0  ;;  %v972_v40 = vpop.f32.mrf.mxu1 }
  0xf0   :  { %v577_v44 = vadd.f32 %v576_v39, %v436_v31  ;;  %v973_v45 = vadd.f32 %v972_v40, %v838_v32  ;;  %v500_v39 = vrot.slane %v493_v55, %v25269_v22 }
  0xf1   :  { %v24115_v33 = vpop.f32.mrf.mxu0  ;;  %v24132_v46 = vpop.f32.mrf.mxu1 }
  0xf2   :  { %v593_v49 = vcombine.high %v577_v44, %v577_v44  ;;  %v600_v50 = vrot.slane %v577_v44, %v25269_v22  ;;  %v989_v51 = vcombine.high %v973_v45, %v973_v45  ;;  %v996_v37 = vrot.slane %v973_v45, %v25269_v22 }
  0xf3   :  { %v581_v52 = vpop.f32.mrf.mxu0  ;;  %v977_v54 = vpop.f32.mrf.mxu1 }
  0xf4   :  { %v607_v30 = vrot.slane %v593_v49, %v25269_v22  ;;  %v608_v56 = vcombine.high %v600_v50, %v600_v50  ;;  %v616_v57 = vrot.slane %v600_v50, %v25269_v22  ;;  %v1003_v58 = vrot.slane %v989_v51, %v25269_v22 }
  0xf5   :  { %v1004_v59 = vcombine.high %v996_v37, %v996_v37  ;;  %v1012_v34 = vrot.slane %v996_v37, %v25269_v22  ;;  %v582_v60 = vadd.f32 %v581_v52, %v485_v47  ;;  %v24135_v61 = vpop.f32.mrf.mxu1  ;;  %v24118_v62 = vpop.f32.mrf.mxu0  ;;  %v978_v8 = vadd.f32 %v977_v54, %v887_v53 }
  0xf6   :  { %v609_v1 = vcombine.high %v607_v30, %v607_v30  ;;  %v623_v2 = vrot.slane %v607_v30, %v25269_v22  ;;  %v630_v3 = vrot.slane %v608_v56, %v25269_v22  ;;  %v638_v4 = vcombine.high %v616_v57, %v616_v57 }
  0xf7   :  { %v1487_v5 = vmul.f32 0.35355338, %v616_v57  ;;  %v1005_v6 = vcombine.high %v1003_v58, %v1003_v58  ;;  %v1026_v7 = vrot.slane %v1004_v59, %v25269_v22  ;;  %v586_v9 = vpop.f32.mrf.mxu0  ;;  %v25424_v10 = vpop.f32.mrf.mxu1  ;;  %v1019_v17 = vrot.slane %v1003_v58, %v25269_v22 }
  0xf8   :  { %v637_v11 = vrot.slane %v609_v1, %v25269_v22  ;;  %v640_v12 = vcombine.high %v630_v3, %v630_v3  ;;  %v1488_v15 = vmul.f32 0.35355338, %v630_v3  ;;  %v639_v18 = vcombine.high %v623_v2, %v623_v2 }
  0xf9   :  { %v1489_v19 = vmul.f32 0.35355338, %v638_v4  ;;  %v1033_v20 = vrot.slane %v1005_v6, %v25269_v22  ;;  %v1577_v21 = vcombine.low %v1012_v34, %v1026_v7  ;;  %v24138_v23 = vpop.f32.mrf.mxu1  ;;  %v24121_v24 = vpop.f32.mrf.mxu0  ;;  %v1491_v27 = vmul.f32 0.35355338, %v623_v2 }
  0xfa   :  { %v641_v25 = vcombine.high %v637_v11, %v637_v11  ;;  %v1490_v26 = vmul.f32 0.35355338, %v640_v12  ;;  %v1492_v28 = vmul.f32 0.35355338, %v637_v11  ;;  %v1514_v29 = vcombine.low %v1487_v5, %v1488_v15 }
  0xfb   :  { %v23254_v31 = vcombine.high %v1012_v34, %v1026_v7  ;;  %v1579_v32 = vcombine.low %v1019_v17, %v1033_v20  ;;  %v23255_v35 = vcombine.high %v1019_v17, %v1033_v20  ;;  %v1493_v40 = vmul.f32 0.35355338, %v639_v18 }
  0xfc   :  { %v1494_v36 = vmul.f32 0.35355338, %v641_v25  ;;  %v1515_v38 = vcombine.low %v1489_v19, %v1490_v26  ;;  %v1516_v41 = vcombine.low %v1491_v27, %v1492_v28  ;;  %v25431_v42 = vrot.slane %v1577_v21, %v25269_v22 }
  0xfd   :  { %v25435_v44 = vrot.slane %v1514_v29, %v25269_v22  ;;  %v25438_v45 = vrot.slane %v23254_v31, %v25269_v22  ;;  %v25441_v33 = vrot.slane %v1579_v32, %v25269_v22  ;;  %v642_v46 = vcombine.high %v582_v60, %v582_v60 }
  0xfe   :  { %v25444_v47 = vrot.slane %v23255_v35, %v25269_v22  ;;  %v649_v48 = vrot.slane %v582_v60, %v25269_v22  ;;  %v1038_v49 = vcombine.high %v978_v8, %v978_v8  ;;  %v1045_v50 = vrot.slane %v978_v8, %v25269_v22 }
  0xff   :  { %v1517_v51 = vcombine.low %v1493_v40, %v1494_v36  ;;  %v25449_v37 = vrot.slane %v1515_v38, %v25269_v22  ;;  %v656_v52 = vrot.slane %v642_v46, %v25269_v22  ;;  %v587_v53 = vadd.f32 %v586_v9, %v500_v39 }
 0x100   :  { %v25453_v54 = vrot.slane %v1516_v41, %v25269_v22  ;;  %v657_v55 = vcombine.high %v649_v48, %v649_v48  ;;  %v665_v30 = vrot.slane %v649_v48, %v25269_v22  ;;  %v1052_v56 = vrot.slane %v1038_v49, %v25269_v22 }
 0x101   :  { %v1609_v57 = vcombine.low %v25431_v42, %v25438_v45  ;;  %v658_v58 = vcombine.high %v656_v52, %v656_v52  ;;  %v672_v59 = vrot.slane %v656_v52, %v25269_v22  ;;  %v1053_v34 = vcombine.high %v1045_v50, %v1045_v50 }
 0x102   :  { %v679_v60 = vrot.slane %v657_v55, %v25269_v22  ;;  %v687_v61 = vcombine.high %v665_v30, %v665_v30  ;;  %v1061_v62 = vrot.slane %v1045_v50, %v25269_v22  ;;  %v697_v63 = vrot.slane %v587_v53, %v25269_v22 }
 0x103   :  { %v686_v1 = vrot.slane %v658_v58, %v25269_v22  ;;  %v688_v2 = vcombine.high %v672_v59, %v672_v59  ;;  %v1054_v3 = vcombine.high %v1052_v56, %v1052_v56  ;;  %v1068_v4 = vrot.slane %v1052_v56, %v25269_v22 }
 0x104   :  { %v689_v5 = vcombine.high %v679_v60, %v679_v60  ;;  %v1496_v6 = vmul.f32 0.35355338, %v679_v60  ;;  %v1497_v7 = vmul.f32 0.35355338, %v687_v61  ;;  %v1499_v8 = vmul.f32 0.35355338, %v672_v59 }
 0x105   :  { %v1495_v9 = vmul.f32 0.35355338, %v665_v30  ;;  %v1500_v11 = vmul.f32 0.35355338, %v686_v1  ;;  %v1501_v12 = vmul.f32 0.35355338, %v688_v2  ;;  %v1075_v15 = vrot.slane %v1053_v34, %v25269_v22 }
 0x106   :  { %v1498_v17 = vmul.f32 0.35355338, %v689_v5  ;;  %v1733_v18 = vcombine.low %v1496_v6, %v1497_v7  ;;  %v1083_v19 = vcombine.high %v1061_v62, %v1061_v62  ;;  %v983_v20 = vadd.f32 %v25424_v10, %v902_v43 }
 0x107   :  { %v1735_v21 = vcombine.low %v1500_v11, %v1501_v12  ;;  %v1082_v23 = vrot.slane %v1054_v3, %v25269_v22  ;;  %v1084_v24 = vcombine.high %v1068_v4, %v1068_v4  ;;  %v1085_v25 = vcombine.high %v1075_v15, %v1075_v15 }
 0x108   :  { %v1734_v26 = vcombine.low %v1498_v17, %v1499_v8  ;;  %v1632_v27 = vrot.slane %v1061_v62, %v25269_v22  ;;  %v1796_v28 = vcombine.low %v1075_v15, %v1083_v19  ;;  %v690_v29 = vcombine.high %v686_v1, %v686_v1 }
 0x109   :  { %v1545_v31 = vrot.slane %v1517_v51, %v25269_v22  ;;  %v1569_v32 = vrot.slane %v1495_v9, %v25269_v22  ;;  %v1797_v35 = vcombine.low %v1085_v25, %v1068_v4  ;;  %v705_v36 = vrot.slane %v697_v63, %v25269_v22 }
 0x10a   :  { %v1743_v38 = vrot.slane %v1733_v18, %v25269_v22  ;;  %v1798_v10 = vcombine.low %v1082_v23, %v1084_v24  ;;  %v698_v39 = vcombine.high %v697_v63, %v697_v63  ;;  %v1502_v40 = vmul.f32 0.35355338, %v690_v29  ;;  %v1109_v24 = vld [vmem:[%s29658_s7] sm:$0xff] }
 0x10b   :  { %v1750_v41 = vrot.slane %v1734_v26, %v25269_v22  ;;  %v1806_v42 = vrot.slane %v1796_v28, %v25269_v22  ;;  %v1503_v43 = vmul.f32 0.35355338, %v705_v36  ;;  %v1757_v45 = vrot.slane %v1735_v21, %v25269_v22  ;;  %v1111_v21 = vld [vmem:[%s29658_s7 + $0x10] sm:$0xff]  ;;  %v23248_v36 = vld [vmem:[%s29659_s8] ss:$0 sm:$0xff] }
 0x10c   :  { %v1086_v46 = vcombine.high %v1082_v23, %v1082_v23  ;;  %v1093_v48 = vrot.slane %v983_v20, %v25269_v22  ;;  %v1639_v49 = vrot.slane %v1632_v27, %v25269_v22  ;;  %v1610_v50 = vcombine.low %v25441_v33, %v25444_v47  ;;  %v1112_v20 = vld [vmem:[%s29658_s7 + $0x18] sm:$0xff]  ;;  %v1110_v23 = vld [vmem:[%s29658_s7 + $0x8] sm:$0xff] }
 0x10d   :  { %v1813_v51 = vrot.slane %v1797_v35, %v25269_v22  ;;  %v1736_v52 = vcombine.low %v1502_v40, %v1503_v43  ;;  %v1617_v53 = vrot.slane %v1609_v57, %v25269_v22  ;;  %v1546_v55 = vcombine.low %v25435_v44, %v25449_v37  ;;  %24140 = vmatpush3.msra.mxu0 %v1112_v20 }
 0x10e   :  { %v1094_v30 = vcombine.high %v1093_v48, %v1093_v48  ;;  %v1101_v56 = vrot.slane %v1093_v48, %v25269_v22  ;;  %24156 = vmatprep.subr.msk.mxu1 %vm1640_vm3, %v1639_v49  ;;  %v1624_v58 = vrot.slane %v1610_v50, %v25269_v22  ;;  %v1547_v59 = vcombine.low %v25453_v54, %v1545_v31 }
 0x10f   :  { %v712_v34 = vrot.slane %v698_v39, %v25269_v22  ;;  %v1764_v33 = vrot.slane %v1736_v52, %v25269_v22  ;;  %v1820_v47 = vrot.slane %v1798_v10, %v25269_v22  ;;  %24157 = vmatpush3.xpose.msk.msra.mxu1 %vm1640_vm3, %v1639_v49  ;;  %v1554_v57 = vrot.slane %v1546_v55, %v25269_v22 }
 0x110   :  { %v1108_v44 = vrot.slane %v1094_v30, %v25269_v22  ;;  %v1799_v37 = vcombine.low %v1086_v46, %v1101_v56  ;;  %v1625_v60 = vcombine.low %v1617_v53, %v1624_v58  ;;  %v1561_v61 = vrot.slane %v1547_v59, %v25269_v22  ;;  %24141 = vmatprep.subr.mxu0 %v25088_v0 }
 0x111   :  { %v1766_v62 = vcombine.low %v1757_v45, %v1764_v33  ;;  %v1765_v63 = vcombine.low %v1743_v38, %v1750_v41  ;;  %v1828_v3 = vcombine.low %v1806_v42, %v1813_v51  ;;  %v1576_v6 = vrot.slane %v1569_v32, %v25269_v22  ;;  %24142 = vmatpush3.msra.mxu0 %v1111_v21 }
 0x112   :  { %v1827_v54 = vrot.slane %v1799_v37, %v25269_v22  ;;  %v1851_v1 = vrot.slane %v1108_v44, %v25269_v22  ;;  %24158 = vmatprep.subr.msk.mxu1 %vm1640_vm3, %v1625_v60  ;;  %v1562_v2 = vcombine.low %v1554_v57, %v1561_v61  ;;  %v1504_v7 = vmul.f32 0.35355338, %v712_v34  ;;  %24143 = vmatprep.subr.mxu0 %v25088_v0 }
 0x113   :  { %24159 = vmatpush3.xpose.msk.msra.mxu1 %vm1640_vm3, %v1625_v60  ;;  %v1773_v4 = vrot.slane %v1765_v63, %v25269_v22  ;;  %v1780_v5 = vrot.slane %v1766_v62, %v25269_v22  ;;  %v1836_v12 = vrot.slane %v1828_v3, %v25269_v22  ;;  %24144 = vmatpush3.msra.mxu0 %v1110_v23 }
 0x114   :  { %v1829_v8 = vcombine.low %v1820_v47, %v1827_v54  ;;  %24160 = vmatprep.mubr.msk.f32.mxu1 %vm1640_vm3, %v1562_v2  ;;  %v1858_v9 = vrot.slane %v1851_v1, %v25269_v22  ;;  %v1788_v17 = vrot.slane %v1504_v7, %v25269_v22  ;;  %24145 = vmatprep.subr.mxu0 %v25088_v0 }
 0x115   :  { %v1781_v11 = vcombine.low %v1773_v4, %v1780_v5  ;;  %24146 = vmatpush3.msra.mxu0 %v1109_v24  ;;  %v1119_v38 = vcombine.high %v23248_v36, %v23248_v36  ;;  %v1126_v10 = vrot.slane %v23248_v36, %v25269_v22 }
 0x116   :  { %24163 = vmatprep.subr.msk.mxu1 %vm1640_vm3, %v1858_v9  ;;  %24161 = vmatmul.mubr.msk.f32.vlgmr.msra.gmra.mxu1 %vm1640_vm3, %v1576_v6  ;;  %v1843_v15 = vrot.slane %v1829_v8, %v25269_v22  ;;  %v1795_v19 = vrot.slane %v1788_v17, %v25269_v22 }
 0x117   :  { %24164 = vmatpush3.xpose.msk.msra.mxu1 %vm1640_vm3, %v1858_v9  ;;  %24167 = vmatprep.mubr.msk.f32.mxu1 %vm1640_vm3, %v1781_v11  ;;  %v1133_v39 = vrot.slane %v1119_v38, %v25269_v22  ;;  %v1134_v40 = vcombine.high %v1126_v10, %v1126_v10  ;;  %v25565_v42 = vrot.slane %v1126_v10, %v25269_v22 }
 0x118   :  { %v1844_v18 = vcombine.low %v1836_v12, %v1843_v15  ;;  %24148 = vmatmul.mubr.msk.f32.vlgmr.msra.gmra.mxu0 %vm79_vm1, %v25309_v13  ;;  %24184 = vmatprep.subr.mxu0 %v25088_v0 }
 0x119   :  { %24150 = vmatprep.mubr.msk.f32.mxu0 %vm25090_vm2, %v25088_v0  ;;  %v1135_v41 = vcombine.high %v1133_v39, %v1133_v39  ;;  %v1149_v43 = vrot.slane %v1133_v39, %v25269_v22  ;;  %v1156_v45 = vrot.slane %v1134_v40, %v25269_v22  ;;  %v1164_v46 = vcombine.high %v25565_v42, %v25565_v42 }
 0x11a   :  { %24165 = vmatprep.subr.msk.mxu1 %vm1640_vm3, %v1844_v18  ;;  %v1217_v51 = vcombine.low %v25565_v42, %v25565_v42 }
 0x11b   :  { %24166 = vmatpush3.xpose.msk.msra.mxu1 %vm1640_vm3, %v1844_v18  ;;  %v1165_v48 = vcombine.high %v1149_v43, %v1149_v43  ;;  %v1166_v49 = vcombine.high %v1156_v45, %v1156_v45  ;;  %v25572_v50 = vrot.slane %v1135_v41, %v25269_v22  ;;  %v1218_v52 = vcombine.low %v1156_v45, %v1164_v46 }
 0x11c   :  { %24151 = vmatmul.mubr.msk.f32.gmra.mxu0 %vm79_vm1, %v25315_v14  ;;  %v1227_v30 = vrot.slane %v1217_v51, %v25269_v22  ;;  %v1168_v12 = vcombine.low %v25565_v42, %v1156_v45  ;;  %v23249_v15 = vcombine.high %v25565_v42, %v1156_v45 }
 0x11d   :  { %24153 = vmatprep.mubr.msk.f32.mxu0 %vm25090_vm2, %v25088_v0  ;;  %v1219_v53 = vcombine.low %v1166_v49, %v1149_v43  ;;  %v1220_v55 = vcombine.low %v25572_v50, %v1165_v48  ;;  %v1234_v56 = vrot.slane %v1218_v52, %v25269_v22  ;;  %v1170_v17 = vcombine.low %v1149_v43, %v25572_v50 }
 0x11e   :  { %24168 = vmatmul.mubr.msk.f32.vlgmr.msra.gmra.mxu1 %vm1640_vm3, %v1795_v19  ;;  %v23250_v18 = vcombine.high %v1149_v43, %v25572_v50  ;;  %v1178_v19 = vrot.slane %v1168_v12, %v25269_v22  ;;  %v1185_v20 = vrot.slane %v23249_v15, %v25269_v22 }
 0x11f   :  { %v1241_v58 = vrot.slane %v1219_v53, %v25269_v22  ;;  %v1248_v59 = vrot.slane %v1220_v55, %v25269_v22  ;;  %v1249_v34 = vcombine.low %v1227_v30, %v1234_v56  ;;  %v1192_v21 = vrot.slane %v1170_v17, %v25269_v22 }
 0x120   :  { %24154 = vmatmul.mubr.msk.f32.gmra.mxu0 %vm79_vm1, %v25327_v16  ;;  %v1199_v23 = vrot.slane %v23250_v18, %v25269_v22 }
 0x121   :  { %24192 = vmatprep.mubr.msk.f32.mxu0 %vm25090_vm2, %v25088_v0  ;;  %v1250_v33 = vcombine.low %v1241_v58, %v1248_v59  ;;  %v1257_v47 = vrot.slane %v1249_v34, %v25269_v22 }
 0x123   :  { %v1264_v57 = vrot.slane %v1250_v33, %v25269_v22 }
 0x125   :  { %v1265_v37 = vcombine.low %v1257_v47, %v1264_v57  ;;  %v1167_v57 = vcombine.high %v25572_v50, %v25572_v50 }
 0x1d6   :  { %v25543_v25 = vpop.f32.mrf.mxu1 }
 0x1d7   :  { %v1947_v28 = vsel %vm1946_vm5, %v25543_v25, -inf }
 0x1d8   :  { %v25545_v26 = vpop.f32.mrf.mxu1  ;;  %v1350_v44 = vpop.f32.mrf.mxu0 }
 0x1d9   :  { %v1943_v27 = vsel %vm1942_vm4, %v25545_v26, -inf }
 0x1da   :  { %1944 = vmax.xlane.f32.xlu0 %v1943_v27  ;;  %v24149_v60 = vpop.f32.mrf.mxu0 }
 0x1dc   :  { %v1355_v61 = vpop.f32.mrf.mxu0 }
 0x1dd   :  { %v1356_v62 = vadd.f32 %v1355_v61, %v1265_v37 }
 0x1de   :  { %v25551_v29 = vpop.f32.mrf.mxu1  ;;  %1948 = vmax.xlane.f32.xlu0 %v1947_v28  ;;  %v24152_v63 = vpop.f32.mrf.mxu0  ;;  %v1200_v28 = vcombine.low %v1178_v19, %v1185_v20 }
 0x1df   :  { %v1953_v35 = vsel %vm1946_vm5, %v25551_v29, -inf  ;;  %v1416_v54 = vcombine.high %v1356_v62, %v1356_v62  ;;  %v1423_v1 = vrot.slane %v1356_v62, %v25269_v22  ;;  %v1266_v63 = vcombine.low %v1167_v57, %v25565_v42 }
 0x1e0   :  { %v25553_v31 = vpop.f32.mrf.mxu1  ;;  %v1208_v10 = vrot.slane %v1200_v28, %v25269_v22 }
 0x1e1   :  { %v1950_v32 = vsel %vm1942_vm4, %v25553_v31, -inf  ;;  %v1431_v2 = vcombine.high %v1423_v1, %v1423_v1  ;;  %v25585_v3 = vrot.slane %v1423_v1, %v25269_v22  ;;  %v25588_v4 = vrot.slane %v1416_v54, %v25269_v22 }
 0x1e2   :  { %1951 = vmax.xlane.f32.xlu1 %v1950_v32  ;;  %v1201_v32 = vcombine.low %v1192_v21, %v1199_v23 }
 0x1e3   :  { %v1453_v5 = vrot.slane %v1431_v2, %v25269_v22  ;;  %v1461_v6 = vcombine.high %v25585_v3, %v25585_v3  ;;  %v25595_v7 = vrot.slane %v25588_v4, %v25269_v22  ;;  %v1432_v62 = vcombine.high %v25588_v4, %v25588_v4 }
 0x1e4   :  { %v1215_v39 = vrot.slane %v1201_v32, %v25269_v22  ;;  %v1273_v2 = vrot.slane %v1266_v63, %v25269_v22  ;;  %v2043_v19 = vrot.slane %v25585_v3, %v25269_v22 }
 0x1e5   :  { %v1463_v8 = vcombine.high %v1453_v5, %v1453_v5  ;;  %v25597_v9 = vcombine.low %v1453_v5, %v1461_v6  ;;  %v1360_v6 = vpop.f32.mrf.mxu0  ;;  %v1462_v42 = vcombine.high %v25595_v7, %v25595_v7 }
 0x1e6   :  { %1954 = vmax.xlane.f32.xlu1 %v1953_v35  ;;  %v1216_v45 = vcombine.low %v1208_v10, %v1215_v39  ;;  %v1280_v12 = vrot.slane %v1273_v2, %v25269_v22 }
 0x1e7   :  { %v25600_v11 = vcombine.low %v1463_v8, %v25595_v7  ;;  %v1460_v8 = vrot.slane %v1432_v62, %v25269_v22  ;;  %v24155_v18 = vpop.f32.mrf.mxu0 }
 0x1e8   :  { %v1351_v49 = vadd.f32 %v1350_v44, %v1216_v45  ;;  %v1361_v4 = vadd.f32 %v1360_v6, %v1280_v12  ;;  %v2146_v45 = vrot.slane %v25597_v9, %v25269_v22  ;;  %v23275_v9 = vld [vmem:[%s29683_s26 + $0x38] sm:$0xff] }
 0x1e9   :  { %v1464_v23 = vcombine.high %v1460_v8, %v1460_v8  ;;  %v2138_v32 = vcombine.low %v1460_v8, %v1462_v42  ;;  %24185 = vmatpush3.msra.mxu0 %v23275_v9 }
 0x1ea   :  { %v1374_v55 = vrot.slane %v1351_v49, %v25269_v22  ;;  %24186 = vmatprep.subr.mxu0 %v25088_v0 }
 0x1ec   :  { %v1390_v33 = vrot.slane %v1374_v55, %v25269_v22 }
 0x263   :  { %v1945_v24 = vpop.xlane.xlu0 %1944 }
 0x264   :  { %v1956_v27 = vsub.f32 %v25545_v26, %v1945_v24  ;;  %v1471_v24 = vrot.slane %v1361_v4, %v25269_v22 }
 0x266   :  { %v1960_v35 = vmul.f32 1.442695, %v1956_v27 }
 0x267   :  { %v1949_v36 = vpop.xlane.xlu0 %1948 }
 0x268   :  { %24914 = vpow2.f32 %v1960_v35  ;;  %v1957_v38 = vsub.f32 %v25543_v25, %v1949_v36  ;;  %v1367_v25 = vcombine.high %v1351_v49, %v1351_v49  ;;  %v1472_v35 = vcombine.high %v1471_v24, %v1471_v24 }
 0x269   :  { %v1479_v36 = vrot.slane %v1471_v24, %v25269_v22 }
 0x26a   :  { %v1962_v40 = vmul.f32 1.442695, %v1957_v38  ;;  %v2050_v38 = vrot.slane %v2043_v19, %v25269_v22  ;;  %v1486_v10 = vrot.slane %v1472_v35, %v25269_v22 }
 0x26b   :  { %v1952_v41 = vpop.xlane.xlu1 %1951  ;;  %v2139_v39 = vcombine.low %v1464_v23, %v1479_v36 }
 0x26c   :  { %24916 = vpow2.f32 %v1962_v40  ;;  %v1958_v43 = vsub.f32 %v25553_v31, %v1952_v41  ;;  %v1381_v31 = vrot.slane %v1367_v25, %v25269_v22  ;;  %24170 = vmatprep.subr.msk.mxu1 %vm2058_vm6, %v2050_v38 }
 0x26d   :  { %v2167_v41 = vrot.slane %v2139_v39, %v25269_v22  ;;  %24171 = vmatpush3.msk.msra.mxu1 %vm2058_vm6, %v2050_v38 }
 0x26e   :  { %v1964_v46 = vmul.f32 1.442695, %v1958_v43  ;;  %v1383_v59 = vcombine.high %v1381_v31, %v1381_v31  ;;  %v1397_v37 = vrot.slane %v1381_v31, %v25269_v22  ;;  %v2191_v43 = vrot.slane %v1486_v10, %v25269_v22  ;;  %v23273_v31 = vld [vmem:[%s29683_s26 + $0x28] sm:$0xff] }
 0x26f   :  { %v1955_v48 = vpop.xlane.xlu1 %1954 }
 0x270   :  { %24918 = vpow2.f32 %v1964_v46  ;;  %v1959_v26 = vsub.f32 %v25551_v29, %v1955_v48  ;;  %v1382_v29 = vcombine.high %v1374_v55, %v1374_v55  ;;  %v1411_v60 = vrot.slane %v1383_v59, %v25269_v22 }
 0x271   :  { %v2153_v46 = vrot.slane %v25600_v11, %v25269_v22  ;;  %v2160_v48 = vrot.slane %v2138_v32, %v25269_v22  ;;  %v23274_v11 = vld [vmem:[%s29683_s26 + $0x30] sm:$0xff] }
 0x272   :  { %v1966_v51 = vmul.f32 1.442695, %v1959_v26  ;;  %v1404_v47 = vrot.slane %v1382_v29, %v25269_v22  ;;  %v1990_v50 = vcombine.low %v1397_v37, %v1411_v60  ;;  %v23265_v5 = vcombine.high %v1397_v37, %v1411_v60  ;;  %24187 = vmatpush3.msra.mxu0 %v23274_v11 }
 0x273   :  { %v2198_v26 = vrot.slane %v2191_v43, %v25269_v22  ;;  %v2168_v49 = vcombine.low %v2146_v45, %v2153_v46  ;;  %24188 = vmatprep.subr.mxu0 %v25088_v0 }
 0x274   :  { %24920 = vpow2.f32 %v1966_v51  ;;  %v1988_v54 = vcombine.low %v1390_v33, %v1404_v47  ;;  %v23264_v1 = vcombine.high %v1390_v33, %v1404_v47  ;;  %v2012_v20 = vrot.slane %v1990_v50, %v25269_v22  ;;  %24189 = vmatpush3.msra.mxu0 %v23273_v31 }
 0x275   :  { %v25616_v52 = vpop.eup %24914  ;;  %v2019_v21 = vrot.slane %v23265_v5, %v25269_v22  ;;  %v2169_v51 = vcombine.low %v2160_v48, %v2167_v41  ;;  %v2176_v25 = vrot.slane %v2168_v49, %v25269_v22  ;;  %24190 = vmatprep.subr.mxu0 %v25088_v0 }
 0x276   :  { %v1968_v53 = vsel %vm1942_vm4, %v25616_v52, 0.0  ;;  %v1998_v15 = vrot.slane %v1988_v54, %v25269_v22  ;;  %v2005_v17 = vrot.slane %v23264_v1, %v25269_v22  ;;  %v23285_v54 = vld [vmem:[%s29684_s28 + $0x30] sm:$0xff]  ;;  %v23277_v1 = vld [vmem:[%s29656_s4 + $0x1] ss:$0 sm:$0xff] }
 0x277   :  { %1969 = vadd.xlane.f32.xlu0 %v1968_v53  ;;  %v2021_v28 = vcombine.low %v2012_v20, %v2019_v21  ;;  %v2183_v53 = vrot.slane %v2169_v51, %v25269_v22  ;;  %v2296_v2 = vcombine.high %v23277_v1, %v23277_v1  ;;  %v2303_v50 = vrot.slane %v23277_v1, %v25269_v22 }
 0x278   :  { %v2020_v27 = vcombine.low %v1998_v15, %v2005_v17 }
 0x279   :  { %v25621_v30 = vpop.eup %24916  ;;  %v2035_v3 = vrot.slane %v2021_v28, %v25269_v22  ;;  %v2184_v55 = vcombine.low %v2176_v25, %v2183_v53  ;;  %v2310_v5 = vrot.slane %v2296_v2, %v25269_v22  ;;  %v2311_v6 = vcombine.high %v2303_v50, %v2303_v50 }
 0x27a   :  { %v1971_v56 = vsel %vm1946_vm5, %v25621_v30, 0.0  ;;  %v2028_v7 = vrot.slane %v2020_v27, %v25269_v22  ;;  %v25744_v12 = vrot.slane %v2303_v50, %v25269_v22 }
 0x27b   :  { %1972 = vadd.xlane.f32.xlu1 %v1971_v56  ;;  %v23272_v56 = vld [vmem:[%s29683_s26 + $0x20] sm:$0xff]  ;;  %v2312_v8 = vcombine.high %v2310_v5, %v2310_v5  ;;  %v2326_v15 = vrot.slane %v2310_v5, %v25269_v22  ;;  %v2333_v17 = vrot.slane %v2311_v6, %v25269_v22 }
 0x27c   :  { %v2036_v40 = vcombine.low %v2028_v7, %v2035_v3  ;;  %24191 = vmatpush3.msra.mxu0 %v23272_v56  ;;  %v2341_v7 = vcombine.high %v25744_v12, %v25744_v12  ;;  %v2394_v41 = vcombine.low %v25744_v12, %v25744_v12 }
 0x27d   :  { %v25626_v58 = vpop.eup %24918  ;;  %24193 = vmatmul.mubr.msk.f32.vlgmr.msra.gmra.mxu0 %vm79_vm1, %v25309_v13  ;;  %24218 = vmatprep.subr.mxu0 %v25088_v0  ;;  %v25749_v18 = vrot.slane %v2312_v8, %v25269_v22  ;;  %v2345_v42 = vcombine.low %v25744_v12, %v2333_v17  ;;  %v23278_v4 = vcombine.high %v25744_v12, %v2333_v17 }
 0x27e   :  { %v1974_v34 = vsel %vm1942_vm4, %v25626_v58, 0.0  ;;  %24172 = vmatprep.subr.mxu1 %v2036_v40  ;;  %24195 = vmatprep.mubr.msk.f32.mxu0 %vm25090_vm2, %v25088_v0  ;;  %v2342_v3 = vcombine.high %v2326_v15, %v2326_v15  ;;  %v2343_v10 = vcombine.high %v2333_v17, %v2333_v17  ;;  %v2395_v43 = vcombine.low %v2333_v17, %v2341_v7 }
 0x27f   :  { %1975 = vadd.xlane.f32.xlu0 %v1974_v34  ;;  %24173 = vmatpush3.msra.mxu1 %v2036_v40  ;;  %v2347_v19 = vcombine.low %v2326_v15, %v25749_v18  ;;  %v23279_v20 = vcombine.high %v2326_v15, %v25749_v18  ;;  %v2355_v21 = vrot.slane %v2345_v42, %v25269_v22 }
 0x280   :  { %24177 = vmatprep.subr.msk.mxu1 %vm2058_vm6, %v2198_v26  ;;  %v2362_v23 = vrot.slane %v23278_v4, %v25269_v22  ;;  %v2396_v45 = vcombine.low %v2343_v10, %v2326_v15  ;;  %v2397_v48 = vcombine.low %v25749_v18, %v2342_v3  ;;  %v2404_v49 = vrot.slane %v2394_v41, %v25269_v22 }
 0x281   :  { %v25634_v44 = vpop.eup %24920  ;;  %24196 = vmatmul.mubr.msk.f32.gmra.mxu0 %vm79_vm1, %v25315_v14  ;;  %v2369_v24 = vrot.slane %v2347_v19, %v25269_v22  ;;  %v2376_v27 = vrot.slane %v23279_v20, %v25269_v22  ;;  %v2411_v51 = vrot.slane %v2395_v43, %v25269_v22 }
 0x282   :  { %v1977_v61 = vsel %vm1946_vm5, %v25634_v44, 0.0  ;;  %24198 = vmatprep.mubr.msk.f32.mxu0 %vm25090_vm2, %v25088_v0  ;;  %v2377_v28 = vcombine.low %v2355_v21, %v2362_v23  ;;  %v2418_v25 = vrot.slane %v2396_v45, %v25269_v22 }
 0x283   :  { %1978 = vadd.xlane.f32.xlu1 %v1977_v61  ;;  %v2378_v32 = vcombine.low %v2369_v24, %v2376_v27  ;;  %v2426_v11 = vcombine.low %v2404_v49, %v2411_v51 }
 0x284   :  { %v2385_v35 = vrot.slane %v2377_v28, %v25269_v22  ;;  %v2344_v28 = vcombine.high %v25749_v18, %v25749_v18 }
 0x285   :  { %24199 = vmatmul.mubr.msk.f32.gmra.mxu0 %vm79_vm1, %v25327_v16  ;;  %v2392_v36 = vrot.slane %v2378_v32, %v25269_v22 }
 0x286   :  { %24226 = vmatprep.mubr.msk.f32.mxu0 %vm25090_vm2, %v25088_v0  ;;  %v2443_v10 = vcombine.low %v2344_v28, %v25744_v12 }
 0x287   :  { %v2393_v38 = vcombine.low %v2385_v35, %v2392_v36 }
 0x300   :  { %v1970_v29 = vpop.xlane.xlu0 %1969 }
 0x301   :  { %24922 = vrcp.f32 %v1970_v29 }
 0x304   :  { %v1973_v59 = vpop.xlane.xlu1 %1972 }
 0x305   :  { %24924 = vrcp.f32 %v1973_v59 }
 0x308   :  { %v1976_v34 = vpop.xlane.xlu0 %1975 }
 0x309   :  { %24926 = vrcp.f32 %v1976_v34 }
 0x30c   :  { %v1979_v33 = vpop.xlane.xlu1 %1978 }
 0x30d   :  { %24928 = vrcp.f32 %v1979_v33  ;;  %v2434_v33 = vrot.slane %v2426_v11, %v25269_v22 }
 0x30e   :  { %v24923_v47 = vpop.eup %24922 }
 0x30f   :  { %v1984_v57 = vmul.f32 %v24923_v47, %v25616_v52 }
 0x311   :  { %24174 = vmatprep.mubr.msk.f32.mxu1 %vm1942_vm4, %v1984_v57 }
 0x312   :  { %v24925_v37 = vpop.eup %24924 }
 0x313   :  { %v1985_v60 = vmul.f32 %v24925_v37, %v25621_v30  ;;  %v23286_v30 = vld [vmem:[%s29684_s28 + $0x38] sm:$0xff] }
 0x315   :  { %24175 = vmatmul.mubr.msk.f32.vlgmr.msra.gmra.mxu1 %vm1942_vm4, %v1985_v60 }
 0x316   :  { %v24927_v61 = vpop.eup %24926  ;;  %24178 = vmatpush3.msk.msra.mxu1 %vm2058_vm6, %v2198_v26 }
 0x317   :  { %24179 = vmatprep.subr.mxu1 %v2184_v55  ;;  %v1986_v62 = vmul.f32 %v24927_v61, %v25626_v58  ;;  %v23284_v58 = vld [vmem:[%s29684_s28 + $0x28] sm:$0xff] }
 0x318   :  { %24180 = vmatpush3.msra.mxu1 %v2184_v55  ;;  %v2425_v55 = vrot.slane %v2397_v48, %v25269_v22 }
 0x319   :  { %24181 = vmatprep.mubr.msk.f32.mxu1 %vm1942_vm4, %v1986_v62  ;;  %24201 = vmatprep.subr.mxu1 %v25088_v0 }
 0x31a   :  { %v24929_v63 = vpop.eup %24928  ;;  %v2427_v29 = vcombine.low %v2418_v25, %v2425_v55  ;;  %v2450_v25 = vrot.slane %v2443_v10, %v25269_v22 }
 0x31b   :  { %v1987_v52 = vmul.f32 %v24929_v63, %v25634_v44  ;;  %v23283_v44 = vld [vmem:[%s29684_s28 + $0x20] sm:$0xff] }
 0x31c   :  { %v2441_v37 = vrot.slane %v2427_v29, %v25269_v22  ;;  %v2457_v12 = vrot.slane %v2450_v25, %v25269_v22 }
 0x31d   :  { %24182 = vmatmul.mubr.msk.f32.vlgmr.msra.gmra.mxu1 %vm1942_vm4, %v1987_v52 }
 0x31e   :  { %24202 = vmatpush3.msra.mxu1 %v23286_v30  ;;  %24209 = vmatprep.mubr.msk.f32.mxu1 %vm25090_vm2, %v25088_v0  ;;  %v2442_v52 = vcombine.low %v2434_v33, %v2441_v37 }
 0x31f   :  { %24203 = vmatprep.subr.mxu1 %v25088_v0 }
 0x320   :  { %24204 = vmatpush3.msra.mxu1 %v23285_v54 }
 0x321   :  { %24205 = vmatprep.subr.mxu1 %v25088_v0 }
 0x322   :  { %24206 = vmatpush3.msra.mxu1 %v23284_v58 }
 0x323   :  { %24207 = vmatprep.subr.mxu1 %v25088_v0 }
 0x324   :  { %24208 = vmatpush3.msra.mxu1 %v23283_v44 }
 0x325   :  { %24210 = vmatmul.mubr.msk.f32.vlgmr.msra.gmra.mxu1 %vm79_vm1, %v25309_v13 }
 0x326   :  { %24212 = vmatprep.mubr.msk.f32.mxu1 %vm25090_vm2, %v25088_v0 }
 0x329   :  { %24213 = vmatmul.mubr.msk.f32.gmra.mxu1 %vm79_vm1, %v25315_v14 }
 0x32a   :  { %24215 = vmatprep.mubr.msk.f32.mxu1 %vm25090_vm2, %v25088_v0 }
 0x32d   :  { %24216 = vmatmul.mubr.msk.f32.gmra.mxu1 %vm79_vm1, %v25327_v16 }
 0x33d   :  { %v2527_v39 = vpop.f32.mrf.mxu0 }
 0x33e   :  { %v2528_v40 = vadd.f32 %v2527_v39, %v2393_v38 }
 0x33f   :  { %v24194_v46 = vpop.f32.mrf.mxu0 }
 0x340   :  { %v2544_v26 = vcombine.high %v2528_v40, %v2528_v40  ;;  %v2551_v53 = vrot.slane %v2528_v40, %v25269_v22 }
 0x341   :  { %v2532_v62 = vpop.f32.mrf.mxu0 }
 0x342   :  { %v2558_v9 = vrot.slane %v2544_v26, %v25269_v22  ;;  %v2559_v31 = vcombine.high %v2551_v53, %v2551_v53  ;;  %v2567_v56 = vrot.slane %v2551_v53, %v25269_v22  ;;  %v2533_v6 = vadd.f32 %v2532_v62, %v2442_v52 }
 0x343   :  { %v24197_v1 = vpop.f32.mrf.mxu0 }
 0x344   :  { %v2560_v59 = vcombine.high %v2558_v9, %v2558_v9  ;;  %v2574_v34 = vrot.slane %v2558_v9, %v25269_v22  ;;  %v2581_v47 = vrot.slane %v2559_v31, %v25269_v22  ;;  %v2589_v57 = vcombine.high %v2567_v56, %v2567_v56 }
 0x345   :  { %v3442_v54 = vmul.f32 0.35355338, %v2567_v56  ;;  %v2593_v17 = vcombine.high %v2533_v6, %v2533_v6  ;;  %v2600_v42 = vrot.slane %v2533_v6, %v25269_v22  ;;  %v2537_v19 = vpop.f32.mrf.mxu0  ;;  %v23288_v6 = vld [vmem:[%s29657_s6 + $0x1] ss:$0 sm:$0xff] }
 0x346   :  { %v2588_v60 = vrot.slane %v2560_v59, %v25269_v22  ;;  %v2590_v61 = vcombine.high %v2574_v34, %v2574_v34  ;;  %v2591_v63 = vcombine.high %v2581_v47, %v2581_v47  ;;  %v3443_v58 = vmul.f32 0.35355338, %v2581_v47 }
 0x347   :  { %v3446_v44 = vmul.f32 0.35355338, %v2574_v34  ;;  %v3444_v2 = vmul.f32 0.35355338, %v2589_v57  ;;  %v2607_v23 = vrot.slane %v2593_v17, %v25269_v22  ;;  %v2608_v24 = vcombine.high %v2600_v42, %v2600_v42  ;;  %v24200_v32 = vpop.f32.mrf.mxu0 }
 0x348   :  { %v2592_v30 = vcombine.high %v2588_v60, %v2588_v60  ;;  %v3445_v50 = vmul.f32 0.35355338, %v2591_v63  ;;  %v3447_v5 = vmul.f32 0.35355338, %v2588_v60  ;;  %v3448_v8 = vmul.f32 0.35355338, %v2590_v61 }
 0x349   :  { %v3469_v4 = vcombine.low %v3442_v54, %v3443_v58  ;;  %v2609_v35 = vcombine.high %v2607_v23, %v2607_v23  ;;  %v25783_v36 = vrot.slane %v2600_v42, %v25269_v22  ;;  %v2623_v38 = vrot.slane %v2607_v23, %v25269_v22 }
 0x34a   :  { %v3449_v15 = vmul.f32 0.35355338, %v2592_v30  ;;  %v3470_v20 = vcombine.low %v3444_v2, %v3445_v50  ;;  %v3471_v21 = vcombine.low %v3446_v44, %v3447_v5  ;;  %v2630_v7 = vrot.slane %v2608_v24, %v25269_v22 }
 0x34b   :  { %v3479_v3 = vrot.slane %v3469_v4, %v25269_v22  ;;  %v2638_v18 = vcombine.high %v25783_v36, %v25783_v36  ;;  %v2637_v45 = vrot.slane %v2609_v35, %v25269_v22  ;;  %v2639_v46 = vcombine.high %v2623_v38, %v2623_v38 }
 0x34c   :  { %v3472_v27 = vcombine.low %v3448_v8, %v3449_v15  ;;  %v3486_v39 = vrot.slane %v3470_v20, %v25269_v22  ;;  %v3493_v40 = vrot.slane %v3471_v21, %v25269_v22  ;;  %v2640_v41 = vcombine.high %v2630_v7, %v2630_v7 }
 0x34d   :  { %v3451_v48 = vmul.f32 0.35355338, %v2630_v7  ;;  %v3452_v26 = vmul.f32 0.35355338, %v2638_v18  ;;  %v3454_v51 = vmul.f32 0.35355338, %v2623_v38  ;;  %v2641_v11 = vcombine.high %v2637_v45, %v2637_v45 }
 0x34e   :  { %v3500_v43 = vrot.slane %v3472_v27, %v25269_v22  ;;  %v3453_v49 = vmul.f32 0.35355338, %v2640_v41  ;;  %v3501_v53 = vcombine.low %v3479_v3, %v3486_v39  ;;  %v3455_v55 = vmul.f32 0.35355338, %v2637_v45 }
 0x34f   :  { %v3456_v9 = vmul.f32 0.35355338, %v2639_v46  ;;  %v3687_v31 = vcombine.low %v3451_v48, %v3452_v26  ;;  %v2538_v29 = vadd.f32 %v2537_v19, %v2457_v12  ;;  %v3457_v37 = vmul.f32 0.35355338, %v2641_v11 }
 0x350   :  { %v3688_v56 = vcombine.low %v3453_v49, %v3454_v51  ;;  %v3502_v59 = vcombine.low %v3493_v40, %v3500_v43  ;;  %v3509_v34 = vrot.slane %v3501_v53, %v25269_v22  ;;  %v2694_v8 = vcombine.high %v23288_v6, %v23288_v6 }
 0x351   :  { %v25799_v33 = vrot.slane %v2538_v29, %v25269_v22  ;;  %v3689_v57 = vcombine.low %v3455_v55, %v3456_v9  ;;  %v3697_v60 = vrot.slane %v3687_v31, %v25269_v22  ;;  %v2701_v15 = vrot.slane %v23288_v6, %v25269_v22 }
 0x352   :  { %v3516_v47 = vrot.slane %v3502_v59, %v25269_v22  ;;  %v3704_v61 = vrot.slane %v3688_v56, %v25269_v22  ;;  %v2708_v17 = vrot.slane %v2694_v8, %v25269_v22 }
 0x353   :  { %v2656_v62 = vrot.slane %v25799_v33, %v25269_v22  ;;  %v3711_v54 = vrot.slane %v3689_v57, %v25269_v22  ;;  %v2709_v42 = vcombine.high %v2701_v15, %v2701_v15  ;;  %v2717_v19 = vrot.slane %v2701_v15, %v25269_v22 }
 0x354   :  { %v3517_v63 = vcombine.low %v3509_v34, %v3516_v47  ;;  %v3719_v58 = vcombine.low %v3697_v60, %v3704_v61  ;;  %v2710_v4 = vcombine.high %v2708_v17, %v2708_v17  ;;  %v2724_v20 = vrot.slane %v2708_v17, %v25269_v22 }
 0x355   :  { %v3458_v52 = vmul.f32 0.35355338, %v2656_v62  ;;  %v2731_v21 = vrot.slane %v2709_v42, %v25269_v22  ;;  %v2739_v35 = vcombine.high %v2717_v19, %v2717_v19  ;;  %v2792_v18 = vcombine.low %v2717_v19, %v2717_v19 }
 0x356   :  { %24239 = vmatprep.mubr.msk.f32.mxu1 %vm1640_vm3, %v3517_v63  ;;  %v25810_v2 = vrot.slane %v3719_v58, %v25269_v22  ;;  %v2738_v23 = vrot.slane %v2710_v4, %v25269_v22  ;;  %v2740_v38 = vcombine.high %v2724_v20, %v2724_v20 }
 0x357   :  { %v3690_v30 = vcombine.low %v3457_v37, %v3458_v52  ;;  %v2743_v24 = vcombine.low %v2717_v19, %v2731_v21  ;;  %v23289_v27 = vcombine.high %v2717_v19, %v2731_v21  ;;  %v2741_v7 = vcombine.high %v2731_v21, %v2731_v21 }
 0x358   :  { %v2745_v28 = vcombine.low %v2724_v20, %v2738_v23  ;;  %v23290_v32 = vcombine.high %v2724_v20, %v2738_v23  ;;  %v2793_v41 = vcombine.low %v2731_v21, %v2739_v35  ;;  %v2795_v45 = vcombine.low %v2738_v23, %v2740_v38 }
 0x359   :  { %v3718_v44 = vrot.slane %v3690_v30, %v25269_v22  ;;  %v2753_v3 = vrot.slane %v2743_v24, %v25269_v22  ;;  %v2760_v10 = vrot.slane %v23289_v27, %v25269_v22  ;;  %v2794_v43 = vcombine.low %v2741_v7, %v2724_v20 }
 0x35a   :  { %v2767_v39 = vrot.slane %v2745_v28, %v25269_v22  ;;  %v2774_v40 = vrot.slane %v23290_v32, %v25269_v22  ;;  %v2802_v49 = vrot.slane %v2792_v18, %v25269_v22  ;;  %v2809_v51 = vrot.slane %v2793_v41, %v25269_v22 }
 0x35b   :  { %v3720_v1 = vcombine.low %v3711_v54, %v3718_v44  ;;  %v2775_v48 = vcombine.low %v2753_v3, %v2760_v10  ;;  %v2816_v25 = vrot.slane %v2794_v43, %v25269_v22  ;;  %v2823_v12 = vrot.slane %v2795_v45, %v25269_v22 }
 0x35c   :  { %v2776_v26 = vcombine.low %v2767_v39, %v2774_v40  ;;  %v2824_v11 = vcombine.low %v2802_v49, %v2809_v51  ;;  %v2742_v29 = vcombine.high %v2738_v23, %v2738_v23  ;;  %v3450_v21 = vmul.f32 0.35355338, %v25783_v36 }
 0x35d   :  { %v25813_v50 = vrot.slane %v3720_v1, %v25269_v22  ;;  %v2783_v55 = vrot.slane %v2775_v48, %v25269_v22  ;;  %v2825_v31 = vcombine.low %v2816_v25, %v2823_v12  ;;  %v2649_v3 = vcombine.high %v25799_v33, %v25799_v33 }
 0x35e   :  { %v2790_v9 = vrot.slane %v2776_v26, %v25269_v22  ;;  %v2832_v34 = vrot.slane %v2824_v11, %v25269_v22  ;;  %v2841_v37 = vcombine.low %v2742_v29, %v2717_v19 }
 0x35f   :  { %v3735_v5 = vcombine.low %v25810_v2, %v25813_v50  ;;  %v2839_v47 = vrot.slane %v2825_v31, %v25269_v22  ;;  %v23296_v2 = vld [vmem:[%s29658_s7 + $0x30] sm:$0xff]  ;;  %v23295_v50 = vld [vmem:[%s29658_s7 + $0x28] sm:$0xff] }
 0x360   :  { %v2791_v59 = vcombine.low %v2783_v55, %v2790_v9  ;;  %v2848_v52 = vrot.slane %v2841_v37, %v25269_v22 }
 0x361   :  { %v2840_v62 = vcombine.low %v2832_v34, %v2839_v47 }
 0x362   :  { %v2855_v15 = vrot.slane %v2848_v52, %v25269_v22 }
 0x3d5   :  { %v25830_v46 = vpop.f32.mrf.mxu1 }
 0x3d7   :  { %v25836_v53 = vpop.f32.mrf.mxu1 }
 0x3dd   :  { %v25840_v56 = vpop.f32.mrf.mxu1 }
 0x3df   :  { %v25844_v57 = vpop.f32.mrf.mxu1 }
 0x3e5   :  { %v2925_v60 = vpop.f32.mrf.mxu1 }
 0x3e6   :  { %v2926_v61 = vadd.f32 %v2925_v60, %v2791_v59 }
 0x3e7   :  { %v24211_v63 = vpop.f32.mrf.mxu1 }
 0x3e8   :  { %v2942_v30 = vcombine.high %v2926_v61, %v2926_v61  ;;  %v2949_v54 = vrot.slane %v2926_v61, %v25269_v22 }
 0x3e9   :  { %v2930_v58 = vpop.f32.mrf.mxu1 }
 0x3ea   :  { %v2956_v44 = vrot.slane %v2942_v30, %v25269_v22  ;;  %v2957_v1 = vcombine.high %v2949_v54, %v2949_v54  ;;  %v2931_v6 = vadd.f32 %v2930_v58, %v2840_v62  ;;  %v2965_v42 = vrot.slane %v2949_v54, %v25269_v22 }
 0x3eb   :  { %v24214_v8 = vpop.f32.mrf.mxu1  ;;  %v3524_v30 = vrot.slane %v3450_v21, %v25269_v22  ;;  %v2663_v58 = vrot.slane %v2649_v3, %v25269_v22 }
 0x3ec   :  { %v2958_v17 = vcombine.high %v2956_v44, %v2956_v44  ;;  %v2979_v4 = vrot.slane %v2957_v1, %v25269_v22  ;;  %v2991_v19 = vcombine.high %v2931_v6, %v2931_v6  ;;  %v2972_v20 = vrot.slane %v2956_v44, %v25269_v22 }
 0x3ed   :  { %v2998_v23 = vrot.slane %v2931_v6, %v25269_v22  ;;  %v2935_v24 = vpop.f32.mrf.mxu1 }
 0x3ee   :  { %v2986_v27 = vrot.slane %v2958_v17, %v25269_v22  ;;  %v3532_v28 = vcombine.low %v2965_v42, %v2979_v4  ;;  %v23305_v32 = vcombine.high %v2965_v42, %v2979_v4  ;;  %v3005_v35 = vrot.slane %v2991_v19, %v25269_v22 }
 0x3ef   :  { %v3006_v38 = vcombine.high %v2998_v23, %v2998_v23  ;;  %v3014_v7 = vrot.slane %v2998_v23, %v25269_v22  ;;  %v2936_v10 = vadd.f32 %v2935_v24, %v2855_v15  ;;  %v24217_v39 = vpop.f32.mrf.mxu1  ;;  %v3531_v4 = vrot.slane %v3524_v30, %v25269_v22 }
 0x3f0   :  { %v3534_v40 = vcombine.low %v2972_v20, %v2986_v27  ;;  %v23306_v18 = vcombine.high %v2972_v20, %v2986_v27  ;;  %v3542_v36 = vrot.slane %v3532_v28, %v25269_v22  ;;  %v3549_v41 = vrot.slane %v23305_v32, %v25269_v22 }
 0x3f1   :  { %v3007_v43 = vcombine.high %v3005_v35, %v3005_v35  ;;  %v3021_v45 = vrot.slane %v3005_v35, %v25269_v22  ;;  %v3028_v48 = vrot.slane %v3006_v38, %v25269_v22  ;;  %v3036_v26 = vcombine.high %v3014_v7, %v3014_v7  ;;  %v23297_v35 = vld [vmem:[%s29658_s7 + $0x38] sm:$0xff] }
 0x3f2   :  { %v3556_v49 = vrot.slane %v3534_v40, %v25269_v22  ;;  %v3563_v51 = vrot.slane %v23306_v18, %v25269_v22  ;;  %v3564_v25 = vcombine.low %v3542_v36, %v3549_v41  ;;  %v3587_v33 = vrot.slane %v3014_v7, %v25269_v22  ;;  %24219 = vmatpush3.msra.mxu0 %v23297_v35 }
 0x3f3   :  { %v3035_v12 = vrot.slane %v3007_v43, %v25269_v22  ;;  %v3037_v55 = vcombine.high %v3021_v45, %v3021_v45  ;;  %v3038_v9 = vcombine.high %v3028_v48, %v3028_v48  ;;  %v3750_v11 = vcombine.low %v3028_v48, %v3036_v26  ;;  %24220 = vmatprep.subr.mxu0 %v25088_v0  ;;  %v23299_v26 = vld [vmem:[%s29659_s8 + $0x1] ss:$0 sm:$0xff] }
 0x3f4   :  { %v3046_v31 = vrot.slane %v2936_v10, %v25269_v22  ;;  %v3594_v29 = vrot.slane %v3587_v33, %v25269_v22  ;;  %v3565_v59 = vcombine.low %v3556_v49, %v3563_v51  ;;  %v3572_v60 = vrot.slane %v3564_v25, %v25269_v22  ;;  %24221 = vmatpush3.msra.mxu0 %v23296_v2 }
 0x3f5   :  { %v3751_v34 = vcombine.low %v3038_v9, %v3021_v45  ;;  %v3752_v47 = vcombine.low %v3035_v12, %v3037_v55  ;;  %v3039_v37 = vcombine.high %v3035_v12, %v3035_v12  ;;  %v3760_v61 = vrot.slane %v3750_v11, %v25269_v22  ;;  %24222 = vmatprep.subr.mxu0 %v25088_v0 }
 0x3f6   :  { %v3047_v62 = vcombine.high %v3046_v31, %v3046_v31  ;;  %v3054_v63 = vrot.slane %v3046_v31, %v25269_v22  ;;  %24235 = vmatprep.subr.msk.mxu1 %vm1640_vm3, %v3594_v29  ;;  %v3579_v52 = vrot.slane %v3565_v59, %v25269_v22  ;;  %v3459_v19 = vmul.f32 0.35355338, %v2663_v58  ;;  %24223 = vmatpush3.msra.mxu0 %v23295_v50 }
 0x3f7   :  { %v3767_v54 = vrot.slane %v3751_v34, %v25269_v22  ;;  %24236 = vmatpush3.xpose.msk.msra.mxu1 %vm1640_vm3, %v3594_v29  ;;  %v3774_v6 = vrot.slane %v3752_v47, %v25269_v22  ;;  %24224 = vmatprep.subr.mxu0 %v25088_v0  ;;  %v3074_v49 = vcombine.high %v23299_v26, %v23299_v26 }
 0x3f8   :  { %v3061_v44 = vrot.slane %v3047_v62, %v25269_v22  ;;  %v3753_v1 = vcombine.low %v3039_v37, %v3054_v63  ;;  %v3580_v8 = vcombine.low %v3572_v60, %v3579_v52  ;;  %v3742_v27 = vrot.slane %v3459_v19, %v25269_v22 }
 0x3f9   :  { %v3782_v42 = vcombine.low %v3760_v61, %v3767_v54  ;;  %v3081_v51 = vrot.slane %v23299_v26, %v25269_v22  ;;  %v3088_v25 = vrot.slane %v3074_v49, %v25269_v22 }
 0x3fa   :  { %v3781_v15 = vrot.slane %v3753_v1, %v25269_v22  ;;  %v3805_v17 = vrot.slane %v3061_v44, %v25269_v22  ;;  %24237 = vmatprep.subr.msk.mxu1 %vm1640_vm3, %v3580_v8  ;;  %v3749_v32 = vrot.slane %v3742_v27, %v25269_v22 }
 0x3fb   :  { %24238 = vmatpush3.xpose.msk.msra.mxu1 %vm1640_vm3, %v3580_v8  ;;  %v3790_v23 = vrot.slane %v3782_v42, %v25269_v22  ;;  %v3089_v33 = vcombine.high %v3081_v51, %v3081_v51  ;;  %v3090_v12 = vcombine.high %v3088_v25, %v3088_v25  ;;  %v25938_v55 = vrot.slane %v3081_v51, %v25269_v22 }
 0x3fc   :  { %v3783_v20 = vcombine.low %v3774_v6, %v3781_v15  ;;  %v3812_v21 = vrot.slane %v3805_v17, %v25269_v22  ;;  %v3104_v9 = vrot.slane %v3088_v25, %v25269_v22 }
 0x3fd   :  { %v3111_v11 = vrot.slane %v3089_v33, %v25269_v22  ;;  %v25943_v31 = vrot.slane %v3090_v12, %v25269_v22  ;;  %v3119_v37 = vcombine.high %v25938_v55, %v25938_v55  ;;  %v3172_v58 = vcombine.low %v25938_v55, %v25938_v55 }
 0x3fe   :  { %24240 = vmatmul.mubr.msk.f32.vlgmr.msra.gmra.mxu1 %vm1640_vm3, %v3531_v4  ;;  %24242 = vmatprep.subr.msk.mxu1 %vm1640_vm3, %v3812_v21  ;;  %v3797_v24 = vrot.slane %v3783_v20, %v25269_v22  ;;  %v3120_v60 = vcombine.high %v3104_v9, %v3104_v9 }
 0x3ff   :  { %24243 = vmatpush3.xpose.msk.msra.mxu1 %vm1640_vm3, %v3812_v21  ;;  %24246 = vmatprep.mubr.msk.f32.mxu1 %vm1640_vm3, %v3735_v5  ;;  %v23294_v5 = vld [vmem:[%s29658_s7 + $0x20] sm:$0xff]  ;;  %v3123_v29 = vcombine.low %v25938_v55, %v3111_v11  ;;  %v23300_v59 = vcombine.high %v25938_v55, %v3111_v11  ;;  %v3125_v34 = vcombine.low %v3104_v9, %v25943_v31 }
 0x400   :  { %v3798_v28 = vcombine.low %v3790_v23, %v3797_v24  ;;  %24225 = vmatpush3.msra.mxu0 %v23294_v5  ;;  %v23301_v47 = vcombine.high %v3104_v9, %v25943_v31  ;;  %v3121_v61 = vcombine.high %v3111_v11, %v3111_v11  ;;  %v3173_v44 = vcombine.low %v3111_v11, %v3119_v37 }
 0x401   :  { %24227 = vmatmul.mubr.msk.f32.vlgmr.msra.gmra.mxu0 %vm79_vm1, %v25309_v13  ;;  %v3133_v62 = vrot.slane %v3123_v29, %v25269_v22  ;;  %v3140_v63 = vrot.slane %v23300_v59, %v25269_v22  ;;  %v3147_v52 = vrot.slane %v3125_v34, %v25269_v22  ;;  %v3175_v6 = vcombine.low %v25943_v31, %v3120_v60 }
 0x402   :  { %24244 = vmatprep.subr.msk.mxu1 %vm1640_vm3, %v3798_v28  ;;  %24229 = vmatprep.mubr.msk.f32.mxu0 %vm25090_vm2, %v25088_v0  ;;  %v3154_v30 = vrot.slane %v23301_v47, %v25269_v22  ;;  %v3174_v1 = vcombine.low %v3121_v61, %v3104_v9  ;;  %v3182_v20 = vrot.slane %v3172_v58, %v25269_v22 }
 0x403   :  { %24245 = vmatpush3.xpose.msk.msra.mxu1 %vm1640_vm3, %v3798_v28  ;;  %v3155_v17 = vcombine.low %v3133_v62, %v3140_v63  ;;  %v3189_v21 = vrot.slane %v3173_v44, %v25269_v22  ;;  %v3203_v24 = vrot.slane %v3175_v6, %v25269_v22  ;;  %v3122_v63 = vcombine.high %v25943_v31, %v25943_v31 }
 0x404   :  { %v3156_v42 = vcombine.low %v3147_v52, %v3154_v30  ;;  %v3196_v23 = vrot.slane %v3174_v1, %v25269_v22 }
 0x405   :  { %24230 = vmatmul.mubr.msk.f32.gmra.mxu0 %vm79_vm1, %v25315_v14  ;;  %v3163_v28 = vrot.slane %v3155_v17, %v25269_v22  ;;  %v3204_v2 = vcombine.low %v3182_v20, %v3189_v21  ;;  %v3221_v58 = vcombine.low %v3122_v63, %v25938_v55 }
 0x406   :  { %24247 = vmatmul.mubr.msk.f32.vlgmr.msra.gmra.mxu1 %vm1640_vm3, %v3749_v32  ;;  %24232 = vmatprep.mubr.msk.f32.mxu0 %vm25090_vm2, %v25088_v0  ;;  %v3170_v32 = vrot.slane %v3156_v42, %v25269_v22  ;;  %v3205_v50 = vcombine.low %v3196_v23, %v3203_v24 }
 0x407   :  { %v3228_v17 = vrot.slane %v3221_v58, %v25269_v22 }
 0x409   :  { %24233 = vmatmul.mubr.msk.f32.gmra.mxu0 %vm79_vm1, %v25327_v16 }
 0x4be   :  { %v24241_v38 = vpop.f32.mrf.mxu1 }
 0x4bf   :  { %v3899_v7 = vsel %vm1946_vm5, %v24241_v38, -inf }
 0x4c0   :  { %3900 = vmax.xlane.f32.xlu1 %v3899_v7  ;;  %v3669_v3 = vpop.f32.mrf.mxu1  ;;  %v3171_v7 = vcombine.low %v3163_v28, %v3170_v32 }
 0x4c1   :  { %v3896_v10 = vsel %vm1942_vm4, %v3669_v3, -inf  ;;  %v3305_v41 = vpop.f32.mrf.mxu0 }
 0x4c2   :  { %3897 = vmax.xlane.f32.xlu0 %v3896_v10 }
 0x4c3   :  { %v24228_v43 = vpop.f32.mrf.mxu0 }
 0x4c5   :  { %v25930_v45 = vpop.f32.mrf.mxu0 }
 0x4c6   :  { %v24248_v39 = vpop.f32.mrf.mxu1 }
 0x4c7   :  { %v3905_v40 = vsel %vm1946_vm5, %v24248_v39, -inf  ;;  %v24231_v48 = vpop.f32.mrf.mxu0 }
 0x4c8   :  { %3906 = vmax.xlane.f32.xlu1 %v3905_v40  ;;  %v3887_v18 = vpop.f32.mrf.mxu1  ;;  %v3212_v40 = vrot.slane %v3204_v2, %v25269_v22  ;;  %v3306_v48 = vadd.f32 %v3305_v41, %v3171_v7 }
 0x4c9   :  { %v3902_v36 = vsel %vm1942_vm4, %v3887_v18, -inf  ;;  %v3315_v23 = vpop.f32.mrf.mxu0 }
 0x4ca   :  { %3903 = vmax.xlane.f32.xlu0 %v3902_v36  ;;  %v3219_v36 = vrot.slane %v3205_v50, %v25269_v22  ;;  %v3322_v51 = vcombine.high %v3306_v48, %v3306_v48 }
 0x4cc   :  { %v3220_v26 = vcombine.low %v3212_v40, %v3219_v36  ;;  %v3336_v41 = vrot.slane %v3322_v51, %v25269_v22 }
 0x4ce   :  { %v3311_v33 = vadd.f32 %v25930_v45, %v3220_v26  ;;  %v3338_v34 = vcombine.high %v3336_v41, %v3336_v41  ;;  %v3352_v30 = vrot.slane %v3336_v41, %v25269_v22 }
 0x4d0   :  { %v3378_v9 = vrot.slane %v3311_v33, %v25269_v22  ;;  %v3371_v29 = vcombine.high %v3311_v33, %v3311_v33 }
 0x4d2   :  { %v3386_v37 = vcombine.high %v3378_v9, %v3378_v9  ;;  %v3385_v62 = vrot.slane %v3371_v29, %v25269_v22  ;;  %v3394_v44 = vrot.slane %v3378_v9, %v25269_v22 }
 0x4d4   :  { %v3408_v1 = vrot.slane %v3386_v37, %v25269_v22  ;;  %v3401_v31 = vrot.slane %v3385_v62, %v25269_v22  ;;  %v3416_v20 = vcombine.high %v3394_v44, %v3394_v44  ;;  %v3995_v2 = vrot.slane %v3394_v44, %v25269_v22 }
 0x4d5   :  { %v4632_v44 = vcombine.high %v25844_v57, %v25844_v57 }
 0x4d6   :  { %v3418_v21 = vcombine.high %v3408_v1, %v3408_v1  ;;  %v3417_v32 = vcombine.high %v3401_v31, %v3401_v31  ;;  %v4087_v7 = vcombine.low %v3408_v1, %v3416_v20  ;;  %v4639_v1 = vrot.slane %v25844_v57, %v25269_v22 }
 0x4d8   :  { %v4097_v9 = vrot.slane %v4087_v7, %v25269_v22  ;;  %v4624_v7 = vrot.slane %v25830_v46, %v25269_v22 }
 0x549   :  { %v3901_v54 = vpop.xlane.xlu1 %3900 }
 0x54a   :  { %v3909_v8 = vsub.f32 %v24241_v38, %v3901_v54  ;;  %v3366_v54 = vrot.slane %v3338_v34, %v25269_v22 }
 0x54b   :  { %v3898_v15 = vpop.xlane.xlu0 %3897 }
 0x54c   :  { %v3914_v4 = vmul.f32 1.442695, %v3909_v8  ;;  %v3908_v19 = vsub.f32 %v3669_v3, %v3898_v15  ;;  %v3387_v15 = vcombine.high %v3385_v62, %v3385_v62  ;;  %v3942_v42 = vcombine.low %v3352_v30, %v3366_v54 }
 0x54e   :  { %24930 = vpow2.f32 %v3914_v4  ;;  %v3912_v27 = vmul.f32 1.442695, %v3908_v19  ;;  %v23316_v4 = vcombine.high %v3352_v30, %v3366_v54  ;;  %v3235_v19 = vrot.slane %v3228_v17, %v25269_v22 }
 0x54f   :  { %v4569_v30 = vcombine.high %v25836_v53, %v25836_v53  ;;  %v4646_v17 = vrot.slane %v4632_v44, %v25269_v22 }
 0x550   :  { %24932 = vpow2.f32 %v3912_v27  ;;  %v3415_v27 = vrot.slane %v3387_v15, %v25269_v22  ;;  %v3316_v28 = vadd.f32 %v3315_v23, %v3235_v19 }
 0x551   :  { %v3907_v35 = vpop.xlane.xlu1 %3906  ;;  %v4583_v58 = vrot.slane %v4569_v30, %v25269_v22  ;;  %v4648_v20 = vcombine.high %v4646_v17, %v4646_v17  ;;  %v2283_v30 = vld [vmem:[%s29660_s9] sm:$0xff] }
 0x552   :  { %v3911_v5 = vsub.f32 %v24248_v39, %v3907_v35  ;;  %v24234_v35 = vpop.f32.mrf.mxu0  ;;  %v3426_v50 = vrot.slane %v3316_v28, %v25269_v22 }
 0x553   :  { %v3904_v38 = vpop.xlane.xlu0 %3903  ;;  %v4585_v15 = vcombine.high %v4583_v58, %v4583_v58  ;;  %v4676_v35 = vrot.slane %v4648_v20, %v25269_v22  ;;  %v23345_v20 = vld [vmem:[%s29684_s28 + $0x40] sm:$0xff] }
 0x554   :  { %v3918_v3 = vmul.f32 1.442695, %v3911_v5  ;;  %v3910_v10 = vsub.f32 %v3887_v18, %v3904_v38  ;;  %v3329_v18 = vrot.slane %v3306_v48, %v25269_v22  ;;  %v3964_v5 = vrot.slane %v3942_v42, %v25269_v22 }
 0x555   :  { %v3971_v38 = vrot.slane %v23316_v4, %v25269_v22  ;;  %v3434_v40 = vrot.slane %v3426_v50, %v25269_v22  ;;  %v4089_v48 = vcombine.low %v3415_v27, %v3417_v32  ;;  %v3427_v26 = vcombine.high %v3426_v50, %v3426_v50 }
 0x556   :  { %24934 = vpow2.f32 %v3918_v3  ;;  %v3916_v43 = vmul.f32 1.442695, %v3910_v10  ;;  %v3337_v11 = vcombine.high %v3329_v18, %v3329_v18  ;;  %v3345_v45 = vrot.slane %v3329_v18, %v25269_v22 }
 0x557   :  { %v4088_v3 = vcombine.low %v3418_v21, %v3401_v31  ;;  %v3419_v10 = vcombine.high %v3415_v27, %v3415_v27  ;;  %v4111_v34 = vrot.slane %v4089_v48, %v25269_v22  ;;  %v4647_v31 = vcombine.high %v4639_v1, %v4639_v1 }
 0x558   :  { %24936 = vpow2.f32 %v3916_v43  ;;  %v3359_v61 = vrot.slane %v3337_v11, %v25269_v22  ;;  %v3973_v43 = vcombine.low %v3964_v5, %v3971_v38  ;;  %v4613_v19 = vrot.slane %v4585_v15, %v25269_v22 }
 0x559   :  { %v4090_v51 = vcombine.low %v3419_v10, %v3434_v40  ;;  %v4104_v11 = vrot.slane %v4088_v3, %v25269_v22  ;;  %v4662_v21 = vrot.slane %v4646_v17, %v25269_v22  ;;  %v4669_v23 = vrot.slane %v4647_v31, %v25269_v22  ;;  %v23323_v31 = vld [vmem:[%s29660_s9 + $0x8] sm:$0xff] }
 0x55a   :  { %v3940_v6 = vcombine.low %v3345_v45, %v3359_v61  ;;  %v23315_v8 = vcombine.high %v3345_v45, %v3359_v61  ;;  %v3987_v33 = vrot.slane %v3973_v43, %v25269_v22 }
 0x55b   :  { %v25966_v49 = vpop.eup %24930  ;;  %v4118_v41 = vrot.slane %v4090_v51, %v25269_v22  ;;  %v4119_v37 = vcombine.low %v4097_v9, %v4104_v11  ;;  %v4679_v50 = vcombine.high %v4669_v23, %v4669_v23 }
 0x55c   :  { %v3923_v25 = vsel %vm1946_vm5, %v25966_v49, 0.0  ;;  %v3950_v55 = vrot.slane %v3940_v6, %v25269_v22  ;;  %v3957_v24 = vrot.slane %v23315_v8, %v25269_v22  ;;  %v4576_v8 = vrot.slane %v25836_v53, %v25269_v22 }
 0x55d   :  { %v25970_v39 = vpop.eup %24932  ;;  %3924 = vadd.xlane.f32.xlu1 %v3923_v25  ;;  %v4002_v25 = vrot.slane %v3995_v2, %v25269_v22  ;;  %v4120_v45 = vcombine.low %v4111_v34, %v4118_v41  ;;  %v4127_v62 = vrot.slane %v4119_v37, %v25269_v22  ;;  %v4678_v2 = vcombine.high %v4662_v21, %v4662_v21 }
 0x55e   :  { %v3920_v12 = vsel %vm1942_vm4, %v25970_v39, 0.0  ;;  %v3972_v36 = vcombine.low %v3950_v55, %v3957_v24  ;;  %v4584_v42 = vcombine.high %v4576_v8, %v4576_v8  ;;  %v4599_v55 = vrot.slane %v4583_v58, %v25269_v22 }
 0x55f   :  { %3921 = vadd.xlane.f32.xlu0 %v3920_v12  ;;  %v3441_v12 = vrot.slane %v3427_v26, %v25269_v22  ;;  %24249 = vmatprep.subr.msk.mxu0 %vm2058_vm6, %v4002_v25  ;;  %v4134_v63 = vrot.slane %v4120_v45, %v25269_v22  ;;  %v4655_v24 = vrot.slane %v4639_v1, %v25269_v22 }
 0x560   :  { %v3980_v18 = vrot.slane %v3972_v36, %v25269_v22  ;;  %24250 = vmatpush3.msk.msra.mxu0 %vm2058_vm6, %v4002_v25  ;;  %v4606_v53 = vrot.slane %v4584_v42, %v25269_v22  ;;  %v4697_v27 = vcombine.low %v4599_v55, %v4613_v19  ;;  %v23330_v28 = vcombine.high %v4599_v55, %v4613_v19  ;;  %v23348_v42 = vld [vmem:[%s29684_s28 + $0x58] sm:$0xff]  ;;  %v23346_v19 = vld [vmem:[%s29684_s28 + $0x48] sm:$0xff] }
 0x561   :  { %v4592_v32 = vrot.slane %v4576_v8, %v25269_v22  ;;  %v4677_v40 = vcombine.high %v4655_v24, %v4655_v24  ;;  %v4746_v26 = vcombine.low %v4679_v50, %v4662_v21  ;;  %v4747_v51 = vcombine.low %v4676_v35, %v4678_v2 }
 0x562   :  { %v3988_v29 = vcombine.low %v3980_v18, %v3987_v33  ;;  %v4719_v36 = vrot.slane %v4697_v27, %v25269_v22  ;;  %v4726_v43 = vrot.slane %v23330_v28, %v25269_v22  ;;  %v4631_v18 = vrot.slane %v4624_v7, %v25269_v22 }
 0x563   :  { %v25978_v59 = vpop.eup %24934  ;;  %v4695_v3 = vcombine.low %v4592_v32, %v4606_v53  ;;  %v23329_v10 = vcombine.high %v4592_v32, %v4606_v53  ;;  %v4768_v9 = vrot.slane %v4746_v26, %v25269_v22 }
 0x564   :  { %v3929_v47 = vsel %vm1946_vm5, %v25978_v59, 0.0  ;;  %24251 = vmatprep.subr.mxu0 %v3988_v29  ;;  %v4728_v41 = vcombine.low %v4719_v36, %v4726_v43 }
 0x565   :  { %v25982_v60 = vpop.eup %24936  ;;  %3930 = vadd.xlane.f32.xlu1 %v3929_v47  ;;  %v4142_v47 = vrot.slane %v3441_v12, %v25269_v22  ;;  %24252 = vmatpush3.msra.mxu0 %v3988_v29  ;;  %v4705_v33 = vrot.slane %v4695_v3, %v25269_v22  ;;  %v4712_v46 = vrot.slane %v23329_v10, %v25269_v22 }
 0x566   :  { %v3926_v52 = vsel %vm1942_vm4, %v25982_v60, 0.0  ;;  %24263 = vmatprep.subr.mxu0 %v25088_v0  ;;  %v4745_v12 = vcombine.low %v4669_v23, %v4677_v40 }
 0x567   :  { %3927 = vadd.xlane.f32.xlu0 %v3926_v52  ;;  %v4149_v61 = vrot.slane %v4142_v47, %v25269_v22  ;;  %v4135_v52 = vcombine.low %v4127_v62, %v4134_v63  ;;  %v4727_v34 = vcombine.low %v4705_v33, %v4712_v46  ;;  %v4687_v47 = vrot.slane %v25840_v56, %v25269_v22 }
 0x568   :  { %v4761_v37 = vrot.slane %v4745_v12, %v25269_v22  ;;  %v4680_v62 = vcombine.high %v4676_v35, %v4676_v35 }
 0x569   :  { %24256 = vmatprep.subr.msk.mxu1 %vm2058_vm6, %v4149_v61  ;;  %v4735_v56 = vrot.slane %v4727_v34, %v25269_v22  ;;  %v4694_v58 = vrot.slane %v4687_v47, %v25269_v22 }
 0x56a   :  { %24257 = vmatpush3.msk.msra.mxu1 %vm2058_vm6, %v4149_v61  ;;  %v4742_v61 = vrot.slane %v4728_v41, %v25269_v22 }
 0x56b   :  { %24258 = vmatprep.subr.mxu1 %v4135_v52  ;;  %v4793_v1 = vcombine.low %v4680_v62, %v4694_v58 }
 0x56c   :  { %24259 = vmatpush3.msra.mxu1 %v4135_v52  ;;  %v4743_v44 = vcombine.low %v4735_v56, %v4742_v61 }
 0x56d   :  { %24274 = vmatprep.subr.mxu1 %v25088_v0  ;;  %v4800_v15 = vrot.slane %v4793_v1, %v25269_v22 }
 0x56f   :  { %v4807_v17 = vrot.slane %v4800_v15, %v25269_v22 }
 0x5e6   :  { %v3925_v54 = vpop.xlane.xlu1 %3924 }
 0x5e7   :  { %24938 = vrcp.f32 %v3925_v54 }
 0x5e8   :  { %v3922_v6 = vpop.xlane.xlu0 %3921 }
 0x5e9   :  { %24940 = vrcp.f32 %v3922_v6 }
 0x5ee   :  { %v3931_v4 = vpop.xlane.xlu1 %3930 }
 0x5ef   :  { %24942 = vrcp.f32 %v3931_v4  ;;  %v23347_v4 = vld [vmem:[%s29684_s28 + $0x50] sm:$0xff] }
 0x5f0   :  { %v3928_v57 = vpop.xlane.xlu0 %3927 }
 0x5f1   :  { %24944 = vrcp.f32 %v3928_v57 }
 0x5f4   :  { %v24939_v5 = vpop.eup %24938 }
 0x5f5   :  { %v3937_v25 = vmul.f32 %v24939_v5, %v25966_v49  ;;  %v4775_v49 = vrot.slane %v4747_v51, %v25269_v22 }
 0x5f6   :  { %v24941_v38 = vpop.eup %24940 }
 0x5f7   :  { %v3936_v48 = vmul.f32 %v24941_v38, %v25970_v39  ;;  %v4744_v39 = vcombine.low %v4631_v18, %v4655_v24  ;;  %v4777_v54 = vcombine.low %v4768_v9, %v4775_v49 }
 0x5f9   :  { %24253 = vmatprep.mubr.msk.f32.mxu0 %vm1942_vm4, %v3936_v48  ;;  %v4754_v63 = vrot.slane %v4744_v39, %v25269_v22 }
 0x5fa   :  { %24254 = vmatmul.mubr.msk.f32.vlgmr.msra.gmra.mxu0 %vm1942_vm4, %v3937_v25 }
 0x5fb   :  { %24265 = vmatprep.mubr.msk.f32.mxu0 %vm25090_vm2, %v25088_v0  ;;  %24264 = vmatpush3.msra.mxu0 %v23323_v31 }
 0x5fc   :  { %v24943_v11 = vpop.eup %24942  ;;  %24285 = vmatprep.subr.mxu0 %v25088_v0 }
 0x5fd   :  { %v3939_v52 = vmul.f32 %v24943_v11, %v25978_v59  ;;  %v4791_v59 = vrot.slane %v4777_v54, %v25269_v22 }
 0x5fe   :  { %v24945_v29 = vpop.eup %24944 }
 0x5ff   :  { %v3938_v45 = vmul.f32 %v24945_v29, %v25982_v60  ;;  %v4776_v60 = vcombine.low %v4754_v63, %v4761_v37 }
 0x601   :  { %24260 = vmatprep.mubr.msk.f32.mxu1 %vm1942_vm4, %v3938_v45  ;;  %v4784_v6 = vrot.slane %v4776_v60, %v25269_v22 }
 0x602   :  { %24261 = vmatmul.mubr.msk.f32.vlgmr.msra.gmra.mxu1 %vm1942_vm4, %v3939_v52 }
 0x603   :  { %24275 = vmatpush3.msra.mxu1 %v2283_v30  ;;  %24276 = vmatprep.mubr.msk.f32.mxu1 %vm25090_vm2, %v25088_v0  ;;  %v4792_v8 = vcombine.low %v4784_v6, %v4791_v59  ;;  %v23337_v59 = vld [vmem:[%s29683_s26 + $0x58] sm:$0xff] }
 0x604   :  { %24302 = vmatprep.subr.mxu1 %v25088_v0 }
 0x606   :  { %24277 = vmatmul.mubr.msk.f32.vlgmr.msra.gmra.mxu1 %vm1640_vm3, %v4743_v44 }
 0x607   :  { %24279 = vmatprep.mubr.msk.f32.mxu1 %vm25090_vm2, %v25088_v0  ;;  %24303 = vmatpush3.msra.mxu1 %v23348_v42  ;;  %v23336_v42 = vld [vmem:[%s29683_s26 + $0x50] sm:$0xff] }
 0x608   :  { %24304 = vmatprep.subr.mxu1 %v25088_v0 }
 0x609   :  { %24305 = vmatpush3.msra.mxu1 %v23347_v4 }
 0x60a   :  { %24280 = vmatmul.mubr.msk.f32.gmra.mxu1 %vm1640_vm3, %v4792_v8  ;;  %24306 = vmatprep.subr.mxu1 %v25088_v0 }
 0x60b   :  { %24282 = vmatprep.mubr.msk.f32.mxu1 %vm25090_vm2, %v25088_v0  ;;  %24307 = vmatpush3.msra.mxu1 %v23346_v19 }
 0x60c   :  { %24308 = vmatprep.subr.mxu1 %v25088_v0 }
 0x60d   :  { %24309 = vmatpush3.msra.mxu1 %v23345_v20 }
 0x60e   :  { %24283 = vmatmul.mubr.msk.f32.gmra.mxu1 %vm1640_vm3, %v4807_v17 }
 0x60f   :  { %24310 = vmatprep.mubr.msk.f32.mxu1 %vm25090_vm2, %v25088_v0 }
 0x612   :  { %24311 = vmatmul.mubr.msk.f32.vlgmr.msra.gmra.mxu1 %vm79_vm1, %v25309_v13 }
 0x613   :  { %24313 = vmatprep.mubr.msk.f32.mxu1 %vm25090_vm2, %v25088_v0 }
 0x616   :  { %24314 = vmatmul.mubr.msk.f32.gmra.mxu1 %vm79_vm1, %v25315_v14 }
 0x617   :  { %24316 = vmatprep.mubr.msk.f32.mxu1 %vm25090_vm2, %v25088_v0 }
 0x61a   :  { %24317 = vmatmul.mubr.msk.f32.gmra.mxu1 %vm79_vm1, %v25327_v16 }
 0x6ba   :  { %v24255_v21 = vpop.f32.mrf.mxu0 }
 0x6bb   :  { %v4295_v7 = vrot.slane %v24255_v21, %v25269_v22 }
 0x6bc   :  { %v4078_v23 = vpop.f32.mrf.mxu0 }
 0x6bd   :  { %v4240_v57 = vcombine.high %v4078_v23, %v4078_v23  ;;  %v4247_v55 = vrot.slane %v4078_v23, %v25269_v22  ;;  %v4302_v9 = vrot.slane %v4295_v7, %v25269_v22  ;;  %v23335_v23 = vld [vmem:[%s29683_s26 + $0x48] sm:$0xff] }
 0x6bf   :  { %v4254_v53 = vrot.slane %v4240_v57, %v25269_v22  ;;  %v4255_v24 = vcombine.high %v4247_v55, %v4247_v55  ;;  %v4263_v28 = vrot.slane %v4247_v55, %v25269_v22 }
 0x6c1   :  { %v4256_v27 = vcombine.high %v4254_v53, %v4254_v53  ;;  %v4277_v32 = vrot.slane %v4255_v24, %v25269_v22  ;;  %v4270_v2 = vrot.slane %v4254_v53, %v25269_v22  ;;  %v23334_v53 = vld [vmem:[%s29683_s26 + $0x40] sm:$0xff] }
 0x6c2   :  { %v24262_v35 = vpop.f32.mrf.mxu1 }
 0x6c3   :  { %v4284_v50 = vrot.slane %v4256_v27, %v25269_v22  ;;  %v4366_v5 = vcombine.low %v4263_v28, %v4277_v32  ;;  %v23324_v38 = vcombine.high %v4263_v28, %v4277_v32  ;;  %v4358_v61 = vrot.slane %v24262_v35, %v25269_v22 }
 0x6c4   :  { %v4225_v3 = vpop.f32.mrf.mxu1 }
 0x6c5   :  { %v4368_v10 = vcombine.low %v4270_v2, %v4284_v50  ;;  %v23325_v40 = vcombine.high %v4270_v2, %v4284_v50  ;;  %v4376_v36 = vrot.slane %v4366_v5, %v25269_v22  ;;  %v4383_v43 = vrot.slane %v23324_v38, %v25269_v22  ;;  %v23350_v2 = vld [vmem:[%s29657_s6 + $0x2] ss:$0 sm:$0xff] }
 0x6c6   :  { %v4303_v48 = vcombine.high %v4225_v3, %v4225_v3  ;;  %v4310_v26 = vrot.slane %v4225_v3, %v25269_v22  ;;  %v26127_v51 = vpop.f32.mrf.mxu1  ;;  %v4365_v31 = vrot.slane %v4358_v61, %v25269_v22  ;;  %v5445_v50 = vcombine.high %v23350_v2, %v23350_v2 }
 0x6c7   :  { %v4390_v25 = vrot.slane %v4368_v10, %v25269_v22  ;;  %v4397_v18 = vrot.slane %v23325_v40, %v25269_v22  ;;  %v4398_v33 = vcombine.low %v4376_v36, %v4383_v43  ;;  %v5452_v5 = vrot.slane %v23350_v2, %v25269_v22 }
 0x6c8   :  { %v4317_v46 = vrot.slane %v4303_v48, %v25269_v22  ;;  %v4318_v12 = vcombine.high %v4310_v26, %v4310_v26  ;;  %v4326_v41 = vrot.slane %v4310_v26, %v25269_v22  ;;  %v24278_v39 = vpop.f32.mrf.mxu1  ;;  %v5459_v38 = vrot.slane %v5445_v50, %v25269_v22 }
 0x6c9   :  { %v4399_v49 = vcombine.low %v4390_v25, %v4397_v18  ;;  %v4406_v45 = vrot.slane %v4398_v33, %v25269_v22  ;;  %v5460_v7 = vcombine.high %v5452_v5, %v5452_v5  ;;  %v5468_v10 = vrot.slane %v5452_v5, %v25269_v22 }
 0x6ca   :  { %v4319_v11 = vcombine.high %v4317_v46, %v4317_v46  ;;  %v4333_v29 = vrot.slane %v4317_v46, %v25269_v22  ;;  %v4340_v34 = vrot.slane %v4318_v12, %v25269_v22  ;;  %v4348_v47 = vcombine.high %v4326_v41, %v4326_v41  ;;  %v26136_v37 = vpop.f32.mrf.mxu1 }
 0x6cb   :  { %v4415_v62 = vcombine.low %v4302_v9, %v4326_v41  ;;  %v4413_v63 = vrot.slane %v4399_v49, %v25269_v22  ;;  %v5461_v3 = vcombine.high %v5459_v38, %v5459_v38  ;;  %v5475_v40 = vrot.slane %v5459_v38, %v25269_v22 }
 0x6cc   :  { %v4347_v52 = vrot.slane %v4319_v11, %v25269_v22  ;;  %v4349_v30 = vcombine.high %v4333_v29, %v4333_v29  ;;  %v4350_v54 = vcombine.high %v4340_v34, %v4340_v34  ;;  %v4416_v56 = vcombine.low %v4340_v34, %v4348_v47  ;;  %v24281_v58 = vpop.f32.mrf.mxu1 }
 0x6cd   :  { %v4425_v60 = vrot.slane %v4415_v62, %v25269_v22  ;;  %v4414_v44 = vcombine.low %v4406_v45, %v4413_v63  ;;  %v5482_v36 = vrot.slane %v5460_v7, %v25269_v22  ;;  %v5489_v43 = vrot.slane %v5461_v3, %v25269_v22 }
 0x6ce   :  { %v4351_v1 = vcombine.high %v4347_v52, %v4347_v52  ;;  %v4417_v6 = vcombine.low %v4350_v54, %v4333_v29  ;;  %v4418_v8 = vcombine.low %v4347_v52, %v4349_v30  ;;  %v4432_v15 = vrot.slane %v4416_v56, %v25269_v22  ;;  %v26147_v17 = vpop.f32.mrf.mxu1 }
 0x6cf   :  { %24266 = vmatmul.mubr.msk.f32.vlgmr.msra.gmra.mxu0 %vm1640_vm3, %v4414_v44  ;;  %v5494_v48 = vcombine.low %v5468_v10, %v5482_v36  ;;  %v23351_v26 = vcombine.high %v5468_v10, %v5482_v36  ;;  %v5496_v25 = vcombine.low %v5475_v40, %v5489_v43  ;;  %v23352_v18 = vcombine.high %v5475_v40, %v5489_v43 }
 0x6d0   :  { %v4439_v4 = vrot.slane %v4417_v6, %v25269_v22  ;;  %v24284_v19 = vpop.f32.mrf.mxu1  ;;  %24268 = vmatprep.mubr.msk.f32.mxu0 %vm25090_vm2, %v25088_v0  ;;  %24286 = vmatpush3.msra.mxu0 %v23337_v59  ;;  %v4446_v20 = vrot.slane %v4418_v8, %v25269_v22  ;;  %v4447_v21 = vcombine.low %v4425_v60, %v4432_v15 }
 0x6d1   :  { %24287 = vmatprep.subr.mxu0 %v25088_v0  ;;  %v4464_v55 = vcombine.low %v4351_v1, %v4365_v31  ;;  %v5504_v33 = vrot.slane %v5494_v48, %v25269_v22  ;;  %v5511_v46 = vrot.slane %v23351_v26, %v25269_v22  ;;  %v5518_v12 = vrot.slane %v5496_v25, %v25269_v22 }
 0x6d2   :  { %v4448_v57 = vcombine.low %v4439_v4, %v4446_v20  ;;  %24288 = vmatpush3.msra.mxu0 %v23336_v42  ;;  %v4455_v24 = vrot.slane %v4447_v21, %v25269_v22  ;;  %v5525_v41 = vrot.slane %v23352_v18, %v25269_v22  ;;  %v5490_v49 = vcombine.high %v5468_v10, %v5468_v10  ;;  %v5676_v30 = vpop.f32.mrf.mxu1 }
 0x6d3   :  { %24289 = vmatprep.subr.mxu0 %v25088_v0  ;;  %v4471_v32 = vrot.slane %v4464_v55, %v25269_v22  ;;  %v5526_v39 = vcombine.low %v5504_v33, %v5511_v46  ;;  %v5491_v11 = vcombine.high %v5475_v40, %v5475_v40  ;;  %v5492_v47 = vcombine.high %v5482_v36, %v5482_v36 }
 0x6d4   :  { %v4462_v27 = vrot.slane %v4448_v57, %v25269_v22  ;;  %24290 = vmatpush3.msra.mxu0 %v23335_v23  ;;  %v5527_v9 = vcombine.low %v5518_v12, %v5525_v41  ;;  %v5543_v45 = vcombine.low %v5468_v10, %v5468_v10  ;;  %v5544_v62 = vcombine.low %v5482_v36, %v5490_v49  ;;  %v24312_v59 = vpop.f32.mrf.mxu1 }
 0x6d5   :  { %24291 = vmatprep.subr.mxu0 %v25088_v0  ;;  %v4478_v35 = vrot.slane %v4471_v32, %v25269_v22  ;;  %v5534_v29 = vrot.slane %v5526_v39, %v25269_v22  ;;  %v5545_v63 = vcombine.low %v5492_v47, %v5475_v40  ;;  %v5546_v52 = vcombine.low %v5489_v43, %v5491_v11 }
 0x6d6   :  { %v4463_v28 = vcombine.low %v4455_v24, %v4462_v27  ;;  %24292 = vmatpush3.msra.mxu0 %v23334_v53  ;;  %v5541_v34 = vrot.slane %v5527_v9, %v25269_v22  ;;  %v5553_v54 = vrot.slane %v5543_v45, %v25269_v22  ;;  %v5560_v58 = vrot.slane %v5544_v62, %v25269_v22  ;;  %v5681_v21 = vpop.f32.mrf.mxu1 }
 0x6d7   :  { %24319 = vmatprep.subr.mxu0 %v25088_v0  ;;  %v5567_v60 = vrot.slane %v5545_v63, %v25269_v22  ;;  %v5574_v44 = vrot.slane %v5546_v52, %v25269_v22  ;;  %v5493_v27 = vcombine.high %v5489_v43, %v5489_v43 }
 0x6d8   :  { %24269 = vmatmul.mubr.msk.f32.gmra.mxu0 %vm1640_vm3, %v4463_v28  ;;  %v5542_v61 = vcombine.low %v5534_v29, %v5541_v34  ;;  %v5575_v8 = vcombine.low %v5553_v54, %v5560_v58  ;;  %v24315_v24 = vpop.f32.mrf.mxu1 }
 0x6d9   :  { %24271 = vmatprep.mubr.msk.f32.mxu0 %vm25090_vm2, %v25088_v0  ;;  %v5576_v15 = vcombine.low %v5567_v60, %v5574_v44  ;;  %v5592_v50 = vcombine.low %v5493_v27, %v5468_v10  ;;  %v23339_v27 = vld [vmem:[%s29656_s4 + $0x2] ss:$0 sm:$0xff] }
 0x6da   :  { %v5677_v56 = vadd.f32 %v5676_v30, %v5542_v61  ;;  %v5583_v19 = vrot.slane %v5575_v8, %v25269_v22  ;;  %v5686_v18 = vpop.f32.mrf.mxu1 }
 0x6db   :  { %v5590_v20 = vrot.slane %v5576_v15, %v25269_v22  ;;  %v5599_v48 = vrot.slane %v5592_v50, %v25269_v22 }
 0x6dc   :  { %24272 = vmatmul.mubr.msk.f32.gmra.mxu0 %vm1640_vm3, %v4478_v35  ;;  %v5693_v1 = vcombine.high %v5677_v56, %v5677_v56  ;;  %v5700_v6 = vrot.slane %v5677_v56, %v25269_v22  ;;  %v24318_v41 = vpop.f32.mrf.mxu1 }
 0x6dd   :  { %24293 = vmatprep.mubr.msk.f32.mxu0 %vm25090_vm2, %v25088_v0  ;;  %v5591_v53 = vcombine.low %v5583_v19, %v5590_v20  ;;  %v5606_v12 = vrot.slane %v5599_v48, %v25269_v22 }
 0x6de   :  { %v5707_v31 = vrot.slane %v5693_v1, %v25269_v22  ;;  %v5708_v42 = vcombine.high %v5700_v6, %v5700_v6  ;;  %v5716_v4 = vrot.slane %v5700_v6, %v25269_v22 }
 0x6df   :  { %v5682_v2 = vadd.f32 %v5681_v21, %v5591_v53  ;;  %v5687_v47 = vadd.f32 %v5686_v18, %v5606_v12 }
 0x6e0   :  { %24294 = vmatmul.mubr.msk.f32.vlgmr.msra.gmra.mxu0 %vm79_vm1, %v25309_v13  ;;  %v5709_v23 = vcombine.high %v5707_v31, %v5707_v31  ;;  %v5723_v57 = vrot.slane %v5707_v31, %v25269_v22  ;;  %v5730_v55 = vrot.slane %v5708_v42, %v25269_v22 }
 0x6e1   :  { %24296 = vmatprep.mubr.msk.f32.mxu0 %vm25090_vm2, %v25088_v0  ;;  %v5742_v40 = vcombine.high %v5682_v2, %v5682_v2  ;;  %v5749_v36 = vrot.slane %v5682_v2, %v25269_v22  ;;  %v5797_v30 = vrot.slane %v5687_v47, %v25269_v22 }
 0x6e2   :  { %v5737_v28 = vrot.slane %v5709_v23, %v25269_v22  ;;  %v6283_v32 = vcombine.low %v5716_v4, %v5730_v55  ;;  %v23367_v35 = vcombine.high %v5716_v4, %v5730_v55 }
 0x6e3   :  { %v5756_v33 = vrot.slane %v5742_v40, %v25269_v22  ;;  %v5757_v10 = vcombine.high %v5749_v36, %v5749_v36  ;;  %v5765_v46 = vrot.slane %v5749_v36, %v25269_v22  ;;  %v5798_v1 = vcombine.high %v5797_v30, %v5797_v30 }
 0x6e4   :  { %24297 = vmatmul.mubr.msk.f32.gmra.mxu0 %vm79_vm1, %v25315_v14  ;;  %v6285_v5 = vcombine.low %v5723_v57, %v5737_v28  ;;  %v23368_v38 = vcombine.high %v5723_v57, %v5737_v28  ;;  %v6293_v7 = vrot.slane %v6283_v32, %v25269_v22  ;;  %v6300_v3 = vrot.slane %v23367_v35, %v25269_v22 }
 0x6e5   :  { %24299 = vmatprep.mubr.msk.f32.mxu0 %vm25090_vm2, %v25088_v0  ;;  %v5758_v9 = vcombine.high %v5756_v33, %v5756_v33  ;;  %v5772_v49 = vrot.slane %v5756_v33, %v25269_v22  ;;  %v5779_v11 = vrot.slane %v5757_v10, %v25269_v22  ;;  %v5787_v29 = vcombine.high %v5765_v46, %v5765_v46 }
 0x6e6   :  { %v6307_v26 = vrot.slane %v6285_v5, %v25269_v22  ;;  %v6314_v43 = vrot.slane %v23368_v38, %v25269_v22  ;;  %v6315_v25 = vcombine.low %v6293_v7, %v6300_v3  ;;  %v6338_v34 = vrot.slane %v5765_v46, %v25269_v22 }
 0x6e7   :  { %v5786_v61 = vrot.slane %v5758_v9, %v25269_v22  ;;  %v5788_v62 = vcombine.high %v5772_v49, %v5772_v49  ;;  %v5789_v63 = vcombine.high %v5779_v11, %v5779_v11  ;;  %v6501_v52 = vcombine.low %v5779_v11, %v5787_v29 }
 0x6e8   :  { %24300 = vmatmul.mubr.msk.f32.gmra.mxu0 %vm79_vm1, %v25327_v16  ;;  %v6316_v39 = vcombine.low %v6307_v26, %v6314_v43  ;;  %v6323_v45 = vrot.slane %v6315_v25, %v25269_v22  ;;  %v6345_v54 = vrot.slane %v6338_v34, %v25269_v22  ;;  %v5805_v6 = vrot.slane %v5797_v30, %v25269_v22 }
 0x6e9   :  { %24327 = vmatprep.mubr.msk.f32.mxu0 %vm25090_vm2, %v25088_v0  ;;  %v6502_v58 = vcombine.low %v5789_v63, %v5772_v49  ;;  %v6503_v60 = vcombine.low %v5786_v61, %v5788_v62  ;;  %v6511_v44 = vrot.slane %v6501_v52, %v25269_v22  ;;  %v5790_v59 = vcombine.high %v5786_v61, %v5786_v61 }
 0x6ea   :  { %v6330_v56 = vrot.slane %v6316_v39, %v25269_v22  ;;  %24336 = vmatprep.subr.msk.mxu1 %vm1640_vm3, %v6345_v54  ;;  %v5812_v31 = vrot.slane %v5798_v1, %v25269_v22  ;;  %v5047_v28 = vcombine.high %v23339_v27, %v23339_v27  ;;  %v5054_v32 = vrot.slane %v23339_v27, %v25269_v22 }
 0x6eb   :  { %v6518_v15 = vrot.slane %v6502_v58, %v25269_v22  ;;  %24337 = vmatpush3.xpose.msk.msra.mxu1 %vm1640_vm3, %v6345_v54  ;;  %v6504_v42 = vcombine.low %v5790_v59, %v5805_v6  ;;  %v6525_v4 = vrot.slane %v6503_v60, %v25269_v22 }
 0x6ec   :  { %v6331_v8 = vcombine.low %v6323_v45, %v6330_v56  ;;  %v6556_v21 = vrot.slane %v5812_v31, %v25269_v22  ;;  %v5061_v35 = vrot.slane %v5047_v28, %v25269_v22  ;;  %v5062_v2 = vcombine.high %v5054_v32, %v5054_v32 }
 0x6ed   :  { %v6533_v19 = vcombine.low %v6511_v44, %v6518_v15  ;;  %v6532_v20 = vrot.slane %v6504_v42, %v25269_v22  ;;  %v5070_v5 = vrot.slane %v5054_v32, %v25269_v22 }
 0x6ee   :  { %24338 = vmatprep.subr.msk.mxu1 %vm1640_vm3, %v6331_v8  ;;  %v26246_v57 = vrot.slane %v6556_v21, %v25269_v22  ;;  %v5063_v50 = vcombine.high %v5061_v35, %v5061_v35  ;;  %v5077_v38 = vrot.slane %v5061_v35, %v25269_v22  ;;  %v5084_v7 = vrot.slane %v5062_v2, %v25269_v22 }
 0x6ef   :  { %24339 = vmatpush3.xpose.msk.msra.mxu1 %vm1640_vm3, %v6331_v8  ;;  %v6534_v23 = vcombine.low %v6525_v4, %v6532_v20  ;;  %v6541_v55 = vrot.slane %v6533_v19, %v25269_v22  ;;  %v5092_v43 = vcombine.high %v5070_v5, %v5070_v5  ;;  %v5145_v9 = vcombine.low %v5070_v5, %v5070_v5 }
 0x6f0   :  { %24343 = vmatprep.subr.msk.mxu1 %vm1640_vm3, %v26246_v57  ;;  %v5091_v3 = vrot.slane %v5063_v50, %v25269_v22  ;;  %v5096_v40 = vcombine.low %v5070_v5, %v5084_v7  ;;  %v23340_v36 = vcombine.high %v5070_v5, %v5084_v7  ;;  %v5093_v25 = vcombine.high %v5077_v38, %v5077_v38 }
 0x6f1   :  { %v6548_v53 = vrot.slane %v6534_v23, %v25269_v22  ;;  %v5094_v18 = vcombine.high %v5084_v7, %v5084_v7  ;;  %v5146_v49 = vcombine.low %v5084_v7, %v5092_v43  ;;  %v5155_v45 = vrot.slane %v5145_v9, %v25269_v22 }
 0x6f2   :  { %v5098_v48 = vcombine.low %v5077_v38, %v5091_v3  ;;  %v23341_v26 = vcombine.high %v5077_v38, %v5091_v3  ;;  %v5106_v10 = vrot.slane %v5096_v40, %v25269_v22  ;;  %v5113_v46 = vrot.slane %v23340_v36, %v25269_v22 }
 0x6f3   :  { %v26252_v24 = vcombine.low %v6541_v55, %v6548_v53  ;;  %v5147_v11 = vcombine.low %v5094_v18, %v5077_v38  ;;  %v5148_v29 = vcombine.low %v5091_v3, %v5093_v25  ;;  %v5162_v61 = vrot.slane %v5146_v49, %v25269_v22 }
 0x6f4   :  { %v5120_v12 = vrot.slane %v5098_v48, %v25269_v22  ;;  %v5127_v41 = vrot.slane %v23341_v26, %v25269_v22  ;;  %v5128_v34 = vcombine.low %v5106_v10, %v5113_v46  ;;  %v5095_v59 = vcombine.high %v5091_v3, %v5091_v3 }
 0x6f5   :  { %v5169_v62 = vrot.slane %v5147_v11, %v25269_v22  ;;  %v5176_v63 = vrot.slane %v5148_v29, %v25269_v22  ;;  %v5177_v56 = vcombine.low %v5155_v45, %v5162_v61 }
 0x6f6   :  { %v5129_v47 = vcombine.low %v5120_v12, %v5127_v41  ;;  %v5136_v30 = vrot.slane %v5128_v34, %v25269_v22  ;;  %v5194_v42 = vcombine.low %v5095_v59, %v5070_v5 }
 0x6f7   :  { %v5178_v58 = vcombine.low %v5169_v62, %v5176_v63  ;;  %v5185_v6 = vrot.slane %v5177_v56, %v25269_v22 }
 0x6f8   :  { %v5143_v54 = vrot.slane %v5129_v47, %v25269_v22  ;;  %v5201_v53 = vrot.slane %v5194_v42, %v25269_v22 }
 0x6f9   :  { %v5192_v8 = vrot.slane %v5178_v58, %v25269_v22 }
 0x6fa   :  { %v5144_v1 = vcombine.low %v5136_v30, %v5143_v54  ;;  %v5208_v48 = vrot.slane %v5201_v53, %v25269_v22 }
 0x6fb   :  { %v5193_v19 = vcombine.low %v5185_v6, %v5192_v8 }
 0x78f   :  { %v26263_v33 = vpop.f32.mrf.mxu0 }
 0x791   :  { %v24267_v39 = vpop.f32.mrf.mxu0 }
 0x798   :  { %v26273_v52 = vpop.f32.mrf.mxu0 }
 0x79a   :  { %v24270_v60 = vpop.f32.mrf.mxu0 }
 0x79c   :  { %v26277_v44 = vpop.f32.mrf.mxu0 }
 0x79e   :  { %v24273_v15 = vpop.f32.mrf.mxu0 }
 0x7a0   :  { %v5278_v31 = vpop.f32.mrf.mxu0 }
 0x7a1   :  { %v5279_v4 = vadd.f32 %v5278_v31, %v5144_v1 }
 0x7a2   :  { %v24295_v20 = vpop.f32.mrf.mxu0 }
 0x7a3   :  { %v5295_v21 = vcombine.high %v5279_v4, %v5279_v4  ;;  %v5302_v23 = vrot.slane %v5279_v4, %v25269_v22 }
 0x7a4   :  { %v5283_v55 = vpop.f32.mrf.mxu0 }
 0x7a5   :  { %v5309_v27 = vrot.slane %v5295_v21, %v25269_v22  ;;  %v5310_v28 = vcombine.high %v5302_v23, %v5302_v23  ;;  %v5318_v32 = vrot.slane %v5302_v23, %v25269_v22  ;;  %v5284_v35 = vadd.f32 %v5283_v55, %v5193_v19 }
 0x7a6   :  { %v24298_v2 = vpop.f32.mrf.mxu0 }
 0x7a7   :  { %v5311_v50 = vcombine.high %v5309_v27, %v5309_v27  ;;  %v5325_v38 = vrot.slane %v5309_v27, %v25269_v22  ;;  %v5332_v5 = vrot.slane %v5310_v28, %v25269_v22  ;;  %v5340_v7 = vcombine.high %v5318_v32, %v5318_v32 }
 0x7a8   :  { %v6193_v3 = vmul.f32 0.35355338, %v5318_v32  ;;  %v5344_v40 = vcombine.high %v5284_v35, %v5284_v35  ;;  %v5351_v36 = vrot.slane %v5284_v35, %v25269_v22  ;;  %v5288_v26 = vpop.f32.mrf.mxu0 }
 0x7a9   :  { %v5339_v43 = vrot.slane %v5311_v50, %v25269_v22  ;;  %v5341_v25 = vcombine.high %v5325_v38, %v5325_v38  ;;  %v5342_v18 = vcombine.high %v5332_v5, %v5332_v5  ;;  %v6194_v10 = vmul.f32 0.35355338, %v5332_v5 }
 0x7aa   :  { %v6195_v46 = vmul.f32 0.35355338, %v5340_v7  ;;  %v6197_v12 = vmul.f32 0.35355338, %v5325_v38  ;;  %v5358_v41 = vrot.slane %v5344_v40, %v25269_v22  ;;  %v5359_v39 = vcombine.high %v5351_v36, %v5351_v36  ;;  %v24301_v9 = vpop.f32.mrf.mxu0 }
 0x7ab   :  { %v5343_v49 = vcombine.high %v5339_v43, %v5339_v43  ;;  %v6196_v11 = vmul.f32 0.35355338, %v5342_v18  ;;  %v6198_v29 = vmul.f32 0.35355338, %v5339_v43  ;;  %v6199_v34 = vmul.f32 0.35355338, %v5341_v25 }
 0x7ac   :  { %v6220_v47 = vcombine.low %v6193_v3, %v6194_v10  ;;  %v5360_v45 = vcombine.high %v5358_v41, %v5358_v41  ;;  %v5367_v61 = vrot.slane %v5351_v36, %v25269_v22  ;;  %v5374_v62 = vrot.slane %v5358_v41, %v25269_v22 }
 0x7ad   :  { %v6200_v63 = vmul.f32 0.35355338, %v5343_v49  ;;  %v6221_v30 = vcombine.low %v6195_v46, %v6196_v11  ;;  %v6222_v54 = vcombine.low %v6197_v12, %v6198_v29  ;;  %v5381_v56 = vrot.slane %v5359_v39, %v25269_v22 }
 0x7ae   :  { %v6230_v58 = vrot.slane %v6220_v47, %v25269_v22  ;;  %v5388_v60 = vrot.slane %v5360_v45, %v25269_v22  ;;  %v5389_v59 = vcombine.high %v5367_v61, %v5367_v61  ;;  %v5390_v1 = vcombine.high %v5374_v62, %v5374_v62 }
 0x7af   :  { %v6223_v6 = vcombine.low %v6199_v34, %v6200_v63  ;;  %v6237_v8 = vrot.slane %v6221_v30, %v25269_v22  ;;  %v6244_v15 = vrot.slane %v6222_v54, %v25269_v22  ;;  %v5391_v31 = vcombine.high %v5381_v56, %v5381_v56  ;;  %v23358_v63 = vld [vmem:[%s29658_s7 + $0x50] sm:$0xff]  ;;  %v23356_v30 = vld [vmem:[%s29658_s7 + $0x40] sm:$0xff] }
 0x7b0   :  { %v6201_v42 = vmul.f32 0.35355338, %v5367_v61  ;;  %v6202_v4 = vmul.f32 0.35355338, %v5381_v56  ;;  %v6203_v19 = vmul.f32 0.35355338, %v5389_v59  ;;  %v5289_v20 = vadd.f32 %v5288_v26, %v5208_v48 }
 0x7b1   :  { %v6251_v21 = vrot.slane %v6223_v6, %v25269_v22  ;;  %v6204_v23 = vmul.f32 0.35355338, %v5391_v31  ;;  %v6205_v55 = vmul.f32 0.35355338, %v5374_v62  ;;  %v6206_v53 = vmul.f32 0.35355338, %v5388_v60 }
 0x7b2   :  { %v6207_v27 = vmul.f32 0.35355338, %v5390_v1  ;;  %v6438_v28 = vcombine.low %v6202_v4, %v6203_v19  ;;  %v5392_v32 = vcombine.high %v5388_v60, %v5388_v60  ;;  %v5399_v2 = vrot.slane %v5289_v20, %v25269_v22  ;;  %v23361_v19 = vld [vmem:[%s29659_s8 + $0x2] ss:$0 sm:$0xff] }
 0x7b3   :  { %v6439_v35 = vcombine.low %v6204_v23, %v6205_v55  ;;  %v6252_v50 = vcombine.low %v6230_v58, %v6237_v8  ;;  %v6253_v38 = vcombine.low %v6244_v15, %v6251_v21  ;;  %v6275_v5 = vrot.slane %v6201_v42, %v25269_v22 }
 0x7b4   :  { %v6440_v7 = vcombine.low %v6206_v53, %v6207_v27  ;;  %v6448_v3 = vrot.slane %v6438_v28, %v25269_v22  ;;  %v5400_v36 = vcombine.high %v5399_v2, %v5399_v2  ;;  %v5407_v48 = vrot.slane %v5399_v2, %v25269_v22 }
 0x7b5   :  { %v6455_v40 = vrot.slane %v6439_v35, %v25269_v22  ;;  %v6208_v26 = vmul.f32 0.35355338, %v5392_v32  ;;  %v6260_v43 = vrot.slane %v6252_v50, %v25269_v22  ;;  %v6267_v25 = vrot.slane %v6253_v38, %v25269_v22 }
 0x7b6   :  { %v5414_v18 = vrot.slane %v5400_v36, %v25269_v22  ;;  %v6209_v10 = vmul.f32 0.35355338, %v5407_v48  ;;  %v6282_v12 = vrot.slane %v6275_v5, %v25269_v22  ;;  %v6462_v39 = vrot.slane %v6440_v7, %v25269_v22 }
 0x7b7   :  { %v6268_v46 = vcombine.low %v6260_v43, %v6267_v25  ;;  %v6470_v9 = vcombine.low %v6448_v3, %v6455_v40  ;;  %v5825_v20 = vcombine.high %v23361_v19, %v23361_v19  ;;  %v5832_v21 = vrot.slane %v23361_v19, %v25269_v22 }
 0x7b8   :  { %v6441_v41 = vcombine.low %v6208_v26, %v6209_v10  ;;  %v6210_v49 = vmul.f32 0.35355338, %v5414_v18 }
 0x7b9   :  { %24340 = vmatprep.mubr.msk.f32.mxu1 %vm1640_vm3, %v6268_v46  ;;  %v6478_v34 = vrot.slane %v6470_v9, %v25269_v22  ;;  %v5839_v23 = vrot.slane %v5825_v20, %v25269_v22  ;;  %v5840_v55 = vcombine.high %v5832_v21, %v5832_v21  ;;  %v26361_v27 = vrot.slane %v5832_v21, %v25269_v22 }
 0x7ba   :  { %v6469_v11 = vrot.slane %v6441_v41, %v25269_v22  ;;  %24341 = vmatmul.mubr.msk.f32.vlgmr.msra.gmra.mxu1 %vm1640_vm3, %v6282_v12  ;;  %v6493_v47 = vrot.slane %v6210_v49, %v25269_v22 }
 0x7bb   :  { %24344 = vmatpush3.xpose.msk.msra.mxu1 %vm1640_vm3, %v26246_v57  ;;  %v23359_v57 = vld [vmem:[%s29658_s7 + $0x58] sm:$0xff]  ;;  %v5841_v53 = vcombine.high %v5839_v23, %v5839_v23  ;;  %v5862_v28 = vrot.slane %v5840_v55, %v25269_v22  ;;  %v5855_v32 = vrot.slane %v5839_v23, %v25269_v22  ;;  %v5870_v7 = vcombine.high %v26361_v27, %v26361_v27 }
 0x7bc   :  { %v6471_v29 = vcombine.low %v6462_v39, %v6469_v11  ;;  %24345 = vmatprep.subr.msk.mxu1 %vm1640_vm3, %v26252_v24  ;;  %v6500_v62 = vrot.slane %v6493_v47, %v25269_v22  ;;  %24320 = vmatpush3.msra.mxu0 %v23359_v57  ;;  %v5923_v46 = vcombine.low %v26361_v27, %v26361_v27 }
 0x7bd   :  { %24321 = vmatprep.subr.mxu0 %v25088_v0  ;;  %v26366_v35 = vrot.slane %v5841_v53, %v25269_v22  ;;  %v5874_v2 = vcombine.low %v26361_v27, %v5862_v28  ;;  %v23362_v50 = vcombine.high %v26361_v27, %v5862_v28  ;;  %v5871_v3 = vcombine.high %v5855_v32, %v5855_v32 }
 0x7be   :  { %v6485_v45 = vrot.slane %v6471_v29, %v25269_v22  ;;  %24322 = vmatpush3.msra.mxu0 %v23358_v63  ;;  %v5872_v40 = vcombine.high %v5862_v28, %v5862_v28  ;;  %v5924_v12 = vcombine.low %v5862_v28, %v5870_v7  ;;  %v5933_v47 = vrot.slane %v5923_v46, %v25269_v22 }
 0x7bf   :  { %24346 = vmatpush3.xpose.msk.msra.mxu1 %vm1640_vm3, %v26252_v24  ;;  %v23357_v24 = vld [vmem:[%s29658_s7 + $0x48] sm:$0xff]  ;;  %24323 = vmatprep.subr.mxu0 %v25088_v0  ;;  %v5876_v38 = vcombine.low %v5855_v32, %v26366_v35  ;;  %v23363_v5 = vcombine.high %v5855_v32, %v26366_v35  ;;  %v5884_v48 = vrot.slane %v5874_v2, %v25269_v22 }
 0x7c0   :  { %v6486_v61 = vcombine.low %v6478_v34, %v6485_v45  ;;  %24324 = vmatpush3.msra.mxu0 %v23357_v24  ;;  %v5891_v43 = vrot.slane %v23362_v50, %v25269_v22  ;;  %v5925_v9 = vcombine.low %v5872_v40, %v5855_v32  ;;  %v5926_v49 = vcombine.low %v26366_v35, %v5871_v3 }
 0x7c1   :  { %24325 = vmatprep.subr.mxu0 %v25088_v0  ;;  %v5898_v25 = vrot.slane %v5876_v38, %v25269_v22  ;;  %v5905_v18 = vrot.slane %v23363_v5, %v25269_v22  ;;  %v5940_v45 = vrot.slane %v5924_v12, %v25269_v22 }
 0x7c2   :  { %24347 = vmatprep.mubr.msk.f32.mxu1 %vm1640_vm3, %v6486_v61  ;;  %24326 = vmatpush3.msra.mxu0 %v23356_v30  ;;  %v5906_v29 = vcombine.low %v5884_v48, %v5891_v43  ;;  %v5947_v61 = vrot.slane %v5925_v9, %v25269_v22 }
 0x7c3   :  { %24348 = vmatmul.mubr.msk.f32.vlgmr.msra.gmra.mxu1 %vm1640_vm3, %v6500_v62  ;;  %24328 = vmatmul.mubr.msk.f32.vlgmr.msra.gmra.mxu0 %vm79_vm1, %v25309_v13  ;;  %v5907_v34 = vcombine.low %v5898_v25, %v5905_v18  ;;  %v5954_v62 = vrot.slane %v5926_v49, %v25269_v22  ;;  %v5873_v25 = vcombine.high %v26366_v35, %v26366_v35 }
 0x7c4   :  { %24330 = vmatprep.mubr.msk.f32.mxu0 %vm25090_vm2, %v25088_v0  ;;  %v5914_v63 = vrot.slane %v5906_v29, %v25269_v22 }
 0x7c5   :  { %v5921_v24 = vrot.slane %v5907_v34, %v25269_v22  ;;  %v5972_v46 = vcombine.low %v5873_v25, %v26361_v27 }
 0x7c7   :  { %24331 = vmatmul.mubr.msk.f32.gmra.mxu0 %vm79_vm1, %v25315_v14 }
 0x7c8   :  { %24333 = vmatprep.mubr.msk.f32.mxu0 %vm25090_vm2, %v25088_v0 }
 0x7cb   :  { %24334 = vmatmul.mubr.msk.f32.gmra.mxu0 %vm79_vm1, %v25327_v16 }
 0x87a   :  { %v24342_v54 = vpop.f32.mrf.mxu1 }
 0x87b   :  { %v6650_v56 = vsel %vm1946_vm5, %v24342_v54, -inf }
 0x87c   :  { %6651 = vmax.xlane.f32.xlu1 %v6650_v56  ;;  %v6420_v58 = vpop.f32.mrf.mxu1  ;;  %v5955_v56 = vcombine.low %v5933_v47, %v5940_v45 }
 0x87d   :  { %v6647_v60 = vsel %vm1942_vm4, %v6420_v58, -inf }
 0x87e   :  { %6648 = vmax.xlane.f32.xlu0 %v6647_v60 }
 0x883   :  { %v24349_v59 = vpop.f32.mrf.mxu1  ;;  %v6056_v15 = vpop.f32.mrf.mxu0 }
 0x884   :  { %v6656_v1 = vsel %vm1946_vm5, %v24349_v59, -inf }
 0x885   :  { %6657 = vmax.xlane.f32.xlu1 %v6656_v1  ;;  %v6638_v6 = vpop.f32.mrf.mxu1  ;;  %v24329_v31 = vpop.f32.mrf.mxu0 }
 0x886   :  { %v6653_v8 = vsel %vm1942_vm4, %v6638_v6, -inf }
 0x887   :  { %6654 = vmax.xlane.f32.xlu0 %v6653_v8  ;;  %v26353_v42 = vpop.f32.mrf.mxu0  ;;  %v5922_v8 = vcombine.low %v5914_v63, %v5921_v24 }
 0x889   :  { %v24332_v4 = vpop.f32.mrf.mxu0  ;;  %v6057_v20 = vadd.f32 %v6056_v15, %v5922_v8 }
 0x88a   :  { %v5963_v4 = vrot.slane %v5955_v56, %v25269_v22 }
 0x88b   :  { %v6073_v53 = vcombine.high %v6057_v20, %v6057_v20  ;;  %v6080_v28 = vrot.slane %v6057_v20, %v25269_v22 }
 0x88d   :  { %v6087_v15 = vrot.slane %v6073_v53, %v25269_v22  ;;  %v6088_v38 = vcombine.high %v6080_v28, %v6080_v28 }
 0x88f   :  { %v6089_v40 = vcombine.high %v6087_v15, %v6087_v15  ;;  %v6103_v18 = vrot.slane %v6087_v15, %v25269_v22 }
 0x905   :  { %v6652_v36 = vpop.xlane.xlu1 %6651 }
 0x906   :  { %v6660_v26 = vsub.f32 %v24342_v54, %v6652_v36 }
 0x907   :  { %v6649_v10 = vpop.xlane.xlu0 %6648 }
 0x908   :  { %v6665_v41 = vmul.f32 1.442695, %v6660_v26  ;;  %v6659_v39 = vsub.f32 %v6420_v58, %v6649_v10  ;;  %v5956_v58 = vcombine.low %v5947_v61, %v5954_v62  ;;  %v6110_v26 = vrot.slane %v6088_v38, %v25269_v22  ;;  %v6066_v62 = vpop.f32.mrf.mxu0 }
 0x909   :  { %v6117_v10 = vrot.slane %v6089_v40, %v25269_v22 }
 0x90a   :  { %24946 = vpow2.f32 %v6665_v41  ;;  %v6663_v11 = vmul.f32 1.442695, %v6659_v39  ;;  %v5970_v19 = vrot.slane %v5956_v58, %v25269_v22  ;;  %v24335_v56 = vpop.f32.mrf.mxu0 }
 0x90b   :  { %v6693_v34 = vcombine.low %v6103_v18, %v6117_v10  ;;  %v23378_v47 = vcombine.high %v6103_v18, %v6117_v10 }
 0x90c   :  { %24948 = vpow2.f32 %v6663_v11  ;;  %v5979_v11 = vrot.slane %v5972_v46, %v25269_v22 }
 0x90e   :  { %v6658_v57 = vpop.xlane.xlu1 %6657  ;;  %v5986_v35 = vrot.slane %v5979_v11, %v25269_v22 }
 0x90f   :  { %v6662_v30 = vsub.f32 %v24349_v59, %v6658_v57  ;;  %v5971_v59 = vcombine.low %v5963_v4, %v5970_v19 }
 0x910   :  { %v6655_v54 = vpop.xlane.xlu0 %6654  ;;  %v6067_v24 = vadd.f32 %v6066_v62, %v5986_v35 }
 0x911   :  { %v6669_v60 = vmul.f32 1.442695, %v6662_v30  ;;  %v6661_v1 = vsub.f32 %v6638_v6, %v6655_v54  ;;  %v6062_v32 = vadd.f32 %v26353_v42, %v5971_v59  ;;  %v6096_v42 = vrot.slane %v6080_v28, %v25269_v22 }
 0x912   :  { %v6177_v58 = vrot.slane %v6067_v24, %v25269_v22 }
 0x913   :  { %24950 = vpow2.f32 %v6669_v60  ;;  %v6667_v31 = vmul.f32 1.442695, %v6661_v1  ;;  %v6129_v2 = vrot.slane %v6062_v32, %v25269_v22  ;;  %v6122_v5 = vcombine.high %v6062_v32, %v6062_v32 }
 0x914   :  { %v6691_v39 = vcombine.low %v6096_v42, %v6110_v26  ;;  %v23377_v9 = vcombine.high %v6096_v42, %v6110_v26  ;;  %v6715_v60 = vrot.slane %v6693_v34, %v25269_v22  ;;  %v6722_v1 = vrot.slane %v23378_v47, %v25269_v22 }
 0x915   :  { %24952 = vpow2.f32 %v6667_v31  ;;  %v6137_v48 = vcombine.high %v6129_v2, %v6129_v2  ;;  %v6136_v43 = vrot.slane %v6122_v5, %v25269_v22  ;;  %v6145_v12 = vrot.slane %v6129_v2, %v25269_v22 }
 0x916   :  { %v6701_v27 = vrot.slane %v6691_v39, %v25269_v22  ;;  %v6708_v57 = vrot.slane %v23377_v9, %v25269_v22  ;;  %v6185_v19 = vrot.slane %v6177_v58, %v25269_v22 }
 0x917   :  { %v26389_v21 = vpop.eup %24946  ;;  %v6159_v41 = vrot.slane %v6137_v48, %v25269_v22  ;;  %v6138_v49 = vcombine.high %v6136_v43, %v6136_v43  ;;  %v6152_v29 = vrot.slane %v6136_v43, %v25269_v22  ;;  %v6167_v45 = vcombine.high %v6145_v12, %v6145_v12 }
 0x918   :  { %v6674_v23 = vsel %vm1946_vm5, %v26389_v21, 0.0  ;;  %v6746_v54 = vrot.slane %v6145_v12, %v25269_v22  ;;  %v6723_v20 = vcombine.low %v6701_v27, %v6708_v57 }
 0x919   :  { %v26393_v55 = vpop.eup %24948  ;;  %6675 = vadd.xlane.f32.xlu1 %v6674_v23  ;;  %v6169_v61 = vcombine.high %v6159_v41, %v6159_v41  ;;  %v6166_v63 = vrot.slane %v6138_v49, %v25269_v22  ;;  %v6168_v30 = vcombine.high %v6152_v29, %v6152_v29  ;;  %v6838_v8 = vcombine.low %v6159_v41, %v6167_v45 }
 0x91a   :  { %v6671_v6 = vsel %vm1942_vm4, %v26393_v55, 0.0  ;;  %v6724_v23 = vcombine.low %v6715_v60, %v6722_v1  ;;  %v6753_v53 = vrot.slane %v6746_v54, %v25269_v22  ;;  %v6731_v32 = vrot.slane %v6723_v20, %v25269_v22 }
 0x91b   :  { %6672 = vadd.xlane.f32.xlu0 %v6671_v6  ;;  %v6839_v31 = vcombine.low %v6169_v61, %v6152_v29  ;;  %v6170_v4 = vcombine.high %v6166_v63, %v6166_v63  ;;  %v6840_v59 = vcombine.low %v6166_v63, %v6168_v30  ;;  %v6178_v6 = vcombine.high %v6177_v58, %v6177_v58  ;;  %v23391_v61 = vld [vmem:[%s29683_s26 + $0x60] sm:$0xff] }
 0x91c   :  { %v6738_v15 = vrot.slane %v6724_v23, %v25269_v22  ;;  %24350 = vmatprep.subr.msk.mxu0 %vm2058_vm6, %v6753_v53 }
 0x91d   :  { %v6841_v28 = vcombine.low %v6170_v4, %v6185_v19  ;;  %v6192_v2 = vrot.slane %v6178_v6, %v25269_v22  ;;  %24351 = vmatpush3.msk.msra.mxu0 %vm2058_vm6, %v6753_v53  ;;  %v6855_v40 = vrot.slane %v6839_v31, %v25269_v22  ;;  %v6862_v48 = vrot.slane %v6840_v59, %v25269_v22 }
 0x91e   :  { %v6739_v5 = vcombine.low %v6731_v32, %v6738_v15 }
 0x91f   :  { %v6869_v38 = vrot.slane %v6841_v28, %v25269_v22 }
 0x920   :  { %v26401_v50 = vpop.eup %24950  ;;  %24352 = vmatprep.subr.mxu0 %v6739_v5 }
 0x921   :  { %v6680_v7 = vsel %vm1946_vm5, %v26401_v50, 0.0  ;;  %24353 = vmatpush3.msra.mxu0 %v6739_v5  ;;  %v6871_v43 = vcombine.low %v6862_v48, %v6869_v38 }
 0x922   :  { %v26405_v3 = vpop.eup %24952  ;;  %6681 = vadd.xlane.f32.xlu1 %v6680_v7  ;;  %v6848_v7 = vrot.slane %v6838_v8, %v25269_v22  ;;  %24364 = vmatprep.subr.mxu0 %v25088_v0 }
 0x923   :  { %v6677_v36 = vsel %vm1942_vm4, %v26405_v3, 0.0  ;;  %v6885_v18 = vrot.slane %v6871_v43, %v25269_v22 }
 0x924   :  { %6678 = vadd.xlane.f32.xlu0 %v6677_v36  ;;  %v6893_v36 = vrot.slane %v6192_v2, %v25269_v22  ;;  %v6870_v42 = vcombine.low %v6848_v7, %v6855_v40 }
 0x926   :  { %v6900_v26 = vrot.slane %v6893_v36, %v25269_v22  ;;  %v6878_v25 = vrot.slane %v6870_v42, %v25269_v22 }
 0x928   :  { %24357 = vmatprep.subr.msk.mxu1 %vm2058_vm6, %v6900_v26  ;;  %v6886_v10 = vcombine.low %v6878_v25, %v6885_v18 }
 0x929   :  { %24358 = vmatpush3.msk.msra.mxu1 %vm2058_vm6, %v6900_v26 }
 0x92a   :  { %24359 = vmatprep.subr.mxu1 %v6886_v10 }
 0x92b   :  { %24360 = vmatpush3.msra.mxu1 %v6886_v10 }
 0x92c   :  { %24375 = vmatprep.subr.mxu1 %v25088_v0 }
 0x9a2   :  { %v6676_v46 = vpop.xlane.xlu1 %6675 }
 0x9a3   :  { %24954 = vrcp.f32 %v6676_v46 }
 0x9a4   :  { %v6673_v12 = vpop.xlane.xlu0 %6672 }
 0x9a5   :  { %24956 = vrcp.f32 %v6673_v12 }
 0x9ab   :  { %v6682_v41 = vpop.xlane.xlu1 %6681 }
 0x9ac   :  { %24958 = vrcp.f32 %v6682_v41 }
 0x9ad   :  { %v6679_v39 = vpop.xlane.xlu0 %6678 }
 0x9ae   :  { %24960 = vrcp.f32 %v6679_v39 }
 0x9b0   :  { %v24955_v9 = vpop.eup %24954 }
 0x9b1   :  { %v6688_v29 = vmul.f32 %v24955_v9, %v26389_v21  ;;  %v23385_v21 = vld [vmem:[%s29660_s9 + $0x10] sm:$0xff] }
 0x9b2   :  { %v24957_v49 = vpop.eup %24956 }
 0x9b3   :  { %v6687_v11 = vmul.f32 %v24957_v49, %v26393_v55  ;;  %v23394_v55 = vld [vmem:[%s29683_s26 + $0x78] sm:$0xff] }
 0x9b5   :  { %24354 = vmatprep.mubr.msk.f32.mxu0 %vm1942_vm4, %v6687_v11 }
 0x9b6   :  { %24355 = vmatmul.mubr.msk.f32.vlgmr.msra.gmra.mxu0 %vm1942_vm4, %v6688_v29 }
 0x9b7   :  { %24366 = vmatprep.mubr.msk.f32.mxu0 %vm25090_vm2, %v25088_v0  ;;  %24365 = vmatpush3.msra.mxu0 %v23385_v21 }
 0x9b8   :  { %24392 = vmatprep.subr.mxu0 %v25088_v0 }
 0x9b9   :  { %v24959_v34 = vpop.eup %24958 }
 0x9ba   :  { %v6690_v45 = vmul.f32 %v24959_v34, %v26401_v50  ;;  %v23392_v50 = vld [vmem:[%s29683_s26 + $0x68] sm:$0xff]  ;;  %v23405_v34 = vld [vmem:[%s29684_s28 + $0x78] sm:$0xff] }
 0x9bb   :  { %v24961_v47 = vpop.eup %24960 }
 0x9bc   :  { %v6689_v35 = vmul.f32 %v24961_v47, %v26405_v3  ;;  %v23393_v3 = vld [vmem:[%s29683_s26 + $0x70] sm:$0xff] }
 0x9be   :  { %24361 = vmatprep.mubr.msk.f32.mxu1 %vm1942_vm4, %v6689_v35 }
 0x9bf   :  { %24362 = vmatmul.mubr.msk.f32.vlgmr.msra.gmra.mxu1 %vm1942_vm4, %v6690_v45 }
 0x9c0   :  { %24383 = vmatprep.mubr.msk.f32.mxu1 %vm25090_vm2, %v25088_v0  ;;  %24376 = vmatpush3.msra.mxu1 %v23394_v55 }
 0x9c1   :  { %24377 = vmatprep.subr.mxu1 %v25088_v0 }
 0x9c2   :  { %24378 = vmatpush3.msra.mxu1 %v23393_v3  ;;  %v23404_v3 = vld [vmem:[%s29684_s28 + $0x70] sm:$0xff] }
 0x9c3   :  { %24379 = vmatprep.subr.mxu1 %v25088_v0 }
 0x9c4   :  { %24380 = vmatpush3.msra.mxu1 %v23392_v50 }
 0x9c5   :  { %24381 = vmatprep.subr.mxu1 %v25088_v0 }
 0x9c6   :  { %24382 = vmatpush3.msra.mxu1 %v23391_v61 }
 0x9c7   :  { %24384 = vmatmul.mubr.msk.f32.vlgmr.msra.gmra.mxu1 %vm79_vm1, %v25309_v13  ;;  %24409 = vmatprep.subr.mxu1 %v25088_v0 }
 0x9c8   :  { %24386 = vmatprep.mubr.msk.f32.mxu1 %vm25090_vm2, %v25088_v0 }
 0x9cb   :  { %24387 = vmatmul.mubr.msk.f32.gmra.mxu1 %vm79_vm1, %v25315_v14 }
 0x9cc   :  { %24389 = vmatprep.mubr.msk.f32.mxu1 %vm25090_vm2, %v25088_v0 }
 0x9cf   :  { %24390 = vmatmul.mubr.msk.f32.gmra.mxu1 %vm79_vm1, %v25327_v16 }
 0x9d0   :  { %24417 = vmatprep.mubr.msk.f32.mxu1 %vm25090_vm2, %v25088_v0 }
 0xa76   :  { %v24356_v62 = vpop.f32.mrf.mxu0 }
 0xa77   :  { %v7046_v19 = vrot.slane %v24356_v62, %v25269_v22 }
 0xa78   :  { %v6829_v27 = vpop.f32.mrf.mxu0 }
 0xa79   :  { %v6991_v57 = vcombine.high %v6829_v27, %v6829_v27  ;;  %v6998_v63 = vrot.slane %v6829_v27, %v25269_v22  ;;  %v7053_v36 = vrot.slane %v7046_v19, %v25269_v22  ;;  %v23403_v27 = vld [vmem:[%s29684_s28 + $0x68] sm:$0xff] }
 0xa7b   :  { %v7005_v24 = vrot.slane %v6991_v57, %v25269_v22  ;;  %v7006_v30 = vcombine.high %v6998_v63, %v6998_v63  ;;  %v7014_v56 = vrot.slane %v6998_v63, %v25269_v22 }
 0xa7d   :  { %v7007_v54 = vcombine.high %v7005_v24, %v7005_v24  ;;  %v7028_v58 = vrot.slane %v7006_v30, %v25269_v22  ;;  %v7021_v60 = vrot.slane %v7005_v24, %v25269_v22  ;;  %v23402_v24 = vld [vmem:[%s29684_s28 + $0x60] sm:$0xff] }
 0xa7f   :  { %v7035_v1 = vrot.slane %v7007_v54, %v25269_v22  ;;  %v7117_v8 = vcombine.low %v7014_v56, %v7028_v58  ;;  %v23386_v31 = vcombine.high %v7014_v56, %v7028_v58  ;;  %v24363_v4 = vpop.f32.mrf.mxu1 }
 0xa80   :  { %v7109_v46 = vrot.slane %v24363_v4, %v25269_v22 }
 0xa81   :  { %v7119_v20 = vcombine.low %v7021_v60, %v7035_v1  ;;  %v23387_v23 = vcombine.high %v7021_v60, %v7035_v1  ;;  %v7127_v59 = vrot.slane %v7117_v8, %v25269_v22  ;;  %v7134_v6 = vrot.slane %v23386_v31, %v25269_v22  ;;  %v6976_v53 = vpop.f32.mrf.mxu1  ;;  %v23396_v1 = vld [vmem:[%s29656_s4 + $0x3] ss:$0 sm:$0xff] }
 0xa82   :  { %v7054_v28 = vcombine.high %v6976_v53, %v6976_v53  ;;  %v7061_v32 = vrot.slane %v6976_v53, %v25269_v22  ;;  %v7116_v55 = vrot.slane %v7109_v46, %v25269_v22  ;;  %v7487_v8 = vcombine.high %v23396_v1, %v23396_v1 }
 0xa83   :  { %v7141_v15 = vrot.slane %v7119_v20, %v25269_v22  ;;  %v7148_v2 = vrot.slane %v23387_v23, %v25269_v22  ;;  %v7149_v38 = vcombine.low %v7127_v59, %v7134_v6  ;;  %v7494_v31 = vrot.slane %v23396_v1, %v25269_v22 }
 0xa84   :  { %v7068_v5 = vrot.slane %v7054_v28, %v25269_v22  ;;  %v7069_v7 = vcombine.high %v7061_v32, %v7061_v32  ;;  %v7077_v40 = vrot.slane %v7061_v32, %v25269_v22  ;;  %v7501_v4 = vrot.slane %v7487_v8, %v25269_v22 }
 0xa85   :  { %v7150_v48 = vcombine.low %v7141_v15, %v7148_v2  ;;  %v7157_v18 = vrot.slane %v7149_v38, %v25269_v22  ;;  %v7502_v19 = vcombine.high %v7494_v31, %v7494_v31  ;;  %v26562_v23 = vrot.slane %v7494_v31, %v25269_v22 }
 0xa86   :  { %v7070_v42 = vcombine.high %v7068_v5, %v7068_v5  ;;  %v7084_v26 = vrot.slane %v7068_v5, %v25269_v22  ;;  %v7091_v43 = vrot.slane %v7069_v7, %v25269_v22  ;;  %v7099_v25 = vcombine.high %v7077_v40, %v7077_v40 }
 0xa87   :  { %v7164_v10 = vrot.slane %v7150_v48, %v25269_v22  ;;  %v7166_v12 = vcombine.low %v7053_v36, %v7077_v40  ;;  %v7503_v20 = vcombine.high %v7501_v4, %v7501_v4  ;;  %v7517_v59 = vrot.slane %v7501_v4, %v25269_v22 }
 0xa88   :  { %v7098_v41 = vrot.slane %v7070_v42, %v25269_v22  ;;  %v7100_v39 = vcombine.high %v7084_v26, %v7084_v26  ;;  %v7101_v9 = vcombine.high %v7091_v43, %v7091_v43  ;;  %v7167_v49 = vcombine.low %v7091_v43, %v7099_v25 }
 0xa89   :  { %v7176_v11 = vrot.slane %v7166_v12, %v25269_v22  ;;  %v7165_v29 = vcombine.low %v7157_v18, %v7164_v10  ;;  %v7524_v6 = vrot.slane %v7502_v19, %v25269_v22  ;;  %v26567_v53 = vrot.slane %v7503_v20, %v25269_v22 }
 0xa8a   :  { %v7102_v47 = vcombine.high %v7098_v41, %v7098_v41  ;;  %v7168_v35 = vcombine.low %v7101_v9, %v7084_v26  ;;  %v7169_v45 = vcombine.low %v7098_v41, %v7100_v39  ;;  %v7183_v21 = vrot.slane %v7167_v49, %v25269_v22  ;;  %v7718_v9 = vpop.f32.mrf.mxu1 }
 0xa8b   :  { %24367 = vmatmul.mubr.msk.f32.vlgmr.msra.gmra.mxu0 %vm1640_vm3, %v7165_v29  ;;  %v7536_v28 = vcombine.low %v26562_v23, %v7524_v6  ;;  %v23397_v32 = vcombine.high %v26562_v23, %v7524_v6  ;;  %v7538_v15 = vcombine.low %v7517_v59, %v26567_v53  ;;  %v23398_v2 = vcombine.high %v7517_v59, %v26567_v53 }
 0xa8c   :  { %v7190_v50 = vrot.slane %v7168_v35, %v25269_v22  ;;  %v7197_v61 = vrot.slane %v7169_v45, %v25269_v22  ;;  %v7198_v62 = vcombine.low %v7176_v11, %v7183_v21  ;;  %24369 = vmatprep.mubr.msk.f32.mxu0 %vm25090_vm2, %v25088_v0  ;;  %24393 = vmatpush3.msra.mxu0 %v23405_v34  ;;  %v24385_v35 = vpop.f32.mrf.mxu1 }
 0xa8d   :  { %24394 = vmatprep.subr.mxu0 %v25088_v0  ;;  %v7215_v63 = vcombine.low %v7102_v47, %v7116_v55  ;;  %v7546_v38 = vrot.slane %v7536_v28, %v25269_v22  ;;  %v7553_v5 = vrot.slane %v23397_v32, %v25269_v22  ;;  %v7560_v7 = vrot.slane %v7538_v15, %v25269_v22 }
 0xa8e   :  { %v7199_v57 = vcombine.low %v7190_v50, %v7197_v61  ;;  %24395 = vmatpush3.msra.mxu0 %v23404_v3  ;;  %v7206_v30 = vrot.slane %v7198_v62, %v25269_v22  ;;  %v7567_v40 = vrot.slane %v23398_v2, %v25269_v22  ;;  %v7532_v42 = vcombine.high %v26562_v23, %v26562_v23 }
 0xa8f   :  { %24396 = vmatprep.subr.mxu0 %v25088_v0  ;;  %v7222_v58 = vrot.slane %v7215_v63, %v25269_v22  ;;  %v7568_v36 = vcombine.low %v7546_v38, %v7553_v5  ;;  %v7533_v26 = vcombine.high %v7517_v59, %v7517_v59  ;;  %v7534_v18 = vcombine.high %v7524_v6, %v7524_v6  ;;  %v7723_v63 = vpop.f32.mrf.mxu1  ;;  %v23416_v38 = vld [vmem:[%s29658_s7 + $0x78] sm:$0xff] }
 0xa90   :  { %v7213_v54 = vrot.slane %v7199_v57, %v25269_v22  ;;  %24397 = vmatpush3.msra.mxu0 %v23403_v27  ;;  %v7569_v48 = vcombine.low %v7560_v7, %v7567_v40  ;;  %v7585_v10 = vcombine.low %v26562_v23, %v26562_v23  ;;  %v7586_v12 = vcombine.low %v7524_v6, %v7532_v42 }
 0xa91   :  { %24398 = vmatprep.subr.mxu0 %v25088_v0  ;;  %v7229_v60 = vrot.slane %v7222_v58, %v25269_v22  ;;  %v7576_v43 = vrot.slane %v7568_v36, %v25269_v22  ;;  %v7587_v41 = vcombine.low %v7534_v18, %v7517_v59  ;;  %v7588_v39 = vcombine.low %v26567_v53, %v7533_v26  ;;  %v23415_v26 = vld [vmem:[%s29658_s7 + $0x70] sm:$0xff] }
 0xa92   :  { %v7214_v56 = vcombine.low %v7206_v30, %v7213_v54  ;;  %24399 = vmatpush3.msra.mxu0 %v23402_v24  ;;  %v7583_v25 = vrot.slane %v7569_v48, %v25269_v22  ;;  %v7595_v49 = vrot.slane %v7585_v10, %v25269_v22  ;;  %v7602_v29 = vrot.slane %v7586_v12, %v25269_v22 }
 0xa93   :  { %v7609_v34 = vrot.slane %v7587_v41, %v25269_v22  ;;  %v7616_v47 = vrot.slane %v7588_v39, %v25269_v22  ;;  %24410 = vmatpush3.msra.mxu1 %v23416_v38  ;;  %v23414_v41 = vld [vmem:[%s29658_s7 + $0x68] sm:$0xff] }
 0xa94   :  { %24370 = vmatmul.mubr.msk.f32.gmra.mxu0 %vm1640_vm3, %v7214_v56  ;;  %v7584_v46 = vcombine.low %v7576_v43, %v7583_v25  ;;  %v7617_v21 = vcombine.low %v7595_v49, %v7602_v29  ;;  %24411 = vmatprep.subr.mxu1 %v25088_v0  ;;  %v23413_v29 = vld [vmem:[%s29658_s7 + $0x60] sm:$0xff] }
 0xa95   :  { %24372 = vmatprep.mubr.msk.f32.mxu0 %vm25090_vm2, %v25088_v0  ;;  %v7618_v55 = vcombine.low %v7609_v34, %v7616_v47  ;;  %24412 = vmatpush3.msra.mxu1 %v23415_v26 }
 0xa96   :  { %v7719_v11 = vadd.f32 %v7718_v9, %v7584_v46  ;;  %v7625_v61 = vrot.slane %v7617_v21, %v25269_v22  ;;  %24413 = vmatprep.subr.mxu1 %v25088_v0 }
 0xa97   :  { %v7632_v62 = vrot.slane %v7618_v55, %v25269_v22  ;;  %24414 = vmatpush3.msra.mxu1 %v23414_v41  ;;  %v7535_v55 = vcombine.high %v26567_v53, %v26567_v53  ;;  %v4886_v41 = vadd.f32 %v26136_v37, %v26273_v52 }
 0xa98   :  { %24373 = vmatmul.mubr.msk.f32.gmra.mxu0 %vm1640_vm3, %v7229_v60  ;;  %v7735_v45 = vcombine.high %v7719_v11, %v7719_v11  ;;  %v7742_v3 = vrot.slane %v7719_v11, %v25269_v22  ;;  %v24388_v60 = vpop.f32.mrf.mxu1  ;;  %24415 = vmatprep.subr.mxu1 %v25088_v0 }
 0xa99   :  { %24400 = vmatprep.mubr.msk.f32.mxu0 %vm25090_vm2, %v25088_v0  ;;  %v7633_v54 = vcombine.low %v7625_v61, %v7632_v62  ;;  %24416 = vmatpush3.msra.mxu1 %v23413_v29  ;;  %v4946_v29 = vcombine.high %v4886_v41, %v4886_v41 }
 0xa9a   :  { %v7749_v50 = vrot.slane %v7735_v45, %v25269_v22  ;;  %v7750_v27 = vcombine.high %v7742_v3, %v7742_v3  ;;  %v7758_v57 = vrot.slane %v7742_v3, %v25269_v22  ;;  %v7728_v40 = vpop.f32.mrf.mxu1  ;;  %24418 = vmatmul.mubr.msk.f32.vlgmr.msra.gmra.mxu1 %vm79_vm1, %v25309_v13 }
 0xa9b   :  { %v7724_v4 = vadd.f32 %v7723_v63, %v7633_v54  ;;  %24420 = vmatprep.mubr.msk.f32.mxu1 %vm25090_vm2, %v25088_v0 }
 0xa9c   :  { %24401 = vmatmul.mubr.msk.f32.vlgmr.msra.gmra.mxu0 %vm79_vm1, %v25309_v13  ;;  %v7751_v24 = vcombine.high %v7749_v50, %v7749_v50  ;;  %v7765_v30 = vrot.slane %v7749_v50, %v25269_v22  ;;  %v7772_v56 = vrot.slane %v7750_v27, %v25269_v22  ;;  %v7780_v58 = vcombine.high %v7758_v57, %v7758_v57  ;;  %v24391_v18 = vpop.f32.mrf.mxu1 }
 0xa9d   :  { %24403 = vmatprep.mubr.msk.f32.mxu0 %vm25090_vm2, %v25088_v0  ;;  %v8633_v31 = vmul.f32 0.35355338, %v7758_v57  ;;  %v7784_v2 = vcombine.high %v7724_v4, %v7724_v4  ;;  %v7791_v7 = vrot.slane %v7724_v4, %v25269_v22  ;;  %v7634_v50 = vcombine.low %v7535_v55, %v26562_v23 }
 0xa9e   :  { %v7779_v1 = vrot.slane %v7751_v24, %v25269_v22  ;;  %v7781_v8 = vcombine.high %v7765_v30, %v7765_v30  ;;  %v7782_v19 = vcombine.high %v7772_v56, %v7772_v56  ;;  %v8634_v20 = vmul.f32 0.35355338, %v7772_v56  ;;  %24421 = vmatmul.mubr.msk.f32.gmra.mxu1 %vm79_vm1, %v25315_v14 }
 0xa9f   :  { %v8635_v59 = vmul.f32 0.35355338, %v7780_v58  ;;  %v8637_v6 = vmul.f32 0.35355338, %v7765_v30  ;;  %v7798_v42 = vrot.slane %v7784_v2, %v25269_v22  ;;  %v7799_v25 = vcombine.high %v7791_v7, %v7791_v7  ;;  %24423 = vmatprep.mubr.msk.f32.mxu1 %vm25090_vm2, %v25088_v0 }
 0xaa0   :  { %24404 = vmatmul.mubr.msk.f32.gmra.mxu0 %vm79_vm1, %v25315_v14  ;;  %v7783_v28 = vcombine.high %v7779_v1, %v7779_v1  ;;  %v8638_v32 = vmul.f32 0.35355338, %v7779_v1  ;;  %v8639_v15 = vmul.f32 0.35355338, %v7781_v8  ;;  %v8636_v5 = vmul.f32 0.35355338, %v7782_v19 }
 0xaa1   :  { %24406 = vmatprep.mubr.msk.f32.mxu0 %vm25090_vm2, %v25088_v0  ;;  %v8660_v48 = vcombine.low %v8633_v31, %v8634_v20  ;;  %v26606_v12 = vrot.slane %v7791_v7, %v25269_v22  ;;  %v7821_v39 = vrot.slane %v7799_v25, %v25269_v22  ;;  %v7800_v11 = vcombine.high %v7798_v42, %v7798_v42 }
 0xaa2   :  { %v8640_v36 = vmul.f32 0.35355338, %v7783_v28  ;;  %v8661_v43 = vcombine.low %v8635_v59, %v8636_v5  ;;  %v8662_v10 = vcombine.low %v8637_v6, %v8638_v32  ;;  %v7814_v34 = vrot.slane %v7798_v42, %v25269_v22  ;;  %24424 = vmatmul.mubr.msk.f32.gmra.mxu1 %vm79_vm1, %v25327_v16 }
 0xaa3   :  { %v8670_v9 = vrot.slane %v8660_v48, %v25269_v22  ;;  %v7829_v47 = vcombine.high %v26606_v12, %v26606_v12  ;;  %v7831_v21 = vcombine.high %v7821_v39, %v7821_v39  ;;  %v7828_v3 = vrot.slane %v7800_v11, %v25269_v22  ;;  %v23407_v48 = vld [vmem:[%s29657_s6 + $0x3] ss:$0 sm:$0xff] }
 0xaa4   :  { %24407 = vmatmul.mubr.msk.f32.gmra.mxu0 %vm79_vm1, %v25327_v16  ;;  %v8663_v46 = vcombine.low %v8639_v15, %v8640_v36  ;;  %v8677_v49 = vrot.slane %v8661_v43, %v25269_v22  ;;  %v8684_v35 = vrot.slane %v8662_v10, %v25269_v22  ;;  %v7830_v62 = vcombine.high %v7814_v34, %v7814_v34 }
 0xaa5   :  { %v8642_v27 = vmul.f32 0.35355338, %v7821_v39  ;;  %v8643_v57 = vmul.f32 0.35355338, %v7829_v47  ;;  %v8645_v63 = vmul.f32 0.35355338, %v7814_v34  ;;  %v7641_v30 = vrot.slane %v7634_v50, %v25269_v22 }
 0xaa6   :  { %v8691_v45 = vrot.slane %v8663_v46, %v25269_v22  ;;  %v8692_v61 = vcombine.low %v8670_v9, %v8677_v49  ;;  %v8644_v24 = vmul.f32 0.35355338, %v7831_v21  ;;  %v8646_v56 = vmul.f32 0.35355338, %v7828_v3 }
 0xaa7   :  { %v7648_v54 = vrot.slane %v7641_v30, %v25269_v22  ;;  %v8647_v58 = vmul.f32 0.35355338, %v7830_v62  ;;  %v7832_v60 = vcombine.high %v7828_v3, %v7828_v3  ;;  %v8878_v1 = vcombine.low %v8642_v27, %v8643_v57 }
 0xaa8   :  { %v8693_v53 = vcombine.low %v8684_v35, %v8691_v45  ;;  %v8700_v13 = vrot.slane %v8692_v61, %v25269_v22  ;;  %v8879_v8 = vcombine.low %v8644_v24, %v8645_v63  ;;  %v4881_v42 = vadd.f32 %v26127_v51, %v26263_v33 }
 0xaa9   :  { %v7729_v31 = vadd.f32 %v7728_v40, %v7648_v54  ;;  %v8880_v19 = vcombine.low %v8646_v56, %v8647_v58  ;;  %v8888_v20 = vrot.slane %v8878_v1, %v25269_v22  ;;  %v8648_v28 = vmul.f32 0.35355338, %v7832_v60 }
 0xaaa   :  { %v8707_v23 = vrot.slane %v8693_v53, %v25269_v22  ;;  %v8895_v59 = vrot.slane %v8879_v8, %v25269_v22  ;;  %v7885_v26 = vcombine.high %v23407_v48, %v23407_v48  ;;  %v4897_v43 = vcombine.high %v4881_v42, %v4881_v42 }
 0xaab   :  { %v26643_v14 = vrot.slane %v7729_v31, %v25269_v22  ;;  %v8902_v2 = vrot.slane %v8880_v19, %v25269_v22  ;;  %v7892_v25 = vrot.slane %v23407_v48, %v25269_v22  ;;  %v4904_v10 = vrot.slane %v4881_v42, %v25269_v22 }
 0xaac   :  { %v8708_v4 = vcombine.low %v8700_v13, %v8707_v23  ;;  %v8910_v38 = vcombine.low %v8888_v20, %v8895_v59  ;;  %v7899_v18 = vrot.slane %v7885_v26, %v25269_v22  ;;  %v4911_v46 = vrot.slane %v4897_v43, %v25269_v22 }
 0xaad   :  { %v7847_v6 = vrot.slane %v26643_v14, %v25269_v22  ;;  %v7900_v39 = vcombine.high %v7892_v25, %v7892_v25  ;;  %v4912_v49 = vcombine.high %v4904_v10, %v4904_v10  ;;  %v26667_v51 = vrot.slane %v7892_v25, %v25269_v22 }
 0xaae   :  { %24430 = vmatprep.mubr.msk.f32.mxu0 %vm1640_vm3, %v8708_v4  ;;  %v8918_v7 = vrot.slane %v8910_v38, %v25269_v22  ;;  %v7901_v9 = vcombine.high %v7899_v18, %v7899_v18  ;;  %v4913_v11 = vcombine.high %v4911_v46, %v4911_v46  ;;  %v7915_v33 = vrot.slane %v7899_v18, %v25269_v22 }
 0xaaf   :  { %v8649_v32 = vmul.f32 0.35355338, %v7847_v6  ;;  %v7922_v34 = vrot.slane %v7900_v39, %v25269_v22  ;;  %v4920_v35 = vrot.slane %v4904_v10, %v25269_v22  ;;  %v26676_v45 = vrot.slane %v4911_v46, %v25269_v22 }
 0xab0   :  { %v26672_v47 = vrot.slane %v7901_v9, %v25269_v22  ;;  %v7930_v37 = vcombine.high %v26667_v51, %v26667_v51  ;;  %v7931_v52 = vcombine.high %v7915_v33, %v7915_v33  ;;  %v4934_v55 = vrot.slane %v4912_v49, %v25269_v22 }
 0xab1   :  { %v8881_v15 = vcombine.low %v8648_v28, %v8649_v32  ;;  %v7932_v21 = vcombine.high %v7922_v34, %v7922_v34  ;;  %v26682_v3 = vrot.slane %v4913_v11, %v25269_v22  ;;  %v4953_v50 = vrot.slane %v4886_v41, %v25269_v22 }
 0xab2   :  { %v4960_v61 = vrot.slane %v4946_v29, %v25269_v22  ;;  %v7934_v62 = vcombine.low %v26667_v51, %v7922_v34  ;;  %v23408_v27 = vcombine.high %v26667_v51, %v7922_v34  ;;  %v7936_v57 = vcombine.low %v7915_v33, %v26672_v47 }
 0xab3   :  { %v8909_v16 = vrot.slane %v8881_v15, %v25269_v22  ;;  %v23409_v63 = vcombine.high %v7915_v33, %v26672_v47  ;;  %v4942_v24 = vcombine.high %v4920_v35, %v4920_v35  ;;  %v4943_v30 = vcombine.high %v26676_v45, %v26676_v45 }
 0xab4   :  { %v4891_v53 = vadd.f32 %v26147_v17, %v26277_v44  ;;  %v7983_v13 = vcombine.low %v26667_v51, %v26667_v51  ;;  %v7984_v54 = vcombine.low %v7922_v34, %v7930_v37  ;;  %v7985_v23 = vcombine.low %v7932_v21, %v7915_v33 }
 0xab5   :  { %v8911_v5 = vcombine.low %v8902_v2, %v8909_v16  ;;  %v7986_v56 = vcombine.low %v26672_v47, %v7931_v52  ;;  %v4944_v58 = vcombine.high %v4934_v55, %v4934_v55  ;;  %v4945_v60 = vcombine.high %v26682_v3, %v26682_v3 }
 0xab6   :  { %v4961_v1 = vcombine.high %v4953_v50, %v4953_v50  ;;  %v4962_v8 = vcombine.high %v4960_v61, %v4960_v61  ;;  %v7944_v4 = vrot.slane %v7934_v62, %v25269_v22  ;;  %v7951_v19 = vrot.slane %v23408_v27, %v25269_v22 }
 0xab7   :  { %v8925_v40 = vrot.slane %v8911_v5, %v25269_v22  ;;  %v7958_v17 = vrot.slane %v7936_v57, %v25269_v22  ;;  %v7965_v44 = vrot.slane %v23409_v63, %v25269_v22  ;;  %v26704_v20 = vrot.slane %v4953_v50, %v25269_v22 }
 0xab8   :  { %v26707_v59 = vrot.slane %v4891_v53, %v25269_v22  ;;  %v7993_v15 = vrot.slane %v7983_v13, %v25269_v22  ;;  %v8000_v2 = vrot.slane %v7984_v54, %v25269_v22  ;;  %v8007_v38 = vrot.slane %v7985_v23, %v25269_v22 }
 0xab9   :  { %v8926_v36 = vcombine.low %v8918_v7, %v8925_v40  ;;  %v8014_v16 = vrot.slane %v7986_v56, %v25269_v22  ;;  %v26715_v5 = vrot.slane %v4960_v61, %v25269_v22  ;;  %v26720_v48 = vrot.slane %v4961_v1, %v25269_v22 }
 0xaba   :  { %v26723_v42 = vrot.slane %v4962_v8, %v25269_v22  ;;  %v7966_v26 = vcombine.low %v7944_v4, %v7951_v19  ;;  %v7967_v43 = vcombine.low %v7958_v17, %v7965_v44  ;;  %v5002_v41 = vcombine.high %v26707_v59, %v26707_v59 }
 0xabb   :  { %24437 = vmatprep.mubr.msk.f32.mxu1 %vm1640_vm3, %v8926_v36  ;;  %v8015_v9 = vcombine.low %v7993_v15, %v8000_v2  ;;  %v8016_v49 = vcombine.low %v8007_v38, %v8014_v16  ;;  %v4993_v23 = vcombine.high %v26720_v48, %v26720_v48  ;;  %v5009_v8 = vrot.slane %v26707_v59, %v25269_v22 }
 0xabc   :  { %v7974_v21 = vrot.slane %v7966_v26, %v25269_v22  ;;  %v7981_v50 = vrot.slane %v7967_v43, %v25269_v22 }
 0xabd   :  { %v8023_v54 = vrot.slane %v8015_v9, %v25269_v22 }
 0xabe   :  { %v7982_v19 = vcombine.low %v7974_v21, %v7981_v50 }
 0xb4b   :  { %v7302_v31 = vpop.f32.mrf.mxu0 }
 0xb4c   :  { %v7319_v6 = vcombine.high %v7302_v31, %v7302_v31  ;;  %v7326_v28 = vrot.slane %v7302_v31, %v25269_v22  ;;  %v5016_v31 = vrot.slane %v5002_v41, %v25269_v22 }
 0xb4d   :  { %v24368_v32 = vpop.f32.mrf.mxu0 }
 0xb4e   :  { %v7333_v7 = vrot.slane %v7319_v6, %v25269_v22  ;;  %v7334_v40 = vcombine.high %v7326_v28, %v7326_v28  ;;  %v7342_v36 = vrot.slane %v7326_v28, %v25269_v22 }
 0xb50   :  { %v7335_v25 = vcombine.high %v7333_v7, %v7333_v7  ;;  %v7349_v18 = vrot.slane %v7333_v7, %v25269_v22  ;;  %v7356_v10 = vrot.slane %v7334_v40, %v25269_v22  ;;  %v7364_v46 = vcombine.high %v7342_v36, %v7342_v36 }
 0xb51   :  { %v26729_v39 = vadd.f32 %v7342_v36, %v4920_v35 }
 0xb52   :  { %v7363_v11 = vrot.slane %v7335_v25, %v25269_v22  ;;  %v7365_v29 = vcombine.high %v7349_v18, %v7349_v18  ;;  %v7366_v33 = vcombine.high %v7356_v10, %v7356_v10  ;;  %v26732_v34 = vadd.f32 %v7356_v10, %v4934_v55 }
 0xb53   :  { %v26734_v37 = vadd.f32 %v7364_v46, %v4942_v24  ;;  %v26737_v52 = vadd.f32 %v7349_v18, %v26676_v45  ;;  %v4991_v55 = vcombine.high %v26704_v20, %v26704_v20  ;;  %v4992_v45 = vcombine.high %v26715_v5, %v26715_v5 }
 0xb54   :  { %v7367_v61 = vcombine.high %v7363_v11, %v7363_v11  ;;  %v26741_v35 = vadd.f32 %v7366_v33, %v4944_v58  ;;  %v26744_v62 = vadd.f32 %v7363_v11, %v26682_v3  ;;  %v26746_v27 = vadd.f32 %v7365_v29, %v4943_v30  ;;  %v7307_v57 = vpop.f32.mrf.mxu0 }
 0xb55   :  { %v7368_v63 = vcombine.high %v7307_v57, %v7307_v57  ;;  %v7375_v24 = vrot.slane %v7307_v57, %v25269_v22  ;;  %v8030_v3 = vrot.slane %v8016_v49, %v25269_v22  ;;  %v7933_v30 = vcombine.high %v26672_v47, %v26672_v47 }
 0xb56   :  { %v26753_v53 = vadd.f32 %v7367_v61, %v4945_v60  ;;  %v24371_v13 = vpop.f32.mrf.mxu0  ;;  %v4994_v60 = vcombine.high %v26723_v42, %v26723_v42 }
 0xb57   :  { %v7382_v56 = vrot.slane %v7368_v63, %v25269_v22  ;;  %v7383_v58 = vcombine.high %v7375_v24, %v7375_v24  ;;  %v7391_v1 = vrot.slane %v7375_v24, %v25269_v22  ;;  %v8031_v2 = vcombine.low %v8023_v54, %v8030_v3 }
 0xb58   :  { %v7312_v4 = vpop.f32.mrf.mxu0  ;;  %v8032_v38 = vcombine.low %v7933_v30, %v26667_v51 }
 0xb59   :  { %v7384_v17 = vcombine.high %v7382_v56, %v7382_v56  ;;  %v7398_v47 = vrot.slane %v7382_v56, %v25269_v22  ;;  %v7405_v44 = vrot.slane %v7383_v58, %v25269_v22  ;;  %v7413_v6 = vcombine.high %v7391_v1, %v7391_v1 }
 0xb5a   :  { %v26771_v28 = vadd.f32 %v7391_v1, %v26704_v20  ;;  %v7423_v32 = vrot.slane %v7312_v4, %v25269_v22  ;;  %v24374_v15 = vpop.f32.mrf.mxu0 }
 0xb5b   :  { %v7412_v59 = vrot.slane %v7384_v17, %v25269_v22  ;;  %v7414_v16 = vcombine.high %v7398_v47, %v7398_v47  ;;  %v7415_v7 = vcombine.high %v7405_v44, %v7405_v44  ;;  %v26777_v40 = vadd.f32 %v7405_v44, %v26720_v48 }
 0xb5c   :  { %v26779_v36 = vadd.f32 %v7413_v6, %v4991_v55  ;;  %v26782_v26 = vadd.f32 %v7398_v47, %v26715_v5  ;;  %v7424_v20 = vcombine.high %v7423_v32, %v7423_v32  ;;  %v7431_v43 = vrot.slane %v7423_v32, %v25269_v22  ;;  %v8116_v25 = vpop.f32.mrf.mxu0 }
 0xb5d   :  { %v7416_v18 = vcombine.high %v7412_v59, %v7412_v59  ;;  %v26785_v10 = vadd.f32 %v7415_v7, %v4993_v23  ;;  %v26788_v51 = vadd.f32 %v7412_v59, %v26723_v42  ;;  %v26790_v46 = vadd.f32 %v7414_v16, %v4992_v45 }
 0xb5e   :  { %v7438_v48 = vrot.slane %v7424_v20, %v25269_v22  ;;  %v26793_v41 = vadd.f32 %v7431_v43, %v5009_v8  ;;  %v8117_v9 = vadd.f32 %v8116_v25, %v7982_v19  ;;  %v24402_v49 = vpop.f32.mrf.mxu0  ;;  %v8039_v5 = vrot.slane %v8032_v38, %v25269_v22 }
 0xb5f   :  { %v26796_v11 = vadd.f32 %v7416_v18, %v4994_v60 }
 0xb60   :  { %v26798_v29 = vadd.f32 %v7438_v48, %v5016_v31  ;;  %v8133_v33 = vcombine.high %v8117_v9, %v8117_v9  ;;  %v8140_v21 = vrot.slane %v8117_v9, %v25269_v22  ;;  %v8121_v50 = vpop.f32.mrf.mxu0  ;;  %v8046_v45 = vrot.slane %v8039_v5, %v25269_v22 }
 0xb61   :  { %v8122_v42 = vadd.f32 %v8121_v50, %v8031_v2  ;;  %v7840_v48 = vcombine.high %v26643_v14, %v26643_v14 }
 0xb62   :  { %v8147_v61 = vrot.slane %v8133_v33, %v25269_v22  ;;  %v8148_v57 = vcombine.high %v8140_v21, %v8140_v21  ;;  %v24405_v55 = vpop.f32.mrf.mxu0  ;;  %v8156_v54 = vrot.slane %v8140_v21, %v25269_v22  ;;  %v8641_v21 = vmul.f32 0.35355338, %v26606_v12 }
 0xb63   :  { %v8182_v63 = vcombine.high %v8122_v42, %v8122_v42  ;;  %v8189_v24 = vrot.slane %v8122_v42, %v25269_v22 }
 0xb64   :  { %v8149_v13 = vcombine.high %v8147_v61, %v8147_v61  ;;  %v8170_v3 = vrot.slane %v8148_v57, %v25269_v22  ;;  %v8126_v30 = vpop.f32.mrf.mxu0  ;;  %v8163_v23 = vrot.slane %v8147_v61, %v25269_v22 }
 0xb65   :  { %v8196_v56 = vrot.slane %v8182_v63, %v25269_v22  ;;  %v8197_v58 = vcombine.high %v8189_v24, %v8189_v24  ;;  %v8205_v1 = vrot.slane %v8189_v24, %v25269_v22  ;;  %v8127_v4 = vadd.f32 %v8126_v30, %v8046_v45 }
 0xb66   :  { %v8177_v60 = vrot.slane %v8149_v13, %v25269_v22  ;;  %v8723_v8 = vcombine.low %v8156_v54, %v8170_v3  ;;  %v23424_v31 = vcombine.high %v8156_v54, %v8170_v3  ;;  %v24408_v19 = vpop.f32.mrf.mxu0  ;;  %v7854_v13 = vrot.slane %v7840_v48, %v25269_v22 }
 0xb67   :  { %v8198_v17 = vcombine.high %v8196_v56, %v8196_v56  ;;  %v8212_v47 = vrot.slane %v8196_v56, %v25269_v22  ;;  %v8219_v44 = vrot.slane %v8197_v58, %v25269_v22  ;;  %v8227_v6 = vcombine.high %v8205_v1, %v8205_v1 }
 0xb68   :  { %v8725_v32 = vcombine.low %v8163_v23, %v8177_v60  ;;  %v23425_v15 = vcombine.high %v8163_v23, %v8177_v60  ;;  %v8733_v2 = vrot.slane %v8723_v8, %v25269_v22  ;;  %v8740_v38 = vrot.slane %v23424_v31, %v25269_v22 }
 0xb69   :  { %v8226_v59 = vrot.slane %v8198_v17, %v25269_v22  ;;  %v8228_v16 = vcombine.high %v8212_v47, %v8212_v47  ;;  %v8229_v7 = vcombine.high %v8219_v44, %v8219_v44  ;;  %v8778_v20 = vrot.slane %v8205_v1, %v25269_v22 }
 0xb6a   :  { %v8747_v43 = vrot.slane %v8725_v32, %v25269_v22  ;;  %v8754_v25 = vrot.slane %v23425_v15, %v25269_v22  ;;  %v8755_v18 = vcombine.low %v8733_v2, %v8740_v38  ;;  %v8941_v9 = vcombine.low %v8219_v44, %v8227_v6  ;;  %v23418_v32 = vld [vmem:[%s29659_s8 + $0x3] ss:$0 sm:$0xff] }
 0xb6b   :  { %v8942_v49 = vcombine.low %v8229_v7, %v8212_v47  ;;  %v8230_v5 = vcombine.high %v8226_v59, %v8226_v59  ;;  %v8237_v33 = vrot.slane %v8127_v4, %v25269_v22  ;;  %v8785_v50 = vrot.slane %v8778_v20, %v25269_v22 }
 0xb6c   :  { %v8756_v42 = vcombine.low %v8747_v43, %v8754_v25  ;;  %v8943_v61 = vcombine.low %v8226_v59, %v8228_v16  ;;  %v8763_v14 = vrot.slane %v8755_v18, %v25269_v22  ;;  %v8951_v24 = vrot.slane %v8941_v9, %v25269_v22 }
 0xb6d   :  { %v8958_v57 = vrot.slane %v8942_v49, %v25269_v22  ;;  %v8238_v55 = vcombine.high %v8237_v33, %v8237_v33  ;;  %v8245_v45 = vrot.slane %v8237_v33, %v25269_v22  ;;  %24426 = vmatprep.subr.msk.mxu0 %vm1640_vm3, %v8785_v50  ;;  %v8715_v3 = vrot.slane %v8641_v21, %v25269_v22 }
 0xb6e   :  { %v8770_v63 = vrot.slane %v8756_v42, %v25269_v22  ;;  %24427 = vmatpush3.xpose.msk.msra.mxu0 %vm1640_vm3, %v8785_v50  ;;  %v8965_v23 = vrot.slane %v8943_v61, %v25269_v22  ;;  %v8650_v60 = vmul.f32 0.35355338, %v7854_v13  ;;  %v8265_v15 = vcombine.high %v23418_v32, %v23418_v32 }
 0xb6f   :  { %v8252_v12 = vrot.slane %v8238_v55, %v25269_v22  ;;  %v8944_v54 = vcombine.low %v8230_v5, %v8245_v45  ;;  %v8973_v1 = vcombine.low %v8951_v24, %v8958_v57  ;;  %v8722_v4 = vrot.slane %v8715_v3, %v25269_v22 }
 0xb70   :  { %v8771_v30 = vcombine.low %v8763_v14, %v8770_v63  ;;  %v8933_v47 = vrot.slane %v8650_v60, %v25269_v22  ;;  %v8272_v2 = vrot.slane %v23418_v32, %v25269_v22  ;;  %v8279_v38 = vrot.slane %v8265_v15, %v25269_v22 }
 0xb71   :  { %v8972_v56 = vrot.slane %v8944_v54, %v25269_v22  ;;  %v8996_v58 = vrot.slane %v8252_v12, %v25269_v22  ;;  %v8981_v19 = vrot.slane %v8973_v1, %v25269_v22 }
 0xb72   :  { %24428 = vmatprep.subr.msk.mxu0 %vm1640_vm3, %v8771_v30  ;;  %v8940_v6 = vrot.slane %v8933_v47, %v25269_v22  ;;  %v8280_v59 = vcombine.high %v8272_v2, %v8272_v2  ;;  %v8281_v16 = vcombine.high %v8279_v38, %v8279_v38  ;;  %v8288_v7 = vrot.slane %v8272_v2, %v25269_v22 }
 0xb73   :  { %v8974_v8 = vcombine.low %v8965_v23, %v8972_v56  ;;  %v9003_v31 = vrot.slane %v8996_v58, %v25269_v22  ;;  %24429 = vmatpush3.xpose.msk.msra.mxu0 %vm1640_vm3, %v8771_v30  ;;  %v8295_v20 = vrot.slane %v8279_v38, %v25269_v22 }
 0xb74   :  { %v8302_v43 = vrot.slane %v8280_v59, %v25269_v22  ;;  %v8309_v25 = vrot.slane %v8281_v16, %v25269_v22  ;;  %v8310_v5 = vcombine.high %v8288_v7, %v8288_v7  ;;  %v8363_v55 = vcombine.low %v8288_v7, %v8288_v7 }
 0xb75   :  { %24433 = vmatprep.subr.msk.mxu1 %vm1640_vm3, %v9003_v31  ;;  %v8988_v17 = vrot.slane %v8974_v8, %v25269_v22  ;;  %v8311_v33 = vcombine.high %v8295_v20, %v8295_v20 }
 0xb76   :  { %24434 = vmatpush3.xpose.msk.msra.mxu1 %vm1640_vm3, %v9003_v31  ;;  %24431 = vmatmul.mubr.msk.f32.vlgmr.msra.gmra.mxu0 %vm1640_vm3, %v8722_v4  ;;  %v8314_v18 = vcombine.low %v8288_v7, %v8302_v43  ;;  %v23419_v48 = vcombine.high %v8288_v7, %v8302_v43  ;;  %v8316_v9 = vcombine.low %v8295_v20, %v8309_v25 }
 0xb77   :  { %v8989_v44 = vcombine.low %v8981_v19, %v8988_v17  ;;  %v23420_v49 = vcombine.high %v8295_v20, %v8309_v25  ;;  %v8312_v21 = vcombine.high %v8302_v43, %v8302_v43  ;;  %v8364_v45 = vcombine.low %v8302_v43, %v8310_v5  ;;  %v8496_v17 = vpop.f32.mrf.mxu1 }
 0xb78   :  { %v8324_v50 = vrot.slane %v8314_v18, %v25269_v22  ;;  %v8331_v42 = vrot.slane %v23419_v48, %v25269_v22  ;;  %v8338_v61 = vrot.slane %v8316_v9, %v25269_v22  ;;  %v8366_v63 = vcombine.low %v8309_v25, %v8311_v33 }
 0xb79   :  { %24435 = vmatprep.subr.msk.mxu1 %vm1640_vm3, %v8989_v44  ;;  %v8345_v57 = vrot.slane %v23420_v49, %v25269_v22  ;;  %v8365_v14 = vcombine.low %v8312_v21, %v8295_v20  ;;  %v8373_v12 = vrot.slane %v8363_v55, %v25269_v22  ;;  %v8380_v54 = vrot.slane %v8364_v45, %v25269_v22 }
 0xb7a   :  { %24436 = vmatpush3.xpose.msk.msra.mxu1 %vm1640_vm3, %v8989_v44  ;;  %v8346_v24 = vcombine.low %v8324_v50, %v8331_v42  ;;  %v8394_v30 = vrot.slane %v8366_v63, %v25269_v22  ;;  %v8313_v60 = vcombine.high %v8309_v25, %v8309_v25 }
 0xb7b   :  { %24454 = vmatprep.subr.mxu1 %v25088_v0  ;;  %v8347_v13 = vcombine.low %v8338_v61, %v8345_v57  ;;  %v8387_v3 = vrot.slane %v8365_v14, %v25269_v22  ;;  %v8395_v58 = vcombine.low %v8373_v12, %v8380_v54 }
 0xb7c   :  { %v8354_v23 = vrot.slane %v8346_v24, %v25269_v22  ;;  %v8412_v19 = vcombine.low %v8313_v60, %v8288_v7 }
 0xb7d   :  { %24438 = vmatmul.mubr.msk.f32.vlgmr.msra.gmra.mxu1 %vm1640_vm3, %v8940_v6  ;;  %v8361_v56 = vrot.slane %v8347_v13, %v25269_v22  ;;  %v8396_v1 = vcombine.low %v8387_v3, %v8394_v30  ;;  %v8403_v31 = vrot.slane %v8395_v58, %v25269_v22  ;;  %v24419_v6 = vpop.f32.mrf.mxu1 }
 0xb7e   :  { %24456 = vmatprep.mubr.msk.f32.mxu1 %vm25090_vm2, %v25088_v0  ;;  %v8419_v32 = vrot.slane %v8412_v19, %v25269_v22 }
 0xb7f   :  { %v8362_v8 = vcombine.low %v8354_v23, %v8361_v56  ;;  %v8410_v4 = vrot.slane %v8396_v1, %v25269_v22  ;;  %v8501_v38 = vpop.f32.mrf.mxu1 }
 0xb80   :  { %v8426_v18 = vrot.slane %v8419_v32, %v25269_v22 }
 0xb81   :  { %v8497_v47 = vadd.f32 %v8496_v17, %v8362_v8  ;;  %v8411_v44 = vcombine.low %v8403_v31, %v8410_v4  ;;  %v24422_v25 = vpop.f32.mrf.mxu1 }
 0xb83   :  { %v8513_v15 = vcombine.high %v8497_v47, %v8497_v47  ;;  %v8520_v2 = vrot.slane %v8497_v47, %v25269_v22  ;;  %v8502_v43 = vadd.f32 %v8501_v38, %v8411_v44  ;;  %v8506_v33 = vpop.f32.mrf.mxu1 }
 0xb84   :  { %v8507_v45 = vadd.f32 %v8506_v33, %v8426_v18 }
 0xb85   :  { %v8527_v59 = vrot.slane %v8513_v15, %v25269_v22  ;;  %v8528_v16 = vcombine.high %v8520_v2, %v8520_v2  ;;  %v8536_v20 = vrot.slane %v8520_v2, %v25269_v22  ;;  %v8562_v49 = vcombine.high %v8502_v43, %v8502_v43  ;;  %v24425_v14 = vpop.f32.mrf.mxu1 }
 0xb86   :  { %v8569_v5 = vrot.slane %v8502_v43, %v25269_v22  ;;  %v8617_v58 = vrot.slane %v8507_v45, %v25269_v22 }
 0xb87   :  { %v8529_v7 = vcombine.high %v8527_v59, %v8527_v59  ;;  %v8543_v48 = vrot.slane %v8527_v59, %v25269_v22  ;;  %v8550_v9 = vrot.slane %v8528_v16, %v25269_v22  ;;  %v8576_v61 = vrot.slane %v8562_v49, %v25269_v22 }
 0xb88   :  { %v8577_v57 = vcombine.high %v8569_v5, %v8569_v5  ;;  %v8585_v55 = vrot.slane %v8569_v5, %v25269_v22  ;;  %v8618_v17 = vcombine.high %v8617_v58, %v8617_v58  ;;  %v8625_v47 = vrot.slane %v8617_v58, %v25269_v22 }
 0xb89   :  { %v8557_v21 = vrot.slane %v8529_v7, %v25269_v22  ;;  %v9131_v50 = vcombine.low %v8536_v20, %v8550_v9  ;;  %v23434_v42 = vcombine.high %v8536_v20, %v8550_v9  ;;  %v8578_v54 = vcombine.high %v8576_v61, %v8576_v61 }
 0xb8a   :  { %v8592_v3 = vrot.slane %v8576_v61, %v25269_v22  ;;  %v8599_v30 = vrot.slane %v8577_v57, %v25269_v22  ;;  %v8607_v23 = vcombine.high %v8585_v55, %v8585_v55  ;;  %v9186_v56 = vrot.slane %v8585_v55, %v25269_v22 }
 0xb8b   :  { %v9133_v63 = vcombine.low %v8543_v48, %v8557_v21  ;;  %v23435_v24 = vcombine.high %v8543_v48, %v8557_v21  ;;  %v9141_v13 = vrot.slane %v9131_v50, %v25269_v22  ;;  %v9148_v12 = vrot.slane %v23434_v42, %v25269_v22 }
 0xb8c   :  { %v8606_v8 = vrot.slane %v8578_v54, %v25269_v22  ;;  %v8608_v31 = vcombine.high %v8592_v3, %v8592_v3  ;;  %v8609_v4 = vcombine.high %v8599_v30, %v8599_v30  ;;  %v9278_v19 = vcombine.low %v8599_v30, %v8607_v23 }
 0xb8d   :  { %v9155_v1 = vrot.slane %v9133_v63, %v25269_v22  ;;  %v9162_v60 = vrot.slane %v23435_v24, %v25269_v22  ;;  %v9163_v44 = vcombine.low %v9141_v13, %v9148_v12  ;;  %v8632_v38 = vrot.slane %v8618_v17, %v25269_v22 }
 0xb8e   :  { %v9279_v32 = vcombine.low %v8609_v4, %v8592_v3  ;;  %v9280_v15 = vcombine.low %v8606_v8, %v8608_v31  ;;  %v8610_v2 = vcombine.high %v8606_v8, %v8606_v8  ;;  %v9193_v59 = vrot.slane %v9186_v56, %v25269_v22 }
 0xb8f   :  { %v9164_v6 = vcombine.low %v9155_v1, %v9162_v60  ;;  %v9171_v16 = vrot.slane %v9163_v44, %v25269_v22  ;;  %v9333_v25 = vrot.slane %v8632_v38, %v25269_v22  ;;  %v9288_v48 = vrot.slane %v9278_v19, %v25269_v22 }
 0xb90   :  { %v9281_v43 = vcombine.low %v8610_v2, %v8625_v47  ;;  %24440 = vmatprep.subr.msk.mxu0 %vm2058_vm6, %v9193_v59  ;;  %v9295_v9 = vrot.slane %v9279_v32, %v25269_v22  ;;  %v9302_v49 = vrot.slane %v9280_v15, %v25269_v22 }
 0xb91   :  { %v9178_v20 = vrot.slane %v9164_v6, %v25269_v22  ;;  %24441 = vmatpush3.msk.msra.mxu0 %vm2058_vm6, %v9193_v59  ;;  %v9340_v5 = vrot.slane %v9333_v25, %v25269_v22 }
 0xb92   :  { %v9309_v7 = vrot.slane %v9281_v43, %v25269_v22  ;;  %v9310_v33 = vcombine.low %v9288_v48, %v9295_v9 }
 0xb93   :  { %v9179_v18 = vcombine.low %v9171_v16, %v9178_v20 }
 0xb94   :  { %v9311_v21 = vcombine.low %v9302_v49, %v9309_v7  ;;  %v9318_v50 = vrot.slane %v9310_v33, %v25269_v22 }
 0xb95   :  { %24442 = vmatprep.subr.mxu0 %v9179_v18 }
 0xb96   :  { %24443 = vmatpush3.msra.mxu0 %v9179_v18  ;;  %v9325_v42 = vrot.slane %v9311_v21, %v25269_v22 }
 0xb97   :  { %24447 = vmatprep.subr.msk.mxu0 %vm2058_vm6, %v9340_v5 }
 0xb98   :  { %v9326_v61 = vcombine.low %v9318_v50, %v9325_v42  ;;  %v23442_v50 = vld [vmem:[%s29660_s9 + $0x18] sm:$0xff] }
 0xb99   :  { %24455 = vmatpush3.msra.mxu1 %v23442_v50 }
 0xb9a   :  { %24482 = vmatprep.subr.mxu1 %v25088_v0 }
 0xc36   :  { %v24432_v57 = vpop.f32.mrf.mxu0 }
 0xc37   :  { %v9090_v55 = vsel %vm1946_vm5, %v24432_v57, -inf }
 0xc38   :  { %9091 = vmax.xlane.f32.xlu1 %v9090_v55  ;;  %v8860_v45 = vpop.f32.mrf.mxu0 }
 0xc39   :  { %v9087_v14 = vsel %vm1942_vm4, %v8860_v45, -inf }
 0xc3a   :  { %9088 = vmax.xlane.f32.xlu0 %v9087_v14 }
 0xc3d   :  { %v24439_v63 = vpop.f32.mrf.mxu1 }
 0xc3e   :  { %v9096_v24 = vsel %vm1946_vm5, %v24439_v63, -inf }
 0xc3f   :  { %v9078_v13 = vpop.f32.mrf.mxu1  ;;  %9097 = vmax.xlane.f32.xlu1 %v9096_v24 }
 0xc40   :  { %v9093_v12 = vsel %vm1942_vm4, %v9078_v13, -inf }
 0xc41   :  { %9094 = vmax.xlane.f32.xlu0 %v9093_v12 }
 0xcc1   :  { %v9092_v54 = vpop.xlane.xlu1 %9091 }
 0xcc2   :  { %v9100_v3 = vsub.f32 %v24432_v57, %v9092_v54 }
 0xcc3   :  { %v9089_v30 = vpop.xlane.xlu0 %9088 }
 0xcc4   :  { %v9105_v23 = vmul.f32 1.442695, %v9100_v3  ;;  %v9099_v56 = vsub.f32 %v8860_v45, %v9089_v30 }
 0xcc6   :  { %24962 = vpow2.f32 %v9105_v23  ;;  %v9103_v58 = vmul.f32 1.442695, %v9099_v56 }
 0xcc8   :  { %24964 = vpow2.f32 %v9103_v58  ;;  %v9098_v1 = vpop.xlane.xlu1 %9097 }
 0xcc9   :  { %v9102_v60 = vsub.f32 %v24439_v63, %v9098_v1 }
 0xcca   :  { %v9095_v8 = vpop.xlane.xlu0 %9094 }
 0xccb   :  { %v9109_v31 = vmul.f32 1.442695, %v9102_v60  ;;  %v9101_v4 = vsub.f32 %v9078_v13, %v9095_v8 }
 0xccd   :  { %24966 = vpow2.f32 %v9109_v31  ;;  %v9107_v19 = vmul.f32 1.442695, %v9101_v4 }
 0xccf   :  { %24968 = vpow2.f32 %v9107_v19 }
 0xcd3   :  { %v24963_v17 = vpop.eup %24962 }
 0xcd4   :  { %v9114_v47 = vsel %vm1946_vm5, %v24963_v17, 0.0 }
 0xcd5   :  { %v24965_v44 = vpop.eup %24964  ;;  %9115 = vadd.xlane.f32.xlu1 %v9114_v47 }
 0xcd6   :  { %v9111_v6 = vsel %vm1942_vm4, %v24965_v44, 0.0 }
 0xcd7   :  { %9112 = vadd.xlane.f32.xlu0 %v9111_v6 }
 0xcda   :  { %v24967_v32 = vpop.eup %24966 }
 0xcdb   :  { %v9120_v15 = vsel %vm1946_vm5, %v24967_v32, 0.0 }
 0xcdc   :  { %v24969_v2 = vpop.eup %24968  ;;  %9121 = vadd.xlane.f32.xlu1 %v9120_v15 }
 0xcdd   :  { %v9117_v38 = vsel %vm1942_vm4, %v24969_v2, 0.0 }
 0xcde   :  { %9118 = vadd.xlane.f32.xlu0 %v9117_v38 }
 0xd5e   :  { %v9116_v59 = vpop.xlane.xlu1 %9115 }
 0xd5f   :  { %24970 = vrcp.f32 %v9116_v59 }
 0xd60   :  { %v9113_v16 = vpop.xlane.xlu0 %9112 }
 0xd61   :  { %24972 = vrcp.f32 %v9113_v16 }
 0xd65   :  { %v9122_v20 = vpop.xlane.xlu1 %9121 }
 0xd66   :  { %24974 = vrcp.f32 %v9122_v20 }
 0xd67   :  { %v9119_v43 = vpop.xlane.xlu0 %9118 }
 0xd68   :  { %24976 = vrcp.f32 %v9119_v43 }
 0xd6c   :  { %v24971_v25 = vpop.eup %24970 }
 0xd6d   :  { %v9128_v48 = vmul.f32 %v24971_v25, %v24963_v17 }
 0xd6e   :  { %v24973_v18 = vpop.eup %24972 }
 0xd6f   :  { %v9127_v7 = vmul.f32 %v24973_v18, %v24965_v44 }
 0xd71   :  { %24444 = vmatprep.mubr.msk.f32.mxu0 %vm1942_vm4, %v9127_v7 }
 0xd72   :  { %24445 = vmatmul.mubr.msk.f32.vlgmr.msra.gmra.mxu0 %vm1942_vm4, %v9128_v48 }
 0xd73   :  { %24448 = vmatpush3.msk.msra.mxu0 %vm2058_vm6, %v9340_v5  ;;  %v24975_v9 = vpop.eup %24974 }
 0xd74   :  { %24449 = vmatprep.subr.mxu0 %v9326_v61  ;;  %v9130_v21 = vmul.f32 %v24975_v9, %v24967_v32 }
 0xd75   :  { %v24977_v49 = vpop.eup %24976  ;;  %24450 = vmatpush3.msra.mxu0 %v9326_v61 }
 0xd76   :  { %v9129_v33 = vmul.f32 %v24977_v49, %v24969_v2  ;;  %24465 = vmatprep.subr.mxu0 %v25088_v0 }
 0xd78   :  { %24451 = vmatprep.mubr.msk.f32.mxu0 %vm1942_vm4, %v9129_v33 }
 0xd79   :  { %24452 = vmatmul.mubr.msk.f32.vlgmr.msra.gmra.mxu0 %vm1942_vm4, %v9130_v21 }
 0xd7a   :  { %24473 = vmatprep.mubr.msk.f32.mxu0 %vm25090_vm2, %v25088_v0 }
 0xe32   :  { %v24446_v5 = vpop.f32.mrf.mxu0 }
 0xe33   :  { %v9486_v12 = vrot.slane %v24446_v5, %v25269_v22 }
 0xe34   :  { %v9269_v42 = vpop.f32.mrf.mxu0 }
 0xe35   :  { %v9431_v61 = vcombine.high %v9269_v42, %v9269_v42  ;;  %v9438_v57 = vrot.slane %v9269_v42, %v25269_v22  ;;  %v9493_v44 = vrot.slane %v9486_v12, %v25269_v22 }
 0xe37   :  { %v9445_v55 = vrot.slane %v9431_v61, %v25269_v22  ;;  %v9446_v45 = vcombine.high %v9438_v57, %v9438_v57  ;;  %v9454_v63 = vrot.slane %v9438_v57, %v25269_v22 }
 0xe39   :  { %v9447_v14 = vcombine.high %v9445_v55, %v9445_v55  ;;  %v9468_v24 = vrot.slane %v9446_v45, %v25269_v22  ;;  %v24453_v13 = vpop.f32.mrf.mxu0  ;;  %v9461_v54 = vrot.slane %v9445_v55, %v25269_v22 }
 0xe3a   :  { %v9549_v43 = vrot.slane %v24453_v13, %v25269_v22 }
 0xe3b   :  { %v9475_v3 = vrot.slane %v9447_v14, %v25269_v22  ;;  %v9557_v30 = vcombine.low %v9454_v63, %v9468_v24  ;;  %v23443_v23 = vcombine.high %v9454_v63, %v9468_v24  ;;  %v9416_v56 = vpop.f32.mrf.mxu0 }
 0xe3c   :  { %v9494_v58 = vcombine.high %v9416_v56, %v9416_v56  ;;  %v9501_v1 = vrot.slane %v9416_v56, %v25269_v22  ;;  %v9556_v55 = vrot.slane %v9549_v43, %v25269_v22  ;;  %v23448_v56 = vld [vmem:[%s29661_s10] ss:$0 sm:$0xff] }
 0xe3d   :  { %v9559_v60 = vcombine.low %v9461_v54, %v9475_v3  ;;  %v23444_v8 = vcombine.high %v9461_v54, %v9475_v3  ;;  %v9567_v31 = vrot.slane %v9557_v30, %v25269_v22  ;;  %v9574_v4 = vrot.slane %v23443_v23, %v25269_v22 }
 0xe3e   :  { %v9508_v19 = vrot.slane %v9494_v58, %v25269_v22  ;;  %v9509_v17 = vcombine.high %v9501_v1, %v9501_v1  ;;  %v9517_v47 = vrot.slane %v9501_v1, %v25269_v22  ;;  %v9921_v58 = vcombine.high %v23448_v56, %v23448_v56 }
 0xe3f   :  { %v9581_v6 = vrot.slane %v9559_v60, %v25269_v22  ;;  %v9588_v32 = vrot.slane %v23444_v8, %v25269_v22  ;;  %v9589_v15 = vcombine.low %v9567_v31, %v9574_v4  ;;  %v9928_v1 = vrot.slane %v23448_v56, %v25269_v22 }
 0xe40   :  { %v9510_v2 = vcombine.high %v9508_v19, %v9508_v19  ;;  %v9524_v38 = vrot.slane %v9508_v19, %v25269_v22  ;;  %v9531_v59 = vrot.slane %v9509_v17, %v25269_v22  ;;  %v9539_v16 = vcombine.high %v9517_v47, %v9517_v47 }
 0xe41   :  { %v9590_v20 = vcombine.low %v9581_v6, %v9588_v32  ;;  %v9606_v25 = vcombine.low %v9493_v44, %v9517_v47  ;;  %v9597_v49 = vrot.slane %v9589_v15, %v25269_v22  ;;  %v9935_v60 = vrot.slane %v9921_v58, %v25269_v22 }
 0xe42   :  { %v9538_v18 = vrot.slane %v9510_v2, %v25269_v22  ;;  %v9540_v7 = vcombine.high %v9524_v38, %v9524_v38  ;;  %v9541_v48 = vcombine.high %v9531_v59, %v9531_v59  ;;  %v9607_v9 = vcombine.low %v9531_v59, %v9539_v16 }
 0xe43   :  { %v9604_v33 = vrot.slane %v9590_v20, %v25269_v22  ;;  %v9616_v21 = vrot.slane %v9606_v25, %v25269_v22  ;;  %v9936_v8 = vcombine.high %v9928_v1, %v9928_v1  ;;  %v9937_v31 = vcombine.high %v9935_v60, %v9935_v60 }
 0xe44   :  { %v9542_v50 = vcombine.high %v9538_v18, %v9538_v18  ;;  %v9608_v5 = vcombine.low %v9541_v48, %v9524_v38  ;;  %v9609_v42 = vcombine.low %v9538_v18, %v9540_v7  ;;  %v9623_v61 = vrot.slane %v9607_v9, %v25269_v22 }
 0xe45   :  { %v9605_v57 = vcombine.low %v9597_v49, %v9604_v33  ;;  %v26975_v19 = vrot.slane %v9928_v1, %v25269_v22  ;;  %v26979_v44 = vrot.slane %v9935_v60, %v25269_v22  ;;  %v26982_v6 = vrot.slane %v9936_v8, %v25269_v22 }
 0xe46   :  { %v9630_v45 = vrot.slane %v9608_v5, %v25269_v22  ;;  %v9637_v14 = vrot.slane %v9609_v42, %v25269_v22  ;;  %v9638_v63 = vcombine.low %v9616_v21, %v9623_v61  ;;  %v9655_v13 = vcombine.low %v9542_v50, %v9556_v55 }
 0xe47   :  { %24457 = vmatmul.mubr.msk.f32.vlgmr.msra.gmra.mxu1 %vm1640_vm3, %v9605_v57  ;;  %v26985_v32 = vrot.slane %v9937_v31, %v25269_v22  ;;  %v26991_v16 = vcombine.high %v26975_v19, %v26975_v19  ;;  %v26998_v48 = vcombine.high %v26979_v44, %v26979_v44  ;;  %v9968_v9 = vcombine.high %v26982_v6, %v26982_v6 }
 0xe48   :  { %24459 = vmatprep.mubr.msk.f32.mxu1 %vm25090_vm2, %v25088_v0  ;;  %v9639_v24 = vcombine.low %v9630_v45, %v9637_v14  ;;  %v9646_v12 = vrot.slane %v9638_v63, %v25269_v22  ;;  %v9662_v30 = vrot.slane %v9655_v13, %v25269_v22 }
 0xe49   :  { %v27004_v49 = vcombine.high %v26985_v32, %v26985_v32 }
 0xe4a   :  { %v9653_v54 = vrot.slane %v9639_v24, %v25269_v22  ;;  %v9669_v23 = vrot.slane %v9662_v30, %v25269_v22 }
 0xe4c   :  { %v9654_v3 = vcombine.low %v9646_v12, %v9653_v54 }
 0xe4e   :  { %24460 = vmatmul.mubr.msk.f32.gmra.mxu1 %vm1640_vm3, %v9654_v3 }
 0xe4f   :  { %24462 = vmatprep.mubr.msk.f32.mxu1 %vm25090_vm2, %v25088_v0 }
 0xe52   :  { %24463 = vmatmul.mubr.msk.f32.gmra.mxu1 %vm1640_vm3, %v9669_v23 }
 0xe53   :  { %24498 = vmatprep.mubr.msk.f32.mxu1 %vm25090_vm2, %v25088_v0 }
 0xf07   :  { %v9742_v4 = vpop.f32.mrf.mxu1 }
 0xf08   :  { %v9759_v17 = vcombine.high %v9742_v4, %v9742_v4  ;;  %v9766_v47 = vrot.slane %v9742_v4, %v25269_v22 }
 0xf09   :  { %v24458_v15 = vpop.f32.mrf.mxu1 }
 0xf0a   :  { %v9773_v2 = vrot.slane %v9759_v17, %v25269_v22  ;;  %v9774_v38 = vcombine.high %v9766_v47, %v9766_v47  ;;  %v9782_v59 = vrot.slane %v9766_v47, %v25269_v22 }
 0xf0c   :  { %v9775_v20 = vcombine.high %v9773_v2, %v9773_v2  ;;  %v9789_v43 = vrot.slane %v9773_v2, %v25269_v22  ;;  %v9796_v25 = vrot.slane %v9774_v38, %v25269_v22  ;;  %v9804_v18 = vcombine.high %v9782_v59, %v9782_v59 }
 0xf0d   :  { %v9897_v7 = vadd.f32 %v9782_v59, %v26729_v39 }
 0xf0e   :  { %v9803_v33 = vrot.slane %v9775_v20, %v25269_v22  ;;  %v9805_v21 = vcombine.high %v9789_v43, %v9789_v43  ;;  %v9806_v50 = vcombine.high %v9796_v25, %v9796_v25  ;;  %v9898_v5 = vadd.f32 %v9796_v25, %v26732_v34  ;;  %v9747_v42 = vpop.f32.mrf.mxu1 }
 0xf0f   :  { %v9899_v39 = vadd.f32 %v9804_v18, %v26734_v37  ;;  %v9901_v61 = vadd.f32 %v9789_v43, %v26737_v52  ;;  %v9978_v57 = vadd.f32 %v26975_v19, %v9897_v7  ;;  %v9808_v55 = vcombine.high %v9747_v42, %v9747_v42 }
 0xf10   :  { %v9807_v45 = vcombine.high %v9803_v33, %v9803_v33  ;;  %v9900_v14 = vadd.f32 %v9806_v50, %v26741_v35  ;;  %v9902_v63 = vadd.f32 %v9803_v33, %v26744_v62  ;;  %v9903_v24 = vadd.f32 %v9805_v21, %v26746_v27  ;;  %v24461_v13 = vpop.f32.mrf.mxu1 }
 0xf11   :  { %v9979_v12 = vadd.f32 %v26982_v6, %v9898_v5  ;;  %v9980_v34 = vadd.f32 %v26991_v16, %v9899_v39  ;;  %v9982_v54 = vadd.f32 %v26979_v44, %v9901_v61  ;;  %v9815_v37 = vrot.slane %v9747_v42, %v25269_v22 }
 0xf12   :  { %v9904_v52 = vadd.f32 %v9807_v45, %v26753_v53  ;;  %v9981_v3 = vadd.f32 %v9968_v9, %v9900_v14  ;;  %v9983_v30 = vadd.f32 %v26985_v32, %v9902_v63  ;;  %v9984_v35 = vadd.f32 %v26998_v48, %v9903_v24  ;;  %v9752_v23 = vpop.f32.mrf.mxu1 }
 0xf13   :  { %v10014_v62 = vcombine.low %v9978_v57, %v9979_v12  ;;  %v9822_v27 = vrot.slane %v9808_v55, %v25269_v22  ;;  %v9823_v56 = vcombine.high %v9815_v37, %v9815_v37  ;;  %v9831_v58 = vrot.slane %v9815_v37, %v25269_v22 }
 0xf14   :  { %v10015_v1 = vcombine.low %v9980_v34, %v9981_v3  ;;  %v10016_v60 = vcombine.low %v9982_v54, %v9983_v30  ;;  %v9863_v8 = vrot.slane %v9752_v23, %v25269_v22  ;;  %v9985_v31 = vadd.f32 %v27004_v49, %v9904_v52  ;;  %v24464_v4 = vpop.f32.mrf.mxu1 }
 0xf15   :  { %v9824_v53 = vcombine.high %v9822_v27, %v9822_v27  ;;  %v9838_v17 = vrot.slane %v9822_v27, %v25269_v22  ;;  %v9845_v47 = vrot.slane %v9823_v56, %v25269_v22  ;;  %v9853_v15 = vcombine.high %v9831_v58, %v9831_v58  ;;  %v25083_v4 = vld [vmem:[%s29688_s3 + $0x8] sm:$0x1] }
 0xf16   :  { %v9864_v2 = vcombine.high %v9863_v8, %v9863_v8  ;;  %v9871_v38 = vrot.slane %v9863_v8, %v25269_v22  ;;  %v10017_v59 = vcombine.low %v9984_v35, %v9985_v31  ;;  %v9905_v7 = vadd.f32 %v9831_v58, %v26771_v28  ;;  %v25082_v58 = vld [vmem:[%s29688_s3] sm:$0xff] }
 0xf17   :  { %v9852_v20 = vrot.slane %v9824_v53, %v25269_v22  ;;  %v9854_v43 = vcombine.high %v9838_v17, %v9838_v17  ;;  %v9855_v25 = vcombine.high %v9845_v47, %v9845_v47  ;;  %v9906_v18 = vadd.f32 %v9845_v47, %v26777_v40 }
 0xf18   :  { %v9907_v33 = vadd.f32 %v9853_v15, %v26779_v36  ;;  %v9909_v21 = vadd.f32 %v9838_v17, %v26782_v26  ;;  %v9878_v50 = vrot.slane %v9864_v2, %v25269_v22  ;;  %v9913_v28 = vadd.f32 %v9871_v38, %v26793_v41  ;;  %v25084_v17 = vld [vmem:[%s29688_s3 + $0x10] sm:$0xff]  ;;  %v25085_v2 = vld [vmem:[%s29688_s3 + $0x18] sm:$0x1] }
 0xf19   :  { %v9856_v5 = vcombine.high %v9852_v20, %v9852_v20  ;;  %v9908_v42 = vadd.f32 %v9855_v25, %v26785_v10  ;;  %v9910_v39 = vadd.f32 %v9852_v20, %v26788_v51  ;;  %v9911_v61 = vadd.f32 %v9854_v43, %v26790_v46 }
 0xf1a   :  { %v9987_v57 = vadd.f32 %v26975_v19, %v9906_v18  ;;  %v9988_v55 = vadd.f32 %v26982_v6, %v9907_v33  ;;  %v9990_v40 = vadd.f32 %v9968_v9, %v9909_v21  ;;  %v9986_v10 = vadd.f32 %v26975_v19, %v9905_v7 }
 0xf1b   :  { %v9912_v36 = vadd.f32 %v9856_v5, %v26796_v11  ;;  %v9989_v26 = vadd.f32 %v26991_v16, %v9908_v42  ;;  %v9991_v45 = vadd.f32 %v26979_v44, %v9910_v39  ;;  %v9992_v14 = vadd.f32 %v26985_v32, %v9911_v61 }
 0xf1c   :  { %v10077_v51 = vcombine.low %v9987_v57, %v9988_v55  ;;  %v9914_v46 = vadd.f32 %v9878_v50, %v26798_v29  ;;  %v9994_v63 = vadd.f32 %v27004_v49, %v9913_v28  ;;  %v10024_v41 = vrot.slane %v10014_v62, %v25269_v22 }
 0xf1d   :  { %v10078_v24 = vcombine.low %v9989_v26, %v9990_v40  ;;  %v9993_v6 = vadd.f32 %v26998_v48, %v9912_v36  ;;  %v10031_v11 = vrot.slane %v10015_v1, %v25269_v22  ;;  %v10038_v16 = vrot.slane %v10016_v60, %v25269_v22 }
 0xf1e   :  { %v10045_v44 = vrot.slane %v10017_v59, %v25269_v22  ;;  %v10079_v9 = vcombine.low %v9991_v45, %v9992_v14  ;;  %v10087_v32 = vrot.slane %v10077_v51, %v25269_v22  ;;  %v9995_v49 = vadd.f32 %v26975_v19, %v9914_v46  ;;  %v10226_v51 = vld [vmem:[%s29662_s13 + $0x18] sm:$0xff]  ;;  %v10225_v46 = vld [vmem:[%s29662_s13 + $0x10] sm:$0xff] }
 0xf1f   :  { %v10080_v13 = vcombine.low %v9993_v6, %v9994_v63  ;;  %v10046_v12 = vcombine.low %v10024_v41, %v10031_v11  ;;  %v10094_v29 = vrot.slane %v10078_v24, %v25269_v22  ;;  %v10069_v48 = vrot.slane %v9986_v10, %v25269_v22  ;;  %24466 = vmatpush3.msra.mxu0 %v10226_v51  ;;  %v10224_v63 = vld [vmem:[%s29662_s13 + $0x8] sm:$0xff]  ;;  %v10223_v24 = vld [vmem:[%s29662_s13] sm:$0xff] }
 0xf20   :  { %v10047_v34 = vcombine.low %v10038_v16, %v10045_v44  ;;  %v10101_v54 = vrot.slane %v10079_v9, %v25269_v22  ;;  %v10132_v23 = vrot.slane %v9995_v49, %v25269_v22  ;;  %24467 = vmatprep.subr.mxu0 %v25088_v0 }
 0xf21   :  { %v10108_v37 = vrot.slane %v10080_v13, %v25269_v22  ;;  %v10109_v52 = vcombine.low %v10087_v32, %v10094_v29  ;;  %v10054_v3 = vrot.slane %v10046_v12, %v25269_v22  ;;  %v10076_v27 = vrot.slane %v10069_v48, %v25269_v22  ;;  %24468 = vmatpush3.msra.mxu0 %v10225_v46 }
 0xf22   :  { %v10061_v30 = vrot.slane %v10047_v34, %v25269_v22  ;;  %v10139_v8 = vrot.slane %v10132_v23, %v25269_v22  ;;  %24469 = vmatprep.subr.mxu0 %v25088_v0 }
 0xf23   :  { %v10110_v35 = vcombine.low %v10101_v54, %v10108_v37  ;;  %v10117_v19 = vrot.slane %v10109_v52, %v25269_v22  ;;  %v10145_v53 = vadd.f32 %v25083_v4, %v10076_v27  ;;  %24470 = vmatpush3.msra.mxu0 %v10224_v63  ;;  %v23449_v54 = vld [vmem:[%s29663_s11] ss:$0 sm:$0xff] }
 0xf24   :  { %v10062_v62 = vcombine.low %v10054_v3, %v10061_v30  ;;  %v10147_v38 = vadd.f32 %v25085_v2, %v10139_v8  ;;  %24471 = vmatprep.subr.mxu0 %v25088_v0  ;;  %v23450_v52 = vld [vmem:[%s29664_s12] ss:$0 sm:$0xff] }
 0xf25   :  { %v10124_v56 = vrot.slane %v10110_v35, %v25269_v22  ;;  %v10153_v59 = vsel %vm73_vm0, %v10145_v53, 0.0  ;;  %24472 = vmatpush3.msra.mxu0 %v10223_v24 }
 0xf26   :  { %v10144_v1 = vadd.f32 %v25082_v58, %v10062_v62  ;;  %v10159_v20 = vsel %vm73_vm0, %v10147_v38, 0.0  ;;  %24507 = vmatprep.subr.mxu0 %v25088_v0 }
 0xf27   :  { %v10125_v60 = vcombine.low %v10117_v19, %v10124_v56 }
 0xf28   :  { %v10150_v31 = vsel %vm79_vm1, %v10144_v1, 0.0 }
 0xf29   :  { %10151 = vadd.xlane.f32.xlu0 %v10150_v31  ;;  %v10146_v47 = vadd.f32 %v25084_v17, %v10125_v60 }
 0xf2b   :  { %v10156_v15 = vsel %vm79_vm1, %v10146_v47, 0.0 }
 0xf2c   :  { %10157 = vadd.xlane.f32.xlu1 %v10156_v15 }
 0xf2d   :  { %10154 = vadd.xlane.f32.xlu0 %v10153_v59 }
 0xf30   :  { %10160 = vadd.xlane.f32.xlu1 %v10159_v20 }
 0xfb2   :  { %v10152_v43 = vpop.xlane.xlu0 %10151 }
 0xfb3   :  { %v10163_v25 = vmul.f32 0.03125, %v10152_v43 }
 0xfb5   :  { %v10167_v18 = vsub.f32 %v10144_v1, %v10163_v25  ;;  %v10158_v7 = vpop.xlane.xlu1 %10157 }
 0xfb6   :  { %v10155_v33 = vpop.xlane.xlu0 %10154  ;;  %v10165_v21 = vmul.f32 0.03125, %v10158_v7 }
 0xfb7   :  { %v10164_v50 = vmul.f32 0.03125, %v10155_v33  ;;  %v10171_v5 = vmul.f32 %v10167_v18, %v10167_v18 }
 0xfb8   :  { %v10169_v42 = vsub.f32 %v10146_v47, %v10165_v21 }
 0xfb9   :  { %v10168_v39 = vsub.f32 %v10145_v53, %v10164_v50  ;;  %v10175_v61 = vsel %vm79_vm1, %v10171_v5, 0.0  ;;  %v10161_v57 = vpop.xlane.xlu1 %10160 }
 0xfba   :  { %10176 = vadd.xlane.f32.xlu0 %v10175_v61  ;;  %v10166_v55 = vmul.f32 0.03125, %v10161_v57  ;;  %v10173_v40 = vmul.f32 %v10169_v42, %v10169_v42 }
 0xfbb   :  { %v10172_v28 = vmul.f32 %v10168_v39, %v10168_v39 }
 0xfbc   :  { %v10170_v36 = vsub.f32 %v10147_v38, %v10166_v55  ;;  %v10181_v26 = vsel %vm79_vm1, %v10173_v40, 0.0 }
 0xfbd   :  { %v10178_v45 = vsel %vm73_vm0, %v10172_v28, 0.0  ;;  %10182 = vadd.xlane.f32.xlu1 %v10181_v26 }
 0xfbe   :  { %10179 = vadd.xlane.f32.xlu0 %v10178_v45  ;;  %v10174_v14 = vmul.f32 %v10170_v36, %v10170_v36 }
 0xfc0   :  { %v10184_v10 = vsel %vm73_vm0, %v10174_v14, 0.0 }
 0xfc1   :  { %10185 = vadd.xlane.f32.xlu1 %v10184_v10 }
0x1043   :  { %v10177_v6 = vpop.xlane.xlu0 %10176 }
0x1044   :  { %v10187_v41 = vmul.f32 0.03125, %v10177_v6 }
0x1046   :  { %v10191_v11 = vadd.f32 1e-05, %v10187_v41  ;;  %v10183_v16 = vpop.xlane.xlu1 %10182 }
0x1047   :  { %v10180_v44 = vpop.xlane.xlu0 %10179  ;;  %v10189_v9 = vmul.f32 0.03125, %v10183_v16 }
0x1048   :  { %24978 = vrsqrt.f32 %v10191_v11  ;;  %v10188_v32 = vmul.f32 0.03125, %v10180_v44 }
0x1049   :  { %v10193_v13 = vadd.f32 1e-05, %v10189_v9 }
0x104a   :  { %v10192_v12 = vadd.f32 1e-05, %v10188_v32  ;;  %v10186_v29 = vpop.xlane.xlu1 %10185 }
0x104b   :  { %24980 = vrsqrt.f32 %v10193_v13  ;;  %v10190_v49 = vmul.f32 0.03125, %v10186_v29 }
0x104c   :  { %24982 = vrsqrt.f32 %v10192_v12 }
0x104d   :  { %v10194_v34 = vadd.f32 1e-05, %v10190_v49 }
0x104f   :  { %24984 = vrsqrt.f32 %v10194_v34 }
0x1055   :  { %v24979_v48 = vpop.eup %24978 }
0x1056   :  { %v10199_v37 = vmul.f32 %v24979_v48, %v10167_v18 }
0x1058   :  { %v24981_v3 = vpop.eup %24980  ;;  %v10209_v30 = vmul.f32 %v23449_v54, %v10199_v37 }
0x1059   :  { %v24983_v35 = vpop.eup %24982  ;;  %v10201_v23 = vmul.f32 %v24981_v3, %v10169_v42 }
0x105a   :  { %v27107_v62 = vadd.f32 %v23450_v52, %v10209_v30  ;;  %v10200_v27 = vmul.f32 %v24983_v35, %v10168_v39 }
0x105b   :  { %v10211_v19 = vmul.f32 %v23449_v54, %v10201_v23 }
0x105c   :  { %v24985_v56 = vpop.eup %24984  ;;  %v10237_v58 = vcombine.high %v27107_v62, %v27107_v62  ;;  %v10210_v1 = vmul.f32 %v23449_v54, %v10200_v27  ;;  %v10244_v60 = vrot.slane %v27107_v62, %v25269_v22 }
0x105d   :  { %v27113_v8 = vadd.f32 %v23450_v52, %v10211_v19  ;;  %v10202_v31 = vmul.f32 %v24985_v56, %v10170_v36 }
0x105e   :  { %v27115_v4 = vadd.f32 %v23450_v52, %v10210_v1  ;;  %v10251_v53 = vrot.slane %v10237_v58, %v25269_v22  ;;  %v10252_v17 = vcombine.high %v10244_v60, %v10244_v60  ;;  %v10260_v15 = vrot.slane %v10244_v60, %v25269_v22  ;;  %v10893_v58 = vld [vmem:[%s29665_s15 + $0x38] sm:$0xff]  ;;  %v10892_v1 = vld [vmem:[%s29665_s15 + $0x30] sm:$0xff]  ;;  %v10891_v60 = vld [vmem:[%s29665_s15 + $0x28] sm:$0xff] }
0x105f   :  { %v10212_v47 = vmul.f32 %v23449_v54, %v10202_v31  ;;  %v10300_v2 = vcombine.high %v27113_v8, %v27113_v8  ;;  %v10307_v38 = vrot.slane %v27113_v8, %v25269_v22  ;;  %24483 = vmatpush3.msra.mxu1 %v10893_v58  ;;  %v10890_v31 = vld [vmem:[%s29665_s15 + $0x20] sm:$0xff] }
0x1060   :  { %v10253_v59 = vcombine.high %v10251_v53, %v10251_v53  ;;  %v10267_v20 = vrot.slane %v10251_v53, %v25269_v22  ;;  %v10274_v43 = vrot.slane %v10252_v17, %v25269_v22  ;;  %v10292_v25 = vrot.slane %v27115_v4, %v25269_v22  ;;  %24484 = vmatprep.subr.mxu1 %v25088_v0  ;;  %v10889_v53 = vld [vmem:[%s29665_s15 + $0x18] sm:$0xff]  ;;  %v10888_v17 = vld [vmem:[%s29665_s15 + $0x10] sm:$0xff] }
0x1061   :  { %v10314_v18 = vrot.slane %v10300_v2, %v25269_v22  ;;  %v10315_v7 = vcombine.high %v10307_v38, %v10307_v38  ;;  %v10323_v33 = vrot.slane %v10307_v38, %v25269_v22  ;;  %v27129_v21 = vadd.f32 %v23450_v52, %v10212_v47  ;;  %24485 = vmatpush3.msra.mxu1 %v10892_v1  ;;  %v10887_v47 = vld [vmem:[%s29665_s15 + $0x8] sm:$0xff]  ;;  %v23451_v2 = vld [vmem:[%s29666_s14] ss:$0 sm:$0xff] }
0x1062   :  { %v10281_v50 = vrot.slane %v10253_v59, %v25269_v22  ;;  %v10412_v5 = vcombine.low %v10260_v15, %v10274_v43  ;;  %v23452_v42 = vcombine.high %v10260_v15, %v10274_v43  ;;  %v10299_v39 = vrot.slane %v10292_v25, %v25269_v22  ;;  %24486 = vmatprep.subr.mxu1 %v25088_v0  ;;  %v10886_v15 = vld [vmem:[%s29665_s15] sm:$0xff] }
0x1063   :  { %v10316_v61 = vcombine.high %v10314_v18, %v10314_v18  ;;  %v10330_v57 = vrot.slane %v10314_v18, %v25269_v22  ;;  %v10337_v55 = vrot.slane %v10315_v7, %v25269_v22  ;;  %v10345_v40 = vcombine.high %v10323_v33, %v10323_v33  ;;  %24487 = vmatpush3.msra.mxu1 %v10891_v60 }
0x1064   :  { %v10414_v28 = vcombine.low %v10267_v20, %v10281_v50  ;;  %v23453_v36 = vcombine.high %v10267_v20, %v10281_v50  ;;  %v10422_v26 = vrot.slane %v10412_v5, %v25269_v22  ;;  %v10429_v45 = vrot.slane %v23452_v42, %v25269_v22  ;;  %24488 = vmatprep.subr.mxu1 %v25088_v0 }
0x1065   :  { %v10344_v14 = vrot.slane %v10316_v61, %v25269_v22  ;;  %v10346_v10 = vcombine.high %v10330_v57, %v10330_v57  ;;  %v10347_v51 = vcombine.high %v10337_v55, %v10337_v55  ;;  %v10461_v46 = vcombine.low %v10299_v39, %v10323_v33  ;;  %24489 = vmatpush3.msra.mxu1 %v10890_v31 }
0x1066   :  { %v10436_v63 = vrot.slane %v10414_v28, %v25269_v22  ;;  %v10443_v24 = vrot.slane %v23453_v36, %v25269_v22  ;;  %v10444_v6 = vcombine.low %v10422_v26, %v10429_v45  ;;  %v10462_v41 = vcombine.low %v10337_v55, %v10345_v40  ;;  %24490 = vmatprep.subr.mxu1 %v25088_v0 }
0x1067   :  { %v10463_v11 = vcombine.low %v10347_v51, %v10330_v57  ;;  %v10464_v16 = vcombine.low %v10344_v14, %v10346_v10  ;;  %v10471_v44 = vrot.slane %v10461_v46, %v25269_v22  ;;  %v10348_v13 = vcombine.high %v10344_v14, %v10344_v14  ;;  %24491 = vmatpush3.msra.mxu1 %v10889_v53 }
0x1068   :  { %v10445_v9 = vcombine.low %v10436_v63, %v10443_v24  ;;  %v10478_v32 = vrot.slane %v10462_v41, %v25269_v22  ;;  %v10355_v12 = vrot.slane %v27129_v21, %v25269_v22  ;;  %v10452_v34 = vrot.slane %v10444_v6, %v25269_v22  ;;  %24492 = vmatprep.subr.mxu1 %v25088_v0 }
0x1069   :  { %v10485_v29 = vrot.slane %v10463_v11, %v25269_v22  ;;  %v10492_v49 = vrot.slane %v10464_v16, %v25269_v22  ;;  %24493 = vmatpush3.msra.mxu1 %v10888_v17  ;;  %v10363_v38 = vcombine.high %v23451_v2, %v23451_v2  ;;  %v10370_v59 = vrot.slane %v23451_v2, %v25269_v22 }
0x106a   :  { %v10459_v48 = vrot.slane %v10445_v9, %v25269_v22  ;;  %v10493_v54 = vcombine.low %v10471_v44, %v10478_v32  ;;  %v10362_v37 = vrot.slane %v10355_v12, %v25269_v22  ;;  %24494 = vmatprep.subr.mxu1 %v25088_v0 }
0x106b   :  { %v10494_v52 = vcombine.low %v10485_v29, %v10492_v49  ;;  %24495 = vmatpush3.msra.mxu1 %v10887_v47  ;;  %v10377_v20 = vrot.slane %v10363_v38, %v25269_v22  ;;  %v10378_v43 = vcombine.high %v10370_v59, %v10370_v59  ;;  %v10386_v18 = vrot.slane %v10370_v59, %v25269_v22 }
0x106c   :  { %v10460_v3 = vcombine.low %v10452_v34, %v10459_v48  ;;  %v10510_v30 = vcombine.low %v10348_v13, %v10362_v37  ;;  %v10501_v35 = vrot.slane %v10493_v54, %v25269_v22  ;;  %24496 = vmatprep.subr.mxu1 %v25088_v0 }
0x106d   :  { %v10508_v23 = vrot.slane %v10494_v52, %v25269_v22  ;;  %24497 = vmatpush3.msra.mxu1 %v10886_v15  ;;  %v10379_v25 = vcombine.high %v10377_v20, %v10377_v20  ;;  %v10393_v7 = vrot.slane %v10377_v20, %v25269_v22  ;;  %v10400_v33 = vrot.slane %v10378_v43, %v25269_v22 }
0x106e   :  { %24474 = vmatmul.mubr.msk.f32.vlgmr.msra.gmra.mxu0 %vm79_vm1, %v10460_v3  ;;  %v10517_v19 = vrot.slane %v10510_v30, %v25269_v22  ;;  %24524 = vmatprep.subr.mxu1 %v25088_v0  ;;  %v10408_v57 = vcombine.high %v10386_v18, %v10386_v18  ;;  %v10574_v14 = vcombine.low %v10386_v18, %v10386_v18 }
0x106f   :  { %24476 = vmatprep.mubr.msk.f32.mxu0 %vm25090_vm2, %v25088_v0  ;;  %v10509_v27 = vcombine.low %v10501_v35, %v10508_v23  ;;  %v10407_v50 = vrot.slane %v10379_v25, %v25269_v22  ;;  %v10525_v5 = vcombine.low %v10386_v18, %v10400_v33  ;;  %v23454_v42 = vcombine.high %v10386_v18, %v10400_v33 }
0x1070   :  { %v10524_v56 = vrot.slane %v10517_v19, %v25269_v22  ;;  %v10409_v55 = vcombine.high %v10393_v7, %v10393_v7  ;;  %v10410_v40 = vcombine.high %v10400_v33, %v10400_v33  ;;  %v10575_v10 = vcombine.low %v10400_v33, %v10408_v57 }
0x1071   :  { %v10527_v39 = vcombine.low %v10393_v7, %v10407_v50  ;;  %v23455_v61 = vcombine.high %v10393_v7, %v10407_v50  ;;  %v10535_v28 = vrot.slane %v10525_v5, %v25269_v22  ;;  %v10542_v36 = vrot.slane %v23454_v42, %v25269_v22 }
0x1072   :  { %24477 = vmatmul.mubr.msk.f32.gmra.mxu0 %vm79_vm1, %v10509_v27  ;;  %v10576_v51 = vcombine.low %v10410_v40, %v10393_v7  ;;  %v10577_v46 = vcombine.low %v10407_v50, %v10409_v55  ;;  %v10584_v6 = vrot.slane %v10574_v14, %v25269_v22  ;;  %v10591_v41 = vrot.slane %v10575_v10, %v25269_v22 }
0x1073   :  { %24479 = vmatprep.mubr.msk.f32.mxu0 %vm25090_vm2, %v25088_v0  ;;  %v10549_v26 = vrot.slane %v10527_v39, %v25269_v22  ;;  %v10556_v45 = vrot.slane %v23455_v61, %v25269_v22  ;;  %v10557_v63 = vcombine.low %v10535_v28, %v10542_v36  ;;  %v10411_v12 = vcombine.high %v10407_v50, %v10407_v50 }
0x1074   :  { %v10598_v11 = vrot.slane %v10576_v51, %v25269_v22  ;;  %v10605_v16 = vrot.slane %v10577_v46, %v25269_v22  ;;  %v10606_v32 = vcombine.low %v10584_v6, %v10591_v41 }
0x1075   :  { %v10558_v24 = vcombine.low %v10549_v26, %v10556_v45  ;;  %v10565_v44 = vrot.slane %v10557_v63, %v25269_v22  ;;  %v10623_v54 = vcombine.low %v10411_v12, %v10386_v18 }
0x1076   :  { %24480 = vmatmul.mubr.msk.f32.gmra.mxu0 %vm79_vm1, %v10524_v56  ;;  %v10607_v13 = vcombine.low %v10598_v11, %v10605_v16  ;;  %v10614_v49 = vrot.slane %v10606_v32, %v25269_v22 }
0x1077   :  { %24515 = vmatprep.mubr.msk.f32.mxu0 %vm25090_vm2, %v25088_v0  ;;  %v10572_v9 = vrot.slane %v10558_v24, %v25269_v22  ;;  %v10630_v27 = vrot.slane %v10623_v54, %v25269_v22 }
0x1078   :  { %v10621_v34 = vrot.slane %v10607_v13, %v25269_v22 }
0x1079   :  { %v10573_v29 = vcombine.low %v10565_v44, %v10572_v9  ;;  %v10637_v59 = vrot.slane %v10630_v27, %v25269_v22 }
0x107a   :  { %v10622_v52 = vcombine.low %v10614_v49, %v10621_v34 }
0x112e   :  { %v10713_v48 = vpop.f32.mrf.mxu0 }
0x112f   :  { %v10714_v37 = vadd.f32 %v10713_v48, %v10573_v29 }
0x1130   :  { %v24475_v3 = vpop.f32.mrf.mxu0 }
0x1131   :  { %v10730_v30 = vcombine.high %v10714_v37, %v10714_v37  ;;  %v10737_v35 = vrot.slane %v10714_v37, %v25269_v22 }
0x1132   :  { %v10718_v23 = vpop.f32.mrf.mxu0 }
0x1133   :  { %v10744_v19 = vrot.slane %v10730_v30, %v25269_v22  ;;  %v10745_v56 = vcombine.high %v10737_v35, %v10737_v35  ;;  %v10753_v58 = vrot.slane %v10737_v35, %v25269_v22  ;;  %v10719_v1 = vadd.f32 %v10718_v23, %v10622_v52 }
0x1134   :  { %v24478_v60 = vpop.f32.mrf.mxu0 }
0x1135   :  { %v10746_v31 = vcombine.high %v10744_v19, %v10744_v19  ;;  %v10760_v53 = vrot.slane %v10744_v19, %v25269_v22  ;;  %v10767_v17 = vrot.slane %v10745_v56, %v25269_v22  ;;  %v10775_v47 = vcombine.high %v10753_v58, %v10753_v58 }
0x1136   :  { %v10868_v15 = vmax.f32 %v10753_v58, 0.0  ;;  %v10779_v2 = vcombine.high %v10719_v1, %v10719_v1  ;;  %v10786_v38 = vrot.slane %v10719_v1, %v25269_v22  ;;  %v10723_v20 = vpop.f32.mrf.mxu0 }
0x1137   :  { %v10774_v43 = vrot.slane %v10746_v31, %v25269_v22  ;;  %v10776_v25 = vcombine.high %v10760_v53, %v10760_v53  ;;  %v10777_v18 = vcombine.high %v10767_v17, %v10767_v17  ;;  %v10869_v7 = vmax.f32 %v10767_v17, 0.0 }
0x1138   :  { %v10870_v33 = vmax.f32 %v10775_v47, 0.0  ;;  %v10872_v50 = vmax.f32 %v10760_v53, 0.0  ;;  %v10793_v5 = vrot.slane %v10779_v2, %v25269_v22  ;;  %v10794_v42 = vcombine.high %v10786_v38, %v10786_v38  ;;  %v24481_v39 = vpop.f32.mrf.mxu0 }
0x1139   :  { %v10778_v61 = vcombine.high %v10774_v43, %v10774_v43  ;;  %v10871_v57 = vmax.f32 %v10777_v18, 0.0  ;;  %v10873_v55 = vmax.f32 %v10774_v43, 0.0  ;;  %v10874_v40 = vmax.f32 %v10776_v25, 0.0 }
0x113a   :  { %v10967_v28 = vcombine.low %v10868_v15, %v10869_v7  ;;  %v10795_v36 = vcombine.high %v10793_v5, %v10793_v5  ;;  %v10802_v26 = vrot.slane %v10786_v38, %v25269_v22  ;;  %v10809_v45 = vrot.slane %v10793_v5, %v25269_v22 }
0x113b   :  { %v10875_v14 = vmax.f32 %v10778_v61, 0.0  ;;  %v10968_v10 = vcombine.low %v10870_v33, %v10871_v57  ;;  %v10969_v51 = vcombine.low %v10872_v50, %v10873_v55  ;;  %v10816_v46 = vrot.slane %v10794_v42, %v25269_v22  ;;  %v23459_v61 = vld [vmem:[%s29667_s16] ss:$0 sm:$0xff] }
0x113c   :  { %v10977_v63 = vrot.slane %v10967_v28, %v25269_v22  ;;  %v10823_v24 = vrot.slane %v10795_v36, %v25269_v22  ;;  %v10824_v6 = vcombine.high %v10802_v26, %v10802_v26  ;;  %v10825_v41 = vcombine.high %v10809_v45, %v10809_v45 }
0x113d   :  { %v10970_v11 = vcombine.low %v10874_v40, %v10875_v14  ;;  %v10984_v16 = vrot.slane %v10968_v10, %v25269_v22  ;;  %v10991_v44 = vrot.slane %v10969_v51, %v25269_v22  ;;  %v10826_v9 = vcombine.high %v10816_v46, %v10816_v46 }
0x113e   :  { %v10827_v32 = vcombine.high %v10823_v24, %v10823_v24  ;;  %v10876_v13 = vmax.f32 %v10802_v26, 0.0  ;;  %v10877_v12 = vmax.f32 %v10816_v46, 0.0  ;;  %v10878_v29 = vmax.f32 %v10824_v6, 0.0 }
0x113f   :  { %v10998_v49 = vrot.slane %v10970_v11, %v25269_v22  ;;  %v10999_v34 = vcombine.low %v10977_v63, %v10984_v16  ;;  %v10879_v48 = vmax.f32 %v10826_v9, 0.0  ;;  %v10880_v54 = vmax.f32 %v10809_v45, 0.0 }
0x1140   :  { %v10881_v37 = vmax.f32 %v10823_v24, 0.0  ;;  %v10882_v52 = vmax.f32 %v10825_v41, 0.0  ;;  %v10883_v3 = vmax.f32 %v10827_v32, 0.0  ;;  %v11016_v30 = vcombine.low %v10876_v13, %v10877_v12 }
0x1141   :  { %v11000_v35 = vcombine.low %v10991_v44, %v10998_v49  ;;  %v11017_v23 = vcombine.low %v10878_v29, %v10879_v48  ;;  %v10724_v27 = vadd.f32 %v10723_v20, %v10637_v59  ;;  %v11007_v19 = vrot.slane %v10999_v34, %v25269_v22 }
0x1142   :  { %v11018_v56 = vcombine.low %v10880_v54, %v10881_v37  ;;  %v11019_v58 = vcombine.low %v10882_v52, %v10883_v3  ;;  %v11026_v60 = vrot.slane %v11016_v30, %v25269_v22  ;;  %v10900_v57 = vcombine.high %v23459_v61, %v23459_v61 }
0x1143   :  { %v11014_v1 = vrot.slane %v11000_v35, %v25269_v22  ;;  %v11033_v31 = vrot.slane %v11017_v23, %v25269_v22  ;;  %v10834_v53 = vrot.slane %v10724_v27, %v25269_v22  ;;  %v10907_v55 = vrot.slane %v23459_v61, %v25269_v22 }
0x1144   :  { %v11040_v17 = vrot.slane %v11018_v56, %v25269_v22  ;;  %v11047_v47 = vrot.slane %v11019_v58, %v25269_v22  ;;  %v10914_v40 = vrot.slane %v10900_v57, %v25269_v22 }
0x1145   :  { %v11015_v15 = vcombine.low %v11007_v19, %v11014_v1  ;;  %v10835_v2 = vcombine.high %v10834_v53, %v10834_v53  ;;  %v10842_v38 = vrot.slane %v10834_v53, %v25269_v22  ;;  %v11048_v59 = vcombine.low %v11026_v60, %v11033_v31 }
0x1146   :  { %v11049_v20 = vcombine.low %v11040_v17, %v11047_v47  ;;  %v10915_v28 = vcombine.high %v10907_v55, %v10907_v55  ;;  %v10916_v36 = vcombine.high %v10914_v40, %v10914_v40  ;;  %v10923_v26 = vrot.slane %v10907_v55, %v25269_v22 }
0x1147   :  { %v10849_v43 = vrot.slane %v10835_v2, %v25269_v22  ;;  %24499 = vmatmul.mubr.msk.f32.vlgmr.msra.gmra.mxu1 %vm11196_vm7, %v11015_v15  ;;  %v11056_v25 = vrot.slane %v11048_v59, %v25269_v22  ;;  %v10884_v7 = vmax.f32 %v10842_v38, 0.0  ;;  %v10930_v45 = vrot.slane %v10914_v40, %v25269_v22 }
0x1148   :  { %24501 = vmatprep.mubr.msk.f32.mxu1 %vm25090_vm2, %v25088_v0  ;;  %v11063_v18 = vrot.slane %v11049_v20, %v25269_v22  ;;  %v10937_v14 = vrot.slane %v10915_v28, %v25269_v22  ;;  %v10944_v10 = vrot.slane %v10916_v36, %v25269_v22  ;;  %v10945_v6 = vcombine.high %v10923_v26, %v10923_v26 }
0x1149   :  { %v10885_v33 = vmax.f32 %v10849_v43, 0.0  ;;  %v10946_v41 = vcombine.high %v10930_v45, %v10930_v45  ;;  %v11129_v13 = vcombine.low %v10923_v26, %v10923_v26 }
0x114a   :  { %v11064_v50 = vcombine.low %v11056_v25, %v11063_v18  ;;  %v11080_v51 = vcombine.low %v10923_v26, %v10937_v14  ;;  %v23460_v46 = vcombine.high %v10923_v26, %v10937_v14  ;;  %v11082_v63 = vcombine.low %v10930_v45, %v10944_v10 }
0x114b   :  { %v11065_v5 = vcombine.low %v10884_v7, %v10885_v33  ;;  %v23461_v24 = vcombine.high %v10930_v45, %v10944_v10  ;;  %v10947_v11 = vcombine.high %v10937_v14, %v10937_v14  ;;  %v11130_v12 = vcombine.low %v10937_v14, %v10945_v6 }
0x114c   :  { %24502 = vmatmul.mubr.msk.f32.gmra.mxu1 %vm11196_vm7, %v11064_v50  ;;  %v11090_v16 = vrot.slane %v11080_v51, %v25269_v22  ;;  %v11097_v44 = vrot.slane %v23460_v46, %v25269_v22  ;;  %v11104_v9 = vrot.slane %v11082_v63, %v25269_v22  ;;  %v11132_v49 = vcombine.low %v10944_v10, %v10946_v41 }
0x114d   :  { %v11072_v42 = vrot.slane %v11065_v5, %v25269_v22  ;;  %24504 = vmatprep.mubr.msk.f32.mxu1 %vm25090_vm2, %v25088_v0  ;;  %v11111_v32 = vrot.slane %v23461_v24, %v25269_v22  ;;  %v11131_v29 = vcombine.low %v10947_v11, %v10930_v45  ;;  %v11139_v54 = vrot.slane %v11129_v13, %v25269_v22 }
0x114e   :  { %v11112_v34 = vcombine.low %v11090_v16, %v11097_v44  ;;  %v11146_v37 = vrot.slane %v11130_v12, %v25269_v22  ;;  %v11160_v3 = vrot.slane %v11132_v49, %v25269_v22  ;;  %v10948_v19 = vcombine.high %v10944_v10, %v10944_v10 }
0x114f   :  { %v11079_v39 = vrot.slane %v11072_v42, %v25269_v22  ;;  %v11113_v48 = vcombine.low %v11104_v9, %v11111_v32  ;;  %v11153_v52 = vrot.slane %v11131_v29, %v25269_v22 }
0x1150   :  { %v11120_v30 = vrot.slane %v11112_v34, %v25269_v22  ;;  %v11161_v23 = vcombine.low %v11139_v54, %v11146_v37  ;;  %v11178_v31 = vcombine.low %v10948_v19, %v10923_v26 }
0x1151   :  { %24505 = vmatmul.mubr.msk.f32.gmra.mxu1 %vm11196_vm7, %v11079_v39  ;;  %v11127_v35 = vrot.slane %v11113_v48, %v25269_v22  ;;  %v11162_v27 = vcombine.low %v11153_v52, %v11160_v3 }
0x1152   :  { %24532 = vmatprep.mubr.msk.f32.mxu1 %vm25090_vm2, %v25088_v0  ;;  %v11169_v58 = vrot.slane %v11161_v23, %v25269_v22  ;;  %v11185_v38 = vrot.slane %v11178_v31, %v25269_v22 }
0x1153   :  { %v11128_v56 = vcombine.low %v11120_v30, %v11127_v35  ;;  %v11176_v1 = vrot.slane %v11162_v27, %v25269_v22 }
0x1154   :  { %v11192_v39 = vrot.slane %v11185_v38, %v25269_v22 }
0x1155   :  { %v11177_v47 = vcombine.low %v11169_v58, %v11176_v1 }
0x1207   :  { %v11269_v60 = vpop.f32.mrf.mxu1 }
0x1208   :  { %v11270_v53 = vadd.f32 %v11269_v60, %v11128_v56 }
0x1209   :  { %v24500_v17 = vpop.f32.mrf.mxu1 }
0x120a   :  { %v11286_v15 = vcombine.high %v11270_v53, %v11270_v53  ;;  %v11293_v2 = vrot.slane %v11270_v53, %v25269_v22 }
0x120c   :  { %v11300_v59 = vrot.slane %v11286_v15, %v25269_v22  ;;  %v11301_v20 = vcombine.high %v11293_v2, %v11293_v2  ;;  %v11274_v43 = vpop.f32.mrf.mxu1  ;;  %v11309_v7 = vrot.slane %v11293_v2, %v25269_v22 }
0x120d   :  { %v11275_v25 = vadd.f32 %v11274_v43, %v11177_v47 }
0x120e   :  { %v11302_v18 = vcombine.high %v11300_v59, %v11300_v59  ;;  %v11323_v33 = vrot.slane %v11301_v20, %v25269_v22  ;;  %v24503_v50 = vpop.f32.mrf.mxu1  ;;  %v11316_v61 = vrot.slane %v11300_v59, %v25269_v22 }
0x120f   :  { %v11335_v5 = vcombine.high %v11275_v25, %v11275_v25  ;;  %v11342_v42 = vrot.slane %v11275_v25, %v25269_v22 }
0x1210   :  { %v11330_v57 = vrot.slane %v11302_v18, %v25269_v22  ;;  %v11406_v55 = vcombine.low %v11309_v7, %v11323_v33  ;;  %v23465_v40 = vcombine.high %v11309_v7, %v11323_v33 }
0x1211   :  { %v11349_v28 = vrot.slane %v11335_v5, %v25269_v22  ;;  %v11350_v36 = vcombine.high %v11342_v42, %v11342_v42  ;;  %v11358_v26 = vrot.slane %v11342_v42, %v25269_v22  ;;  %v11279_v45 = vpop.f32.mrf.mxu1 }
0x1212   :  { %v11408_v14 = vcombine.low %v11316_v61, %v11330_v57  ;;  %v23466_v10 = vcombine.high %v11316_v61, %v11330_v57  ;;  %v11416_v51 = vrot.slane %v11406_v55, %v25269_v22  ;;  %v11423_v46 = vrot.slane %v23465_v40, %v25269_v22 }
0x1213   :  { %v11351_v63 = vcombine.high %v11349_v28, %v11349_v28  ;;  %v11365_v24 = vrot.slane %v11349_v28, %v25269_v22  ;;  %v11372_v6 = vrot.slane %v11350_v36, %v25269_v22  ;;  %v11380_v41 = vcombine.high %v11358_v26, %v11358_v26  ;;  %v24506_v11 = vpop.f32.mrf.mxu1 }
0x1214   :  { %v11280_v16 = vadd.f32 %v11279_v45, %v11192_v39  ;;  %v11430_v44 = vrot.slane %v11408_v14, %v25269_v22  ;;  %v11437_v9 = vrot.slane %v23466_v10, %v25269_v22  ;;  %v11438_v32 = vcombine.low %v11416_v51, %v11423_v46  ;;  %v23472_v11 = vld [vmem:[%s29683_s26 + $0x98] sm:$0xff] }
0x1215   :  { %v11379_v13 = vrot.slane %v11351_v63, %v25269_v22  ;;  %v11381_v12 = vcombine.high %v11365_v24, %v11365_v24  ;;  %v11382_v29 = vcombine.high %v11372_v6, %v11372_v6  ;;  %v11469_v49 = vcombine.low %v11372_v6, %v11380_v41  ;;  %24508 = vmatpush3.msra.mxu0 %v23472_v11 }
0x1216   :  { %v11390_v34 = vrot.slane %v11280_v16, %v25269_v22  ;;  %v11439_v48 = vcombine.low %v11430_v44, %v11437_v9  ;;  %v11461_v54 = vrot.slane %v11358_v26, %v25269_v22  ;;  %v11446_v3 = vrot.slane %v11438_v32, %v25269_v22  ;;  %v23485_v16 = vld [vmem:[%s29684_s28 + $0x98] sm:$0xff]  ;;  %24509 = vmatprep.subr.mxu0 %v25088_v0  ;;  %v23471_v44 = vld [vmem:[%s29683_s26 + $0x90] sm:$0xff]  ;;  %v23470_v32 = vld [vmem:[%s29683_s26 + $0x88] sm:$0xff] }
0x1217   :  { %v11470_v37 = vcombine.low %v11382_v29, %v11365_v24  ;;  %v11383_v52 = vcombine.high %v11379_v13, %v11379_v13  ;;  %v11471_v30 = vcombine.low %v11379_v13, %v11381_v12  ;;  %v11479_v19 = vrot.slane %v11469_v49, %v25269_v22  ;;  %24525 = vmatpush3.msra.mxu1 %v23485_v16  ;;  %v23484_v9 = vld [vmem:[%s29684_s28 + $0x90] sm:$0xff]  ;;  %v23483_v13 = vld [vmem:[%s29684_s28 + $0x88] sm:$0xff]  ;;  %v23469_v12 = vld [vmem:[%s29683_s26 + $0x80] sm:$0xff] }
0x1218   :  { %v11391_v35 = vcombine.high %v11390_v34, %v11390_v34  ;;  %v11398_v23 = vrot.slane %v11390_v34, %v25269_v22  ;;  %v11453_v27 = vrot.slane %v11439_v48, %v25269_v22  ;;  %v11468_v31 = vrot.slane %v11461_v54, %v25269_v22  ;;  %24526 = vmatprep.subr.mxu1 %v25088_v0  ;;  %v23482_v29 = vld [vmem:[%s29684_s28 + $0x80] sm:$0xff] }
0x1219   :  { %v11486_v56 = vrot.slane %v11470_v37, %v25269_v22  ;;  %v11493_v47 = vrot.slane %v11471_v30, %v25269_v22  ;;  %24510 = vmatpush3.msra.mxu0 %v23471_v44  ;;  %24527 = vmatpush3.msra.mxu1 %v23484_v9 }
0x121a   :  { %v11405_v58 = vrot.slane %v11391_v35, %v25269_v22  ;;  %v11472_v1 = vcombine.low %v11383_v52, %v11398_v23  ;;  %v11454_v60 = vcombine.low %v11446_v3, %v11453_v27  ;;  %v11537_v38 = vadd.f32 %v11468_v31, %v27115_v4  ;;  %24511 = vmatprep.subr.mxu0 %v25088_v0 }
0x121b   :  { %v11501_v15 = vcombine.low %v11479_v19, %v11486_v56  ;;  %24528 = vmatprep.subr.mxu1 %v25088_v0  ;;  %24512 = vmatpush3.msra.mxu0 %v23470_v32 }
0x121c   :  { %v11500_v53 = vrot.slane %v11472_v1, %v25269_v22  ;;  %v11536_v17 = vadd.f32 %v11454_v60, %v27107_v62  ;;  %v11524_v20 = vrot.slane %v11405_v58, %v25269_v22  ;;  %v11545_v18 = vsel %vm73_vm0, %v11537_v38, 0.0  ;;  %24529 = vmatpush3.msra.mxu1 %v23483_v13  ;;  %24513 = vmatprep.subr.mxu0 %v25088_v0  ;;  %v23467_v58 = vld [vmem:[%s29668_s17] ss:$0 sm:$0xff] }
0x121d   :  { %v11509_v43 = vrot.slane %v11501_v15, %v25269_v22  ;;  %24530 = vmatprep.subr.mxu1 %v25088_v0  ;;  %24514 = vmatpush3.msra.mxu0 %v23469_v12  ;;  %v23468_v60 = vld [vmem:[%s29669_s18] ss:$0 sm:$0xff] }
0x121e   :  { %v11542_v2 = vsel %vm79_vm1, %v11536_v17, 0.0  ;;  %v11502_v59 = vcombine.low %v11493_v47, %v11500_v53  ;;  %v11531_v62 = vrot.slane %v11524_v20, %v25269_v22  ;;  %24531 = vmatpush3.msra.mxu1 %v23482_v29  ;;  %24541 = vmatprep.subr.mxu0 %v25088_v0 }
0x121f   :  { %11543 = vadd.xlane.f32.xlu0 %v11542_v2 }
0x1220   :  { %v11516_v25 = vrot.slane %v11502_v59, %v25269_v22  ;;  %v11539_v4 = vadd.f32 %v11531_v62, %v27129_v21 }
0x1222   :  { %v11517_v7 = vcombine.low %v11509_v43, %v11516_v25  ;;  %v11551_v5 = vsel %vm73_vm0, %v11539_v4, 0.0 }
0x1223   :  { %11546 = vadd.xlane.f32.xlu0 %v11545_v18 }
0x1224   :  { %v11538_v33 = vadd.f32 %v11517_v7, %v27113_v8 }
0x1226   :  { %v11548_v50 = vsel %vm79_vm1, %v11538_v33, 0.0 }
0x1227   :  { %11549 = vadd.xlane.f32.xlu1 %v11548_v50 }
0x122b   :  { %11552 = vadd.xlane.f32.xlu1 %v11551_v5 }
0x12a8   :  { %v11544_v42 = vpop.xlane.xlu0 %11543 }
0x12a9   :  { %v11554_v39 = vmul.f32 0.03125, %v11544_v42 }
0x12ab   :  { %v27317_v61 = vsub.f32 %v11536_v17, %v11554_v39 }
0x12ac   :  { %v11547_v57 = vpop.xlane.xlu0 %11546 }
0x12ad   :  { %v11555_v55 = vmul.f32 0.03125, %v11547_v57  ;;  %v11562_v40 = vmul.f32 %v27317_v61, %v27317_v61 }
0x12af   :  { %v27321_v28 = vsub.f32 %v11537_v38, %v11555_v55  ;;  %v11566_v8 = vsel %vm79_vm1, %v11562_v40, 0.0 }
0x12b0   :  { %v11550_v36 = vpop.xlane.xlu1 %11549  ;;  %11567 = vadd.xlane.f32.xlu0 %v11566_v8 }
0x12b1   :  { %v11556_v21 = vmul.f32 0.03125, %v11550_v36  ;;  %v11563_v26 = vmul.f32 %v27321_v28, %v27321_v28 }
0x12b3   :  { %v27326_v45 = vsub.f32 %v11538_v33, %v11556_v21  ;;  %v11569_v14 = vsel %vm73_vm0, %v11563_v26, 0.0 }
0x12b4   :  { %v11553_v10 = vpop.xlane.xlu1 %11552  ;;  %11570 = vadd.xlane.f32.xlu0 %v11569_v14 }
0x12b5   :  { %v11557_v51 = vmul.f32 0.03125, %v11553_v10  ;;  %v11564_v46 = vmul.f32 %v27326_v45, %v27326_v45 }
0x12b7   :  { %v27331_v63 = vsub.f32 %v11539_v4, %v11557_v51  ;;  %v11572_v24 = vsel %vm79_vm1, %v11564_v46, 0.0 }
0x12b8   :  { %11573 = vadd.xlane.f32.xlu1 %v11572_v24 }
0x12b9   :  { %v11565_v6 = vmul.f32 %v27331_v63, %v27331_v63 }
0x12bb   :  { %v11575_v41 = vsel %vm73_vm0, %v11565_v6, 0.0 }
0x12bc   :  { %11576 = vadd.xlane.f32.xlu1 %v11575_v41 }
0x1339   :  { %v11568_v49 = vpop.xlane.xlu0 %11567 }
0x133a   :  { %v11578_v34 = vmul.f32 0.03125, %v11568_v49 }
0x133c   :  { %v11582_v48 = vadd.f32 1e-05, %v11578_v34 }
0x133d   :  { %v11571_v54 = vpop.xlane.xlu0 %11570 }
0x133e   :  { %24986 = vrsqrt.f32 %v11582_v48  ;;  %v11579_v37 = vmul.f32 0.03125, %v11571_v54 }
0x1340   :  { %v11583_v52 = vadd.f32 1e-05, %v11579_v37 }
0x1341   :  { %v11574_v3 = vpop.xlane.xlu1 %11573 }
0x1342   :  { %24988 = vrsqrt.f32 %v11583_v52  ;;  %v11580_v30 = vmul.f32 0.03125, %v11574_v3 }
0x1344   :  { %v11584_v35 = vadd.f32 1e-05, %v11580_v30 }
0x1345   :  { %v11577_v23 = vpop.xlane.xlu1 %11576 }
0x1346   :  { %24990 = vrsqrt.f32 %v11584_v35  ;;  %v11581_v27 = vmul.f32 0.03125, %v11577_v23 }
0x1348   :  { %v11585_v19 = vadd.f32 1e-05, %v11581_v27 }
0x134a   :  { %24992 = vrsqrt.f32 %v11585_v19 }
0x134b   :  { %v24987_v56 = vpop.eup %24986 }
0x134c   :  { %v11590_v1 = vmul.f32 %v24987_v56, %v27317_v61  ;;  %v23496_v56 = vld [vmem:[%s29658_s7 + $0x98] sm:$0xff] }
0x134e   :  { %v11600_v31 = vmul.f32 %v23467_v58, %v11590_v1 }
0x134f   :  { %v24989_v53 = vpop.eup %24988 }
0x1350   :  { %v27375_v17 = vadd.f32 %v23468_v60, %v11600_v31  ;;  %v11591_v47 = vmul.f32 %v24989_v53, %v27321_v28  ;;  %v23495_v53 = vld [vmem:[%s29658_s7 + $0x90] sm:$0xff] }
0x1352   :  { %v11630_v15 = vcombine.high %v27375_v17, %v27375_v17  ;;  %v11637_v2 = vrot.slane %v27375_v17, %v25269_v22  ;;  %v11601_v38 = vmul.f32 %v23467_v58, %v11591_v47 }
0x1353   :  { %v24991_v59 = vpop.eup %24990 }
0x1354   :  { %v11644_v20 = vrot.slane %v11630_v15, %v25269_v22  ;;  %v11645_v43 = vcombine.high %v11637_v2, %v11637_v2  ;;  %v27383_v25 = vadd.f32 %v23468_v60, %v11601_v38  ;;  %v11592_v18 = vmul.f32 %v24991_v59, %v27326_v45 }
0x1355   :  { %v11653_v62 = vrot.slane %v11637_v2, %v25269_v22  ;;  %v23494_v2 = vld [vmem:[%s29658_s7 + $0x88] sm:$0xff] }
0x1356   :  { %v11646_v7 = vcombine.high %v11644_v20, %v11644_v20  ;;  %v11667_v33 = vrot.slane %v11645_v43, %v25269_v22  ;;  %v11602_v4 = vmul.f32 %v23467_v58, %v11592_v18  ;;  %v11660_v5 = vrot.slane %v11644_v20, %v25269_v22  ;;  %v23493_v20 = vld [vmem:[%s29658_s7 + $0x80] sm:$0xff] }
0x1357   :  { %v24993_v50 = vpop.eup %24992  ;;  %v11685_v57 = vrot.slane %v27383_v25, %v25269_v22 }
0x1358   :  { %v11674_v42 = vrot.slane %v11646_v7, %v25269_v22  ;;  %v11805_v39 = vcombine.low %v11653_v62, %v11667_v33  ;;  %v23475_v61 = vcombine.high %v11653_v62, %v11667_v33  ;;  %v27392_v55 = vadd.f32 %v23468_v60, %v11602_v4  ;;  %v23474_v62 = vld [vmem:[%s29656_s4 + $0x4] ss:$0 sm:$0xff] }
0x1359   :  { %v11593_v40 = vmul.f32 %v24993_v50, %v27331_v63  ;;  %v11692_v16 = vrot.slane %v11685_v57, %v25269_v22  ;;  %v11756_v33 = vcombine.high %v23474_v62, %v23474_v62  ;;  %v11763_v50 = vrot.slane %v23474_v62, %v25269_v22 }
0x135a   :  { %v11807_v28 = vcombine.low %v11660_v5, %v11674_v42  ;;  %v23476_v8 = vcombine.high %v11660_v5, %v11674_v42  ;;  %v11815_v36 = vrot.slane %v11805_v39, %v25269_v22  ;;  %v11822_v21 = vrot.slane %v23475_v61, %v25269_v22  ;;  %v23487_v5 = vld [vmem:[%s29657_s6 + $0x4] ss:$0 sm:$0xff] }
0x135b   :  { %v11693_v26 = vcombine.high %v27392_v55, %v27392_v55  ;;  %v11700_v45 = vrot.slane %v27392_v55, %v25269_v22  ;;  %v11603_v14 = vmul.f32 %v23467_v58, %v11593_v40  ;;  %v11770_v4 = vrot.slane %v11756_v33, %v25269_v22 }
0x135c   :  { %v11829_v10 = vrot.slane %v11807_v28, %v25269_v22  ;;  %v11836_v51 = vrot.slane %v23476_v8, %v25269_v22  ;;  %v11837_v46 = vcombine.low %v11815_v36, %v11822_v21  ;;  %v11771_v42 = vcombine.high %v11763_v50, %v11763_v50 }
0x135d   :  { %v11707_v63 = vrot.slane %v11693_v26, %v25269_v22  ;;  %v11708_v24 = vcombine.high %v11700_v45, %v11700_v45  ;;  %v11716_v6 = vrot.slane %v11700_v45, %v25269_v22  ;;  %v27405_v41 = vadd.f32 %v23468_v60, %v11603_v14 }
0x135e   :  { %v11838_v11 = vcombine.low %v11829_v10, %v11836_v51  ;;  %v11845_v12 = vrot.slane %v11837_v46, %v25269_v22  ;;  %v11772_v39 = vcombine.high %v11770_v4, %v11770_v4  ;;  %v12273_v61 = vcombine.high %v23487_v5, %v23487_v5  ;;  %v23498_v46 = vld [vmem:[%s29659_s8 + $0x4] ss:$0 sm:$0xff] }
0x135f   :  { %v11709_v44 = vcombine.high %v11707_v63, %v11707_v63  ;;  %v11723_v9 = vrot.slane %v11707_v63, %v25269_v22  ;;  %v11730_v32 = vrot.slane %v11708_v24, %v25269_v22  ;;  %v11738_v13 = vcombine.high %v11716_v6, %v11716_v6 }
0x1360   :  { %v11852_v29 = vrot.slane %v11838_v11, %v25269_v22  ;;  %v11854_v49 = vcombine.low %v11692_v16, %v11716_v6  ;;  %v11748_v34 = vrot.slane %v27405_v41, %v25269_v22  ;;  %v12280_v57 = vrot.slane %v23487_v5, %v25269_v22 }
0x1361   :  { %v11739_v48 = vcombine.high %v11723_v9, %v11723_v9  ;;  %v11740_v54 = vcombine.high %v11730_v32, %v11730_v32  ;;  %v11855_v37 = vcombine.low %v11730_v32, %v11738_v13  ;;  %v11737_v52 = vrot.slane %v11709_v44, %v25269_v22 }
0x1362   :  { %v27415_v3 = vcombine.low %v11845_v12, %v11852_v29  ;;  %v11864_v30 = vrot.slane %v11854_v49, %v25269_v22  ;;  %v11755_v31 = vrot.slane %v11748_v34, %v25269_v22  ;;  %v27487_v40 = vrot.slane %v11763_v50, %v25269_v22 }
0x1363   :  { %v11856_v35 = vcombine.low %v11740_v54, %v11723_v9  ;;  %v11871_v23 = vrot.slane %v11855_v37, %v25269_v22  ;;  %v11741_v27 = vcombine.high %v11737_v52, %v11737_v52  ;;  %v11857_v19 = vcombine.low %v11737_v52, %v11739_v48 }
0x1364   :  { %24516 = vmatmul.mubr.msk.f32.vlgmr.msra.gmra.mxu0 %vm79_vm1, %v27415_v3  ;;  %24533 = vmatmul.mubr.msk.f32.vlgmr.msra.gmra.mxu1 %vm79_vm1, %v27415_v3  ;;  %v11786_v28 = vrot.slane %v11770_v4, %v25269_v22  ;;  %v11793_v8 = vrot.slane %v11771_v42, %v25269_v22  ;;  %v27492_v36 = vrot.slane %v11772_v39, %v25269_v22 }
0x1365   :  { %v11878_v58 = vrot.slane %v11856_v35, %v25269_v22  ;;  %v11886_v1 = vcombine.low %v11864_v30, %v11871_v23  ;;  %v11885_v60 = vrot.slane %v11857_v19, %v25269_v22  ;;  %24518 = vmatprep.mubr.msk.f32.mxu0 %vm25090_vm2, %v25088_v0  ;;  %24535 = vmatprep.mubr.msk.f32.mxu1 %vm25090_vm2, %v25088_v0 }
0x1366   :  { %24542 = vmatpush3.msra.mxu0 %v23496_v56  ;;  %v11903_v15 = vcombine.low %v11741_v27, %v11755_v31  ;;  %v12287_v21 = vrot.slane %v12273_v61, %v25269_v22  ;;  %v12288_v26 = vcombine.high %v12280_v57, %v12280_v57  ;;  %v11918_v45 = vcombine.low %v27487_v40, %v11793_v8 }
0x1367   :  { %v11887_v47 = vcombine.low %v11878_v58, %v11885_v60  ;;  %24543 = vmatprep.subr.mxu0 %v25088_v0  ;;  %v11894_v38 = vrot.slane %v11886_v1, %v25269_v22  ;;  %v23477_v14 = vcombine.high %v27487_v40, %v11793_v8  ;;  %v11920_v10 = vcombine.low %v11786_v28, %v27492_v36 }
0x1368   :  { %24544 = vmatpush3.msra.mxu0 %v23495_v53  ;;  %v11910_v18 = vrot.slane %v11903_v15, %v25269_v22  ;;  %v23478_v51 = vcombine.high %v11786_v28, %v27492_v36  ;;  %v12289_v63 = vcombine.high %v12287_v21, %v12287_v21  ;;  %v27503_v24 = vrot.slane %v12280_v57, %v25269_v22 }
0x1369   :  { %v11901_v59 = vrot.slane %v11887_v47, %v25269_v22  ;;  %24545 = vmatprep.subr.mxu0 %v25088_v0  ;;  %v12310_v6 = vrot.slane %v12288_v26, %v25269_v22  ;;  %v12653_v11 = vcombine.high %v23498_v46, %v23498_v46  ;;  %v11928_v16 = vrot.slane %v11918_v45, %v25269_v22 }
0x136a   :  { %24546 = vmatpush3.msra.mxu0 %v23494_v2  ;;  %v27459_v7 = vrot.slane %v11910_v18, %v25269_v22  ;;  %v11935_v44 = vrot.slane %v23477_v14, %v25269_v22  ;;  %v11942_v9 = vrot.slane %v11920_v10, %v25269_v22  ;;  %v11949_v32 = vrot.slane %v23478_v51, %v25269_v22 }
0x136b   :  { %v27446_v43 = vcombine.low %v11894_v38, %v11901_v59  ;;  %24547 = vmatprep.subr.mxu0 %v25088_v0  ;;  %v12303_v13 = vrot.slane %v12287_v21, %v25269_v22  ;;  %v27512_v12 = vrot.slane %v12289_v63, %v25269_v22  ;;  %v12322_v29 = vcombine.low %v27503_v24, %v12310_v6 }
0x136c   :  { %24548 = vmatpush3.msra.mxu0 %v23493_v20  ;;  %v23488_v49 = vcombine.high %v27503_v24, %v12310_v6  ;;  %v12660_v34 = vrot.slane %v23498_v46, %v25269_v22  ;;  %v12667_v48 = vrot.slane %v12653_v11, %v25269_v22  ;;  %v11950_v54 = vcombine.low %v11928_v16, %v11935_v44 }
0x136d   :  { %24519 = vmatmul.mubr.msk.f32.gmra.mxu0 %vm79_vm1, %v27446_v43  ;;  %24536 = vmatmul.mubr.msk.f32.gmra.mxu1 %vm79_vm1, %v27446_v43  ;;  %v11951_v37 = vcombine.low %v11942_v9, %v11949_v32  ;;  %v12324_v52 = vcombine.low %v12303_v13, %v27512_v12  ;;  %v23489_v30 = vcombine.high %v12303_v13, %v27512_v12 }
0x136e   :  { %24521 = vmatprep.mubr.msk.f32.mxu0 %vm25090_vm2, %v25088_v0  ;;  %24538 = vmatprep.mubr.msk.f32.mxu1 %vm25090_vm2, %v25088_v0  ;;  %v12332_v35 = vrot.slane %v12322_v29, %v25269_v22  ;;  %v12339_v23 = vrot.slane %v23488_v49, %v25269_v22  ;;  %v11801_v27 = vcombine.high %v27487_v40, %v27487_v40 }
0x136f   :  { %v12668_v19 = vcombine.high %v12660_v34, %v12660_v34  ;;  %v12669_v56 = vcombine.high %v12667_v48, %v12667_v48  ;;  %v27525_v58 = vrot.slane %v11950_v54, %v25269_v22  ;;  %v11802_v1 = vcombine.high %v11786_v28, %v11786_v28 }
0x1370   :  { %v11803_v60 = vcombine.high %v11793_v8, %v11793_v8  ;;  %v12318_v31 = vcombine.high %v27503_v24, %v27503_v24  ;;  %v27530_v53 = vrot.slane %v11951_v37, %v25269_v22  ;;  %v12346_v47 = vrot.slane %v12324_v52, %v25269_v22 }
0x1371   :  { %24522 = vmatmul.mubr.msk.f32.gmra.mxu0 %vm79_vm1, %v27459_v7  ;;  %24539 = vmatmul.mubr.msk.f32.gmra.mxu1 %vm79_vm1, %v27459_v7  ;;  %v12353_v15 = vrot.slane %v23489_v30, %v25269_v22  ;;  %v12354_v2 = vcombine.low %v12332_v35, %v12339_v23  ;;  %v11967_v38 = vcombine.low %v27487_v40, %v27487_v40 }
0x1372   :  { %24549 = vmatprep.mubr.msk.f32.mxu0 %vm25090_vm2, %v25088_v0  ;;  %v11968_v59 = vcombine.low %v11793_v8, %v11801_v27  ;;  %v12319_v20 = vcombine.high %v12303_v13, %v12303_v13  ;;  %v12320_v18 = vcombine.high %v12310_v6, %v12310_v6  ;;  %v27537_v62 = vrot.slane %v12660_v34, %v25269_v22 }
0x1373   :  { %v12683_v33 = vrot.slane %v12667_v48, %v25269_v22  ;;  %v12690_v50 = vrot.slane %v12668_v19, %v25269_v22  ;;  %v27542_v4 = vrot.slane %v12669_v56, %v25269_v22  ;;  %v11969_v5 = vcombine.low %v11803_v60, %v11786_v28 }
0x1374   :  { %v11970_v42 = vcombine.low %v27492_v36, %v11802_v1  ;;  %v12371_v39 = vcombine.low %v27503_v24, %v27503_v24  ;;  %v12372_v61 = vcombine.low %v12310_v6, %v12318_v31  ;;  %v12355_v57 = vcombine.low %v12346_v47, %v12353_v15 }
0x1375   :  { %24550 = vmatmul.mubr.msk.f32.vlgmr.msra.gmra.mxu0 %vm79_vm1, %v27415_v3  ;;  %v12698_v8 = vcombine.high %v27537_v62, %v27537_v62  ;;  %v12699_v21 = vcombine.high %v12683_v33, %v12683_v33  ;;  %v12700_v26 = vcombine.high %v12690_v50, %v12690_v50  ;;  %v11977_v45 = vrot.slane %v11967_v38, %v25269_v22 }
0x1376   :  { %24552 = vmatprep.mubr.msk.f32.mxu0 %vm25090_vm2, %v25088_v0  ;;  %v11984_v14 = vrot.slane %v11968_v59, %v25269_v22  ;;  %v12373_v10 = vcombine.low %v12320_v18, %v12303_v13  ;;  %v12374_v51 = vcombine.low %v27512_v12, %v12319_v20  ;;  %v12702_v28 = vcombine.low %v27537_v62, %v12690_v50 }
0x1377   :  { %v23499_v46 = vcombine.high %v27537_v62, %v12690_v50  ;;  %v12704_v63 = vcombine.low %v12683_v33, %v27542_v4  ;;  %v23500_v6 = vcombine.high %v12683_v33, %v27542_v4  ;;  %v11991_v11 = vrot.slane %v11969_v5, %v25269_v22 }
0x1378   :  { %v11998_v16 = vrot.slane %v11970_v42, %v25269_v22  ;;  %v12381_v44 = vrot.slane %v12371_v39, %v25269_v22  ;;  %v12388_v9 = vrot.slane %v12372_v61, %v25269_v22  ;;  %v12751_v32 = vcombine.low %v27537_v62, %v27537_v62 }
0x1379   :  { %24553 = vmatmul.mubr.msk.f32.gmra.mxu0 %vm79_vm1, %v27446_v43  ;;  %v12752_v13 = vcombine.low %v12690_v50, %v12698_v8  ;;  %v12753_v29 = vcombine.low %v12700_v26, %v12683_v33  ;;  %v12754_v49 = vcombine.low %v27542_v4, %v12699_v21  ;;  %v12395_v34 = vrot.slane %v12373_v10, %v25269_v22 }
0x137a   :  { %24555 = vmatprep.mubr.msk.f32.mxu0 %vm25090_vm2, %v25088_v0  ;;  %v12402_v48 = vrot.slane %v12374_v51, %v25269_v22  ;;  %v11804_v54 = vcombine.high %v27492_v36, %v27492_v36  ;;  %v12321_v37 = vcombine.high %v27512_v12, %v27512_v12  ;;  %v12712_v52 = vrot.slane %v12702_v28, %v25269_v22 }
0x137b   :  { %v12719_v30 = vrot.slane %v23499_v46, %v25269_v22  ;;  %v12726_v35 = vrot.slane %v12704_v63, %v25269_v22  ;;  %v12733_v23 = vrot.slane %v23500_v6, %v25269_v22  ;;  %v12362_v27 = vrot.slane %v12354_v2, %v25269_v22 }
0x137c   :  { %v12369_v19 = vrot.slane %v12355_v57, %v25269_v22  ;;  %v11999_v56 = vcombine.low %v11977_v45, %v11984_v14  ;;  %v12000_v1 = vcombine.low %v11991_v11, %v11998_v16  ;;  %v12761_v60 = vrot.slane %v12751_v32, %v25269_v22 }
0x137d   :  { %24556 = vmatmul.mubr.msk.f32.gmra.mxu0 %vm79_vm1, %v27459_v7  ;;  %v12768_v36 = vrot.slane %v12752_v13, %v25269_v22  ;;  %v12775_v12 = vrot.slane %v12753_v29, %v25269_v22  ;;  %v12782_v31 = vrot.slane %v12754_v49, %v25269_v22  ;;  %v12403_v47 = vcombine.low %v12381_v44, %v12388_v9 }
0x137e   :  { %v12404_v15 = vcombine.low %v12395_v34, %v12402_v48  ;;  %v12016_v38 = vcombine.low %v11804_v54, %v27487_v40  ;;  %v12420_v59 = vcombine.low %v12321_v37, %v27503_v24  ;;  %v12734_v20 = vcombine.low %v12712_v52, %v12719_v30 }
0x137f   :  { %v12735_v2 = vcombine.low %v12726_v35, %v12733_v23  ;;  %v11966_v18 = vcombine.low %v27525_v58, %v27530_v53  ;;  %v12370_v33 = vcombine.low %v12362_v27, %v12369_v19  ;;  %v12007_v50 = vrot.slane %v11999_v56, %v25269_v22 }
0x1380   :  { %v12014_v5 = vrot.slane %v12000_v1, %v25269_v22  ;;  %v12783_v42 = vcombine.low %v12761_v60, %v12768_v36  ;;  %v12784_v39 = vcombine.low %v12775_v12, %v12782_v31  ;;  %v12701_v61 = vcombine.high %v27542_v4, %v27542_v4 }
0x1381   :  { %v12411_v57 = vrot.slane %v12403_v47, %v25269_v22  ;;  %v12418_v40 = vrot.slane %v12404_v15, %v25269_v22  ;;  %v12023_v21 = vrot.slane %v12016_v38, %v25269_v22  ;;  %v12427_v58 = vrot.slane %v12420_v59, %v25269_v22 }
0x1382   :  { %v27592_v53 = vrot.slane %v12734_v20, %v25269_v22  ;;  %v27595_v26 = vrot.slane %v12735_v2, %v25269_v22  ;;  %v12015_v51 = vcombine.low %v12007_v50, %v12014_v5  ;;  %v12791_v28 = vrot.slane %v12783_v42, %v25269_v22 }
0x1383   :  { %v12798_v46 = vrot.slane %v12784_v39, %v25269_v22  ;;  %v12800_v63 = vcombine.low %v12701_v61, %v27537_v62  ;;  %v12419_v9 = vcombine.low %v12411_v57, %v12418_v40  ;;  %v12030_v32 = vrot.slane %v12023_v21, %v25269_v22 }
0x1384   :  { %v12434_v13 = vrot.slane %v12427_v58, %v25269_v22  ;;  %v12750_v29 = vcombine.low %v27592_v53, %v27595_v26 }
0x1385   :  { %v27610_v52 = vcombine.low %v12791_v28, %v12798_v46  ;;  %v12807_v30 = vrot.slane %v12800_v63, %v25269_v22 }
0x1424   :  { %v12106_v24 = vpop.f32.mrf.mxu0  ;;  %v12504_v8 = vpop.f32.mrf.mxu1 }
0x1425   :  { %v12107_v45 = vadd.f32 %v12106_v24, %v11966_v18  ;;  %v12505_v14 = vadd.f32 %v12504_v8, %v12370_v33 }
0x1426   :  { %v24517_v10 = vpop.f32.mrf.mxu0  ;;  %v24534_v4 = vpop.f32.mrf.mxu1 }
0x1427   :  { %v12123_v6 = vcombine.high %v12107_v45, %v12107_v45  ;;  %v12130_v11 = vrot.slane %v12107_v45, %v25269_v22  ;;  %v12521_v16 = vcombine.high %v12505_v14, %v12505_v14  ;;  %v12528_v44 = vrot.slane %v12505_v14, %v25269_v22 }
0x1429   :  { %v12137_v49 = vrot.slane %v12123_v6, %v25269_v22  ;;  %v12138_v34 = vcombine.high %v12130_v11, %v12130_v11  ;;  %v12146_v48 = vrot.slane %v12130_v11, %v25269_v22  ;;  %v12535_v62 = vrot.slane %v12521_v16, %v25269_v22 }
0x142a   :  { %v12536_v54 = vcombine.high %v12528_v44, %v12528_v44  ;;  %v12544_v37 = vrot.slane %v12528_v44, %v25269_v22  ;;  %v27632_v11 = vrot.slane %v12807_v30, %v25269_v22 }
0x142b   :  { %v12139_v35 = vcombine.high %v12137_v49, %v12137_v49  ;;  %v12153_v23 = vrot.slane %v12137_v49, %v25269_v22  ;;  %v12160_v27 = vrot.slane %v12138_v34, %v25269_v22  ;;  %v12168_v19 = vcombine.high %v12146_v48, %v12146_v48 }
0x142c   :  { %v13021_v56 = vmul.f32 0.35355338, %v12146_v48  ;;  %v12537_v1 = vcombine.high %v12535_v62, %v12535_v62  ;;  %v12551_v60 = vrot.slane %v12535_v62, %v25269_v22  ;;  %v12558_v36 = vrot.slane %v12536_v54, %v25269_v22 }
0x142d   :  { %v12167_v12 = vrot.slane %v12139_v35, %v25269_v22  ;;  %v12169_v31 = vcombine.high %v12153_v23, %v12153_v23  ;;  %v12170_v47 = vcombine.high %v12160_v27, %v12160_v27  ;;  %v13022_v15 = vmul.f32 0.35355338, %v12160_v27  ;;  %v12111_v38 = vpop.f32.mrf.mxu0  ;;  %v12509_v59 = vpop.f32.mrf.mxu1 }
0x142e   :  { %v13023_v20 = vmul.f32 0.35355338, %v12168_v19  ;;  %v13025_v2 = vmul.f32 0.35355338, %v12153_v23  ;;  %v12565_v18 = vrot.slane %v12537_v1, %v25269_v22  ;;  %v13111_v33 = vcombine.low %v12544_v37, %v12558_v36 }
0x142f   :  { %v12171_v50 = vcombine.high %v12167_v12, %v12167_v12  ;;  %v13024_v5 = vmul.f32 0.35355338, %v12170_v47  ;;  %v13026_v42 = vmul.f32 0.35355338, %v12167_v12  ;;  %v13027_v39 = vmul.f32 0.35355338, %v12169_v31  ;;  %v24520_v61 = vpop.f32.mrf.mxu0  ;;  %v24537_v57 = vpop.f32.mrf.mxu1 }
0x1430   :  { %v13048_v40 = vcombine.low %v13021_v56, %v13022_v15  ;;  %v23504_v24 = vcombine.high %v12544_v37, %v12558_v36  ;;  %v13113_v8 = vcombine.low %v12551_v60, %v12565_v18  ;;  %v23505_v21 = vcombine.high %v12551_v60, %v12565_v18 }
0x1431   :  { %v13028_v58 = vmul.f32 0.35355338, %v12171_v50  ;;  %v13049_v45 = vcombine.low %v13023_v20, %v13024_v5  ;;  %v13050_v14 = vcombine.low %v13025_v2, %v13026_v42  ;;  %v27620_v10 = vrot.slane %v13111_v33, %v25269_v22  ;;  %v12116_v4 = vpop.f32.mrf.mxu0  ;;  %v12514_v28 = vpop.f32.mrf.mxu1 }
0x1432   :  { %v27623_v46 = vrot.slane %v23504_v24, %v25269_v22  ;;  %v27626_v63 = vrot.slane %v13113_v8, %v25269_v22  ;;  %v27629_v6 = vrot.slane %v23505_v21, %v25269_v22  ;;  %v27635_v44 = vrot.slane %v13048_v40, %v25269_v22 }
0x1433   :  { %v13051_v16 = vcombine.low %v13027_v39, %v13028_v58  ;;  %v27638_v49 = vrot.slane %v13049_v45, %v25269_v22  ;;  %v12112_v34 = vadd.f32 %v12111_v38, %v12015_v51  ;;  %v24523_v48 = vpop.f32.mrf.mxu0  ;;  %v24540_v62 = vpop.f32.mrf.mxu1  ;;  %v27641_v54 = vrot.slane %v13050_v14, %v25269_v22 }
0x1434   :  { %v12510_v37 = vadd.f32 %v12509_v59, %v12419_v9  ;;  %v12117_v35 = vadd.f32 %v12116_v4, %v12030_v32  ;;  %v12515_v23 = vadd.f32 %v12514_v28, %v12434_v13  ;;  %v13143_v30 = vcombine.low %v27620_v10, %v27623_v46 }
0x1435   :  { %v27644_v27 = vrot.slane %v13051_v16, %v25269_v22  ;;  %v12172_v19 = vcombine.high %v12112_v34, %v12112_v34  ;;  %v12179_v56 = vrot.slane %v12112_v34, %v25269_v22  ;;  %v12884_v1 = vpop.f32.mrf.mxu0  ;;  %v13144_v9 = vcombine.low %v27626_v63, %v27629_v6 }
0x1436   :  { %v12570_v60 = vcombine.high %v12510_v37, %v12510_v37  ;;  %v12577_v51 = vrot.slane %v12510_v37, %v25269_v22  ;;  %v12227_v36 = vrot.slane %v12117_v35, %v25269_v22  ;;  %v12625_v31 = vrot.slane %v12515_v23, %v25269_v22 }
0x1437   :  { %v12186_v32 = vrot.slane %v12172_v19, %v25269_v22  ;;  %v12187_v13 = vcombine.high %v12179_v56, %v12179_v56  ;;  %v12195_v12 = vrot.slane %v12179_v56, %v25269_v22  ;;  %v24551_v47 = vpop.f32.mrf.mxu0  ;;  %v12885_v56 = vadd.f32 %v12884_v1, %v12750_v29 }
0x1438   :  { %v12584_v15 = vrot.slane %v12570_v60, %v25269_v22  ;;  %v12585_v38 = vcombine.high %v12577_v51, %v12577_v51  ;;  %v12593_v59 = vrot.slane %v12577_v51, %v25269_v22  ;;  %v12228_v20 = vcombine.high %v12227_v36, %v12227_v36 }
0x1439   :  { %v12188_v2 = vcombine.high %v12186_v32, %v12186_v32  ;;  %v12202_v18 = vrot.slane %v12186_v32, %v25269_v22  ;;  %v12209_v33 = vrot.slane %v12187_v13, %v25269_v22  ;;  %v12217_v50 = vcombine.high %v12195_v12, %v12195_v12  ;;  %v12889_v5 = vpop.f32.mrf.mxu0 }
0x143a   :  { %v13029_v42 = vmul.f32 0.35355338, %v12195_v12  ;;  %v12586_v39 = vcombine.high %v12584_v15, %v12584_v15  ;;  %v12600_v61 = vrot.slane %v12584_v15, %v25269_v22  ;;  %v12607_v57 = vrot.slane %v12585_v38, %v25269_v22 }
0x143b   :  { %v12216_v40 = vrot.slane %v12188_v2, %v25269_v22  ;;  %v12218_v24 = vcombine.high %v12202_v18, %v12202_v18  ;;  %v12219_v8 = vcombine.high %v12209_v33, %v12209_v33  ;;  %v13030_v21 = vmul.f32 0.35355338, %v12209_v33  ;;  %v24554_v58 = vpop.f32.mrf.mxu0 }
0x143c   :  { %v13031_v45 = vmul.f32 0.35355338, %v12217_v50  ;;  %v13033_v14 = vmul.f32 0.35355338, %v12202_v18  ;;  %v13103_v4 = vrot.slane %v13029_v42, %v25269_v22  ;;  %v12614_v28 = vrot.slane %v12586_v39, %v25269_v22 }
0x143d   :  { %v13032_v16 = vmul.f32 0.35355338, %v12219_v8  ;;  %v13034_v34 = vmul.f32 0.35355338, %v12216_v40  ;;  %v13035_v48 = vmul.f32 0.35355338, %v12218_v24  ;;  %v12615_v62 = vcombine.high %v12593_v59, %v12593_v59  ;;  %v12894_v37 = vpop.f32.mrf.mxu0 }
0x143e   :  { %v13266_v35 = vcombine.low %v13030_v21, %v13031_v45  ;;  %v12616_v23 = vcombine.high %v12600_v61, %v12600_v61  ;;  %v12617_v19 = vcombine.high %v12607_v57, %v12607_v57  ;;  %v27669_v60 = vrot.slane %v13103_v4, %v25269_v22 }
0x143f   :  { %v13267_v51 = vcombine.low %v13032_v16, %v13033_v14  ;;  %v13268_v32 = vcombine.low %v13034_v34, %v13035_v48  ;;  %v27671_v13 = vcombine.low %v12607_v57, %v12615_v62  ;;  %v24557_v12 = vpop.f32.mrf.mxu0  ;;  %v13166_v15 = vrot.slane %v12593_v59, %v25269_v22 }
0x1440   :  { %v27674_v47 = vrot.slane %v13266_v35, %v25269_v22  ;;  %v27677_v38 = vcombine.low %v12617_v19, %v12600_v61  ;;  %v12220_v2 = vcombine.high %v12216_v40, %v12216_v40  ;;  %v13331_v53 = vcombine.low %v12614_v28, %v12616_v23 }
0x1441   :  { %v27680_v18 = vrot.slane %v13267_v51, %v25269_v22  ;;  %v12235_v26 = vrot.slane %v12227_v36, %v25269_v22  ;;  %v12242_v29 = vrot.slane %v12228_v20, %v25269_v22  ;;  %v13339_v1 = vrot.slane %v27671_v13, %v25269_v22 }
0x1442   :  { %v13346_v33 = vrot.slane %v27677_v38, %v25269_v22  ;;  %v13036_v50 = vmul.f32 0.35355338, %v12220_v2  ;;  %v12618_v42 = vcombine.high %v12614_v28, %v12614_v28  ;;  %v12626_v61 = vcombine.high %v12625_v31, %v12625_v31 }
0x1443   :  { %v13037_v59 = vmul.f32 0.35355338, %v12235_v26  ;;  %v27688_v39 = vmul.f32 0.35355338, %v12242_v29  ;;  %v12633_v57 = vrot.slane %v12625_v31, %v25269_v22  ;;  %v27692_v40 = vrot.slane %v13268_v32, %v25269_v22 }
0x1444   :  { %v12901_v36 = vcombine.high %v12885_v56, %v12885_v56  ;;  %v12908_v20 = vrot.slane %v12885_v56, %v25269_v22  ;;  %v13173_v24 = vrot.slane %v13166_v15, %v25269_v22  ;;  %v12640_v21 = vrot.slane %v12626_v61, %v25269_v22 }
0x1445   :  { %v13269_v8 = vcombine.low %v13036_v50, %v13037_v59  ;;  %v13332_v58 = vcombine.low %v12618_v42, %v12633_v57  ;;  %v13353_v45 = vrot.slane %v13331_v53, %v25269_v22  ;;  %v13321_v14 = vrot.slane %v27688_v39, %v25269_v22 }
0x1446   :  { %v12915_v4 = vrot.slane %v12901_v36, %v25269_v22  ;;  %v12916_v31 = vcombine.high %v12908_v20, %v12908_v20  ;;  %24558 = vmatprep.subr.msk.mxu1 %vm1640_vm3, %v13173_v24  ;;  %v12890_v28 = vadd.f32 %v12889_v5, %v27610_v52  ;;  %v13384_v48 = vrot.slane %v12640_v21, %v25269_v22 }
0x1447   :  { %v13297_v16 = vrot.slane %v13269_v8, %v25269_v22  ;;  %v13360_v34 = vrot.slane %v13332_v58, %v25269_v22  ;;  %v12924_v62 = vrot.slane %v12908_v20, %v25269_v22  ;;  %24559 = vmatpush3.xpose.msk.msra.mxu1 %vm1640_vm3, %v13173_v24  ;;  %v13151_v5 = vrot.slane %v13143_v30, %v25269_v22 }
0x1448   :  { %v12917_v35 = vcombine.high %v12915_v4, %v12915_v4  ;;  %v12931_v23 = vrot.slane %v12915_v4, %v25269_v22  ;;  %v12938_v19 = vrot.slane %v12916_v31, %v25269_v22  ;;  %v12950_v56 = vcombine.high %v12890_v28, %v12890_v28 }
0x1449   :  { %v13299_v51 = vcombine.low %v27692_v40, %v13297_v16  ;;  %v13362_v32 = vcombine.low %v13353_v45, %v13360_v34  ;;  %v12957_v52 = vrot.slane %v12890_v28, %v25269_v22  ;;  %v13158_v50 = vrot.slane %v13144_v9, %v25269_v22 }
0x144a   :  { %v12945_v12 = vrot.slane %v12917_v35, %v25269_v22  ;;  %v13519_v15 = vcombine.low %v12924_v62, %v12938_v19  ;;  %v23514_v2 = vcombine.high %v12924_v62, %v12938_v19  ;;  %v12964_v53 = vrot.slane %v12950_v56, %v25269_v22 }
0x144b   :  { %v12965_v26 = vcombine.high %v12957_v52, %v12957_v52  ;;  %v12973_v29 = vrot.slane %v12957_v52, %v25269_v22  ;;  %v12895_v42 = vadd.f32 %v12894_v37, %v27632_v11  ;;  %v13159_v24 = vcombine.low %v13151_v5, %v13158_v50 }
0x144c   :  { %v13521_v59 = vcombine.low %v12931_v23, %v12945_v12  ;;  %v23515_v61 = vcombine.high %v12931_v23, %v12945_v12  ;;  %v13529_v10 = vrot.slane %v13519_v15, %v25269_v22  ;;  %v13536_v46 = vrot.slane %v23514_v2, %v25269_v22 }
0x144d   :  { %v12966_v30 = vcombine.high %v12964_v53, %v12964_v53  ;;  %v12980_v57 = vrot.slane %v12964_v53, %v25269_v22  ;;  %v12987_v40 = vrot.slane %v12965_v26, %v25269_v22  ;;  %v12995_v36 = vcombine.high %v12973_v29, %v12973_v29  ;;  %24560 = vmatprep.subr.msk.mxu1 %vm1640_vm3, %v13159_v24 }
0x144e   :  { %v13574_v20 = vrot.slane %v12973_v29, %v25269_v22  ;;  %v13005_v63 = vrot.slane %v12895_v42, %v25269_v22  ;;  %v13080_v6 = vcombine.low %v27635_v44, %v27638_v49  ;;  %v13081_v45 = vcombine.low %v27641_v54, %v27644_v27  ;;  %24561 = vmatpush3.xpose.msk.msra.mxu1 %vm1640_vm3, %v13159_v24 }
0x144f   :  { %v12994_v11 = vrot.slane %v12966_v30, %v25269_v22  ;;  %v12996_v9 = vcombine.high %v12980_v57, %v12980_v57  ;;  %v12997_v37 = vcombine.high %v12987_v40, %v12987_v40  ;;  %v13666_v8 = vcombine.low %v12987_v40, %v12995_v36 }
0x1450   :  { %v13006_v21 = vcombine.high %v13005_v63, %v13005_v63  ;;  %v13013_v58 = vrot.slane %v13005_v63, %v25269_v22  ;;  %v13088_v4 = vrot.slane %v13080_v6, %v25269_v22  ;;  %v13391_v44 = vrot.slane %v13384_v48, %v25269_v22 }
0x1451   :  { %v13667_v31 = vcombine.low %v12997_v37, %v12980_v57  ;;  %v13668_v28 = vcombine.low %v12994_v11, %v12996_v9  ;;  %v12998_v16 = vcombine.high %v12994_v11, %v12994_v11  ;;  %v13095_v34 = vrot.slane %v13081_v45, %v25269_v22 }
0x1452   :  { %v13020_v49 = vrot.slane %v13006_v21, %v25269_v22  ;;  %v13361_v54 = vcombine.low %v13339_v1, %v13346_v33  ;;  %v13376_v27 = vrot.slane %v13362_v32, %v25269_v22  ;;  %24565 = vmatprep.subr.msk.mxu0 %vm1640_vm3, %v13391_v44  ;;  %v13581_v35 = vrot.slane %v13574_v20, %v25269_v22 }
0x1453   :  { %v13669_v62 = vcombine.low %v12998_v16, %v13013_v58  ;;  %v13298_v48 = vcombine.low %v27674_v47, %v27680_v18  ;;  %v13313_v23 = vrot.slane %v13299_v51, %v25269_v22  ;;  %v13096_v56 = vcombine.low %v13088_v4, %v13095_v34  ;;  %24566 = vmatpush3.xpose.msk.msra.mxu0 %vm1640_vm3, %v13391_v44 }
0x1454   :  { %v13721_v19 = vrot.slane %v13020_v49, %v25269_v22  ;;  %v13369_v13 = vrot.slane %v13361_v54, %v25269_v22  ;;  %v13543_v38 = vrot.slane %v13521_v59, %v25269_v22  ;;  %24572 = vmatprep.subr.msk.mxu1 %vm2058_vm6, %v13581_v35  ;;  %v13550_v32 = vrot.slane %v23515_v61, %v25269_v22 }
0x1455   :  { %v13697_v1 = vrot.slane %v13669_v62, %v25269_v22  ;;  %v13306_v33 = vrot.slane %v13298_v48, %v25269_v22  ;;  %v13551_v47 = vcombine.low %v13529_v10, %v13536_v46  ;;  %24562 = vmatprep.mubr.msk.f32.mxu1 %vm1640_vm3, %v13096_v56  ;;  %v13676_v52 = vrot.slane %v13666_v8, %v25269_v22 }
0x1456   :  { %v13377_v18 = vcombine.low %v13369_v13, %v13376_v27  ;;  %v13728_v51 = vrot.slane %v13721_v19, %v25269_v22  ;;  %v13683_v5 = vrot.slane %v13667_v31, %v25269_v22  ;;  %24563 = vmatmul.mubr.msk.f32.vlgmr.msra.gmra.mxu1 %vm1640_vm3, %v27669_v60  ;;  %v13552_v15 = vcombine.low %v13543_v38, %v13550_v32  ;;  %v23526_v32 = vld [vmem:[%s29683_s26 + $0xb8] sm:$0xff] }
0x1457   :  { %v13314_v12 = vcombine.low %v13306_v33, %v13313_v23  ;;  %v13690_v2 = vrot.slane %v13668_v28, %v25269_v22  ;;  %24573 = vmatpush3.msk.msra.mxu1 %vm2058_vm6, %v13581_v35  ;;  %v13559_v26 = vrot.slane %v13551_v47, %v25269_v22  ;;  %v13328_v60 = vrot.slane %v13321_v14, %v25269_v22 }
0x1458   :  { %24567 = vmatprep.subr.msk.mxu0 %vm1640_vm3, %v13377_v18  ;;  %v13698_v53 = vcombine.low %v13676_v52, %v13683_v5  ;;  %v13566_v29 = vrot.slane %v13552_v15, %v25269_v22  ;;  %v23524_v52 = vld [vmem:[%s29683_s26 + $0xa8] sm:$0xff]  ;;  %v23523_v15 = vld [vmem:[%s29683_s26 + $0xa0] sm:$0xff] }
0x1459   :  { %24568 = vmatpush3.xpose.msk.msra.mxu0 %vm1640_vm3, %v13377_v18  ;;  %24569 = vmatprep.mubr.msk.f32.mxu0 %vm1640_vm3, %v13314_v12  ;;  %v13699_v50 = vcombine.low %v13690_v2, %v13697_v1  ;;  %v23525_v18 = vld [vmem:[%s29683_s26 + $0xb0] sm:$0xff]  ;;  %v23537_v12 = vld [vmem:[%s29684_s28 + $0xb8] sm:$0xff] }
0x145a   :  { %24579 = vmatprep.subr.msk.mxu0 %vm2058_vm6, %v13728_v51  ;;  %v13567_v42 = vcombine.low %v13559_v26, %v13566_v29  ;;  %v13706_v59 = vrot.slane %v13698_v53, %v25269_v22  ;;  %v23536_v2 = vld [vmem:[%s29684_s28 + $0xb0] sm:$0xff]  ;;  %v23535_v53 = vld [vmem:[%s29684_s28 + $0xa8] sm:$0xff]  ;;  %v23548_v26 = vld [vmem:[%s29658_s7 + $0xb8] sm:$0xff] }
0x145b   :  { %v13713_v61 = vrot.slane %v13699_v50, %v25269_v22  ;;  %v23534_v29 = vld [vmem:[%s29684_s28 + $0xa0] sm:$0xff]  ;;  %v23547_v50 = vld [vmem:[%s29658_s7 + $0xb0] sm:$0xff] }
0x145c   :  { %24570 = vmatmul.mubr.msk.f32.vlgmr.msra.gmra.mxu0 %vm1640_vm3, %v13328_v60  ;;  %24574 = vmatprep.subr.mxu1 %v13567_v42  ;;  %v23546_v60 = vld [vmem:[%s29658_s7 + $0xa8] sm:$0xff] }
0x145d   :  { %24580 = vmatpush3.msk.msra.mxu0 %vm2058_vm6, %v13728_v51  ;;  %v13714_v10 = vcombine.low %v13706_v59, %v13713_v61  ;;  %24575 = vmatpush3.msra.mxu1 %v13567_v42  ;;  %v23545_v42 = vld [vmem:[%s29658_s7 + $0xa0] sm:$0xff] }
0x145e   :  { %24586 = vmatprep.subr.mxu1 %v25088_v0  ;;  %v23528_v59 = vld [vmem:[%s29656_s4 + $0x5] ss:$0 sm:$0xff] }
0x145f   :  { %24581 = vmatprep.subr.mxu0 %v13714_v10  ;;  %v13827_v61 = vcombine.high %v23528_v59, %v23528_v59 }
0x1460   :  { %24582 = vmatpush3.msra.mxu0 %v13714_v10  ;;  %v13834_v10 = vrot.slane %v23528_v59, %v25269_v22 }
0x1461   :  { %24603 = vmatprep.subr.mxu0 %v25088_v0 }
0x1516   :  { %v24564_v39 = vpop.f32.mrf.mxu1 }
0x1517   :  { %v13478_v57 = vsel %vm1946_vm5, %v24564_v39, -inf }
0x1518   :  { %v13248_v14 = vpop.f32.mrf.mxu1 }
0x1519   :  { %v13475_v46 = vsel %vm1942_vm4, %v13248_v14, -inf }
0x151a   :  { %13476 = vmax.xlane.f32.xlu0 %v13475_v46 }
0x151c   :  { %v24571_v30 = vpop.f32.mrf.mxu0 }
0x151d   :  { %v13484_v20 = vsel %vm1946_vm5, %v24571_v30, -inf }
0x151e   :  { %v13466_v40 = vpop.f32.mrf.mxu0  ;;  %13479 = vmax.xlane.f32.xlu0 %v13478_v57 }
0x151f   :  { %v13481_v36 = vsel %vm1942_vm4, %v13466_v40, -inf }
0x1520   :  { %13482 = vmax.xlane.f32.xlu1 %v13481_v36 }
0x1524   :  { %13485 = vmax.xlane.f32.xlu1 %v13484_v20  ;;  %v23539_v20 = vld [vmem:[%s29657_s6 + $0x5] ss:$0 sm:$0xff] }
0x15a3   :  { %v13477_v24 = vpop.xlane.xlu0 %13476 }
0x15a4   :  { %v13487_v63 = vsub.f32 %v13248_v14, %v13477_v24  ;;  %v13842_v14 = vcombine.high %v13834_v10, %v13834_v10 }
0x15a6   :  { %v13491_v6 = vmul.f32 1.442695, %v13487_v63  ;;  %v13864_v57 = vrot.slane %v13842_v14, %v25269_v22  ;;  %v23550_v63 = vld [vmem:[%s29659_s8 + $0x5] ss:$0 sm:$0xff] }
0x15a7   :  { %v13480_v11 = vpop.xlane.xlu0 %13479 }
0x15a8   :  { %24994 = vpow2.f32 %v13491_v6  ;;  %v13488_v9 = vsub.f32 %v24564_v39, %v13480_v11  ;;  %v13841_v39 = vrot.slane %v13827_v61, %v25269_v22 }
0x15a9   :  { %v13483_v37 = vpop.xlane.xlu1 %13482 }
0x15aa   :  { %v13489_v8 = vsub.f32 %v13466_v40, %v13483_v37  ;;  %v13493_v21 = vmul.f32 1.442695, %v13488_v9  ;;  %v13843_v46 = vcombine.high %v13841_v39, %v13841_v39  ;;  %v13857_v40 = vrot.slane %v13841_v39, %v25269_v22 }
0x15ab   :  { %v14225_v37 = vcombine.high %v23539_v20, %v23539_v20 }
0x15ac   :  { %v13495_v58 = vmul.f32 1.442695, %v13489_v8  ;;  %24996 = vpow2.f32 %v13493_v21  ;;  %v27891_v36 = vrot.slane %v13843_v46, %v25269_v22  ;;  %v14232_v8 = vrot.slane %v23539_v20, %v25269_v22 }
0x15ad   :  { %v13486_v45 = vpop.xlane.xlu1 %13485  ;;  %v14605_v21 = vcombine.high %v23550_v63, %v23550_v63 }
0x15ae   :  { %24998 = vpow2.f32 %v13495_v58  ;;  %v13490_v4 = vsub.f32 %v24571_v30, %v13486_v45  ;;  %v27886_v30 = vrot.slane %v13834_v10, %v25269_v22  ;;  %v13878_v11 = vcombine.low %v13857_v40, %v27891_v36 }
0x15af   :  { %v23530_v9 = vcombine.high %v13857_v40, %v27891_v36 }
0x15b0   :  { %v13497_v31 = vmul.f32 1.442695, %v13490_v4  ;;  %v13876_v24 = vcombine.low %v27886_v30, %v13864_v57  ;;  %v23529_v6 = vcombine.high %v27886_v30, %v13864_v57  ;;  %v13900_v4 = vrot.slane %v13878_v11, %v25269_v22 }
0x15b2   :  { %25000 = vpow2.f32 %v13497_v31  ;;  %v13886_v58 = vrot.slane %v13876_v24, %v25269_v22  ;;  %v13893_v45 = vrot.slane %v23529_v6, %v25269_v22  ;;  %v13907_v31 = vrot.slane %v23530_v9, %v25269_v22 }
0x15b5   :  { %v24995_v28 = vpop.eup %24994 }
0x15b6   :  { %v13499_v16 = vsel %vm1942_vm4, %v24995_v28, 0.0 }
0x15b7   :  { %13500 = vadd.xlane.f32.xlu0 %v13499_v16  ;;  %v14240_v16 = vcombine.high %v14232_v8, %v14232_v8 }
0x15b9   :  { %v24997_v44 = vpop.eup %24996 }
0x15ba   :  { %v13502_v34 = vsel %vm1946_vm5, %v24997_v44, 0.0 }
0x15bb   :  { %v24999_v49 = vpop.eup %24998  ;;  %13503 = vadd.xlane.f32.xlu0 %v13502_v34  ;;  %v13872_v34 = vcombine.high %v27886_v30, %v27886_v30 }
0x15bc   :  { %v13505_v54 = vsel %vm1942_vm4, %v24999_v49, 0.0 }
0x15bd   :  { %13506 = vadd.xlane.f32.xlu1 %v13505_v54  ;;  %v13873_v54 = vcombine.high %v13857_v40, %v13857_v40 }
0x15bf   :  { %v25001_v27 = vpop.eup %25000 }
0x15c0   :  { %v13508_v62 = vsel %vm1946_vm5, %v25001_v27, 0.0 }
0x15c1   :  { %13509 = vadd.xlane.f32.xlu1 %v13508_v62  ;;  %v13908_v62 = vcombine.low %v13886_v58, %v13893_v45 }
0x1640   :  { %v13501_v35 = vpop.xlane.xlu0 %13500 }
0x1641   :  { %25002 = vrcp.f32 %v13501_v35  ;;  %v13909_v35 = vcombine.low %v13900_v4, %v13907_v31 }
0x1644   :  { %v13504_v48 = vpop.xlane.xlu0 %13503 }
0x1645   :  { %25004 = vrcp.f32 %v13504_v48 }
0x1646   :  { %v13507_v23 = vpop.xlane.xlu1 %13506 }
0x1647   :  { %25006 = vrcp.f32 %v13507_v23  ;;  %v13925_v23 = vcombine.low %v27886_v30, %v27886_v30 }
0x164a   :  { %v13510_v19 = vpop.xlane.xlu1 %13509 }
0x164b   :  { %25008 = vrcp.f32 %v13510_v19  ;;  %v27916_v19 = vrot.slane %v14232_v8, %v25269_v22 }
0x164d   :  { %v14323_v46 = vcombine.low %v27916_v19, %v27916_v19 }
0x164e   :  { %v25003_v56 = vpop.eup %25002 }
0x164f   :  { %v13515_v13 = vmul.f32 %v25003_v56, %v24995_v28  ;;  %v14239_v28 = vrot.slane %v14225_v37, %v25269_v22  ;;  %v14262_v56 = vrot.slane %v14240_v16, %v25269_v22  ;;  %v14333_v31 = vrot.slane %v14323_v46, %v25269_v22 }
0x1651   :  { %24576 = vmatprep.mubr.msk.f32.mxu1 %vm1942_vm4, %v13515_v13  ;;  %v14241_v48 = vcombine.high %v14239_v28, %v14239_v28  ;;  %v23540_v10 = vcombine.high %v27916_v19, %v14262_v56 }
0x1652   :  { %v25005_v38 = vpop.eup %25004 }
0x1653   :  { %v13516_v33 = vmul.f32 %v25005_v38, %v24997_v44  ;;  %v14612_v44 = vrot.slane %v23550_v63, %v25269_v22  ;;  %v14291_v8 = vrot.slane %v23540_v10, %v25269_v22 }
0x1654   :  { %v25007_v1 = vpop.eup %25006 }
0x1655   :  { %v13517_v47 = vmul.f32 %v25007_v1, %v24999_v49  ;;  %24577 = vmatmul.mubr.msk.f32.vlgmr.msra.gmra.mxu1 %vm1942_vm4, %v13516_v33  ;;  %v14619_v49 = vrot.slane %v14605_v21, %v25269_v22  ;;  %v14620_v13 = vcombine.high %v14612_v44, %v14612_v44  ;;  %v13926_v1 = vcombine.low %v13864_v57, %v13872_v34 }
0x1656   :  { %24587 = vmatpush3.msra.mxu1 %v23526_v32  ;;  %24594 = vmatprep.mubr.msk.f32.mxu1 %vm25090_vm2, %v25088_v0  ;;  %v13928_v32 = vcombine.low %v27891_v36, %v13873_v54 }
0x1657   :  { %24583 = vmatprep.mubr.msk.f32.mxu0 %vm1942_vm4, %v13517_v47  ;;  %24588 = vmatprep.subr.mxu1 %v25088_v0  ;;  %v14621_v38 = vcombine.high %v14619_v49, %v14619_v49  ;;  %v14255_v47 = vrot.slane %v14239_v28, %v25269_v22 }
0x1658   :  { %v25009_v51 = vpop.eup %25008  ;;  %24589 = vmatpush3.msra.mxu1 %v23525_v18  ;;  %v27922_v18 = vrot.slane %v13908_v62, %v25269_v22  ;;  %v13956_v61 = vrot.slane %v13928_v32, %v25269_v22 }
0x1659   :  { %v13518_v5 = vmul.f32 %v25009_v51, %v25001_v27  ;;  %24590 = vmatprep.subr.mxu1 %v25088_v0  ;;  %v13874_v27 = vcombine.high %v13864_v57, %v13864_v57  ;;  %v27925_v51 = vrot.slane %v13909_v35, %v25269_v22 }
0x165a   :  { %24591 = vmatpush3.msra.mxu1 %v23524_v52  ;;  %v27928_v52 = vrot.slane %v14241_v48, %v25269_v22 }
0x165b   :  { %24584 = vmatmul.mubr.msk.f32.vlgmr.msra.gmra.mxu0 %vm1942_vm4, %v13518_v5  ;;  %24592 = vmatprep.subr.mxu1 %v25088_v0  ;;  %v13927_v33 = vcombine.low %v13874_v27, %v13857_v40  ;;  %v14270_v5 = vcombine.high %v27916_v19, %v27916_v19  ;;  %v13875_v40 = vcombine.high %v27891_v36, %v27891_v36 }
0x165c   :  { %24604 = vmatpush3.msra.mxu0 %v23537_v12  ;;  %24593 = vmatpush3.msra.mxu1 %v23523_v15  ;;  %v13935_v12 = vrot.slane %v13925_v23, %v25269_v22  ;;  %v14274_v15 = vcombine.low %v27916_v19, %v14262_v56  ;;  %v14276_v39 = vcombine.low %v14255_v47, %v27928_v52 }
0x165d   :  { %24605 = vmatprep.subr.mxu0 %v25088_v0  ;;  %24595 = vmatmul.mubr.msk.f32.vlgmr.msra.gmra.mxu1 %vm79_vm1, %v27415_v3  ;;  %v13949_v59 = vrot.slane %v13927_v33, %v25269_v22  ;;  %v23541_v14 = vcombine.high %v14255_v47, %v27928_v52  ;;  %v14324_v57 = vcombine.low %v14262_v56, %v14270_v5 }
0x165e   :  { %24606 = vmatpush3.msra.mxu0 %v23536_v2  ;;  %24597 = vmatprep.mubr.msk.f32.mxu1 %vm25090_vm2, %v25088_v0  ;;  %v14271_v2 = vcombine.high %v14255_v47, %v14255_v47  ;;  %v14284_v20 = vrot.slane %v14274_v15, %v25269_v22  ;;  %v14298_v45 = vrot.slane %v14276_v39, %v25269_v22 }
0x165f   :  { %24607 = vmatprep.subr.mxu0 %v25088_v0  ;;  %24620 = vmatprep.subr.mxu1 %v25088_v0  ;;  %v14305_v4 = vrot.slane %v23541_v14, %v25269_v22  ;;  %v14340_v28 = vrot.slane %v14324_v57, %v25269_v22  ;;  %v13924_v5 = vcombine.low %v27922_v18, %v27925_v51 }
0x1660   :  { %24608 = vmatpush3.msra.mxu0 %v23535_v53  ;;  %24621 = vmatpush3.msra.mxu1 %v23548_v26  ;;  %v14272_v53 = vcombine.high %v14262_v56, %v14262_v56  ;;  %v27935_v26 = vrot.slane %v14612_v44, %v25269_v22  ;;  %v14326_v63 = vcombine.low %v27928_v52, %v14271_v2 }
0x1661   :  { %24609 = vmatprep.subr.mxu0 %v25088_v0  ;;  %24598 = vmatmul.mubr.msk.f32.gmra.mxu1 %vm79_vm1, %v27446_v43  ;;  %v13958_v44 = vcombine.low %v13949_v59, %v13956_v61  ;;  %v14306_v33 = vcombine.low %v14284_v20, %v14291_v8  ;;  %v14307_v32 = vcombine.low %v14298_v45, %v14305_v4 }
0x1662   :  { %24622 = vmatprep.subr.mxu1 %v25088_v0  ;;  %24600 = vmatprep.mubr.msk.f32.mxu1 %vm25090_vm2, %v25088_v0  ;;  %v14325_v24 = vcombine.low %v14272_v53, %v14255_v47  ;;  %v14650_v21 = vcombine.high %v27935_v26, %v27935_v26  ;;  %v14354_v34 = vrot.slane %v14326_v63, %v25269_v22 }
0x1663   :  { %24610 = vmatpush3.msra.mxu0 %v23534_v29  ;;  %24611 = vmatprep.mubr.msk.f32.mxu0 %vm25090_vm2, %v25088_v0  ;;  %v14635_v29 = vrot.slane %v14619_v49, %v25269_v22  ;;  %v14703_v23 = vcombine.low %v27935_v26, %v27935_v26  ;;  %v14355_v47 = vcombine.low %v14333_v31, %v14340_v28 }
0x1664   :  { %24623 = vmatpush3.msra.mxu1 %v23547_v50  ;;  %24612 = vmatmul.mubr.msk.f32.vlgmr.msra.gmra.mxu0 %vm79_vm1, %v27415_v3  ;;  %v14642_v50 = vrot.slane %v14620_v13, %v25269_v22  ;;  %v14347_v49 = vrot.slane %v14325_v24, %v25269_v22  ;;  %v14273_v15 = vcombine.high %v27928_v52, %v27928_v52 }
0x1665   :  { %24624 = vmatprep.subr.mxu1 %v25088_v0  ;;  %24601 = vmatmul.mubr.msk.f32.gmra.mxu1 %vm79_vm1, %v27459_v7  ;;  %v14651_v58 = vcombine.high %v14635_v29, %v14635_v29  ;;  %v27993_v39 = vrot.slane %v14306_v33, %v25269_v22  ;;  %v27996_v14 = vrot.slane %v14307_v32, %v25269_v22 }
0x1666   :  { %24614 = vmatprep.mubr.msk.f32.mxu0 %vm25090_vm2, %v25088_v0  ;;  %24625 = vmatpush3.msra.mxu1 %v23546_v60  ;;  %v27940_v60 = vrot.slane %v14621_v38, %v25269_v22  ;;  %v14654_v6 = vcombine.low %v27935_v26, %v14642_v50  ;;  %v23551_v11 = vcombine.high %v27935_v26, %v14642_v50 }
0x1667   :  { %24628 = vmatprep.mubr.msk.f32.mxu1 %vm25090_vm2, %v25088_v0  ;;  %24626 = vmatprep.subr.mxu1 %v25088_v0  ;;  %v14652_v36 = vcombine.high %v14642_v50, %v14642_v50  ;;  %v14704_v56 = vcombine.low %v14642_v50, %v14650_v21  ;;  %v14363_v46 = vrot.slane %v14355_v47, %v25269_v22 }
0x1668   :  { %24627 = vmatpush3.msra.mxu1 %v23545_v42  ;;  %24615 = vmatmul.mubr.msk.f32.gmra.mxu0 %vm79_vm1, %v27446_v43  ;;  %v13942_v42 = vrot.slane %v13926_v1, %v25269_v22  ;;  %v14656_v9 = vcombine.low %v14635_v29, %v27940_v60  ;;  %v23552_v37 = vcombine.high %v14635_v29, %v27940_v60 }
0x1669   :  { %24629 = vmatmul.mubr.msk.f32.vlgmr.msra.gmra.mxu1 %vm79_vm1, %v27415_v3  ;;  %24617 = vmatprep.mubr.msk.f32.mxu0 %vm25090_vm2, %v25088_v0  ;;  %v14664_v54 = vrot.slane %v14654_v6, %v25269_v22  ;;  %v14671_v27 = vrot.slane %v23551_v11, %v25269_v22  ;;  %v14705_v13 = vcombine.low %v14652_v36, %v14635_v29 }
0x166a   :  { %24631 = vmatprep.mubr.msk.f32.mxu1 %vm25090_vm2, %v25088_v0  ;;  %v13957_v16 = vcombine.low %v13935_v12, %v13942_v42  ;;  %v14678_v62 = vrot.slane %v14656_v9, %v25269_v22  ;;  %v14685_v35 = vrot.slane %v23552_v37, %v25269_v22  ;;  %v14706_v38 = vcombine.low %v27940_v60, %v14651_v58 }
0x166b   :  { %v13974_v1 = vcombine.low %v13875_v40, %v27886_v30  ;;  %v14356_v12 = vcombine.low %v14347_v49, %v14354_v34  ;;  %v13972_v29 = vrot.slane %v13958_v44, %v25269_v22  ;;  %v14686_v50 = vcombine.low %v14664_v54, %v14671_v27 }
0x166c   :  { %24618 = vmatmul.mubr.msk.f32.gmra.mxu0 %vm79_vm1, %v27459_v7  ;;  %v13965_v53 = vrot.slane %v13957_v16, %v25269_v22  ;;  %v14687_v42 = vcombine.low %v14678_v62, %v14685_v35  ;;  %v14713_v30 = vrot.slane %v14703_v23, %v25269_v22  ;;  %v14720_v61 = vrot.slane %v14704_v56, %v25269_v22 }
0x166d   :  { %24632 = vmatmul.mubr.msk.f32.gmra.mxu1 %vm79_vm1, %v27446_v43  ;;  %v14727_v18 = vrot.slane %v14705_v13, %v25269_v22  ;;  %v14734_v51 = vrot.slane %v14706_v38, %v25269_v22  ;;  %v13981_v52 = vrot.slane %v13974_v1, %v25269_v22  ;;  %v14370_v24 = vrot.slane %v14356_v12, %v25269_v22 }
0x166e   :  { %24634 = vmatprep.mubr.msk.f32.mxu1 %vm25090_vm2, %v25088_v0  ;;  %v14372_v63 = vcombine.low %v14273_v15, %v27916_v19  ;;  %v28003_v11 = vrot.slane %v14686_v50, %v25269_v22  ;;  %v28006_v9 = vrot.slane %v14687_v42, %v25269_v22  ;;  %v14653_v37 = vcombine.high %v27940_v60, %v27940_v60 }
0x166f   :  { %v28010_v21 = vcombine.low %v13965_v53, %v13972_v29  ;;  %v14735_v58 = vcombine.low %v14713_v30, %v14720_v61  ;;  %v14736_v36 = vcombine.low %v14727_v18, %v14734_v51  ;;  %v28015_v31 = vrot.slane %v13981_v52, %v25269_v22 }
0x1670   :  { %v14322_v60 = vcombine.low %v27993_v39, %v27996_v14  ;;  %v14379_v49 = vrot.slane %v14372_v63, %v25269_v22  ;;  %v28023_v54 = vcombine.low %v14363_v46, %v14370_v24  ;;  %v14702_v27 = vcombine.low %v28003_v11, %v28006_v9 }
0x1671   :  { %24635 = vmatmul.mubr.msk.f32.gmra.mxu1 %vm79_vm1, %v27459_v7  ;;  %v14752_v62 = vcombine.low %v14653_v37, %v27935_v26  ;;  %v14743_v13 = vrot.slane %v14735_v58, %v25269_v22  ;;  %v14750_v38 = vrot.slane %v14736_v36, %v25269_v22 }
0x1672   :  { %v28036_v53 = vrot.slane %v14379_v49, %v25269_v22 }
0x1673   :  { %v14759_v61 = vrot.slane %v14752_v62, %v25269_v22  ;;  %v28044_v46 = vcombine.low %v14743_v13, %v14750_v38 }
0x1715   :  { %v27971_v48 = vpop.f32.mrf.mxu1 }
0x1716   :  { %v16155_v34 = vrot.slane %v27971_v48, %v25269_v22 }
0x1717   :  { %v27985_v59 = vpop.f32.mrf.mxu1 }
0x1718   :  { %v16162_v29 = vrot.slane %v16155_v34, %v25269_v22 }
0x171b   :  { %v27981_v2 = vpop.f32.mrf.mxu0 }
0x171c   :  { %v16218_v42 = vrot.slane %v27981_v2, %v25269_v22 }
0x171d   :  { %v13804_v10 = vpop.f32.mrf.mxu0  ;;  %v14058_v57 = vpop.f32.mrf.mxu1 }
0x171e   :  { %v16163_v40 = vcombine.high %v13804_v10, %v13804_v10  ;;  %v16170_v20 = vrot.slane %v13804_v10, %v25269_v22  ;;  %v14059_v6 = vadd.f32 %v14058_v57, %v13924_v5 }
0x171f   :  { %v24596_v8 = vpop.f32.mrf.mxu1 }
0x1720   :  { %v16177_v45 = vrot.slane %v16163_v40, %v25269_v22  ;;  %v16178_v4 = vcombine.high %v16170_v20, %v16170_v20  ;;  %v16186_v19 = vrot.slane %v16170_v20, %v25269_v22  ;;  %v14075_v28 = vcombine.high %v14059_v6, %v14059_v6 }
0x1721   :  { %v14082_v16 = vrot.slane %v14059_v6, %v25269_v22  ;;  %v14063_v44 = vpop.f32.mrf.mxu1 }
0x1722   :  { %v14089_v35 = vrot.slane %v14075_v28, %v25269_v22  ;;  %v16179_v33 = vcombine.high %v16177_v45, %v16177_v45  ;;  %v16200_v48 = vrot.slane %v16178_v4, %v25269_v22  ;;  %v16208_v32 = vcombine.high %v16186_v19, %v16186_v19 }
0x1723   :  { %v14090_v23 = vcombine.high %v14082_v16, %v14082_v16  ;;  %v24599_v56 = vpop.f32.mrf.mxu1  ;;  %v14098_v1 = vrot.slane %v14082_v16, %v25269_v22  ;;  %v16193_v26 = vrot.slane %v16177_v45, %v25269_v22  ;;  %v16275_v20 = vcombine.low %v16162_v29, %v16186_v19 }
0x1724   :  { %v14456_v47 = vpop.f32.mrf.mxu0  ;;  %v14091_v5 = vcombine.high %v14089_v35, %v14089_v35  ;;  %v14105_v50 = vrot.slane %v14089_v35, %v25269_v22  ;;  %v28047_v40 = vrot.slane %v16179_v33, %v25269_v22  ;;  %v16276_v24 = vcombine.low %v16200_v48, %v16208_v32 }
0x1725   :  { %v14112_v12 = vrot.slane %v14090_v23, %v25269_v22  ;;  %v14068_v15 = vpop.f32.mrf.mxu1  ;;  %v14120_v57 = vcombine.high %v14098_v1, %v14098_v1  ;;  %v14973_v37 = vmul.f32 0.35355338, %v14098_v1  ;;  %v16209_v2 = vcombine.high %v16193_v26, %v16193_v26 }
0x1726   :  { %v24613_v30 = vpop.f32.mrf.mxu0  ;;  %v14119_v18 = vrot.slane %v14091_v5, %v25269_v22  ;;  %v16210_v8 = vcombine.high %v16200_v48, %v16200_v48  ;;  %v14121_v36 = vcombine.high %v14105_v50, %v14105_v50  ;;  %v28052_v4 = vrot.slane %v16218_v42, %v25269_v22 }
0x1727   :  { %v14122_v51 = vcombine.high %v14112_v12, %v14112_v12  ;;  %v14974_v10 = vmul.f32 0.35355338, %v14112_v12  ;;  %v24602_v52 = vpop.f32.mrf.mxu1  ;;  %v28055_v16 = vrot.slane %v14759_v61, %v25269_v22  ;;  %v16285_v19 = vrot.slane %v16275_v20, %v25269_v22 }
0x1728   :  { %v14461_v63 = vpop.f32.mrf.mxu0  ;;  %v14123_v6 = vcombine.high %v14119_v18, %v14119_v18  ;;  %v14978_v49 = vmul.f32 0.35355338, %v14119_v18  ;;  %v16292_v62 = vrot.slane %v16276_v24, %v25269_v22  ;;  %v14975_v23 = vmul.f32 0.35355338, %v14120_v57 }
0x1729   :  { %v28049_v58 = vpop.f32.mrf.mxu1  ;;  %v14976_v45 = vmul.f32 0.35355338, %v14122_v51  ;;  %v15000_v34 = vcombine.low %v14973_v37, %v14974_v10  ;;  %v14977_v56 = vmul.f32 0.35355338, %v14105_v50  ;;  %v16211_v13 = vcombine.high %v28047_v40, %v28047_v40 }
0x172a   :  { %v24616_v28 = vpop.f32.mrf.mxu0  ;;  %v14064_v38 = vadd.f32 %v14063_v44, %v28010_v21  ;;  %v14980_v33 = vmul.f32 0.35355338, %v14123_v6  ;;  %v28062_v48 = vcombine.low %v16210_v8, %v16193_v26  ;;  %v28065_v32 = vcombine.low %v28047_v40, %v16209_v2 }
0x172b   :  { %v24630_v35 = vpop.f32.mrf.mxu1  ;;  %v28067_v5 = vcombine.low %v16285_v19, %v16292_v62  ;;  %v14069_v50 = vadd.f32 %v14068_v15, %v28015_v31  ;;  %v14457_v21 = vadd.f32 %v14456_v47, %v14322_v60  ;;  %v14979_v30 = vmul.f32 0.35355338, %v14121_v36 }
0x172c   :  { %v14466_v1 = vpop.f32.mrf.mxu0  ;;  %v14124_v29 = vcombine.high %v14064_v38, %v14064_v38  ;;  %v14131_v42 = vrot.slane %v14064_v38, %v25269_v22  ;;  %v15001_v26 = vcombine.low %v14975_v23, %v14976_v45  ;;  %v15002_v61 = vcombine.low %v14977_v56, %v14978_v49 }
0x172d   :  { %v28069_v12 = vpop.f32.mrf.mxu1  ;;  %v28077_v18 = vrot.slane %v15000_v34, %v25269_v22  ;;  %v14179_v20 = vrot.slane %v14069_v50, %v25269_v22  ;;  %v15003_v31 = vcombine.low %v14979_v30, %v14980_v33  ;;  %v16299_v39 = vrot.slane %v28062_v48, %v25269_v22 }
0x172e   :  { %v24619_v44 = vpop.f32.mrf.mxu0  ;;  %v14138_v10 = vrot.slane %v14124_v29, %v25269_v22  ;;  %v14139_v52 = vcombine.high %v14131_v42, %v14131_v42  ;;  %v14147_v57 = vrot.slane %v14131_v42, %v25269_v22  ;;  %v16306_v14 = vrot.slane %v28065_v32, %v25269_v22 }
0x172f   :  { %v24633_v51 = vpop.f32.mrf.mxu1  ;;  %v14473_v60 = vcombine.high %v14457_v21, %v14457_v21  ;;  %v28091_v2 = vrot.slane %v15001_v26, %v25269_v22  ;;  %v28094_v8 = vrot.slane %v15002_v61, %v25269_v22  ;;  %v14480_v36 = vrot.slane %v14457_v21, %v25269_v22 }
0x1730   :  { %v14140_v15 = vcombine.high %v14138_v10, %v14138_v10  ;;  %v14154_v24 = vrot.slane %v14138_v10, %v25269_v22  ;;  %v14161_v6 = vrot.slane %v14139_v52, %v25269_v22  ;;  %v14169_v37 = vcombine.high %v14147_v57, %v14147_v57 }
0x1731   :  { %v28086_v47 = vpop.f32.mrf.mxu1  ;;  %v14462_v45 = vadd.f32 %v14461_v63, %v28023_v54  ;;  %v14187_v62 = vrot.slane %v14179_v20, %v25269_v22  ;;  %v28101_v35 = vrot.slane %v15003_v31, %v25269_v22  ;;  %v28103_v23 = vmul.f32 0.35355338, %v14147_v57 }
0x1732   :  { %v14168_v49 = vrot.slane %v14140_v15, %v25269_v22  ;;  %v14170_v34 = vcombine.high %v14154_v24, %v14154_v24  ;;  %v14171_v19 = vcombine.high %v14161_v6, %v14161_v6  ;;  %v14982_v56 = vmul.f32 0.35355338, %v14161_v6 }
0x1733   :  { %v24636_v28 = vpop.f32.mrf.mxu1  ;;  %v14487_v38 = vrot.slane %v14473_v60, %v25269_v22  ;;  %v14983_v33 = vmul.f32 0.35355338, %v14169_v37  ;;  %v14522_v54 = vcombine.high %v14462_v45, %v14462_v45  ;;  %v14529_v63 = vrot.slane %v14462_v45, %v25269_v22 }
0x1734   :  { %v14986_v29 = vmul.f32 0.35355338, %v14168_v49  ;;  %v14987_v42 = vmul.f32 0.35355338, %v14170_v34  ;;  %v14172_v50 = vcombine.high %v14168_v49, %v14168_v49  ;;  %v14837_v21 = vadd.f32 %v28049_v58, %v14702_v27 }
0x1735   :  { %v14467_v44 = vadd.f32 %v14466_v1, %v28036_v53  ;;  %v14984_v30 = vmul.f32 0.35355338, %v14171_v19  ;;  %v14989_v61 = vmul.f32 0.35355338, %v14187_v62  ;;  %v14488_v51 = vcombine.high %v14480_v36, %v14480_v36 }
0x1736   :  { %v14988_v26 = vmul.f32 0.35355338, %v14172_v50  ;;  %v14985_v10 = vmul.f32 0.35355338, %v14154_v24  ;;  %v15055_v52 = vrot.slane %v28103_v23, %v25269_v22  ;;  %v14180_v57 = vcombine.high %v14179_v20, %v14179_v20 }
0x1737   :  { %v14489_v31 = vcombine.high %v14487_v38, %v14487_v38  ;;  %v15218_v60 = vcombine.low %v14982_v56, %v14983_v33  ;;  %v15220_v15 = vcombine.low %v14986_v29, %v14987_v42  ;;  %v14496_v37 = vrot.slane %v14480_v36, %v25269_v22 }
0x1738   :  { %v15221_v6 = vcombine.low %v14988_v26, %v14989_v61  ;;  %v14503_v11 = vrot.slane %v14487_v38, %v25269_v22  ;;  %v14510_v9 = vrot.slane %v14488_v51, %v25269_v22  ;;  %v14536_v53 = vrot.slane %v14522_v54, %v25269_v22 }
0x1739   :  { %v14517_v27 = vrot.slane %v14489_v31, %v25269_v22  ;;  %v15219_v58 = vcombine.low %v14984_v30, %v14985_v10  ;;  %v14537_v24 = vcombine.high %v14529_v63, %v14529_v63  ;;  %v14545_v20 = vrot.slane %v14529_v63, %v25269_v22 }
0x173a   :  { %v28120_v1 = vrot.slane %v15221_v6, %v25269_v22  ;;  %v15063_v45 = vcombine.low %v14496_v37, %v14510_v9  ;;  %v23556_v28 = vcombine.high %v14496_v37, %v14510_v9  ;;  %v14853_v34 = vcombine.high %v14837_v21, %v14837_v21 }
0x173b   :  { %v15065_v49 = vcombine.low %v14503_v11, %v14517_v27  ;;  %v23557_v36 = vcombine.high %v14503_v11, %v14517_v27  ;;  %v14538_v19 = vcombine.high %v14536_v53, %v14536_v53  ;;  %v14552_v62 = vrot.slane %v14536_v53, %v25269_v22 }
0x173c   :  { %v14559_v56 = vrot.slane %v14537_v24, %v25269_v22  ;;  %v28126_v38 = vrot.slane %v14180_v57, %v25269_v22  ;;  %v28129_v33 = vrot.slane %v15220_v15, %v25269_v22  ;;  %v28132_v29 = vrot.slane %v15063_v45, %v25269_v22 }
0x173d   :  { %v28135_v42 = vrot.slane %v23556_v28, %v25269_v22  ;;  %v14566_v50 = vrot.slane %v14538_v19, %v25269_v22  ;;  %v14567_v54 = vcombine.high %v14545_v20, %v14545_v20  ;;  %v14568_v63 = vcombine.high %v14552_v62, %v14552_v62 }
0x173e   :  { %v14569_v30 = vcombine.high %v14559_v56, %v14559_v56  ;;  %v28139_v26 = vrot.slane %v15218_v60, %v25269_v22  ;;  %v28142_v61 = vrot.slane %v15219_v58, %v25269_v22  ;;  %v14860_v51 = vrot.slane %v14837_v21, %v25269_v22 }
0x173f   :  { %v14867_v10 = vrot.slane %v14853_v34, %v25269_v22  ;;  %v15251_v57 = vcombine.low %v28129_v33, %v28120_v1  ;;  %v28149_v31 = vrot.slane %v15065_v49, %v25269_v22  ;;  %v28152_v15 = vrot.slane %v23557_v36, %v25269_v22 }
0x1740   :  { %v15118_v6 = vrot.slane %v14545_v20, %v25269_v22  ;;  %v28155_v60 = vcombine.low %v14559_v56, %v14567_v54  ;;  %v28157_v37 = vcombine.low %v14569_v30, %v14552_v62  ;;  %v14868_v11 = vcombine.high %v14860_v51, %v14860_v51 }
0x1741   :  { %v14869_v9 = vcombine.high %v14867_v10, %v14867_v10  ;;  %v15095_v21 = vcombine.low %v28132_v29, %v28135_v42  ;;  %v15283_v27 = vcombine.low %v14566_v50, %v14568_v63  ;;  %v14570_v53 = vcombine.high %v14566_v50, %v14566_v50 }
0x1742   :  { %v14577_v58 = vrot.slane %v14467_v44, %v25269_v22  ;;  %v14876_v24 = vrot.slane %v14860_v51, %v25269_v22  ;;  %v14890_v45 = vrot.slane %v14868_v11, %v25269_v22  ;;  %v14842_v20 = vadd.f32 %v28069_v12, %v28044_v46 }
0x1743   :  { %v14847_v28 = vadd.f32 %v28086_v47, %v28055_v16  ;;  %v14897_v49 = vrot.slane %v14869_v9, %v25269_v22  ;;  %v15125_v19 = vrot.slane %v15118_v6, %v25269_v22  ;;  %v15291_v44 = vrot.slane %v28155_v60, %v25269_v22 }
0x1744   :  { %v14578_v34 = vcombine.high %v14577_v58, %v14577_v58  ;;  %v14585_v36 = vrot.slane %v14577_v58, %v25269_v22  ;;  %v15298_v62 = vrot.slane %v28157_v37, %v25269_v22  ;;  %v14883_v56 = vrot.slane %v14867_v10, %v25269_v22 }
0x1745   :  { %v15471_v29 = vcombine.low %v14876_v24, %v14890_v45  ;;  %v15305_v12 = vrot.slane %v15283_v27, %v25269_v22  ;;  %v14902_v16 = vcombine.high %v14842_v20, %v14842_v20  ;;  %v14909_v47 = vrot.slane %v14842_v20, %v25269_v22  ;;  %24637 = vmatprep.subr.msk.mxu0 %vm1640_vm3, %v15125_v19 }
0x1746   :  { %v15284_v46 = vcombine.low %v14570_v53, %v14585_v36  ;;  %v23566_v42 = vcombine.high %v14876_v24, %v14890_v45  ;;  %v14957_v50 = vrot.slane %v14847_v28, %v25269_v22  ;;  %24638 = vmatpush3.xpose.msk.msra.mxu0 %vm1640_vm3, %v15125_v19  ;;  %v15032_v54 = vcombine.low %v28077_v18, %v28091_v2 }
0x1747   :  { %v15033_v63 = vcombine.low %v28094_v8, %v28101_v35  ;;  %v15473_v30 = vcombine.low %v14883_v56, %v14897_v49  ;;  %v14592_v51 = vrot.slane %v14578_v34, %v25269_v22  ;;  %v14916_v10 = vrot.slane %v14902_v16, %v25269_v22 }
0x1748   :  { %v14917_v6 = vcombine.high %v14909_v47, %v14909_v47  ;;  %v23567_v60 = vcombine.high %v14883_v56, %v14897_v49  ;;  %v15481_v37 = vrot.slane %v15471_v29, %v25269_v22  ;;  %v15312_v11 = vrot.slane %v15284_v46, %v25269_v22 }
0x1749   :  { %v14925_v9 = vrot.slane %v14909_v47, %v25269_v22  ;;  %v14918_v27 = vcombine.high %v14916_v10, %v14916_v10  ;;  %v14932_v53 = vrot.slane %v14916_v10, %v25269_v22  ;;  %v14958_v2 = vcombine.high %v14957_v50, %v14957_v50 }
0x174a   :  { %v14939_v18 = vrot.slane %v14917_v6, %v25269_v22  ;;  %v15488_v8 = vrot.slane %v23566_v42, %v25269_v22  ;;  %v15040_v58 = vrot.slane %v15032_v54, %v25269_v22  ;;  %v15047_v24 = vrot.slane %v15033_v63, %v25269_v22 }
0x174b   :  { %v15526_v35 = vrot.slane %v14925_v9, %v25269_v22  ;;  %v15336_v45 = vrot.slane %v14592_v51, %v25269_v22  ;;  %v14946_v20 = vrot.slane %v14918_v27, %v25269_v22  ;;  %v15096_v49 = vcombine.low %v28149_v31, %v28152_v15 }
0x174c   :  { %v14949_v28 = vcombine.high %v14939_v18, %v14939_v18  ;;  %v14948_v34 = vcombine.high %v14932_v53, %v14932_v53  ;;  %v14965_v36 = vrot.slane %v14957_v50, %v25269_v22  ;;  %v15048_v19 = vcombine.low %v15040_v58, %v15047_v24 }
0x174d   :  { %v15533_v56 = vrot.slane %v15526_v35, %v25269_v22  ;;  %v15314_v29 = vcombine.low %v15305_v12, %v15312_v11  ;;  %v14947_v46 = vcombine.high %v14925_v9, %v14925_v9  ;;  %v14950_v16 = vcombine.high %v14946_v20, %v14946_v20 }
0x174e   :  { %v14972_v47 = vrot.slane %v14958_v2, %v25269_v22  ;;  %24641 = vmatprep.mubr.msk.f32.mxu0 %vm1640_vm3, %v15048_v19  ;;  %v15103_v42 = vrot.slane %v15095_v21, %v25269_v22  ;;  %v15110_v54 = vrot.slane %v15096_v49, %v25269_v22  ;;  %v15495_v31 = vrot.slane %v15473_v30, %v25269_v22 }
0x174f   :  { %24651 = vmatprep.subr.msk.mxu1 %vm2058_vm6, %v15533_v56  ;;  %v15619_v15 = vcombine.low %v14949_v28, %v14932_v53  ;;  %v15621_v50 = vcombine.low %v14950_v16, %v14965_v36  ;;  %v15502_v12 = vrot.slane %v23567_v60, %v25269_v22  ;;  %v15503_v63 = vcombine.low %v15481_v37, %v15488_v8 }
0x1750   :  { %24652 = vmatpush3.msk.msra.mxu1 %vm2058_vm6, %v15533_v56  ;;  %v15620_v51 = vcombine.low %v14946_v20, %v14948_v34  ;;  %v15111_v10 = vcombine.low %v15103_v42, %v15110_v54  ;;  %v15250_v6 = vcombine.low %v28139_v26, %v28142_v61  ;;  %v15313_v11 = vcombine.low %v15291_v44, %v15298_v62 }
0x1751   :  { %v15062_v21 = vrot.slane %v15055_v52, %v25269_v22  ;;  %v15618_v9 = vcombine.low %v14939_v18, %v14947_v46  ;;  %v15504_v30 = vcombine.low %v15495_v31, %v15502_v12  ;;  %v15328_v27 = vrot.slane %v15314_v29, %v25269_v22 }
0x1752   :  { %v14990_v53 = vmul.f32 0.35355338, %v28126_v38  ;;  %v15649_v60 = vrot.slane %v15621_v50, %v25269_v22  ;;  %24639 = vmatprep.subr.msk.mxu0 %vm1640_vm3, %v15111_v10  ;;  %v15343_v37 = vrot.slane %v15336_v45, %v25269_v22  ;;  %v15265_v26 = vrot.slane %v15251_v57, %v25269_v22 }
0x1753   :  { %v15673_v23 = vrot.slane %v14972_v47, %v25269_v22  ;;  %24640 = vmatpush3.xpose.msk.msra.mxu0 %vm1640_vm3, %v15111_v10  ;;  %v15511_v52 = vrot.slane %v15503_v63, %v25269_v22  ;;  %v15518_v61 = vrot.slane %v15504_v30, %v25269_v22  ;;  %v15321_v38 = vrot.slane %v15313_v11, %v25269_v22 }
0x1754   :  { %24644 = vmatprep.subr.msk.mxu0 %vm1640_vm3, %v15343_v37  ;;  %v15258_v44 = vrot.slane %v15250_v6, %v25269_v22  ;;  %v15635_v62 = vrot.slane %v15619_v15, %v25269_v22  ;;  %v15642_v18 = vrot.slane %v15620_v51, %v25269_v22  ;;  %v16308_v1 = vcombine.low %v16299_v39, %v16306_v14 }
0x1755   :  { %v15519_v33 = vcombine.low %v15511_v52, %v15518_v61  ;;  %v15329_v57 = vcombine.low %v15321_v38, %v15328_v27  ;;  %v15628_v2 = vrot.slane %v15618_v9, %v25269_v22  ;;  %v28245_v8 = vcombine.low %v16211_v13, %v28052_v4 }
0x1756   :  { %24642 = vmatmul.mubr.msk.f32.vlgmr.msra.gmra.mxu0 %vm1640_vm3, %v15062_v21  ;;  %v15266_v35 = vcombine.low %v15258_v44, %v15265_v26  ;;  %v15651_v58 = vcombine.low %v15642_v18, %v15649_v60  ;;  %v16315_v32 = vrot.slane %v28067_v5, %v25269_v22  ;;  %v16322_v48 = vrot.slane %v16308_v1, %v25269_v22 }
0x1757   :  { %24653 = vmatprep.subr.mxu1 %v15519_v33  ;;  %24645 = vmatpush3.xpose.msk.msra.mxu0 %vm1640_vm3, %v15343_v37  ;;  %v15273_v39 = vrot.slane %v14990_v53, %v25269_v22  ;;  %v15650_v40 = vcombine.low %v15628_v2, %v15635_v62  ;;  %v15680_v13 = vrot.slane %v15673_v23, %v25269_v22 }
0x1758   :  { %24648 = vmatprep.mubr.msk.f32.mxu0 %vm1640_vm3, %v15266_v35  ;;  %24654 = vmatpush3.msra.mxu1 %v15519_v33  ;;  %v28254_v4 = vcombine.low %v16315_v32, %v16322_v48  ;;  %v15665_v5 = vrot.slane %v15651_v58, %v25269_v22  ;;  %v16100_v37 = vcombine.high %v27985_v59, %v27985_v59 }
0x1759   :  { %24646 = vmatprep.subr.msk.mxu0 %vm1640_vm3, %v15329_v57  ;;  %24665 = vmatprep.subr.mxu1 %v25088_v0  ;;  %v15280_v14 = vrot.slane %v15273_v39, %v25269_v22  ;;  %v15658_v24 = vrot.slane %v15650_v40, %v25269_v22  ;;  %v16107_v61 = vrot.slane %v27985_v59, %v25269_v22 }
0x175a   :  { %v16114_v23 = vrot.slane %v16100_v37, %v25269_v22 }
0x175b   :  { %24647 = vmatpush3.xpose.msk.msra.mxu0 %vm1640_vm3, %v15329_v57  ;;  %v15666_v45 = vcombine.low %v15658_v24, %v15665_v5  ;;  %v16115_v44 = vcombine.high %v16107_v61, %v16107_v61  ;;  %v16123_v2 = vrot.slane %v16107_v61, %v25269_v22 }
0x175c   :  { %24658 = vmatprep.subr.msk.mxu0 %vm2058_vm6, %v15680_v13  ;;  %v16116_v38 = vcombine.high %v16114_v23, %v16114_v23  ;;  %v16130_v33 = vrot.slane %v16114_v23, %v25269_v22 }
0x175d   :  { %v16137_v57 = vrot.slane %v16115_v44, %v25269_v22 }
0x175e   :  { %24649 = vmatmul.mubr.msk.f32.vlgmr.msra.gmra.mxu0 %vm1640_vm3, %v15280_v14  ;;  %v16144_v18 = vrot.slane %v16116_v38, %v25269_v22 }
0x175f   :  { %24659 = vmatpush3.msk.msra.mxu0 %vm2058_vm6, %v15680_v13  ;;  %v16226_v39 = vcombine.low %v16123_v2, %v16137_v57  ;;  %v23580_v59 = vcombine.high %v16123_v2, %v16137_v57 }
0x1760   :  { %24660 = vmatprep.subr.mxu0 %v15666_v45  ;;  %v16228_v35 = vcombine.low %v16130_v33, %v16144_v18  ;;  %v23581_v58 = vcombine.high %v16130_v33, %v16144_v18 }
0x1761   :  { %24661 = vmatpush3.msra.mxu0 %v15666_v45  ;;  %v16236_v24 = vrot.slane %v16226_v39, %v25269_v22  ;;  %v16243_v45 = vrot.slane %v23580_v59, %v25269_v22 }
0x1762   :  { %24676 = vmatprep.subr.mxu0 %v25088_v0  ;;  %v16250_v13 = vrot.slane %v16228_v35, %v25269_v22  ;;  %v16257_v5 = vrot.slane %v23581_v58, %v25269_v22 }
0x1816   :  { %v24643_v20 = vpop.f32.mrf.mxu0 }
0x1817   :  { %v15430_v28 = vsel %vm1946_vm5, %v24643_v20, -inf }
0x1818   :  { %15431 = vmax.xlane.f32.xlu1 %v15430_v28  ;;  %v15200_v49 = vpop.f32.mrf.mxu0 }
0x1819   :  { %v15427_v34 = vsel %vm1942_vm4, %v15200_v49, -inf }
0x181a   :  { %15428 = vmax.xlane.f32.xlu0 %v15427_v34  ;;  %v16258_v34 = vcombine.low %v16236_v24, %v16243_v45 }
0x181e   :  { %v24650_v36 = vpop.f32.mrf.mxu0 }
0x181f   :  { %v15436_v19 = vsel %vm1946_vm5, %v24650_v36, -inf }
0x1820   :  { %15437 = vmax.xlane.f32.xlu1 %v15436_v19  ;;  %v15418_v56 = vpop.f32.mrf.mxu0 }
0x1821   :  { %v15433_v29 = vsel %vm1942_vm4, %v15418_v56, -inf }
0x1822   :  { %15434 = vmax.xlane.f32.xlu0 %v15433_v29  ;;  %v23522_v29 = vld [vmem:[%s29660_s9 + $0x20] sm:$0xff] }
0x18a1   :  { %v15432_v46 = vpop.xlane.xlu1 %15431 }
0x18a2   :  { %v15440_v16 = vsub.f32 %v24643_v20, %v15432_v46  ;;  %v16259_v20 = vcombine.low %v16250_v13, %v16257_v5  ;;  %v16266_v46 = vrot.slane %v16258_v34, %v25269_v22 }
0x18a3   :  { %v15429_v47 = vpop.xlane.xlu0 %15428 }
0x18a4   :  { %v15445_v42 = vmul.f32 1.442695, %v15440_v16  ;;  %v15439_v54 = vsub.f32 %v15200_v49, %v15429_v47  ;;  %v16273_v19 = vrot.slane %v16259_v20, %v25269_v22  ;;  %v23599_v47 = vld [vmem:[%s29684_s28 + $0xd8] sm:$0xff] }
0x18a6   :  { %25010 = vpow2.f32 %v15445_v42  ;;  %v15443_v31 = vmul.f32 1.442695, %v15439_v54  ;;  %v16274_v16 = vcombine.low %v16266_v46, %v16273_v19  ;;  %v23598_v42 = vld [vmem:[%s29684_s28 + $0xd0] sm:$0xff]  ;;  %v16331_v54 = vrot.slane %v28245_v8, %v25269_v22 }
0x18a8   :  { %25012 = vpow2.f32 %v15443_v31  ;;  %v23597_v31 = vld [vmem:[%s29684_s28 + $0xc8] sm:$0xff]  ;;  %v16338_v8 = vrot.slane %v16331_v54, %v25269_v22 }
0x18a9   :  { %v15438_v15 = vpop.xlane.xlu1 %15437 }
0x18aa   :  { %v15442_v50 = vsub.f32 %v24650_v36, %v15438_v15  ;;  %v23596_v15 = vld [vmem:[%s29684_s28 + $0xc0] sm:$0xff] }
0x18ab   :  { %v15435_v12 = vpop.xlane.xlu0 %15434 }
0x18ac   :  { %v15449_v63 = vmul.f32 1.442695, %v15442_v50  ;;  %v15441_v51 = vsub.f32 %v15418_v56, %v15435_v12  ;;  %v23601_v50 = vld [vmem:[%s29657_s6 + $0x6] ss:$0 sm:$0xff] }
0x18ad   :  { %v16976_v12 = vcombine.high %v23601_v50, %v23601_v50 }
0x18ae   :  { %25014 = vpow2.f32 %v15449_v63  ;;  %v15447_v10 = vmul.f32 1.442695, %v15441_v51  ;;  %v16983_v63 = vrot.slane %v23601_v50, %v25269_v22 }
0x18af   :  { %v16990_v51 = vrot.slane %v16976_v12, %v25269_v22 }
0x18b0   :  { %25016 = vpow2.f32 %v15447_v10  ;;  %v16991_v10 = vcombine.high %v16983_v63, %v16983_v63 }
0x18b3   :  { %v25011_v6 = vpop.eup %25010 }
0x18b4   :  { %v15454_v11 = vsel %vm1946_vm5, %v25011_v6, 0.0 }
0x18b5   :  { %v25013_v21 = vpop.eup %25012  ;;  %15455 = vadd.xlane.f32.xlu1 %v15454_v11  ;;  %v28350_v11 = vrot.slane %v16983_v63, %v25269_v22 }
0x18b6   :  { %v15451_v9 = vsel %vm1942_vm4, %v25013_v21, 0.0 }
0x18b7   :  { %15452 = vadd.xlane.f32.xlu0 %v15451_v9  ;;  %v17006_v9 = vrot.slane %v16990_v51, %v25269_v22  ;;  %v17074_v2 = vcombine.low %v28350_v11, %v28350_v11 }
0x18b9   :  { %v17022_v61 = vcombine.high %v17006_v9, %v17006_v9  ;;  %v17084_v45 = vrot.slane %v17074_v2, %v25269_v22 }
0x18bb   :  { %v25015_v30 = vpop.eup %25014 }
0x18bc   :  { %v15460_v27 = vsel %vm1946_vm5, %v25015_v30, 0.0 }
0x18bd   :  { %v25017_v53 = vpop.eup %25016  ;;  %15461 = vadd.xlane.f32.xlu1 %v15460_v27 }
0x18be   :  { %v15457_v60 = vsel %vm1942_vm4, %v25017_v53, 0.0 }
0x18bf   :  { %15458 = vadd.xlane.f32.xlu0 %v15457_v60 }
0x193e   :  { %v15456_v26 = vpop.xlane.xlu1 %15455 }
0x193f   :  { %25018 = vrcp.f32 %v15456_v26 }
0x1940   :  { %v15453_v52 = vpop.xlane.xlu0 %15452 }
0x1941   :  { %25020 = vrcp.f32 %v15453_v52  ;;  %v17021_v52 = vcombine.high %v28350_v11, %v28350_v11 }
0x1946   :  { %v15462_v62 = vpop.xlane.xlu1 %15461 }
0x1947   :  { %25022 = vrcp.f32 %v15462_v62 }
0x1948   :  { %v15459_v1 = vpop.xlane.xlu0 %15458 }
0x1949   :  { %25024 = vrcp.f32 %v15459_v1 }
0x194c   :  { %v25019_v32 = vpop.eup %25018 }
0x194d   :  { %v15468_v14 = vmul.f32 %v25019_v32, %v25011_v6  ;;  %v16992_v6 = vcombine.high %v16990_v51, %v16990_v51 }
0x194e   :  { %v25021_v48 = vpop.eup %25020 }
0x194f   :  { %v15467_v40 = vmul.f32 %v25021_v48, %v25013_v21  ;;  %v17013_v21 = vrot.slane %v16991_v10, %v25269_v22 }
0x1951   :  { %24655 = vmatprep.mubr.msk.f32.mxu1 %vm1942_vm4, %v15467_v40  ;;  %v17025_v27 = vcombine.low %v28350_v11, %v17013_v21  ;;  %v23602_v60 = vcombine.high %v28350_v11, %v17013_v21  ;;  %v17023_v38 = vcombine.high %v17013_v21, %v17013_v21  ;;  %v17075_v32 = vcombine.low %v17013_v21, %v17021_v52 }
0x1952   :  { %24656 = vmatmul.mubr.msk.f32.vlgmr.msra.gmra.mxu1 %vm1942_vm4, %v15468_v14 }
0x1953   :  { %24667 = vmatprep.mubr.msk.f32.mxu1 %vm25090_vm2, %v25088_v0  ;;  %v17035_v18 = vrot.slane %v17025_v27, %v25269_v22  ;;  %v17042_v1 = vrot.slane %v23602_v60, %v25269_v22  ;;  %v17076_v48 = vcombine.low %v17023_v38, %v17006_v9 }
0x1954   :  { %v25023_v28 = vpop.eup %25022 }
0x1955   :  { %v15470_v56 = vmul.f32 %v25023_v28, %v25015_v30  ;;  %v28355_v30 = vrot.slane %v16992_v6, %v25269_v22  ;;  %v17057_v14 = vcombine.low %v17035_v18, %v17042_v1 }
0x1956   :  { %v25025_v49 = vpop.eup %25024 }
0x1957   :  { %v15469_v36 = vmul.f32 %v25025_v49, %v25017_v53  ;;  %v17027_v37 = vcombine.low %v17006_v9, %v28355_v30  ;;  %v23603_v26 = vcombine.high %v17006_v9, %v28355_v30  ;;  %v17077_v39 = vcombine.low %v28355_v30, %v17022_v61 }
0x1959   :  { %24662 = vmatprep.mubr.msk.f32.mxu0 %vm1942_vm4, %v15469_v36  ;;  %v17049_v33 = vrot.slane %v17027_v37, %v25269_v22  ;;  %v17056_v57 = vrot.slane %v23603_v26, %v25269_v22  ;;  %v17105_v46 = vrot.slane %v17077_v39, %v25269_v22  ;;  %v17024_v26 = vcombine.high %v28355_v30, %v28355_v30 }
0x195a   :  { %24663 = vmatmul.mubr.msk.f32.vlgmr.msra.gmra.mxu0 %vm1942_vm4, %v15470_v56  ;;  %v17091_v56 = vrot.slane %v17075_v32, %v25269_v22 }
0x195b   :  { %24677 = vmatpush3.msra.mxu0 %v23522_v29  ;;  %24678 = vmatprep.mubr.msk.f32.mxu0 %vm25090_vm2, %v25088_v0  ;;  %v17058_v24 = vcombine.low %v17049_v33, %v17056_v57  ;;  %v17098_v29 = vrot.slane %v17076_v48, %v25269_v22 }
0x195c   :  { %24704 = vmatprep.subr.mxu0 %v25088_v0  ;;  %v17106_v27 = vcombine.low %v17084_v45, %v17091_v56 }
0x195d   :  { %v17072_v51 = vrot.slane %v17058_v24, %v25269_v22  ;;  %v17107_v37 = vcombine.low %v17098_v29, %v17105_v46  ;;  %v23586_v46 = vld [vmem:[%s29683_s26 + $0xc8] sm:$0xff] }
0x195e   :  { %24679 = vmatmul.mubr.msk.f32.vlgmr.msra.gmra.mxu0 %vm1640_vm3, %v16274_v16 }
0x195f   :  { %24681 = vmatprep.mubr.msk.f32.mxu0 %vm25090_vm2, %v25088_v0  ;;  %24705 = vmatpush3.msra.mxu0 %v23599_v47 }
0x1960   :  { %24706 = vmatprep.subr.mxu0 %v25088_v0 }
0x1961   :  { %24707 = vmatpush3.msra.mxu0 %v23598_v42 }
0x1962   :  { %24682 = vmatmul.mubr.msk.f32.gmra.mxu0 %vm1640_vm3, %v28254_v4  ;;  %24708 = vmatprep.subr.mxu0 %v25088_v0  ;;  %v23574_v4 = vld [vmem:[%s29660_s9 + $0x28] sm:$0xff] }
0x1963   :  { %24684 = vmatprep.mubr.msk.f32.mxu0 %vm25090_vm2, %v25088_v0  ;;  %24709 = vmatpush3.msra.mxu0 %v23597_v31 }
0x1964   :  { %24710 = vmatprep.subr.mxu0 %v25088_v0  ;;  %24666 = vmatpush3.msra.mxu1 %v23574_v4  ;;  %v17065_v4 = vrot.slane %v17057_v14, %v25269_v22 }
0x1965   :  { %24711 = vmatpush3.msra.mxu0 %v23596_v15  ;;  %24687 = vmatprep.subr.mxu1 %v25088_v0 }
0x1966   :  { %24685 = vmatmul.mubr.msk.f32.gmra.mxu0 %vm1640_vm3, %v16338_v8  ;;  %v17073_v39 = vcombine.low %v17065_v4, %v17072_v51 }
0x1967   :  { %24712 = vmatprep.mubr.msk.f32.mxu0 %vm25090_vm2, %v25088_v0 }
0x196a   :  { %24713 = vmatmul.mubr.msk.f32.vlgmr.msra.gmra.mxu0 %vm79_vm1, %v27415_v3 }
0x196b   :  { %24715 = vmatprep.mubr.msk.f32.mxu0 %vm25090_vm2, %v25088_v0 }
0x196e   :  { %24716 = vmatmul.mubr.msk.f32.gmra.mxu0 %vm79_vm1, %v27446_v43 }
0x196f   :  { %24718 = vmatprep.mubr.msk.f32.mxu0 %vm25090_vm2, %v25088_v0 }
0x1972   :  { %24719 = vmatmul.mubr.msk.f32.gmra.mxu0 %vm79_vm1, %v27459_v7 }
0x1a12   :  { %v24657_v53 = vpop.f32.mrf.mxu1 }
0x1a13   :  { %v15826_v36 = vrot.slane %v24657_v53, %v25269_v22 }
0x1a14   :  { %v15609_v23 = vpop.f32.mrf.mxu1 }
0x1a15   :  { %v15771_v44 = vcombine.high %v15609_v23, %v15609_v23  ;;  %v15778_v62 = vrot.slane %v15609_v23, %v25269_v22  ;;  %v15833_v53 = vrot.slane %v15826_v36, %v25269_v22 }
0x1a17   :  { %v15785_v35 = vrot.slane %v15771_v44, %v25269_v22  ;;  %v15786_v58 = vcombine.high %v15778_v62, %v15778_v62  ;;  %v15794_v40 = vrot.slane %v15778_v62, %v25269_v22 }
0x1a19   :  { %v15787_v59 = vcombine.high %v15785_v35, %v15785_v35  ;;  %v15808_v13 = vrot.slane %v15786_v58, %v25269_v22  ;;  %v15801_v20 = vrot.slane %v15785_v35, %v25269_v22 }
0x1a1a   :  { %v24664_v5 = vpop.f32.mrf.mxu0 }
0x1a1b   :  { %v15815_v28 = vrot.slane %v15787_v59, %v25269_v22  ;;  %v15897_v49 = vcombine.low %v15794_v40, %v15808_v13  ;;  %v23575_v34 = vcombine.high %v15794_v40, %v15808_v13  ;;  %v15889_v1 = vrot.slane %v24664_v5, %v25269_v22  ;;  %v23588_v59 = vld [vmem:[%s29683_s26 + $0xd8] sm:$0xff] }
0x1a1c   :  { %v15756_v19 = vpop.f32.mrf.mxu0 }
0x1a1d   :  { %v15899_v16 = vcombine.low %v15801_v20, %v15815_v28  ;;  %v23576_v47 = vcombine.high %v15801_v20, %v15815_v28  ;;  %v15907_v42 = vrot.slane %v15897_v49, %v25269_v22  ;;  %v15914_v54 = vrot.slane %v23575_v34, %v25269_v22  ;;  %v23587_v49 = vld [vmem:[%s29683_s26 + $0xd0] sm:$0xff] }
0x1a1e   :  { %v15834_v31 = vcombine.high %v15756_v19, %v15756_v19  ;;  %v15841_v15 = vrot.slane %v15756_v19, %v25269_v22  ;;  %v28384_v8 = vpop.f32.mrf.mxu0  ;;  %v15896_v45 = vrot.slane %v15889_v1, %v25269_v22  ;;  %v17114_v20 = vrot.slane %v17106_v27, %v25269_v22 }
0x1a1f   :  { %v15921_v50 = vrot.slane %v15899_v16, %v25269_v22  ;;  %v15928_v12 = vrot.slane %v23576_v47, %v25269_v22  ;;  %v15929_v63 = vcombine.low %v15907_v42, %v15914_v54  ;;  %v17121_v28 = vrot.slane %v17107_v37, %v25269_v22 }
0x1a20   :  { %v15848_v10 = vrot.slane %v15834_v31, %v25269_v22  ;;  %v15849_v6 = vcombine.high %v15841_v15, %v15841_v15  ;;  %v15857_v21 = vrot.slane %v15841_v15, %v25269_v22  ;;  %v24680_v9 = vpop.f32.mrf.mxu0  ;;  %v17123_v34 = vcombine.low %v17024_v26, %v28350_v11  ;;  %v23585_v31 = vld [vmem:[%s29683_s26 + $0xc0] sm:$0xff] }
0x1a21   :  { %v15930_v60 = vcombine.low %v15921_v50, %v15928_v12  ;;  %v15937_v62 = vrot.slane %v15929_v63, %v25269_v22  ;;  %v17122_v54 = vcombine.low %v17114_v20, %v17121_v28  ;;  %v23610_v28 = vld [vmem:[%s29658_s7 + $0xd8] sm:$0xff] }
0x1a22   :  { %v15850_v23 = vcombine.high %v15848_v10, %v15848_v10  ;;  %v15864_v52 = vrot.slane %v15848_v10, %v25269_v22  ;;  %v15871_v61 = vrot.slane %v15849_v6, %v25269_v22  ;;  %v15879_v38 = vcombine.high %v15857_v21, %v15857_v21  ;;  %v28397_v44 = vpop.f32.mrf.mxu0 }
0x1a23   :  { %v15944_v18 = vrot.slane %v15930_v60, %v25269_v22  ;;  %v15946_v33 = vcombine.low %v15833_v53, %v15857_v21  ;;  %v17130_v12 = vrot.slane %v17123_v34, %v25269_v22 }
0x1a24   :  { %v15878_v57 = vrot.slane %v15850_v23, %v25269_v22  ;;  %v15880_v2 = vcombine.high %v15864_v52, %v15864_v52  ;;  %v15881_v35 = vcombine.high %v15871_v61, %v15871_v61  ;;  %v15947_v30 = vcombine.low %v15871_v61, %v15879_v38  ;;  %v24683_v58 = vpop.f32.mrf.mxu0 }
0x1a25   :  { %v15956_v32 = vrot.slane %v15946_v33, %v25269_v22  ;;  %v15945_v48 = vcombine.low %v15937_v62, %v15944_v18  ;;  %v17137_v37 = vrot.slane %v17130_v12, %v25269_v22 }
0x1a26   :  { %v15882_v40 = vcombine.high %v15878_v57, %v15878_v57  ;;  %v15948_v13 = vcombine.low %v15881_v35, %v15864_v52  ;;  %v15949_v14 = vcombine.low %v15878_v57, %v15880_v2  ;;  %v15963_v5 = vrot.slane %v15947_v30, %v25269_v22  ;;  %v28408_v24 = vpop.f32.mrf.mxu0 }
0x1a27   :  { %24668 = vmatmul.mubr.msk.f32.vlgmr.msra.gmra.mxu1 %vm1640_vm3, %v15945_v48 }
0x1a28   :  { %v15970_v36 = vrot.slane %v15948_v13, %v25269_v22  ;;  %v15977_v19 = vrot.slane %v15949_v14, %v25269_v22  ;;  %v15978_v56 = vcombine.low %v15956_v32, %v15963_v5  ;;  %v24686_v29 = vpop.f32.mrf.mxu0  ;;  %24670 = vmatprep.mubr.msk.f32.mxu1 %vm25090_vm2, %v25088_v0  ;;  %24688 = vmatpush3.msra.mxu1 %v23588_v59 }
0x1a29   :  { %24689 = vmatprep.subr.mxu1 %v25088_v0  ;;  %v15995_v11 = vcombine.low %v15882_v40, %v15896_v45 }
0x1a2a   :  { %v17207_v16 = vpop.f32.mrf.mxu0  ;;  %v15979_v47 = vcombine.low %v15970_v36, %v15977_v19  ;;  %24690 = vmatpush3.msra.mxu1 %v23587_v49  ;;  %v15986_v4 = vrot.slane %v15978_v56, %v25269_v22 }
0x1a2b   :  { %v17208_v42 = vadd.f32 %v17207_v16, %v17073_v39  ;;  %24691 = vmatprep.subr.mxu1 %v25088_v0  ;;  %v16002_v21 = vrot.slane %v15995_v11, %v25269_v22 }
0x1a2c   :  { %v24714_v15 = vpop.f32.mrf.mxu0  ;;  %v15993_v50 = vrot.slane %v15979_v47, %v25269_v22  ;;  %24692 = vmatpush3.msra.mxu1 %v23586_v46  ;;  %v23609_v47 = vld [vmem:[%s29658_s7 + $0xd0] sm:$0xff] }
0x1a2d   :  { %v17224_v63 = vcombine.high %v17208_v42, %v17208_v42  ;;  %v17231_v51 = vrot.slane %v17208_v42, %v25269_v22  ;;  %24693 = vmatprep.subr.mxu1 %v25088_v0  ;;  %v16009_v1 = vrot.slane %v16002_v21, %v25269_v22 }
0x1a2e   :  { %v17212_v10 = vpop.f32.mrf.mxu0  ;;  %v15994_v6 = vcombine.low %v15986_v4, %v15993_v50  ;;  %24694 = vmatpush3.msra.mxu1 %v23585_v31 }
0x1a2f   :  { %v17238_v9 = vrot.slane %v17224_v63, %v25269_v22  ;;  %v17239_v27 = vcombine.high %v17231_v51, %v17231_v51  ;;  %v17213_v53 = vadd.f32 %v17212_v10, %v17122_v54  ;;  %24721 = vmatprep.subr.mxu1 %v25088_v0  ;;  %v17247_v23 = vrot.slane %v17231_v51, %v25269_v22  ;;  %v23608_v51 = vld [vmem:[%s29658_s7 + $0xc8] sm:$0xff] }
0x1a30   :  { %24671 = vmatmul.mubr.msk.f32.gmra.mxu1 %vm1640_vm3, %v15994_v6  ;;  %v24717_v60 = vpop.f32.mrf.mxu0 }
0x1a31   :  { %v17240_v26 = vcombine.high %v17238_v9, %v17238_v9  ;;  %v17261_v52 = vrot.slane %v17239_v27, %v25269_v22  ;;  %v17273_v61 = vcombine.high %v17213_v53, %v17213_v53  ;;  %24673 = vmatprep.mubr.msk.f32.mxu1 %vm25090_vm2, %v25088_v0  ;;  %v17254_v38 = vrot.slane %v17238_v9, %v25269_v22  ;;  %v23607_v60 = vld [vmem:[%s29658_s7 + $0xc0] sm:$0xff] }
0x1a32   :  { %v17280_v62 = vrot.slane %v17213_v53, %v25269_v22  ;;  %v17217_v18 = vpop.f32.mrf.mxu0 }
0x1a33   :  { %v17268_v33 = vrot.slane %v17240_v26, %v25269_v22  ;;  %v17814_v57 = vcombine.low %v17247_v23, %v17261_v52  ;;  %v23618_v2 = vcombine.high %v17247_v23, %v17261_v52  ;;  %v17287_v35 = vrot.slane %v17273_v61, %v25269_v22 }
0x1a34   :  { %v17288_v30 = vcombine.high %v17280_v62, %v17280_v62  ;;  %v17296_v58 = vrot.slane %v17280_v62, %v25269_v22  ;;  %v17218_v32 = vadd.f32 %v17217_v18, %v17137_v37  ;;  %24674 = vmatmul.mubr.msk.f32.gmra.mxu1 %vm1640_vm3, %v16009_v1  ;;  %v24720_v48 = vpop.f32.mrf.mxu0 }
0x1a35   :  { %v17816_v39 = vcombine.low %v17254_v38, %v17268_v33  ;;  %v23619_v59 = vcombine.high %v17254_v38, %v17268_v33  ;;  %v17824_v40 = vrot.slane %v17814_v57, %v25269_v22  ;;  %v17831_v13 = vrot.slane %v23618_v2, %v25269_v22  ;;  %24695 = vmatprep.mubr.msk.f32.mxu1 %vm25090_vm2, %v25088_v0  ;;  %v23590_v33 = vld [vmem:[%s29656_s4 + $0x6] ss:$0 sm:$0xff] }
0x1a36   :  { %v17289_v14 = vcombine.high %v17287_v35, %v17287_v35  ;;  %v17303_v5 = vrot.slane %v17287_v35, %v25269_v22  ;;  %v17310_v45 = vrot.slane %v17288_v30, %v25269_v22  ;;  %v17318_v20 = vcombine.high %v17296_v58, %v17296_v58 }
0x1a37   :  { %v17838_v49 = vrot.slane %v17816_v39, %v25269_v22  ;;  %v17845_v34 = vrot.slane %v23619_v59, %v25269_v22  ;;  %v17846_v36 = vcombine.low %v17824_v40, %v17831_v13  ;;  %v17869_v19 = vrot.slane %v17296_v58, %v25269_v22  ;;  %v23612_v58 = vld [vmem:[%s29659_s8 + $0x6] ss:$0 sm:$0xff] }
0x1a38   :  { %v17317_v56 = vrot.slane %v17289_v14, %v25269_v22  ;;  %v17319_v29 = vcombine.high %v17303_v5, %v17303_v5  ;;  %v17320_v46 = vcombine.high %v17310_v45, %v17310_v45  ;;  %v18032_v16 = vcombine.low %v17310_v45, %v17318_v20  ;;  %24696 = vmatmul.mubr.msk.f32.vlgmr.msra.gmra.mxu1 %vm79_vm1, %v27415_v3 }
0x1a39   :  { %v17328_v11 = vrot.slane %v17218_v32, %v25269_v22  ;;  %v17876_v42 = vrot.slane %v17869_v19, %v25269_v22  ;;  %24698 = vmatprep.mubr.msk.f32.mxu1 %vm25090_vm2, %v25088_v0  ;;  %24722 = vmatpush3.msra.mxu1 %v23610_v28  ;;  %v17847_v54 = vcombine.low %v17838_v49, %v17845_v34 }
0x1a3a   :  { %v18033_v31 = vcombine.low %v17320_v46, %v17303_v5  ;;  %v18034_v15 = vcombine.low %v17317_v56, %v17319_v29  ;;  %v17321_v4 = vcombine.high %v17317_v56, %v17317_v56  ;;  %24723 = vmatprep.subr.mxu1 %v25088_v0  ;;  %v18042_v50 = vrot.slane %v18032_v16, %v25269_v22 }
0x1a3b   :  { %v17329_v12 = vcombine.high %v17328_v11, %v17328_v11  ;;  %v17336_v63 = vrot.slane %v17328_v11, %v25269_v22  ;;  %24738 = vmatprep.subr.msk.mxu0 %vm1640_vm3, %v17876_v42  ;;  %24724 = vmatpush3.msra.mxu1 %v23609_v47  ;;  %v17854_v6 = vrot.slane %v17846_v36, %v25269_v22 }
0x1a3c   :  { %v18049_v10 = vrot.slane %v18033_v31, %v25269_v22  ;;  %24739 = vmatpush3.xpose.msk.msra.mxu0 %vm1640_vm3, %v17876_v42  ;;  %24699 = vmatmul.mubr.msk.f32.gmra.mxu1 %vm79_vm1, %v27446_v43  ;;  %v17861_v21 = vrot.slane %v17847_v54, %v25269_v22  ;;  %v18056_v26 = vrot.slane %v18034_v15, %v25269_v22 }
0x1a3d   :  { %v17343_v9 = vrot.slane %v17329_v12, %v25269_v22  ;;  %v18035_v27 = vcombine.low %v17321_v4, %v17336_v63  ;;  %24701 = vmatprep.mubr.msk.f32.mxu1 %vm25090_vm2, %v25088_v0  ;;  %24725 = vmatprep.subr.mxu1 %v25088_v0  ;;  %v16578_v57 = vcombine.high %v23590_v33, %v23590_v33 }
0x1a3e   :  { %v17862_v53 = vcombine.low %v17854_v6, %v17861_v21  ;;  %24726 = vmatpush3.msra.mxu1 %v23608_v51  ;;  %v18064_v37 = vcombine.low %v18042_v50, %v18049_v10  ;;  %v16585_v2 = vrot.slane %v23590_v33, %v25269_v22  ;;  %v17356_v48 = vcombine.high %v23612_v58, %v23612_v58 }
0x1a3f   :  { %v18063_v23 = vrot.slane %v18035_v27, %v25269_v22  ;;  %v18087_v52 = vrot.slane %v17343_v9, %v25269_v22  ;;  %24727 = vmatprep.subr.mxu1 %v25088_v0  ;;  %v16592_v35 = vrot.slane %v16578_v57, %v25269_v22  ;;  %v17363_v14 = vrot.slane %v23612_v58, %v25269_v22 }
0x1a40   :  { %24702 = vmatmul.mubr.msk.f32.gmra.mxu1 %vm79_vm1, %v27459_v7  ;;  %24740 = vmatprep.subr.msk.mxu0 %vm1640_vm3, %v17862_v53  ;;  %v18072_v62 = vrot.slane %v18064_v37, %v25269_v22  ;;  %v16593_v30 = vcombine.high %v16585_v2, %v16585_v2  ;;  %v28531_v39 = vrot.slane %v16585_v2, %v25269_v22 }
0x1a41   :  { %v18065_v61 = vcombine.low %v18056_v26, %v18063_v23  ;;  %24741 = vmatpush3.xpose.msk.msra.mxu0 %vm1640_vm3, %v17862_v53  ;;  %v28502_v38 = vrot.slane %v18087_v52, %v25269_v22  ;;  %24728 = vmatpush3.msra.mxu1 %v23607_v60  ;;  %v16594_v32 = vcombine.high %v16592_v35, %v16592_v35 }
0x1a42   :  { %24729 = vmatprep.mubr.msk.f32.mxu1 %vm25090_vm2, %v25088_v0  ;;  %v16615_v59 = vrot.slane %v16593_v30, %v25269_v22  ;;  %v16608_v40 = vrot.slane %v16592_v35, %v25269_v22  ;;  %v17370_v5 = vrot.slane %v17356_v48, %v25269_v22  ;;  %v16623_v34 = vcombine.high %v28531_v39, %v28531_v39 }
0x1a43   :  { %24745 = vmatprep.subr.msk.mxu0 %vm1640_vm3, %v28502_v38  ;;  %v18079_v18 = vrot.slane %v18065_v61, %v25269_v22  ;;  %v28536_v13 = vrot.slane %v16594_v32, %v25269_v22  ;;  %v17371_v56 = vcombine.high %v17363_v14, %v17363_v14  ;;  %v16676_v31 = vcombine.low %v28531_v39, %v28531_v39 }
0x1a44   :  { %24730 = vmatmul.mubr.msk.f32.vlgmr.msra.gmra.mxu1 %vm79_vm1, %v27415_v3  ;;  %v16627_v45 = vcombine.low %v28531_v39, %v16615_v59  ;;  %v23591_v20 = vcombine.high %v28531_v39, %v16615_v59  ;;  %v16624_v36 = vcombine.high %v16608_v40, %v16608_v40  ;;  %v16625_v19 = vcombine.high %v16615_v59, %v16615_v59 }
0x1a45   :  { %24732 = vmatprep.mubr.msk.f32.mxu1 %vm25090_vm2, %v25088_v0  ;;  %v28514_v1 = vcombine.low %v18072_v62, %v18079_v18  ;;  %v16629_v28 = vcombine.low %v16608_v40, %v28536_v13  ;;  %v23592_v49 = vcombine.high %v16608_v40, %v28536_v13  ;;  %v17372_v29 = vcombine.high %v17370_v5, %v17370_v5 }
0x1a46   :  { %v16637_v16 = vrot.slane %v16627_v45, %v25269_v22  ;;  %v16644_v47 = vrot.slane %v23591_v20, %v25269_v22  ;;  %v16677_v15 = vcombine.low %v16615_v59, %v16623_v34  ;;  %v16678_v4 = vcombine.low %v16625_v19, %v16608_v40 }
0x1a47   :  { %v16651_v11 = vrot.slane %v16629_v28, %v25269_v22  ;;  %v16658_v42 = vrot.slane %v23592_v49, %v25269_v22  ;;  %v16679_v50 = vcombine.low %v28536_v13, %v16624_v36  ;;  %v17379_v12 = vrot.slane %v17363_v14, %v25269_v22 }
0x1a48   :  { %24733 = vmatmul.mubr.msk.f32.gmra.mxu1 %vm79_vm1, %v27446_v43  ;;  %v17386_v63 = vrot.slane %v17370_v5, %v25269_v22  ;;  %v17393_v51 = vrot.slane %v17371_v56, %v25269_v22  ;;  %v17400_v10 = vrot.slane %v17372_v29, %v25269_v22  ;;  %v16659_v6 = vcombine.low %v16637_v16, %v16644_v47 }
0x1a49   :  { %24735 = vmatprep.mubr.msk.f32.mxu1 %vm25090_vm2, %v25088_v0  ;;  %v16660_v21 = vcombine.low %v16651_v11, %v16658_v42  ;;  %v17401_v9 = vcombine.high %v17379_v12, %v17379_v12  ;;  %v16686_v60 = vrot.slane %v16676_v31, %v25269_v22  ;;  %v16693_v37 = vrot.slane %v16677_v15, %v25269_v22 }
0x1a4a   :  { %v17402_v27 = vcombine.high %v17386_v63, %v17386_v63  ;;  %v17403_v53 = vcombine.high %v17393_v51, %v17393_v51  ;;  %v16700_v26 = vrot.slane %v16678_v4, %v25269_v22  ;;  %v16707_v23 = vrot.slane %v16679_v50, %v25269_v22 }
0x1a4b   :  { %v17405_v52 = vcombine.low %v17379_v12, %v17393_v51  ;;  %v23613_v61 = vcombine.high %v17379_v12, %v17393_v51  ;;  %v17407_v62 = vcombine.low %v17386_v63, %v17400_v10  ;;  %v23614_v18 = vcombine.high %v17386_v63, %v17400_v10 }
0x1a4c   :  { %24736 = vmatmul.mubr.msk.f32.gmra.mxu1 %vm79_vm1, %v27459_v7  ;;  %v16667_v33 = vrot.slane %v16659_v6, %v25269_v22  ;;  %v17454_v2 = vcombine.low %v17379_v12, %v17379_v12  ;;  %v17455_v35 = vcombine.low %v17393_v51, %v17401_v9  ;;  %v17456_v30 = vcombine.low %v17403_v53, %v17386_v63 }
0x1a4d   :  { %v17457_v58 = vcombine.low %v17400_v10, %v17402_v27  ;;  %v16674_v32 = vrot.slane %v16660_v21, %v25269_v22  ;;  %v16708_v48 = vcombine.low %v16686_v60, %v16693_v37  ;;  %v16709_v59 = vcombine.low %v16700_v26, %v16707_v23 }
0x1a4e   :  { %v16626_v40 = vcombine.high %v28536_v13, %v28536_v13  ;;  %v17415_v5 = vrot.slane %v17405_v52, %v25269_v22  ;;  %v17422_v45 = vrot.slane %v23613_v61, %v25269_v22  ;;  %v17429_v20 = vrot.slane %v17407_v62, %v25269_v22 }
0x1a4f   :  { %v17436_v28 = vrot.slane %v23614_v18, %v25269_v22  ;;  %v17464_v34 = vrot.slane %v17454_v2, %v25269_v22  ;;  %v17471_v36 = vrot.slane %v17455_v35, %v25269_v22  ;;  %v17478_v19 = vrot.slane %v17456_v30, %v25269_v22 }
0x1a50   :  { %v17485_v56 = vrot.slane %v17457_v58, %v25269_v22  ;;  %v16675_v13 = vcombine.low %v16667_v33, %v16674_v32  ;;  %v16716_v29 = vrot.slane %v16708_v48, %v25269_v22  ;;  %v16723_v16 = vrot.slane %v16709_v59, %v25269_v22 }
0x1a51   :  { %v16725_v11 = vcombine.low %v16626_v40, %v28531_v39  ;;  %v17437_v42 = vcombine.low %v17415_v5, %v17422_v45  ;;  %v17486_v15 = vcombine.low %v17464_v34, %v17471_v36  ;;  %v17404_v50 = vcombine.high %v17400_v10, %v17400_v10 }
0x1a52   :  { %v17487_v4 = vcombine.low %v17478_v19, %v17485_v56  ;;  %v16724_v51 = vcombine.low %v16716_v29, %v16723_v16 }
0x1a53   :  { %v16732_v21 = vrot.slane %v16725_v11, %v25269_v22  ;;  %v28584_v9 = vrot.slane %v17437_v42, %v25269_v22  ;;  %v17494_v37 = vrot.slane %v17486_v15, %v25269_v22  ;;  %v17503_v10 = vcombine.low %v17404_v50, %v17379_v12 }
0x1a54   :  { %v17501_v26 = vrot.slane %v17487_v4, %v25269_v22 }
0x1a55   :  { %v16739_v33 = vrot.slane %v16732_v21, %v25269_v22 }
0x1a56   :  { %v17502_v40 = vcombine.low %v17494_v37, %v17501_v26 }
0x1ae7   :  { %v28546_v46 = vpop.f32.mrf.mxu1 }
0x1ae9   :  { %v24669_v54 = vpop.f32.mrf.mxu1 }
0x1aea   :  { %v17438_v54 = vcombine.low %v17429_v20, %v17436_v28 }
0x1aec   :  { %v28587_v27 = vrot.slane %v17438_v54, %v25269_v22 }
0x1aee   :  { %v17453_v2 = vcombine.low %v28584_v9, %v28587_v27 }
0x1af0   :  { %v28564_v57 = vpop.f32.mrf.mxu1 }
0x1af2   :  { %v24672_v14 = vpop.f32.mrf.mxu1 }
0x1af3   :  { %v17510_v14 = vrot.slane %v17503_v10, %v25269_v22 }
0x1af4   :  { %v28573_v49 = vpop.f32.mrf.mxu1 }
0x1af6   :  { %v24675_v47 = vpop.f32.mrf.mxu1 }
0x1af8   :  { %v16809_v31 = vpop.f32.mrf.mxu1 }
0x1af9   :  { %v16810_v63 = vadd.f32 %v16809_v31, %v16675_v13 }
0x1afa   :  { %v24697_v6 = vpop.f32.mrf.mxu1 }
0x1afb   :  { %v16826_v53 = vcombine.high %v16810_v63, %v16810_v63  ;;  %v16833_v39 = vrot.slane %v16810_v63, %v25269_v22 }
0x1afc   :  { %v16814_v60 = vpop.f32.mrf.mxu1 }
0x1afd   :  { %v16840_v23 = vrot.slane %v16826_v53, %v25269_v22  ;;  %v16841_v52 = vcombine.high %v16833_v39, %v16833_v39  ;;  %v16849_v61 = vrot.slane %v16833_v39, %v25269_v22  ;;  %v16815_v62 = vadd.f32 %v16814_v60, %v16724_v51 }
0x1afe   :  { %v24700_v18 = vpop.f32.mrf.mxu1  ;;  %v17517_v39 = vrot.slane %v17510_v14, %v25269_v22 }
0x1aff   :  { %v16842_v35 = vcombine.high %v16840_v23, %v16840_v23  ;;  %v16856_v30 = vrot.slane %v16840_v23, %v25269_v22  ;;  %v16863_v58 = vrot.slane %v16841_v52, %v25269_v22  ;;  %v16871_v32 = vcombine.high %v16849_v61, %v16849_v61 }
0x1b00   :  { %v16875_v48 = vcombine.high %v16815_v62, %v16815_v62  ;;  %v16882_v12 = vrot.slane %v16815_v62, %v25269_v22  ;;  %v16819_v59 = vpop.f32.mrf.mxu1  ;;  %v17724_v34 = vmul.f32 0.35355338, %v16849_v61 }
0x1b01   :  { %v16870_v5 = vrot.slane %v16842_v35, %v25269_v22  ;;  %v16872_v45 = vcombine.high %v16856_v30, %v16856_v30  ;;  %v16873_v20 = vcombine.high %v16863_v58, %v16863_v58  ;;  %v17725_v28 = vmul.f32 0.35355338, %v16863_v58 }
0x1b02   :  { %v17726_v36 = vmul.f32 0.35355338, %v16871_v32  ;;  %v16889_v19 = vrot.slane %v16875_v48, %v25269_v22  ;;  %v16890_v56 = vcombine.high %v16882_v12, %v16882_v12  ;;  %v24703_v13 = vpop.f32.mrf.mxu1  ;;  %v17728_v47 = vmul.f32 0.35355338, %v16856_v30 }
0x1b03   :  { %v16874_v29 = vcombine.high %v16870_v5, %v16870_v5  ;;  %v17727_v16 = vmul.f32 0.35355338, %v16873_v20  ;;  %v17729_v11 = vmul.f32 0.35355338, %v16870_v5  ;;  %v17751_v42 = vcombine.low %v17724_v34, %v17725_v28 }
0x1b04   :  { %v16891_v54 = vcombine.high %v16889_v19, %v16889_v19  ;;  %v16898_v31 = vrot.slane %v16882_v12, %v25269_v22  ;;  %v16905_v15 = vrot.slane %v16889_v19, %v25269_v22  ;;  %v17587_v4 = vpop.f32.mrf.mxu1  ;;  %v17730_v50 = vmul.f32 0.35355338, %v16872_v45 }
0x1b05   :  { %v17731_v63 = vmul.f32 0.35355338, %v16874_v29  ;;  %v17752_v51 = vcombine.low %v17726_v36, %v17727_v16  ;;  %v16912_v6 = vrot.slane %v16890_v56, %v25269_v22  ;;  %v17753_v60 = vcombine.low %v17728_v47, %v17729_v11 }
0x1b06   :  { %v16919_v21 = vrot.slane %v16891_v54, %v25269_v22  ;;  %v16920_v9 = vcombine.high %v16898_v31, %v16898_v31  ;;  %v16921_v27 = vcombine.high %v16905_v15, %v16905_v15  ;;  %v24731_v53 = vpop.f32.mrf.mxu1  ;;  %v28609_v26 = vrot.slane %v17751_v42, %v25269_v22 }
0x1b07   :  { %v17754_v37 = vcombine.low %v17730_v50, %v17731_v63  ;;  %v16922_v10 = vcombine.high %v16912_v6, %v16912_v6  ;;  %v17732_v23 = vmul.f32 0.35355338, %v16898_v31  ;;  %v17733_v52 = vmul.f32 0.35355338, %v16912_v6 }
0x1b08   :  { %v17734_v61 = vmul.f32 0.35355338, %v16920_v9  ;;  %v16820_v62 = vadd.f32 %v16819_v59, %v16739_v33  ;;  %v17592_v18 = vpop.f32.mrf.mxu1  ;;  %v28612_v35 = vrot.slane %v17752_v51, %v25269_v22  ;;  %v17736_v58 = vmul.f32 0.35355338, %v16905_v15 }
0x1b09   :  { %v17735_v30 = vmul.f32 0.35355338, %v16922_v10  ;;  %v17737_v32 = vmul.f32 0.35355338, %v16919_v21  ;;  %v17738_v48 = vmul.f32 0.35355338, %v16921_v27  ;;  %v17806_v12 = vrot.slane %v17732_v23, %v25269_v22 }
0x1b0a   :  { %v17969_v14 = vcombine.low %v17733_v52, %v17734_v61  ;;  %v16923_v5 = vcombine.high %v16919_v21, %v16919_v21  ;;  %v24734_v45 = vpop.f32.mrf.mxu1  ;;  %v16930_v28 = vrot.slane %v16820_v62, %v25269_v22  ;;  %v17588_v34 = vadd.f32 %v17587_v4, %v17453_v2 }
0x1b0b   :  { %v17970_v20 = vcombine.low %v17735_v30, %v17736_v58  ;;  %v17593_v36 = vadd.f32 %v17592_v18, %v17502_v40  ;;  %v17775_v33 = vrot.slane %v17753_v60, %v25269_v22  ;;  %v17782_v59 = vrot.slane %v17754_v37, %v25269_v22 }
0x1b0c   :  { %v28619_v19 = vrot.slane %v17806_v12, %v25269_v22  ;;  %v17971_v56 = vcombine.low %v17737_v32, %v17738_v48  ;;  %v17597_v13 = vpop.f32.mrf.mxu1  ;;  %v16931_v29 = vcombine.high %v16930_v28, %v16930_v28  ;;  %v16938_v16 = vrot.slane %v16930_v28, %v25269_v22 }
0x1b0d   :  { %v17739_v47 = vmul.f32 0.35355338, %v16923_v5  ;;  %v17604_v11 = vcombine.high %v17588_v34, %v17588_v34  ;;  %v17979_v42 = vrot.slane %v17969_v14, %v25269_v22  ;;  %v17611_v54 = vrot.slane %v17588_v34, %v25269_v22 }
0x1b0e   :  { %v17653_v2 = vcombine.high %v17593_v36, %v17593_v36  ;;  %v17660_v40 = vrot.slane %v17593_v36, %v25269_v22  ;;  %v24737_v31 = vpop.f32.mrf.mxu1  ;;  %v17986_v15 = vrot.slane %v17970_v20, %v25269_v22  ;;  %v17740_v4 = vmul.f32 0.35355338, %v16938_v16 }
0x1b0f   :  { %v17993_v50 = vrot.slane %v17971_v56, %v25269_v22  ;;  %v17618_v63 = vrot.slane %v17604_v11, %v25269_v22  ;;  %v16945_v51 = vrot.slane %v16931_v29, %v25269_v22  ;;  %v17619_v6 = vcombine.high %v17611_v54, %v17611_v54 }
0x1b10   :  { %v17667_v21 = vrot.slane %v17653_v2, %v25269_v22  ;;  %v17668_v9 = vcombine.high %v17660_v40, %v17660_v40  ;;  %v17972_v27 = vcombine.low %v17739_v47, %v17740_v4  ;;  %v17627_v60 = vrot.slane %v17611_v54, %v25269_v22 }
0x1b11   :  { %v17620_v53 = vcombine.high %v17618_v63, %v17618_v63  ;;  %v17598_v37 = vadd.f32 %v17597_v13, %v17517_v39  ;;  %v17641_v10 = vrot.slane %v17619_v6, %v25269_v22  ;;  %v17676_v52 = vrot.slane %v17660_v40, %v25269_v22 }
0x1b12   :  { %v17669_v23 = vcombine.high %v17667_v21, %v17667_v21  ;;  %v17683_v61 = vrot.slane %v17667_v21, %v25269_v22  ;;  %v18000_v62 = vrot.slane %v17972_v27, %v25269_v22  ;;  %v17634_v18 = vrot.slane %v17618_v63, %v25269_v22 }
0x1b13   :  { %v17648_v30 = vrot.slane %v17620_v53, %v25269_v22  ;;  %v17690_v58 = vrot.slane %v17668_v9, %v25269_v22  ;;  %v18222_v32 = vcombine.low %v17627_v60, %v17641_v10  ;;  %v23628_v48 = vcombine.high %v17627_v60, %v17641_v10 }
0x1b14   :  { %v17697_v12 = vrot.slane %v17669_v23, %v25269_v22  ;;  %v17698_v39 = vcombine.high %v17676_v52, %v17676_v52  ;;  %v17741_v14 = vmul.f32 0.35355338, %v16945_v51  ;;  %v18002_v5 = vcombine.low %v17993_v50, %v18000_v62 }
0x1b15   :  { %v18224_v45 = vcombine.low %v17634_v18, %v17648_v30  ;;  %v23629_v20 = vcombine.high %v17634_v18, %v17648_v30  ;;  %v18232_v28 = vrot.slane %v18222_v32, %v25269_v22  ;;  %v18239_v34 = vrot.slane %v23628_v48, %v25269_v22 }
0x1b16   :  { %v17699_v36 = vcombine.high %v17683_v61, %v17683_v61  ;;  %v17700_v56 = vcombine.high %v17690_v58, %v17690_v58  ;;  %v18277_v13 = vrot.slane %v17676_v52, %v25269_v22  ;;  %v18369_v29 = vcombine.low %v17690_v58, %v17698_v39 }
0x1b17   :  { %v17701_v16 = vcombine.high %v17697_v12, %v17697_v12  ;;  %v17708_v47 = vrot.slane %v17598_v37, %v25269_v22  ;;  %v17783_v2 = vcombine.low %v28609_v26, %v28612_v35  ;;  %v17784_v40 = vcombine.low %v17775_v33, %v17782_v59 }
0x1b18   :  { %v18370_v11 = vcombine.low %v17700_v56, %v17683_v61  ;;  %v18371_v54 = vcombine.low %v17697_v12, %v17699_v36  ;;  %v18284_v50 = vrot.slane %v18277_v13, %v25269_v22  ;;  %v18001_v63 = vcombine.low %v17979_v42, %v17986_v15 }
0x1b19   :  { %v17709_v31 = vcombine.high %v17708_v47, %v17708_v47  ;;  %v17716_v4 = vrot.slane %v17708_v47, %v25269_v22  ;;  %v17791_v51 = vrot.slane %v17783_v2, %v25269_v22  ;;  %v17798_v6 = vrot.slane %v17784_v40, %v25269_v22 }
0x1b1a   :  { %v18016_v21 = vrot.slane %v18002_v5, %v25269_v22  ;;  %v18246_v9 = vrot.slane %v18224_v45, %v25269_v22  ;;  %24752 = vmatprep.subr.msk.mxu1 %vm2058_vm6, %v18284_v50  ;;  %v18009_v26 = vrot.slane %v18001_v63, %v25269_v22  ;;  %v18253_v35 = vrot.slane %v23629_v20, %v25269_v22 }
0x1b1b   :  { %v17723_v27 = vrot.slane %v17709_v31, %v25269_v22  ;;  %v18372_v53 = vcombine.low %v17701_v16, %v17716_v4  ;;  %v17799_v33 = vcombine.low %v17791_v51, %v17798_v6  ;;  %24753 = vmatpush3.msk.msra.mxu1 %vm2058_vm6, %v18284_v50  ;;  %v18254_v59 = vcombine.low %v18232_v28, %v18239_v34 }
0x1b1c   :  { %v18379_v42 = vrot.slane %v18369_v29, %v25269_v22  ;;  %v18386_v15 = vrot.slane %v18370_v11, %v25269_v22  ;;  %v18017_v10 = vcombine.low %v18009_v26, %v18016_v21  ;;  %v18255_v23 = vcombine.low %v18246_v9, %v18253_v35 }
0x1b1d   :  { %v18400_v60 = vrot.slane %v18372_v53, %v25269_v22  ;;  %v18424_v37 = vrot.slane %v17723_v27, %v25269_v22  ;;  %24742 = vmatprep.mubr.msk.f32.mxu0 %vm1640_vm3, %v17799_v33  ;;  %v18393_v52 = vrot.slane %v18371_v54, %v25269_v22  ;;  %v18262_v61 = vrot.slane %v18254_v59, %v25269_v22 }
0x1b1e   :  { %24743 = vmatmul.mubr.msk.f32.vlgmr.msra.gmra.mxu0 %vm1640_vm3, %v28619_v19  ;;  %v18269_v62 = vrot.slane %v18255_v23, %v25269_v22  ;;  %v18401_v18 = vcombine.low %v18379_v42, %v18386_v15  ;;  %v18024_v58 = vrot.slane %v17741_v14, %v25269_v22 }
0x1b1f   :  { %24746 = vmatpush3.xpose.msk.msra.mxu0 %vm1640_vm3, %v28502_v38  ;;  %24749 = vmatprep.mubr.msk.f32.mxu0 %vm1640_vm3, %v18017_v10  ;;  %v18402_v30 = vcombine.low %v18393_v52, %v18400_v60  ;;  %v18431_v48 = vrot.slane %v18424_v37, %v25269_v22 }
0x1b20   :  { %24747 = vmatprep.subr.msk.mxu0 %vm1640_vm3, %v28514_v1  ;;  %v18270_v32 = vcombine.low %v18262_v61, %v18269_v62  ;;  %v18409_v12 = vrot.slane %v18401_v18, %v25269_v22  ;;  %v18031_v38 = vrot.slane %v18024_v58, %v25269_v22  ;;  %v23645_v18 = vld [vmem:[%s29683_s26 + $0xf8] sm:$0xff]  ;;  %v23643_v58 = vld [vmem:[%s29683_s26 + $0xe8] sm:$0xff] }
0x1b21   :  { %v18416_v19 = vrot.slane %v18402_v30, %v25269_v22  ;;  %v23644_v30 = vld [vmem:[%s29683_s26 + $0xf0] sm:$0xff] }
0x1b22   :  { %24754 = vmatprep.subr.mxu1 %v18270_v32 }
0x1b23   :  { %24748 = vmatpush3.xpose.msk.msra.mxu0 %vm1640_vm3, %v28514_v1  ;;  %24755 = vmatpush3.msra.mxu1 %v18270_v32  ;;  %v18417_v39 = vcombine.low %v18409_v12, %v18416_v19  ;;  %v23642_v32 = vld [vmem:[%s29683_s26 + $0xe0] sm:$0xff]  ;;  %v23666_v19 = vld [vmem:[%s29658_s7 + $0xf0] sm:$0xff]  ;;  %v23665_v12 = vld [vmem:[%s29658_s7 + $0xe8] sm:$0xff] }
0x1b24   :  { %24759 = vmatprep.subr.msk.mxu0 %vm2058_vm6, %v18431_v48  ;;  %24766 = vmatprep.subr.mxu1 %v25088_v0 }
0x1b26   :  { %24750 = vmatmul.mubr.msk.f32.vlgmr.msra.gmra.mxu0 %vm1640_vm3, %v18031_v38  ;;  %v23664_v38 = vld [vmem:[%s29658_s7 + $0xe0] sm:$0xff] }
0x1b27   :  { %24760 = vmatpush3.msk.msra.mxu0 %vm2058_vm6, %v18431_v48  ;;  %v23667_v48 = vld [vmem:[%s29658_s7 + $0xf8] sm:$0xff] }
0x1b28   :  { %24761 = vmatprep.subr.mxu0 %v18417_v39 }
0x1b29   :  { %24762 = vmatpush3.msra.mxu0 %v18417_v39  ;;  %v23636_v39 = vld [vmem:[%s29660_s9 + $0x30] sm:$0xff] }
0x1b2a   :  { %24777 = vmatprep.subr.mxu0 %v25088_v0 }
0x1bde   :  { %v24744_v14 = vpop.f32.mrf.mxu0 }
0x1bdf   :  { %v18181_v5 = vsel %vm1946_vm5, %v24744_v14, -inf }
0x1be0   :  { %18182 = vmax.xlane.f32.xlu1 %v18181_v5  ;;  %v17951_v1 = vpop.f32.mrf.mxu0 }
0x1be1   :  { %v18178_v45 = vsel %vm1942_vm4, %v17951_v1, -inf }
0x1be2   :  { %18179 = vmax.xlane.f32.xlu0 %v18178_v45 }
0x1be6   :  { %v24751_v20 = vpop.f32.mrf.mxu0 }
0x1be7   :  { %v18187_v28 = vsel %vm1946_vm5, %v24751_v20, -inf }
0x1be8   :  { %18188 = vmax.xlane.f32.xlu1 %v18187_v28  ;;  %v18169_v34 = vpop.f32.mrf.mxu0 }
0x1be9   :  { %v18184_v36 = vsel %vm1942_vm4, %v18169_v34, -inf }
0x1bea   :  { %18185 = vmax.xlane.f32.xlu0 %v18184_v36 }
0x1c69   :  { %v18183_v56 = vpop.xlane.xlu1 %18182 }
0x1c6a   :  { %v18191_v13 = vsub.f32 %v24744_v14, %v18183_v56  ;;  %v23647_v14 = vld [vmem:[%s29656_s4 + $0x7] ss:$0 sm:$0xff] }
0x1c6b   :  { %v18180_v29 = vpop.xlane.xlu0 %18179  ;;  %v19018_v5 = vcombine.high %v23647_v14, %v23647_v14 }
0x1c6c   :  { %v18196_v16 = vmul.f32 1.442695, %v18191_v13  ;;  %v18190_v47 = vsub.f32 %v17951_v1, %v18180_v29  ;;  %v19025_v1 = vrot.slane %v23647_v14, %v25269_v22 }
0x1c6d   :  { %v19032_v45 = vrot.slane %v19018_v5, %v25269_v22 }
0x1c6e   :  { %25026 = vpow2.f32 %v18196_v16  ;;  %v18194_v11 = vmul.f32 1.442695, %v18190_v47 }
0x1c6f   :  { %v19034_v28 = vcombine.high %v19032_v45, %v19032_v45  ;;  %v19048_v56 = vrot.slane %v19032_v45, %v25269_v22 }
0x1c70   :  { %25028 = vpow2.f32 %v18194_v11 }
0x1c71   :  { %v18189_v54 = vpop.xlane.xlu1 %18188  ;;  %v28767_v13 = vrot.slane %v19034_v28, %v25269_v22 }
0x1c72   :  { %v18193_v2 = vsub.f32 %v24751_v20, %v18189_v54  ;;  %v19033_v20 = vcombine.high %v19025_v1, %v19025_v1 }
0x1c73   :  { %v18186_v40 = vpop.xlane.xlu0 %18185  ;;  %v19069_v47 = vcombine.low %v19048_v56, %v28767_v13  ;;  %v23649_v11 = vcombine.high %v19048_v56, %v28767_v13 }
0x1c74   :  { %v18200_v31 = vmul.f32 1.442695, %v18193_v2  ;;  %v18192_v4 = vsub.f32 %v18169_v34, %v18186_v40  ;;  %v28762_v34 = vrot.slane %v19025_v1, %v25269_v22  ;;  %v19055_v36 = vrot.slane %v19033_v20, %v25269_v22  ;;  %v23669_v40 = vld [vmem:[%s29659_s8 + $0x7] ss:$0 sm:$0xff] }
0x1c76   :  { %25030 = vpow2.f32 %v18200_v31  ;;  %v18198_v50 = vmul.f32 1.442695, %v18192_v4  ;;  %v19067_v29 = vcombine.low %v28762_v34, %v19055_v36  ;;  %v23648_v16 = vcombine.high %v28762_v34, %v19055_v36 }
0x1c77   :  { %v19091_v31 = vrot.slane %v19069_v47, %v25269_v22  ;;  %v19098_v4 = vrot.slane %v23649_v11, %v25269_v22 }
0x1c78   :  { %25032 = vpow2.f32 %v18198_v50  ;;  %v19077_v54 = vrot.slane %v19067_v29, %v25269_v22  ;;  %v19084_v2 = vrot.slane %v23648_v16, %v25269_v22  ;;  %v19063_v50 = vcombine.high %v28762_v34, %v28762_v34 }
0x1c7b   :  { %v25027_v63 = vpop.eup %25026 }
0x1c7c   :  { %v18205_v51 = vsel %vm1946_vm5, %v25027_v63, 0.0 }
0x1c7d   :  { %v25029_v6 = vpop.eup %25028  ;;  %18206 = vadd.xlane.f32.xlu1 %v18205_v51  ;;  %v19065_v51 = vcombine.high %v19055_v36, %v19055_v36 }
0x1c7e   :  { %v18202_v21 = vsel %vm1942_vm4, %v25029_v6, 0.0 }
0x1c7f   :  { %18203 = vadd.xlane.f32.xlu0 %v18202_v21  ;;  %v19803_v21 = vrot.slane %v23669_v40, %v25269_v22 }
0x1c83   :  { %v25031_v9 = vpop.eup %25030 }
0x1c84   :  { %v18211_v27 = vsel %vm1946_vm5, %v25031_v9, 0.0 }
0x1c85   :  { %v25033_v53 = vpop.eup %25032  ;;  %18212 = vadd.xlane.f32.xlu1 %v18211_v27  ;;  %v19100_v27 = vcombine.low %v19091_v31, %v19098_v4 }
0x1c86   :  { %v18208_v26 = vsel %vm1942_vm4, %v25033_v53, 0.0 }
0x1c87   :  { %18209 = vadd.xlane.f32.xlu0 %v18208_v26  ;;  %v19117_v26 = vcombine.low %v19055_v36, %v19063_v50 }
0x1d06   :  { %v18207_v35 = vpop.xlane.xlu1 %18206 }
0x1d07   :  { %25034 = vrcp.f32 %v18207_v35  ;;  %v19118_v35 = vcombine.low %v19065_v51, %v19048_v56 }
0x1d08   :  { %v18204_v33 = vpop.xlane.xlu0 %18203 }
0x1d09   :  { %25036 = vrcp.f32 %v18204_v33 }
0x1d0e   :  { %v18213_v59 = vpop.xlane.xlu1 %18212 }
0x1d0f   :  { %25038 = vrcp.f32 %v18213_v59 }
0x1d10   :  { %v18210_v42 = vpop.xlane.xlu0 %18209 }
0x1d11   :  { %25040 = vrcp.f32 %v18210_v42 }
0x1d14   :  { %v25035_v15 = vpop.eup %25034 }
0x1d15   :  { %v18219_v10 = vmul.f32 %v25035_v15, %v25027_v63  ;;  %v19064_v63 = vcombine.high %v19048_v56, %v19048_v56  ;;  %v19811_v15 = vcombine.high %v19803_v21, %v19803_v21 }
0x1d16   :  { %v25037_v60 = vpop.eup %25036 }
0x1d17   :  { %v18218_v37 = vmul.f32 %v25037_v60, %v25029_v6  ;;  %v19796_v6 = vcombine.high %v23669_v40, %v23669_v40  ;;  %v19119_v33 = vcombine.low %v28767_v13, %v19064_v63  ;;  %v19066_v63 = vcombine.high %v28767_v13, %v28767_v13 }
0x1d19   :  { %24756 = vmatprep.mubr.msk.f32.mxu1 %vm1942_vm4, %v18218_v37  ;;  %v19810_v42 = vrot.slane %v19796_v6, %v25269_v22 }
0x1d1a   :  { %24757 = vmatmul.mubr.msk.f32.vlgmr.msra.gmra.mxu1 %vm1942_vm4, %v18219_v10  ;;  %v19114_v10 = vrot.slane %v19100_v27, %v25269_v22 }
0x1d1b   :  { %24768 = vmatprep.mubr.msk.f32.mxu1 %vm25090_vm2, %v25088_v0  ;;  %24767 = vmatpush3.msra.mxu1 %v23636_v39 }
0x1d1c   :  { %v25039_v23 = vpop.eup %25038  ;;  %24794 = vmatprep.subr.mxu1 %v25088_v0 }
0x1d1d   :  { %v18221_v62 = vmul.f32 %v25039_v23, %v25031_v9  ;;  %v19099_v9 = vcombine.low %v19077_v54, %v19084_v2 }
0x1d1e   :  { %v25041_v52 = vpop.eup %25040 }
0x1d1f   :  { %v18220_v61 = vmul.f32 %v25041_v52, %v25033_v53  ;;  %v19116_v53 = vcombine.low %v28762_v34, %v28762_v34  ;;  %v28790_v60 = vrot.slane %v19099_v9, %v25269_v22  ;;  %v19133_v52 = vrot.slane %v19117_v26, %v25269_v22 }
0x1d21   :  { %24763 = vmatprep.mubr.msk.f32.mxu0 %vm1942_vm4, %v18220_v61  ;;  %v19126_v23 = vrot.slane %v19116_v53, %v25269_v22  ;;  %v28796_v61 = vrot.slane %v19803_v21, %v25269_v22  ;;  %v19115_v36 = vcombine.low %v28790_v60, %v19114_v10 }
0x1d22   :  { %24764 = vmatmul.mubr.msk.f32.vlgmr.msra.gmra.mxu0 %vm1942_vm4, %v18221_v62 }
0x1d23   :  { %24778 = vmatpush3.msra.mxu0 %v23645_v18  ;;  %24785 = vmatprep.mubr.msk.f32.mxu0 %vm25090_vm2, %v25088_v0  ;;  %v19148_v14 = vcombine.low %v19126_v23, %v19133_v52  ;;  %v19894_v47 = vcombine.low %v28796_v61, %v28796_v61 }
0x1d24   :  { %24779 = vmatprep.subr.mxu0 %v25088_v0 }
0x1d25   :  { %24780 = vmatpush3.msra.mxu0 %v23644_v30  ;;  %v19140_v30 = vrot.slane %v19118_v35, %v25269_v22  ;;  %v19156_v50 = vrot.slane %v19148_v14, %v25269_v22 }
0x1d26   :  { %24781 = vmatprep.subr.mxu0 %v25088_v0 }
0x1d27   :  { %24782 = vmatpush3.msra.mxu0 %v23643_v58  ;;  %v19147_v58 = vrot.slane %v19119_v33, %v25269_v22 }
0x1d28   :  { %24783 = vmatprep.subr.mxu0 %v25088_v0 }
0x1d29   :  { %24784 = vmatpush3.msra.mxu0 %v23642_v32  ;;  %v19812_v32 = vcombine.high %v19810_v42, %v19810_v42  ;;  %v19149_v29 = vcombine.low %v19140_v30, %v19147_v58  ;;  %v19165_v30 = vcombine.low %v19066_v63, %v28762_v34 }
0x1d2a   :  { %24786 = vmatmul.mubr.msk.f32.vlgmr.msra.gmra.mxu0 %vm79_vm1, %v27415_v3  ;;  %24811 = vmatprep.subr.mxu0 %v25088_v0 }
0x1d2b   :  { %24788 = vmatprep.mubr.msk.f32.mxu0 %vm25090_vm2, %v25088_v0  ;;  %24812 = vmatpush3.msra.mxu0 %v23667_v48  ;;  %v28802_v48 = vrot.slane %v19810_v42, %v25269_v22  ;;  %v28820_v16 = vrot.slane %v19812_v32, %v25269_v22  ;;  %v19163_v33 = vrot.slane %v19149_v29, %v25269_v22 }
0x1d2c   :  { %24813 = vmatprep.subr.mxu0 %v25088_v0  ;;  %v19904_v42 = vrot.slane %v19894_v47, %v25269_v22  ;;  %v19172_v63 = vrot.slane %v19165_v30, %v25269_v22 }
0x1d2d   :  { %24814 = vmatpush3.msra.mxu0 %v23666_v19  ;;  %v28805_v19 = vrot.slane %v19811_v15, %v25269_v22  ;;  %v19842_v5 = vcombine.high %v28802_v48, %v28802_v48 }
0x1d2e   :  { %24789 = vmatmul.mubr.msk.f32.gmra.mxu0 %vm79_vm1, %v27446_v43  ;;  %24815 = vmatprep.subr.mxu0 %v25088_v0 }
0x1d2f   :  { %24791 = vmatprep.mubr.msk.f32.mxu0 %vm25090_vm2, %v25088_v0  ;;  %24816 = vmatpush3.msra.mxu0 %v23665_v12  ;;  %v19841_v12 = vcombine.high %v28796_v61, %v28796_v61  ;;  %v19843_v1 = vcombine.high %v28805_v19, %v28805_v19  ;;  %v19897_v6 = vcombine.low %v28820_v16, %v19842_v5 }
0x1d30   :  { %24817 = vmatprep.subr.mxu0 %v25088_v0 }
0x1d31   :  { %24818 = vmatpush3.msra.mxu0 %v23664_v38  ;;  %v19895_v11 = vcombine.low %v28805_v19, %v19841_v12  ;;  %v19896_v51 = vcombine.low %v19843_v1, %v28802_v48 }
0x1d32   :  { %24792 = vmatmul.mubr.msk.f32.gmra.mxu0 %vm79_vm1, %v27459_v7 }
0x1d33   :  { %24819 = vmatprep.mubr.msk.f32.mxu0 %vm25090_vm2, %v25088_v0  ;;  %v19918_v52 = vrot.slane %v19896_v51, %v25269_v22 }
0x1d36   :  { %24820 = vmatmul.mubr.msk.f32.vlgmr.msra.gmra.mxu0 %vm79_vm1, %v27415_v3 }
0x1d37   :  { %24822 = vmatprep.mubr.msk.f32.mxu0 %vm25090_vm2, %v25088_v0 }
0x1d3a   :  { %24823 = vmatmul.mubr.msk.f32.gmra.mxu0 %vm79_vm1, %v27446_v43 }
0x1d3b   :  { %24825 = vmatprep.mubr.msk.f32.mxu0 %vm25090_vm2, %v25088_v0 }
0x1d3e   :  { %24826 = vmatmul.mubr.msk.f32.gmra.mxu0 %vm79_vm1, %v27459_v7 }
0x1dda   :  { %v28786_v59 = vpop.f32.mrf.mxu1 }
0x1ddc   :  { %v18360_v37 = vpop.f32.mrf.mxu1 }
0x1ddd   :  { %v18522_v62 = vcombine.high %v18360_v37, %v18360_v37  ;;  %v18529_v18 = vrot.slane %v18360_v37, %v25269_v22  ;;  %v19911_v37 = vrot.slane %v19895_v11, %v25269_v22 }
0x1ddf   :  { %v18536_v38 = vrot.slane %v18522_v62, %v25269_v22  ;;  %v18537_v39 = vcombine.high %v18529_v18, %v18529_v18  ;;  %v18545_v20 = vrot.slane %v18529_v18, %v25269_v22  ;;  %v19925_v62 = vrot.slane %v19897_v6, %v25269_v22 }
0x1de0   :  { %v19926_v29 = vcombine.low %v19904_v42, %v19911_v37 }
0x1de1   :  { %v18538_v45 = vcombine.high %v18536_v38, %v18536_v38  ;;  %v18559_v28 = vrot.slane %v18537_v39, %v25269_v22  ;;  %v18552_v54 = vrot.slane %v18536_v38, %v25269_v22  ;;  %v19844_v39 = vcombine.high %v28820_v16, %v28820_v16 }
0x1de2   :  { %v28817_v56 = vpop.f32.mrf.mxu0  ;;  %v19927_v47 = vcombine.low %v19918_v52, %v19925_v62 }
0x1de3   :  { %v18566_v2 = vrot.slane %v18538_v45, %v25269_v22  ;;  %v18648_v40 = vcombine.low %v18545_v20, %v18559_v28  ;;  %v23637_v31 = vcombine.high %v18545_v20, %v18559_v28  ;;  %v19164_v28 = vcombine.low %v19156_v50, %v19163_v33 }
0x1de4   :  { %v18507_v4 = vpop.f32.mrf.mxu0  ;;  %v19943_v51 = vcombine.low %v19844_v39, %v28796_v61  ;;  %v18577_v50 = vrot.slane %v28786_v59, %v25269_v22  ;;  %v19934_v59 = vrot.slane %v19926_v29, %v25269_v22  ;;  %v19941_v33 = vrot.slane %v19927_v47, %v25269_v22 }
0x1de5   :  { %v18650_v21 = vcombine.low %v18552_v54, %v18566_v2  ;;  %v23638_v9 = vcombine.high %v18552_v54, %v18566_v2  ;;  %v18658_v27 = vrot.slane %v18648_v40, %v25269_v22  ;;  %v18665_v53 = vrot.slane %v23637_v31, %v25269_v22 }
0x1de6   :  { %v18585_v26 = vcombine.high %v18507_v4, %v18507_v4  ;;  %v18592_v35 = vrot.slane %v18507_v4, %v25269_v22  ;;  %v19950_v37 = vrot.slane %v19943_v51, %v25269_v22 }
0x1de7   :  { %v18672_v15 = vrot.slane %v18650_v21, %v25269_v22  ;;  %v18679_v13 = vrot.slane %v23638_v9, %v25269_v22  ;;  %v18680_v60 = vcombine.low %v18658_v27, %v18665_v53  ;;  %v23655_v53 = vld [vmem:[%s29684_s28 + $0xf0] sm:$0xff] }
0x1de8   :  { %v18599_v10 = vrot.slane %v18585_v26, %v25269_v22  ;;  %v18600_v23 = vcombine.high %v18592_v35, %v18592_v35  ;;  %v28851_v1 = vrot.slane %v18592_v35, %v25269_v22 }
0x1de9   :  { %v18681_v18 = vcombine.low %v18672_v15, %v18679_v13  ;;  %v18688_v14 = vrot.slane %v18680_v60, %v25269_v22  ;;  %v19179_v15 = vrot.slane %v19172_v63, %v25269_v22  ;;  %v23654_v60 = vld [vmem:[%s29684_s28 + $0xe8] sm:$0xff] }
0x1dea   :  { %v18601_v58 = vcombine.high %v18599_v10, %v18599_v10  ;;  %v18615_v32 = vrot.slane %v18599_v10, %v25269_v22  ;;  %v18622_v12 = vrot.slane %v18600_v23, %v25269_v22  ;;  %v19249_v38 = vpop.f32.mrf.mxu0  ;;  %v18630_v6 = vcombine.high %v28851_v1, %v28851_v1 }
0x1deb   :  { %v18695_v5 = vrot.slane %v18681_v18, %v25269_v22  ;;  %v19250_v45 = vadd.f32 %v19249_v38, %v19115_v36  ;;  %v23656_v36 = vld [vmem:[%s29684_s28 + $0xf8] sm:$0xff]  ;;  %v18584_v10 = vrot.slane %v18577_v50, %v25269_v22  ;;  %v18640_v23 = vrot.slane %v28817_v56, %v25269_v22 }
0x1dec   :  { %v28854_v20 = vrot.slane %v18601_v58, %v25269_v22  ;;  %v24787_v34 = vpop.f32.mrf.mxu0  ;;  %v18631_v54 = vcombine.high %v18615_v32, %v18615_v32  ;;  %v18632_v2 = vcombine.high %v18622_v12, %v18622_v12  ;;  %v18698_v52 = vcombine.low %v18622_v12, %v18630_v6  ;;  %v23653_v58 = vld [vmem:[%s29684_s28 + $0xe0] sm:$0xff] }
0x1ded   :  { %v18696_v11 = vcombine.low %v18688_v14, %v18695_v5  ;;  %v19266_v40 = vcombine.high %v19250_v45, %v19250_v45  ;;  %v19273_v31 = vrot.slane %v19250_v45, %v25269_v22  ;;  %v28892_v14 = vcombine.low %v19934_v59, %v19941_v33 }
0x1dee   :  { %v19254_v4 = vpop.f32.mrf.mxu0  ;;  %v18699_v26 = vcombine.low %v18632_v2, %v18615_v32  ;;  %v18700_v35 = vcombine.low %v28854_v20, %v18631_v54  ;;  %v18697_v32 = vcombine.low %v18584_v10, %v28851_v1  ;;  %v28901_v34 = vrot.slane %v19950_v37, %v25269_v22 }
0x1def   :  { %v19280_v21 = vrot.slane %v19266_v40, %v25269_v22  ;;  %24769 = vmatmul.mubr.msk.f32.vlgmr.msra.gmra.mxu1 %vm1640_vm3, %v18696_v11  ;;  %v19255_v9 = vadd.f32 %v19254_v4, %v19164_v28  ;;  %v19281_v42 = vcombine.high %v19273_v31, %v19273_v31  ;;  %v18647_v1 = vrot.slane %v18640_v23, %v25269_v22 }
0x1df0   :  { %v24790_v27 = vpop.f32.mrf.mxu0  ;;  %24771 = vmatprep.mubr.msk.f32.mxu1 %vm25090_vm2, %v25088_v0  ;;  %24795 = vmatpush3.msra.mxu1 %v23656_v36  ;;  %v18721_v38 = vrot.slane %v18699_v26, %v25269_v22  ;;  %v18728_v39 = vrot.slane %v18700_v35, %v25269_v22  ;;  %v18714_v28 = vrot.slane %v18698_v52, %v25269_v22 }
0x1df1   :  { %24796 = vmatprep.subr.mxu1 %v25088_v0  ;;  %v19282_v62 = vcombine.high %v19280_v21, %v19280_v21  ;;  %v19315_v18 = vcombine.high %v19255_v9, %v19255_v9  ;;  %v19303_v56 = vrot.slane %v19281_v42, %v25269_v22  ;;  %v19322_v12 = vrot.slane %v19255_v9, %v25269_v22 }
0x1df2   :  { %v19259_v13 = vpop.f32.mrf.mxu0  ;;  %24797 = vmatpush3.msra.mxu1 %v23655_v53  ;;  %v18633_v11 = vcombine.high %v28854_v20, %v28854_v20  ;;  %v18707_v63 = vrot.slane %v18697_v32, %v25269_v22  ;;  %v18730_v36 = vcombine.low %v18721_v38, %v18728_v39  ;;  %v19289_v51 = vrot.slane %v19273_v31, %v25269_v22 }
0x1df3   :  { %24798 = vmatprep.subr.mxu1 %v25088_v0  ;;  %v19329_v5 = vrot.slane %v19315_v18, %v25269_v22  ;;  %v19310_v29 = vrot.slane %v19282_v62, %v25269_v22  ;;  %v19260_v47 = vadd.f32 %v19259_v13, %v19179_v15  ;;  %v19330_v54 = vcombine.high %v19322_v12, %v19322_v12 }
0x1df4   :  { %v24793_v30 = vpop.f32.mrf.mxu0  ;;  %24799 = vmatpush3.msra.mxu1 %v23654_v60  ;;  %v28909_v40 = vrot.slane %v19322_v12, %v25269_v22  ;;  %v19296_v6 = vrot.slane %v19280_v21, %v25269_v22  ;;  %v19313_v9 = vcombine.high %v19303_v56, %v19303_v56  ;;  %v18729_v26 = vcombine.low %v18707_v63, %v18714_v28 }
0x1df5   :  { %24800 = vmatprep.subr.mxu1 %v25088_v0  ;;  %v19331_v2 = vcombine.high %v19329_v5, %v19329_v5  ;;  %v19345_v50 = vrot.slane %v19329_v5, %v25269_v22  ;;  %v19352_v27 = vrot.slane %v19330_v54, %v25269_v22  ;;  %v19314_v35 = vcombine.high %v19310_v29, %v19310_v29 }
0x1df6   :  { %v28897_v45 = vpop.f32.mrf.mxu0  ;;  %24801 = vmatpush3.msra.mxu1 %v23653_v58  ;;  %v28918_v33 = vrot.slane %v19260_v47, %v25269_v22  ;;  %v18746_v42 = vcombine.low %v18633_v11, %v18647_v1  ;;  %v19360_v31 = vcombine.high %v28909_v40, %v28909_v40  ;;  %v18744_v21 = vrot.slane %v18730_v36, %v25269_v22 }
0x1df7   :  { %v19359_v20 = vrot.slane %v19331_v2, %v25269_v22  ;;  %v19361_v59 = vcombine.high %v19345_v50, %v19345_v50  ;;  %v19362_v15 = vcombine.high %v19352_v27, %v19352_v27  ;;  %v19311_v37 = vcombine.high %v19289_v51, %v19289_v51 }
0x1df8   :  { %v24821_v4 = vpop.f32.mrf.mxu0  ;;  %v19312_v52 = vcombine.high %v19296_v6, %v19296_v6  ;;  %v20167_v62 = vmul.f32 0.35355338, %v19313_v9  ;;  %v19378_v30 = vrot.slane %v28918_v33, %v25269_v22  ;;  %v18737_v32 = vrot.slane %v18729_v26, %v25269_v22 }
0x1df9   :  { %v20177_v13 = vmul.f32 0.35355338, %v19359_v20  ;;  %v20178_v10 = vmul.f32 0.35355338, %v19361_v59  ;;  %v19363_v23 = vcombine.high %v19359_v20, %v19359_v20  ;;  %v20175_v18 = vmul.f32 0.35355338, %v19362_v15 }
0x1dfa   :  { %v20032_v53 = vpop.f32.mrf.mxu0  ;;  %v20171_v38 = vmul.f32 0.35355338, %v19314_v35  ;;  %v20176_v39 = vmul.f32 0.35355338, %v19345_v50  ;;  %v20173_v5 = vmul.f32 0.35355338, %v19352_v27  ;;  %v18753_v54 = vrot.slane %v18746_v42, %v25269_v22 }
0x1dfb   :  { %v20179_v12 = vmul.f32 0.35355338, %v19363_v23  ;;  %v20174_v1 = vmul.f32 0.35355338, %v19360_v31  ;;  %v20411_v28 = vcombine.low %v20177_v13, %v20178_v10  ;;  %v20180_v47 = vmul.f32 0.35355338, %v19378_v30 }
0x1dfc   :  { %v24824_v60 = vpop.f32.mrf.mxu0  ;;  %v20165_v2 = vmul.f32 0.35355338, %v19303_v56  ;;  %v20166_v4 = vmul.f32 0.35355338, %v19311_v37  ;;  %v18745_v63 = vcombine.low %v18737_v32, %v18744_v21  ;;  %v20169_v36 = vmul.f32 0.35355338, %v19310_v29 }
0x1dfd   :  { %v20170_v9 = vmul.f32 0.35355338, %v19312_v52  ;;  %v20410_v20 = vcombine.low %v20175_v18, %v20176_v39  ;;  %v20412_v59 = vcombine.low %v20179_v12, %v20180_v47  ;;  %v20164_v15 = vmul.f32 0.35355338, %v19289_v51 }
0x1dfe   :  { %v20037_v58 = vpop.f32.mrf.mxu0  ;;  %v20168_v60 = vmul.f32 0.35355338, %v19296_v6  ;;  %v20192_v26 = vcombine.low %v20166_v4, %v20167_v62  ;;  %24772 = vmatmul.mubr.msk.f32.gmra.mxu1 %vm1640_vm3, %v18745_v63  ;;  %v20033_v50 = vadd.f32 %v20032_v53, %v28892_v14  ;;  %v20409_v35 = vcombine.low %v20173_v5, %v20174_v1 }
0x1dff   :  { %v20194_v27 = vcombine.low %v20170_v9, %v20171_v38  ;;  %v20433_v31 = vrot.slane %v20411_v28, %v25269_v22  ;;  %v20440_v42 = vrot.slane %v20412_v59, %v25269_v22  ;;  %24774 = vmatprep.mubr.msk.f32.mxu1 %vm25090_vm2, %v25088_v0  ;;  %v18760_v51 = vrot.slane %v18753_v54, %v25269_v22 }
0x1e00   :  { %v24827_v11 = vpop.f32.mrf.mxu0  ;;  %v20093_v56 = vcombine.high %v20033_v50, %v20033_v50  ;;  %v20100_v29 = vrot.slane %v20033_v50, %v25269_v22  ;;  %v20038_v6 = vadd.f32 %v20037_v58, %v28901_v34  ;;  %v20191_v13 = vcombine.low %v20164_v15, %v20165_v2 }
0x1e01   :  { %v20193_v21 = vcombine.low %v20168_v60, %v20169_v36  ;;  %v20426_v14 = vrot.slane %v20410_v20, %v25269_v22  ;;  %v20442_v53 = vcombine.low %v20433_v31, %v20440_v42  ;;  %v20208_v23 = vrot.slane %v20192_v26, %v25269_v22 }
0x1e02   :  { %v20107_v37 = vrot.slane %v20093_v56, %v25269_v22  ;;  %v20108_v10 = vcombine.high %v20100_v29, %v20100_v29  ;;  %24775 = vmatmul.mubr.msk.f32.gmra.mxu1 %vm1640_vm3, %v18760_v51  ;;  %v20222_v52 = vrot.slane %v20194_v27, %v25269_v22  ;;  %v20419_v62 = vrot.slane %v20409_v35, %v25269_v22 }
0x1e03   :  { %v28943_v18 = vrot.slane %v20100_v29, %v25269_v22  ;;  %24802 = vmatprep.mubr.msk.f32.mxu1 %vm25090_vm2, %v25088_v0  ;;  %v28950_v32 = vrot.slane %v20038_v6, %v25269_v22  ;;  %v20201_v38 = vrot.slane %v20191_v13, %v25269_v22  ;;  %v20215_v39 = vrot.slane %v20193_v21, %v25269_v22 }
0x1e04   :  { %v20109_v34 = vcombine.high %v20107_v37, %v20107_v37  ;;  %v20123_v30 = vrot.slane %v20107_v37, %v25269_v22  ;;  %v20130_v58 = vrot.slane %v20108_v10, %v25269_v22  ;;  %v20441_v5 = vcombine.low %v20419_v62, %v20426_v14 }
0x1e05   :  { %v20138_v12 = vcombine.high %v28943_v18, %v28943_v18  ;;  %v20456_v11 = vrot.slane %v20442_v53, %v25269_v22  ;;  %v20223_v4 = vcombine.low %v20201_v38, %v20208_v23  ;;  %v20156_v9 = vrot.slane %v28950_v32, %v25269_v22 }
0x1e06   :  { %v20137_v1 = vrot.slane %v20109_v34, %v25269_v22  ;;  %v20139_v28 = vcombine.high %v20123_v30, %v20123_v30  ;;  %v20140_v47 = vcombine.high %v20130_v58, %v20130_v58  ;;  %24803 = vmatmul.mubr.msk.f32.vlgmr.msra.gmra.mxu1 %vm79_vm1, %v27415_v3  ;;  %v20449_v2 = vrot.slane %v20441_v5, %v25269_v22 }
0x1e07   :  { %v20809_v54 = vcombine.low %v20130_v58, %v20138_v12  ;;  %24805 = vmatprep.mubr.msk.f32.mxu1 %vm25090_vm2, %v25088_v0  ;;  %v20224_v20 = vcombine.low %v20215_v39, %v20222_v52  ;;  %v20231_v26 = vrot.slane %v20223_v4, %v25269_v22  ;;  %v16412_v13 = vadd.f32 %v28384_v8, %v28546_v46 }
0x1e08   :  { %v20810_v63 = vcombine.low %v20140_v47, %v20123_v30  ;;  %v20141_v36 = vcombine.high %v20137_v1, %v20137_v1  ;;  %v20811_v59 = vcombine.low %v20137_v1, %v20139_v28  ;;  %v20457_v15 = vcombine.low %v20449_v2, %v20456_v11 }
0x1e09   :  { %v20238_v3 = vrot.slane %v20224_v20, %v25269_v22  ;;  %v20819_v50 = vrot.slane %v20809_v54, %v25269_v22  ;;  %v19845_v21 = vcombine.low %v28796_v61, %v28805_v19  ;;  %v23670_v14 = vcombine.high %v28796_v61, %v28805_v19  ;;  %v23658_v61 = vld [vmem:[%s29657_s6 + $0x7] ss:$0 sm:$0xff] }
0x1e0a   :  { %v20812_v60 = vcombine.low %v20141_v36, %v20156_v9  ;;  %24806 = vmatmul.mubr.msk.f32.gmra.mxu1 %vm79_vm1, %v27446_v43  ;;  %24839 = vmatprep.mubr.msk.f32.mxu0 %vm1640_vm3, %v20457_v15  ;;  %v20826_v27 = vrot.slane %v20810_v63, %v25269_v22  ;;  %v20833_v42 = vrot.slane %v20811_v59, %v25269_v22 }
0x1e0b   :  { %24808 = vmatprep.mubr.msk.f32.mxu1 %vm25090_vm2, %v25088_v0  ;;  %v20239_v31 = vcombine.low %v20231_v26, %v20238_v3  ;;  %v23671_v53 = vcombine.high %v28802_v48, %v28820_v16  ;;  %v16428_v37 = vcombine.high %v16412_v13, %v16412_v13  ;;  %v19855_v10 = vrot.slane %v19845_v21, %v25269_v22 }
0x1e0c   :  { %v20840_v35 = vrot.slane %v20812_v60, %v25269_v22  ;;  %v20841_v56 = vcombine.low %v20819_v50, %v20826_v27  ;;  %v19862_v23 = vrot.slane %v23670_v14, %v25269_v22  ;;  %v16435_v46 = vrot.slane %v16412_v13, %v25269_v22 }
0x1e0d   :  { %v19876_v8 = vrot.slane %v23671_v53, %v25269_v22  ;;  %v16442_v19 = vrot.slane %v16428_v37, %v25269_v22  ;;  %v16417_v38 = vadd.f32 %v28397_v44, %v28564_v57  ;;  %v16422_v27 = vadd.f32 %v28408_v24, %v28573_v49 }
0x1e0e   :  { %24809 = vmatmul.mubr.msk.f32.gmra.mxu1 %vm79_vm1, %v27459_v7  ;;  %v20842_v43 = vcombine.low %v20833_v42, %v20840_v35  ;;  %v20849_v29 = vrot.slane %v20841_v56, %v25269_v22  ;;  %v19847_v7 = vcombine.low %v28802_v48, %v28820_v16  ;;  %v19877_v62 = vcombine.low %v19855_v10, %v19862_v23 }
0x1e0f   :  { %24832 = vmatprep.mubr.msk.f32.mxu1 %vm1640_vm3, %v20239_v31  ;;  %v19416_v48 = vcombine.high %v23658_v61, %v23658_v61  ;;  %v19423_v16 = vrot.slane %v23658_v61, %v25269_v22  ;;  %v16443_v30 = vcombine.high %v16435_v46, %v16435_v46  ;;  %v16444_v58 = vcombine.high %v16442_v19, %v16442_v19 }
0x1e10   :  { %v20856_v51 = vrot.slane %v20842_v43, %v25269_v22  ;;  %v19869_v52 = vrot.slane %v19847_v7, %v25269_v22  ;;  %v19885_v39 = vrot.slane %v19877_v62, %v25269_v22  ;;  %v16451_v5 = vrot.slane %v16435_v46, %v25269_v22 }
0x1e11   :  { %v19430_v1 = vrot.slane %v19416_v48, %v25269_v22  ;;  %v19431_v28 = vcombine.high %v19423_v16, %v19423_v16  ;;  %v16458_v47 = vrot.slane %v16442_v19, %v25269_v22  ;;  %v16465_v11 = vrot.slane %v16443_v30, %v25269_v22 }
0x1e12   :  { %v28981_v6 = vcombine.low %v20849_v29, %v20856_v51  ;;  %v19878_v34 = vcombine.low %v19869_v52, %v19876_v8  ;;  %v16472_v54 = vrot.slane %v16444_v58, %v25269_v22  ;;  %v16477_v2 = vcombine.high %v16417_v38, %v16417_v38 }
0x1e13   :  { %v16473_v63 = vcombine.high %v16451_v5, %v16451_v5  ;;  %v19432_v44 = vcombine.high %v19430_v1, %v19430_v1  ;;  %v29013_v57 = vrot.slane %v19423_v16, %v25269_v22  ;;  %v19453_v9 = vrot.slane %v19431_v28, %v25269_v22 }
0x1e14   :  { %v19892_v12 = vrot.slane %v19878_v34, %v25269_v22  ;;  %v16474_v20 = vcombine.high %v16458_v47, %v16458_v47  ;;  %v16475_v59 = vcombine.high %v16465_v11, %v16465_v11  ;;  %v16476_v3 = vcombine.high %v16472_v54, %v16472_v54 }
0x1e15   :  { %v16484_v26 = vrot.slane %v16417_v38, %v25269_v22  ;;  %v16491_v50 = vrot.slane %v16477_v2, %v25269_v22  ;;  %v19446_v29 = vrot.slane %v19430_v1, %v25269_v22  ;;  %v29026_v51 = vrot.slane %v19432_v44, %v25269_v22 }
0x1e16   :  { %v19893_v4 = vcombine.low %v19885_v39, %v19892_v12  ;;  %v19465_v13 = vcombine.low %v29013_v57, %v19453_v9  ;;  %v23659_v21 = vcombine.high %v29013_v57, %v19453_v9  ;;  %v19461_v53 = vcombine.high %v29013_v57, %v29013_v57 }
0x1e17   :  { %v19462_v37 = vcombine.high %v19446_v29, %v19446_v29  ;;  %v19463_v10 = vcombine.high %v19453_v9, %v19453_v9  ;;  %v19467_v62 = vcombine.low %v19446_v29, %v29026_v51  ;;  %v23660_v34 = vcombine.high %v19446_v29, %v29026_v51 }
0x1e18   :  { %v20028_v31 = vadd.f32 %v28897_v45, %v19893_v4  ;;  %v19514_v38 = vcombine.low %v29013_v57, %v29013_v57  ;;  %v19515_v39 = vcombine.low %v19453_v9, %v19461_v53  ;;  %v16492_v1 = vcombine.high %v16484_v26, %v16484_v26 }
0x1e19   :  { %v19516_v12 = vcombine.low %v19463_v10, %v19446_v29  ;;  %v19482_v2 = vrot.slane %v23659_v21, %v25269_v22  ;;  %v19496_v4 = vrot.slane %v23660_v34, %v25269_v22 }
0x1e1a   :  { %v20044_v28 = vcombine.high %v20028_v31, %v20028_v31  ;;  %v19524_v44 = vrot.slane %v19514_v38, %v25269_v22  ;;  %v19531_v9 = vrot.slane %v19515_v39, %v25269_v22  ;;  %v19464_v38 = vcombine.high %v29026_v51, %v29026_v51 }
0x1eaf   :  { %v18833_v36 = vpop.f32.mrf.mxu1 }
0x1eb0   :  { %v18850_v15 = vcombine.high %v18833_v36, %v18833_v36  ;;  %v18857_v60 = vrot.slane %v18833_v36, %v25269_v22  ;;  %v29061_v36 = vrot.slane %v16422_v27, %v25269_v22 }
0x1eb1   :  { %v24770_v35 = vpop.f32.mrf.mxu1 }
0x1eb2   :  { %v18864_v42 = vrot.slane %v18850_v15, %v25269_v22  ;;  %v18865_v56 = vcombine.high %v18857_v60, %v18857_v60  ;;  %v18873_v43 = vrot.slane %v18857_v60, %v25269_v22  ;;  %v16500_v15 = vrot.slane %v16484_v26, %v25269_v22 }
0x1eb3   :  { %v16507_v60 = vrot.slane %v16491_v50, %v25269_v22  ;;  %v20051_v35 = vrot.slane %v20028_v31, %v25269_v22  ;;  %v16533_v29 = vcombine.high %v29061_v36, %v29061_v36  ;;  %v16540_v10 = vrot.slane %v29061_v36, %v25269_v22 }
0x1eb4   :  { %v18866_v14 = vcombine.high %v18864_v42, %v18864_v42  ;;  %v18880_v24 = vrot.slane %v18864_v42, %v25269_v22  ;;  %v18887_v49 = vrot.slane %v18865_v56, %v25269_v22  ;;  %v18895_v45 = vcombine.high %v18873_v43, %v18873_v43 }
0x1eb5   :  { %v29032_v7 = vadd.f32 %v18873_v43, %v16451_v5  ;;  %v19517_v5 = vcombine.low %v29026_v51, %v19462_v37  ;;  %v20058_v42 = vrot.slane %v20044_v28, %v25269_v22  ;;  %v29086_v39 = vrot.slane %v20051_v35, %v25269_v22 }
0x1eb6   :  { %v18894_v23 = vrot.slane %v18866_v14, %v25269_v22  ;;  %v18896_v52 = vcombine.high %v18880_v24, %v18880_v24  ;;  %v18897_v8 = vcombine.high %v18887_v49, %v18887_v49  ;;  %v29037_v46 = vadd.f32 %v18887_v49, %v16465_v11 }
0x1eb7   :  { %v29039_v61 = vadd.f32 %v18895_v45, %v16473_v63  ;;  %v29041_v19 = vadd.f32 %v18880_v24, %v16458_v47  ;;  %v19475_v11 = vrot.slane %v19465_v13, %v25269_v22  ;;  %v16493_v63 = vcombine.high %v16491_v50, %v16491_v50 }
0x1eb8   :  { %v18898_v48 = vcombine.high %v18894_v23, %v18894_v23  ;;  %v29045_v16 = vadd.f32 %v18897_v8, %v16475_v59  ;;  %v29047_v30 = vadd.f32 %v18894_v23, %v16472_v54  ;;  %v29049_v58 = vadd.f32 %v18896_v52, %v16474_v20 }
0x1eb9   :  { %v19489_v54 = vrot.slane %v19467_v62, %v25269_v22  ;;  %v19538_v20 = vrot.slane %v19516_v12, %v25269_v22  ;;  %v19545_v59 = vrot.slane %v19517_v5, %v25269_v22  ;;  %v19497_v27 = vcombine.low %v19475_v11, %v19482_v2 }
0x1eba   :  { %v29054_v47 = vadd.f32 %v18898_v48, %v16476_v3  ;;  %v16514_v3 = vrot.slane %v16492_v1, %v25269_v22  ;;  %v16521_v43 = vrot.slane %v16493_v63, %v25269_v22  ;;  %v19546_v13 = vcombine.low %v19524_v44, %v19531_v9 }
0x1ebb   :  { %v19498_v56 = vcombine.low %v19489_v54, %v19496_v4  ;;  %v19547_v21 = vcombine.low %v19538_v20, %v19545_v59  ;;  %v16522_v14 = vcombine.high %v16500_v15, %v16500_v15  ;;  %v16523_v24 = vcombine.high %v16507_v60, %v16507_v60 }
0x1ebc   :  { %v16524_v26 = vcombine.high %v16514_v3, %v16514_v3  ;;  %v20059_v49 = vcombine.high %v20051_v35, %v20051_v35  ;;  %v20060_v50 = vcombine.high %v20058_v42, %v20058_v42  ;;  %v19505_v53 = vrot.slane %v19497_v27, %v25269_v22 }
0x1ebd   :  { %v19512_v31 = vrot.slane %v19498_v56, %v25269_v22  ;;  %v16525_v37 = vcombine.high %v16521_v43, %v16521_v43  ;;  %v16547_v8 = vrot.slane %v16533_v29, %v25269_v22  ;;  %v19554_v34 = vrot.slane %v19546_v13, %v25269_v22 }
0x1ebe   :  { %v18838_v45 = vpop.f32.mrf.mxu1  ;;  %v19561_v48 = vrot.slane %v19547_v21, %v25269_v22  ;;  %v29091_v28 = vrot.slane %v20058_v42, %v25269_v22  ;;  %v29094_v11 = vrot.slane %v20059_v49, %v25269_v22  ;;  %v29097_v2 = vrot.slane %v20060_v50, %v25269_v22 }
0x1ebf   :  { %v18899_v23 = vcombine.high %v18838_v45, %v18838_v45  ;;  %v18906_v52 = vrot.slane %v18838_v45, %v25269_v22  ;;  %v19513_v4 = vcombine.low %v19505_v53, %v19512_v31  ;;  %v19563_v42 = vcombine.low %v19464_v38, %v29013_v57 }
0x1ec0   :  { %v24773_v62 = vpop.f32.mrf.mxu1  ;;  %v19562_v35 = vcombine.low %v19554_v34, %v19561_v48  ;;  %v20662_v34 = vcombine.low %v29086_v39, %v29094_v11 }
0x1ec1   :  { %v18913_v12 = vrot.slane %v18899_v23, %v25269_v22  ;;  %v18914_v5 = vcombine.high %v18906_v52, %v18906_v52  ;;  %v18922_v1 = vrot.slane %v18906_v52, %v25269_v22 }
0x1ec2   :  { %v18843_v54 = vpop.f32.mrf.mxu1 }
0x1ec3   :  { %v18915_v51 = vcombine.high %v18913_v12, %v18913_v12  ;;  %v18929_v63 = vrot.slane %v18913_v12, %v25269_v22  ;;  %v18936_v36 = vrot.slane %v18914_v5, %v25269_v22  ;;  %v18944_v44 = vcombine.high %v18922_v1, %v18922_v1 }
0x1ec4   :  { %v29101_v9 = vadd.f32 %v18922_v1, %v16500_v15  ;;  %v18954_v20 = vrot.slane %v18843_v54, %v25269_v22  ;;  %v24776_v59 = vpop.f32.mrf.mxu1  ;;  %v19371_v5 = vcombine.high %v28918_v33, %v28918_v33 }
0x1ec5   :  { %v18943_v27 = vrot.slane %v18915_v51, %v25269_v22  ;;  %v18945_v56 = vcombine.high %v18929_v63, %v18929_v63  ;;  %v18946_v29 = vcombine.high %v18936_v36, %v18936_v36  ;;  %v29106_v13 = vadd.f32 %v18936_v36, %v16514_v3 }
0x1ec6   :  { %v29108_v21 = vadd.f32 %v18944_v44, %v16522_v14  ;;  %v29110_v49 = vadd.f32 %v18929_v63, %v16507_v60  ;;  %v18955_v50 = vcombine.high %v18954_v20, %v18954_v20  ;;  %v18962_v15 = vrot.slane %v18954_v20, %v25269_v22  ;;  %v19647_v45 = vpop.f32.mrf.mxu1 }
0x1ec7   :  { %v18947_v53 = vcombine.high %v18943_v27, %v18943_v27  ;;  %v29113_v31 = vadd.f32 %v18946_v29, %v16524_v26  ;;  %v29115_v23 = vadd.f32 %v18943_v27, %v16521_v43  ;;  %v29117_v57 = vadd.f32 %v18945_v56, %v16523_v24 }
0x1ec8   :  { %v18969_v52 = vrot.slane %v18955_v50, %v25269_v22  ;;  %v29120_v62 = vadd.f32 %v18962_v15, %v16540_v10  ;;  %v19648_v3 = vadd.f32 %v19647_v45, %v19513_v4  ;;  %v24804_v14 = vpop.f32.mrf.mxu1  ;;  %v19570_v60 = vrot.slane %v19563_v42, %v25269_v22 }
0x1ec9   :  { %v29125_v48 = vadd.f32 %v18947_v53, %v16525_v37  ;;  %v20664_v26 = vcombine.low %v29091_v28, %v29097_v2  ;;  %v29133_v10 = vmul.f32 0.35355338, %v28909_v40  ;;  %v23685_v37 = vcombine.high %v29086_v39, %v29094_v11 }
0x1eca   :  { %v29129_v43 = vadd.f32 %v18969_v52, %v16547_v8  ;;  %v19664_v24 = vcombine.high %v19648_v3, %v19648_v3  ;;  %v19671_v38 = vrot.slane %v19648_v3, %v25269_v22  ;;  %v19652_v12 = vpop.f32.mrf.mxu1  ;;  %v19577_v8 = vrot.slane %v19570_v60, %v25269_v22 }
0x1ecb   :  { %v19653_v1 = vadd.f32 %v19652_v12, %v19562_v35  ;;  %v23686_v63 = vcombine.high %v29091_v28, %v29097_v2  ;;  %v29144_v36 = vrot.slane %v20662_v34, %v25269_v22  ;;  %v20686_v59 = vrot.slane %v20664_v26, %v25269_v22 }
0x1ecc   :  { %v19678_v54 = vrot.slane %v19664_v24, %v25269_v22  ;;  %v19679_v4 = vcombine.high %v19671_v38, %v19671_v38  ;;  %v24807_v51 = vpop.f32.mrf.mxu1  ;;  %v19687_v20 = vrot.slane %v19671_v38, %v25269_v22 }
0x1ecd   :  { %v19713_v40 = vcombine.high %v19653_v1, %v19653_v1  ;;  %v19720_v44 = vrot.slane %v19653_v1, %v25269_v22 }
0x1ece   :  { %v19680_v33 = vcombine.high %v19678_v54, %v19678_v54  ;;  %v19701_v39 = vrot.slane %v19679_v4, %v25269_v22  ;;  %v19657_v11 = vpop.f32.mrf.mxu1  ;;  %v19694_v35 = vrot.slane %v19678_v54, %v25269_v22 }
0x1ecf   :  { %v19727_v42 = vrot.slane %v19713_v40, %v25269_v22  ;;  %v19728_v27 = vcombine.high %v19720_v44, %v19720_v44  ;;  %v19736_v28 = vrot.slane %v19720_v44, %v25269_v22  ;;  %v19658_v50 = vadd.f32 %v19657_v11, %v19577_v8 }
0x1ed0   :  { %v19708_v2 = vrot.slane %v19680_v33, %v25269_v22  ;;  %v20254_v56 = vcombine.low %v19687_v20, %v19701_v39  ;;  %v23675_v29 = vcombine.high %v19687_v20, %v19701_v39  ;;  %v24810_v15 = vpop.f32.mrf.mxu1  ;;  %v20693_v8 = vrot.slane %v23686_v63, %v25269_v22 }
0x1ed1   :  { %v19729_v45 = vcombine.high %v19727_v42, %v19727_v42  ;;  %v19743_v53 = vrot.slane %v19727_v42, %v25269_v22  ;;  %v19750_v52 = vrot.slane %v19728_v27, %v25269_v22  ;;  %v19758_v3 = vcombine.high %v19736_v28, %v19736_v28 }
0x1ed2   :  { %v20256_v14 = vcombine.low %v19694_v35, %v19708_v2  ;;  %v23676_v60 = vcombine.high %v19694_v35, %v19708_v2  ;;  %v20264_v34 = vrot.slane %v20254_v56, %v25269_v22  ;;  %v20271_v26 = vrot.slane %v23675_v29, %v25269_v22 }
0x1ed3   :  { %v19757_v24 = vrot.slane %v19729_v45, %v25269_v22  ;;  %v19759_v38 = vcombine.high %v19743_v53, %v19743_v53  ;;  %v19760_v12 = vcombine.high %v19750_v52, %v19750_v52  ;;  %v20309_v1 = vrot.slane %v19736_v28, %v25269_v22 }
0x1ed4   :  { %v20278_v54 = vrot.slane %v20256_v14, %v25269_v22  ;;  %v20285_v4 = vrot.slane %v23676_v60, %v25269_v22  ;;  %v20286_v51 = vcombine.low %v20264_v34, %v20271_v26  ;;  %v20472_v40 = vcombine.low %v19750_v52, %v19758_v3 }
0x1ed5   :  { %v20473_v44 = vcombine.low %v19760_v12, %v19743_v53  ;;  %v19761_v33 = vcombine.high %v19757_v24, %v19757_v24  ;;  %v19768_v20 = vrot.slane %v19658_v50, %v25269_v22  ;;  %v20679_v39 = vrot.slane %v23685_v37, %v25269_v22 }
0x1ed6   :  { %v20149_v11 = vcombine.high %v28950_v32, %v28950_v32  ;;  %v20316_v35 = vrot.slane %v20309_v1, %v25269_v22  ;;  %v20287_v42 = vcombine.low %v20278_v54, %v20285_v4  ;;  %v20474_v27 = vcombine.low %v19757_v24, %v19759_v38 }
0x1ed7   :  { %v20489_v28 = vrot.slane %v20473_v44, %v25269_v22  ;;  %v19769_v2 = vcombine.high %v19768_v20, %v19768_v20  ;;  %v19776_v56 = vrot.slane %v19768_v20, %v25269_v22  ;;  %v20717_v63 = vrot.slane %v28943_v18, %v25269_v22 }
0x1ed8   :  { %24828 = vmatprep.subr.msk.mxu1 %vm1640_vm3, %v20316_v35  ;;  %v20294_v29 = vrot.slane %v20286_v51, %v25269_v22  ;;  %v20301_v37 = vrot.slane %v20287_v42, %v25269_v22  ;;  %v20695_v50 = vcombine.low %v20686_v59, %v20693_v8  ;;  %v19385_v32 = vrot.slane %v19371_v5, %v25269_v22 }
0x1ed9   :  { %v20482_v15 = vrot.slane %v20472_v40, %v25269_v22  ;;  %v19783_v45 = vrot.slane %v19769_v2, %v25269_v22  ;;  %v20475_v53 = vcombine.low %v19761_v33, %v19776_v56  ;;  %24829 = vmatpush3.xpose.msk.msra.mxu1 %vm1640_vm3, %v20316_v35  ;;  %v20246_v52 = vrot.slane %v29133_v10, %v25269_v22 }
0x1eda   :  { %v20163_v18 = vrot.slane %v20149_v11, %v25269_v22  ;;  %v20302_v3 = vcombine.low %v20294_v29, %v20301_v37  ;;  %v20694_v14 = vcombine.low %v29144_v36, %v20679_v39  ;;  %v20496_v60 = vrot.slane %v20474_v27, %v25269_v22 }
0x1edb   :  { %v20503_v59 = vrot.slane %v20475_v53, %v25269_v22  ;;  %v20527_v5 = vrot.slane %v19783_v45, %v25269_v22  ;;  %v20504_v34 = vcombine.low %v20482_v15, %v20489_v28  ;;  %v20724_v26 = vrot.slane %v20717_v63, %v25269_v22 }
0x1edc   :  { %24830 = vmatprep.subr.msk.mxu1 %vm1640_vm3, %v20302_v3  ;;  %v20709_v24 = vrot.slane %v20695_v50, %v25269_v22  ;;  %v20181_v38 = vmul.f32 0.35355338, %v19385_v32  ;;  %v20253_v36 = vrot.slane %v20246_v52, %v25269_v22  ;;  %v20864_v1 = vrot.slane %v20163_v18, %v25269_v22 }
0x1edd   :  { %v20505_v10 = vcombine.low %v20496_v60, %v20503_v59  ;;  %v20534_v12 = vrot.slane %v20527_v5, %v25269_v22  ;;  %24831 = vmatpush3.xpose.msk.msra.mxu1 %vm1640_vm3, %v20302_v3  ;;  %v20702_v54 = vrot.slane %v20694_v14, %v25269_v22  ;;  %v20512_v4 = vrot.slane %v20504_v34, %v25269_v22 }
0x1ede   :  { %24842 = vmatprep.subr.msk.mxu1 %vm2058_vm6, %v20724_v26  ;;  %v20464_v40 = vrot.slane %v20181_v38, %v25269_v22  ;;  %v29203_v33 = vrot.slane %v20864_v1, %v25269_v22 }
0x1edf   :  { %24835 = vmatprep.subr.msk.mxu0 %vm1640_vm3, %v20534_v12  ;;  %v20519_v51 = vrot.slane %v20505_v10, %v25269_v22  ;;  %v20710_v8 = vcombine.low %v20702_v54, %v20709_v24 }
0x1ee0   :  { %24836 = vmatpush3.xpose.msk.msra.mxu0 %vm1640_vm3, %v20534_v12  ;;  %24833 = vmatmul.mubr.msk.f32.vlgmr.msra.gmra.mxu1 %vm1640_vm3, %v20253_v36  ;;  %v20471_v20 = vrot.slane %v20464_v40, %v25269_v22 }
0x1ee1   :  { %24843 = vmatpush3.msk.msra.mxu1 %vm2058_vm6, %v20724_v26  ;;  %v20520_v44 = vcombine.low %v20512_v4, %v20519_v51 }
0x1ee2   :  { %24844 = vmatprep.subr.mxu1 %v20710_v8 }
0x1ee3   :  { %24837 = vmatprep.subr.msk.mxu0 %vm1640_vm3, %v20520_v44  ;;  %24845 = vmatpush3.msra.mxu1 %v20710_v8 }
0x1ee4   :  { %24838 = vmatpush3.xpose.msk.msra.mxu0 %vm1640_vm3, %v20520_v44  ;;  %24849 = vmatprep.subr.msk.mxu1 %vm2058_vm6, %v29203_v33 }
0x1ee5   :  { %24856 = vmatprep.subr.mxu0 %v25088_v0 }
0x1ee7   :  { %24840 = vmatmul.mubr.msk.f32.vlgmr.msra.gmra.mxu0 %vm1640_vm3, %v20471_v20 }
0x1ee8   :  { %24858 = vmatprep.mubr.msk.f32.mxu0 %vm25090_vm2, %v25088_v0 }
0x1fa0   :  { %v24834_v39 = vpop.f32.mrf.mxu1 }
0x1fa1   :  { %v20621_v11 = vsel %vm1946_vm5, %v24834_v39, -inf }
0x1fa2   :  { %20622 = vmax.xlane.f32.xlu1 %v20621_v11  ;;  %v20391_v35 = vpop.f32.mrf.mxu1 }
0x1fa3   :  { %v20618_v42 = vsel %vm1942_vm4, %v20391_v35, -inf }
0x1fa4   :  { %20619 = vmax.xlane.f32.xlu0 %v20618_v42 }
0x1fa7   :  { %v24841_v27 = vpop.f32.mrf.mxu0 }
0x1fa8   :  { %v20627_v28 = vsel %vm1946_vm5, %v24841_v27, -inf }
0x1fa9   :  { %v20609_v2 = vpop.f32.mrf.mxu0  ;;  %20628 = vmax.xlane.f32.xlu1 %v20627_v28 }
0x1faa   :  { %v20624_v56 = vsel %vm1942_vm4, %v20609_v2, -inf }
0x1fab   :  { %20625 = vmax.xlane.f32.xlu0 %v20624_v56 }
0x202b   :  { %v20623_v63 = vpop.xlane.xlu1 %20622 }
0x202c   :  { %v20631_v29 = vsub.f32 %v24834_v39, %v20623_v63 }
0x202d   :  { %v20620_v37 = vpop.xlane.xlu0 %20619 }
0x202e   :  { %v20636_v50 = vmul.f32 1.442695, %v20631_v29  ;;  %v20630_v32 = vsub.f32 %v20391_v35, %v20620_v37 }
0x2030   :  { %25042 = vpow2.f32 %v20636_v50  ;;  %v20634_v15 = vmul.f32 1.442695, %v20630_v32 }
0x2032   :  { %25044 = vpow2.f32 %v20634_v15  ;;  %v20629_v45 = vpop.xlane.xlu1 %20628 }
0x2033   :  { %v20633_v53 = vsub.f32 %v24841_v27, %v20629_v45 }
0x2034   :  { %v20626_v52 = vpop.xlane.xlu0 %20625 }
0x2035   :  { %v20640_v18 = vmul.f32 1.442695, %v20633_v53  ;;  %v20632_v3 = vsub.f32 %v20609_v2, %v20626_v52 }
0x2037   :  { %25046 = vpow2.f32 %v20640_v18  ;;  %v20638_v14 = vmul.f32 1.442695, %v20632_v3 }
0x2039   :  { %25048 = vpow2.f32 %v20638_v14 }
0x203d   :  { %v25043_v60 = vpop.eup %25042 }
0x203e   :  { %v20645_v59 = vsel %vm1946_vm5, %v25043_v60, 0.0 }
0x203f   :  { %v25045_v5 = vpop.eup %25044  ;;  %20646 = vadd.xlane.f32.xlu1 %v20645_v59 }
0x2040   :  { %v20642_v34 = vsel %vm1942_vm4, %v25045_v5, 0.0 }
0x2041   :  { %20643 = vadd.xlane.f32.xlu0 %v20642_v34 }
0x2044   :  { %v25047_v26 = vpop.eup %25046 }
0x2045   :  { %v20651_v24 = vsel %vm1946_vm5, %v25047_v26, 0.0 }
0x2046   :  { %v25049_v38 = vpop.eup %25048  ;;  %20652 = vadd.xlane.f32.xlu1 %v20651_v24 }
0x2047   :  { %v20648_v10 = vsel %vm1942_vm4, %v25049_v38, 0.0 }
0x2048   :  { %20649 = vadd.xlane.f32.xlu0 %v20648_v10 }
0x20c8   :  { %v20647_v12 = vpop.xlane.xlu1 %20646 }
0x20c9   :  { %25050 = vrcp.f32 %v20647_v12 }
0x20ca   :  { %v20644_v36 = vpop.xlane.xlu0 %20643 }
0x20cb   :  { %25052 = vrcp.f32 %v20644_v36 }
0x20cf   :  { %v20653_v1 = vpop.xlane.xlu1 %20652 }
0x20d0   :  { %25054 = vrcp.f32 %v20653_v1 }
0x20d1   :  { %v20650_v54 = vpop.xlane.xlu0 %20649 }
0x20d2   :  { %25056 = vrcp.f32 %v20650_v54 }
0x20d6   :  { %v25051_v4 = vpop.eup %25050 }
0x20d7   :  { %v20659_v40 = vmul.f32 %v25051_v4, %v25043_v60 }
0x20d8   :  { %v25053_v51 = vpop.eup %25052 }
0x20d9   :  { %v20658_v8 = vmul.f32 %v25053_v51, %v25045_v5 }
0x20db   :  { %24846 = vmatprep.mubr.msk.f32.mxu1 %vm1942_vm4, %v20658_v8 }
0x20dc   :  { %24847 = vmatmul.mubr.msk.f32.vlgmr.msra.gmra.mxu1 %vm1942_vm4, %v20659_v40 }
0x20dd   :  { %24850 = vmatpush3.msk.msra.mxu1 %vm2058_vm6, %v29203_v33  ;;  %v25055_v44 = vpop.eup %25054  ;;  %v23693_v33 = vld [vmem:[%s29660_s9 + $0x38] sm:$0xff] }
0x20de   :  { %24851 = vmatprep.subr.mxu1 %v28981_v6  ;;  %v20661_v11 = vmul.f32 %v25055_v44, %v25047_v26  ;;  %24857 = vmatpush3.msra.mxu0 %v23693_v33 }
0x20df   :  { %v25057_v20 = vpop.eup %25056  ;;  %24852 = vmatpush3.msra.mxu1 %v28981_v6  ;;  %24884 = vmatprep.subr.mxu0 %v25088_v0 }
0x20e0   :  { %v20660_v39 = vmul.f32 %v25057_v20, %v25049_v38  ;;  %24867 = vmatprep.subr.mxu1 %v25088_v0 }
0x20e2   :  { %24853 = vmatprep.mubr.msk.f32.mxu1 %vm1942_vm4, %v20660_v39 }
0x20e3   :  { %24854 = vmatmul.mubr.msk.f32.vlgmr.msra.gmra.mxu1 %vm1942_vm4, %v20661_v11 }
0x20e4   :  { %24875 = vmatprep.mubr.msk.f32.mxu1 %vm25090_vm2, %v25088_v0 }
0x219c   :  { %v24848_v35 = vpop.f32.mrf.mxu1 }
0x219d   :  { %v21017_v50 = vrot.slane %v24848_v35, %v25269_v22 }
0x219e   :  { %v20800_v6 = vpop.f32.mrf.mxu1 }
0x219f   :  { %v20962_v42 = vcombine.high %v20800_v6, %v20800_v6  ;;  %v20969_v27 = vrot.slane %v20800_v6, %v25269_v22  ;;  %v21024_v38 = vrot.slane %v21017_v50, %v25269_v22 }
0x21a1   :  { %v20976_v28 = vrot.slane %v20962_v42, %v25269_v22  ;;  %v20977_v2 = vcombine.high %v20969_v27, %v20969_v27  ;;  %v20985_v63 = vrot.slane %v20969_v27, %v25269_v22 }
0x21a3   :  { %v20978_v56 = vcombine.high %v20976_v28, %v20976_v28  ;;  %v20999_v29 = vrot.slane %v20977_v2, %v25269_v22  ;;  %v24855_v37 = vpop.f32.mrf.mxu1  ;;  %v20992_v32 = vrot.slane %v20976_v28, %v25269_v22 }
0x21a4   :  { %v21080_v40 = vrot.slane %v24855_v37, %v25269_v22 }
0x21a5   :  { %v21006_v15 = vrot.slane %v20978_v56, %v25269_v22  ;;  %v21088_v45 = vcombine.low %v20985_v63, %v20999_v29  ;;  %v23694_v53 = vcombine.high %v20985_v63, %v20999_v29  ;;  %v20947_v52 = vpop.f32.mrf.mxu1 }
0x21a6   :  { %v21025_v18 = vcombine.high %v20947_v52, %v20947_v52  ;;  %v21032_v3 = vrot.slane %v20947_v52, %v25269_v22  ;;  %v21087_v29 = vrot.slane %v21080_v40, %v25269_v22 }
0x21a7   :  { %v21090_v14 = vcombine.low %v20992_v32, %v21006_v15  ;;  %v23695_v60 = vcombine.high %v20992_v32, %v21006_v15  ;;  %v21098_v59 = vrot.slane %v21088_v45, %v25269_v22  ;;  %v21105_v5 = vrot.slane %v23694_v53, %v25269_v22 }
0x21a8   :  { %v21039_v34 = vrot.slane %v21025_v18, %v25269_v22  ;;  %v21040_v26 = vcombine.high %v21032_v3, %v21032_v3  ;;  %v21048_v24 = vrot.slane %v21032_v3, %v25269_v22 }
0x21a9   :  { %v21112_v10 = vrot.slane %v21090_v14, %v25269_v22  ;;  %v21119_v12 = vrot.slane %v23695_v60, %v25269_v22  ;;  %v21120_v36 = vcombine.low %v21098_v59, %v21105_v5  ;;  %v23700_v60 = vld [vmem:[%s29661_s10 + $0x1] ss:$0 sm:$0xff] }
0x21aa   :  { %v21041_v1 = vcombine.high %v21039_v34, %v21039_v34  ;;  %v21055_v54 = vrot.slane %v21039_v34, %v25269_v22  ;;  %v21062_v4 = vrot.slane %v21040_v26, %v25269_v22  ;;  %v21070_v51 = vcombine.high %v21048_v24, %v21048_v24 }
0x21ab   :  { %v21121_v8 = vcombine.low %v21112_v10, %v21119_v12  ;;  %v21137_v44 = vcombine.low %v21024_v38, %v21048_v24  ;;  %v21128_v35 = vrot.slane %v21120_v36, %v25269_v22  ;;  %v21453_v59 = vcombine.high %v23700_v60, %v23700_v60 }
0x21ac   :  { %v21069_v20 = vrot.slane %v21041_v1, %v25269_v22  ;;  %v21071_v39 = vcombine.high %v21055_v54, %v21055_v54  ;;  %v21072_v11 = vcombine.high %v21062_v4, %v21062_v4  ;;  %v21138_v33 = vcombine.low %v21062_v4, %v21070_v51 }
0x21ad   :  { %v21135_v6 = vrot.slane %v21121_v8, %v25269_v22  ;;  %v21147_v42 = vrot.slane %v21137_v44, %v25269_v22  ;;  %v21460_v5 = vrot.slane %v23700_v60, %v25269_v22  ;;  %v21467_v34 = vrot.slane %v21453_v59, %v25269_v22 }
0x21ae   :  { %v21073_v27 = vcombine.high %v21069_v20, %v21069_v20  ;;  %v21139_v28 = vcombine.low %v21072_v11, %v21055_v54  ;;  %v21140_v2 = vcombine.low %v21069_v20, %v21071_v39  ;;  %v21154_v56 = vrot.slane %v21138_v33, %v25269_v22 }
0x21af   :  { %v21136_v63 = vcombine.low %v21128_v35, %v21135_v6  ;;  %v21468_v26 = vcombine.high %v21460_v5, %v21460_v5  ;;  %v21469_v24 = vcombine.high %v21467_v34, %v21467_v34  ;;  %v29282_v10 = vrot.slane %v21460_v5, %v25269_v22 }
0x21b0   :  { %v21161_v37 = vrot.slane %v21139_v28, %v25269_v22  ;;  %v21168_v50 = vrot.slane %v21140_v2, %v25269_v22  ;;  %v21169_v32 = vcombine.low %v21147_v42, %v21154_v56  ;;  %v21186_v45 = vcombine.low %v21073_v27, %v21087_v29 }
0x21b1   :  { %24859 = vmatmul.mubr.msk.f32.vlgmr.msra.gmra.mxu0 %vm1640_vm3, %v21136_v63  ;;  %v29286_v1 = vrot.slane %v21467_v34, %v25269_v22  ;;  %v29289_v54 = vrot.slane %v21468_v26, %v25269_v22  ;;  %v29292_v4 = vrot.slane %v21469_v24, %v25269_v22  ;;  %v29298_v20 = vcombine.high %v29282_v10, %v29282_v10 }
0x21b2   :  { %v21170_v15 = vcombine.low %v21161_v37, %v21168_v50  ;;  %24861 = vmatprep.mubr.msk.f32.mxu0 %vm25090_vm2, %v25088_v0  ;;  %v21177_v53 = vrot.slane %v21169_v32, %v25269_v22  ;;  %v21193_v18 = vrot.slane %v21186_v45, %v25269_v22 }
0x21b3   :  { %v29305_v42 = vcombine.high %v29286_v1, %v29286_v1  ;;  %v21500_v27 = vcombine.high %v29289_v54, %v29289_v54  ;;  %v29311_v28 = vcombine.high %v29292_v4, %v29292_v4 }
0x21b4   :  { %v21184_v52 = vrot.slane %v21170_v15, %v25269_v22  ;;  %v21200_v14 = vrot.slane %v21193_v18, %v25269_v22 }
0x21b6   :  { %v21185_v3 = vcombine.low %v21177_v53, %v21184_v52 }
0x21b8   :  { %24862 = vmatmul.mubr.msk.f32.gmra.mxu0 %vm1640_vm3, %v21185_v3 }
0x21b9   :  { %24864 = vmatprep.mubr.msk.f32.mxu0 %vm25090_vm2, %v25088_v0 }
0x21bc   :  { %24865 = vmatmul.mubr.msk.f32.gmra.mxu0 %vm1640_vm3, %v21200_v14 }
0x21bd   :  { %24900 = vmatprep.mubr.msk.f32.mxu0 %vm25090_vm2, %v25088_v0 }
0x2271   :  { %v21273_v38 = vpop.f32.mrf.mxu0 }
0x2272   :  { %v21290_v12 = vcombine.high %v21273_v38, %v21273_v38  ;;  %v21297_v36 = vrot.slane %v21273_v38, %v25269_v22 }
0x2273   :  { %v24860_v51 = vpop.f32.mrf.mxu0 }
0x2274   :  { %v21304_v8 = vrot.slane %v21290_v12, %v25269_v22  ;;  %v21305_v40 = vcombine.high %v21297_v36, %v21297_v36  ;;  %v21313_v44 = vrot.slane %v21297_v36, %v25269_v22 }
0x2276   :  { %v21306_v39 = vcombine.high %v21304_v8, %v21304_v8  ;;  %v21320_v11 = vrot.slane %v21304_v8, %v25269_v22  ;;  %v21327_v33 = vrot.slane %v21305_v40, %v25269_v22  ;;  %v21335_v35 = vcombine.high %v21313_v44, %v21313_v44 }
0x2277   :  { %v21428_v6 = vadd.f32 %v21313_v44, %v29032_v7 }
0x2278   :  { %v21334_v2 = vrot.slane %v21306_v39, %v25269_v22  ;;  %v21336_v56 = vcombine.high %v21320_v11, %v21320_v11  ;;  %v21337_v63 = vcombine.high %v21327_v33, %v21327_v33  ;;  %v21429_v29 = vadd.f32 %v21327_v33, %v29037_v46  ;;  %v21278_v37 = vpop.f32.mrf.mxu0 }
0x2279   :  { %v21430_v7 = vadd.f32 %v21335_v35, %v29039_v61  ;;  %v21432_v50 = vadd.f32 %v21320_v11, %v29041_v19  ;;  %v21510_v32 = vadd.f32 %v29282_v10, %v21428_v6  ;;  %v21339_v15 = vcombine.high %v21278_v37, %v21278_v37 }
0x227a   :  { %v21338_v45 = vcombine.high %v21334_v2, %v21334_v2  ;;  %v21431_v53 = vadd.f32 %v21337_v63, %v29045_v16  ;;  %v21433_v52 = vadd.f32 %v21334_v2, %v29047_v30  ;;  %v21434_v18 = vadd.f32 %v21336_v56, %v29049_v58  ;;  %v24863_v3 = vpop.f32.mrf.mxu0 }
0x227b   :  { %v21511_v14 = vadd.f32 %v29289_v54, %v21429_v29  ;;  %v21512_v46 = vadd.f32 %v29298_v20, %v21430_v7  ;;  %v21514_v60 = vadd.f32 %v29286_v1, %v21432_v50  ;;  %v21346_v61 = vrot.slane %v21278_v37, %v25269_v22 }
0x227c   :  { %v21435_v19 = vadd.f32 %v21338_v45, %v29054_v47  ;;  %v21513_v59 = vadd.f32 %v21500_v27, %v21431_v53  ;;  %v21515_v5 = vadd.f32 %v29292_v4, %v21433_v52  ;;  %v21516_v16 = vadd.f32 %v29305_v42, %v21434_v18  ;;  %v21283_v34 = vpop.f32.mrf.mxu0 }
0x227d   :  { %v21546_v30 = vcombine.low %v21510_v32, %v21511_v14  ;;  %v21353_v58 = vrot.slane %v21339_v15, %v25269_v22  ;;  %v21354_v26 = vcombine.high %v21346_v61, %v21346_v61  ;;  %v21362_v24 = vrot.slane %v21346_v61, %v25269_v22 }
0x227e   :  { %v21547_v38 = vcombine.low %v21512_v46, %v21513_v59  ;;  %v21548_v12 = vcombine.low %v21514_v60, %v21515_v5  ;;  %v21394_v36 = vrot.slane %v21283_v34, %v25269_v22  ;;  %v21517_v51 = vadd.f32 %v29311_v28, %v21435_v19  ;;  %v24866_v8 = vpop.f32.mrf.mxu0 }
0x227f   :  { %v21355_v47 = vcombine.high %v21353_v58, %v21353_v58  ;;  %v21369_v40 = vrot.slane %v21353_v58, %v25269_v22  ;;  %v21376_v44 = vrot.slane %v21354_v26, %v25269_v22  ;;  %v21384_v39 = vcombine.high %v21362_v24, %v21362_v24 }
0x2280   :  { %v21395_v11 = vcombine.high %v21394_v36, %v21394_v36  ;;  %v21402_v33 = vrot.slane %v21394_v36, %v25269_v22  ;;  %v21549_v35 = vcombine.low %v21516_v16, %v21517_v51  ;;  %v21436_v29 = vadd.f32 %v21362_v24, %v29101_v9 }
0x2281   :  { %v21383_v6 = vrot.slane %v21355_v47, %v25269_v22  ;;  %v21385_v2 = vcombine.high %v21369_v40, %v21369_v40  ;;  %v21386_v56 = vcombine.high %v21376_v44, %v21376_v44  ;;  %v21437_v63 = vadd.f32 %v21376_v44, %v29106_v13 }
0x2282   :  { %v21438_v37 = vadd.f32 %v21384_v39, %v29108_v21  ;;  %v21440_v7 = vadd.f32 %v21369_v40, %v29110_v49  ;;  %v21409_v50 = vrot.slane %v21395_v11, %v25269_v22  ;;  %v21444_v9 = vadd.f32 %v21402_v33, %v29120_v62 }
0x2283   :  { %v21387_v32 = vcombine.high %v21383_v6, %v21383_v6  ;;  %v21439_v15 = vadd.f32 %v21386_v56, %v29113_v31  ;;  %v21441_v45 = vadd.f32 %v21383_v6, %v29115_v23  ;;  %v21442_v53 = vadd.f32 %v21385_v2, %v29117_v57 }
0x2284   :  { %v21519_v52 = vadd.f32 %v29282_v10, %v21437_v63  ;;  %v21520_v18 = vadd.f32 %v29289_v54, %v21438_v37  ;;  %v21522_v13 = vadd.f32 %v21500_v27, %v21440_v7  ;;  %v21518_v31 = vadd.f32 %v29282_v10, %v21436_v29 }
0x2285   :  { %v21443_v21 = vadd.f32 %v21387_v32, %v29125_v48  ;;  %v21521_v49 = vadd.f32 %v29298_v20, %v21439_v15  ;;  %v21523_v3 = vadd.f32 %v29286_v1, %v21441_v45  ;;  %v21524_v14 = vadd.f32 %v29292_v4, %v21442_v53 }
0x2286   :  { %v21609_v23 = vcombine.low %v21519_v52, %v21520_v18  ;;  %v21445_v57 = vadd.f32 %v21409_v50, %v29129_v43  ;;  %v21526_v46 = vadd.f32 %v29311_v28, %v21444_v9  ;;  %v21556_v62 = vrot.slane %v21546_v30, %v25269_v22 }
0x2287   :  { %v21610_v60 = vcombine.low %v21521_v49, %v21522_v13  ;;  %v21525_v54 = vadd.f32 %v29305_v42, %v21443_v21  ;;  %v21563_v48 = vrot.slane %v21547_v38, %v25269_v22  ;;  %v21570_v20 = vrot.slane %v21548_v12, %v25269_v22  ;;  %v23708_v49 = vld [vmem:[%s29662_s13 + $0x38] sm:$0xff] }
0x2288   :  { %v21577_v1 = vrot.slane %v21549_v35, %v25269_v22  ;;  %v21611_v27 = vcombine.low %v21523_v3, %v21524_v14  ;;  %v21619_v4 = vrot.slane %v21609_v23, %v25269_v22  ;;  %v21527_v28 = vadd.f32 %v29282_v10, %v21445_v57  ;;  %v23707_v3 = vld [vmem:[%s29662_s13 + $0x30] sm:$0xff]  ;;  %24868 = vmatpush3.msra.mxu1 %v23708_v49  ;;  %v23706_v14 = vld [vmem:[%s29662_s13 + $0x28] sm:$0xff] }
0x2289   :  { %v21612_v61 = vcombine.low %v21525_v54, %v21526_v46  ;;  %v21578_v19 = vcombine.low %v21556_v62, %v21563_v48  ;;  %v21626_v43 = vrot.slane %v21610_v60, %v25269_v22  ;;  %v21601_v42 = vrot.slane %v21518_v31, %v25269_v22  ;;  %24869 = vmatprep.subr.mxu1 %v25088_v0  ;;  %v23705_v31 = vld [vmem:[%s29662_s13 + $0x20] sm:$0xff] }
0x228a   :  { %v21579_v59 = vcombine.low %v21570_v20, %v21577_v1  ;;  %v21633_v5 = vrot.slane %v21611_v27, %v25269_v22  ;;  %v21664_v24 = vrot.slane %v21527_v28, %v25269_v22  ;;  %24870 = vmatpush3.msra.mxu1 %v23707_v3 }
0x228b   :  { %v21640_v16 = vrot.slane %v21612_v61, %v25269_v22  ;;  %v21641_v34 = vcombine.low %v21619_v4, %v21626_v43  ;;  %v21586_v30 = vrot.slane %v21578_v19, %v25269_v22  ;;  %v21608_v12 = vrot.slane %v21601_v42, %v25269_v22  ;;  %24871 = vmatprep.subr.mxu1 %v25088_v0  ;;  %v23703_v43 = vld [vmem:[%s29663_s11 + $0x1] ss:$0 sm:$0xff] }
0x228c   :  { %v21593_v58 = vrot.slane %v21579_v59, %v25269_v22  ;;  %v21671_v47 = vrot.slane %v21664_v24, %v25269_v22  ;;  %24872 = vmatpush3.msra.mxu1 %v23706_v14  ;;  %v23704_v59 = vld [vmem:[%s29664_s12 + $0x1] ss:$0 sm:$0xff] }
0x228d   :  { %v21642_v26 = vcombine.low %v21633_v5, %v21640_v16  ;;  %v21649_v10 = vrot.slane %v21641_v34, %v25269_v22  ;;  %v21677_v44 = vadd.f32 %v21608_v12, %v27383_v25  ;;  %24873 = vmatprep.subr.mxu1 %v25088_v0 }
0x228e   :  { %v21594_v38 = vcombine.low %v21586_v30, %v21593_v58  ;;  %v21679_v33 = vadd.f32 %v21671_v47, %v27405_v41  ;;  %24874 = vmatpush3.msra.mxu1 %v23705_v31 }
0x228f   :  { %v21656_v36 = vrot.slane %v21642_v26, %v25269_v22  ;;  %v21687_v35 = vsel %vm73_vm0, %v21677_v44, 0.0 }
0x2290   :  { %v21676_v51 = vadd.f32 %v21594_v38, %v27375_v17  ;;  %v21693_v17 = vsel %vm73_vm0, %v21679_v33, 0.0 }
0x2291   :  { %v21657_v8 = vcombine.low %v21649_v10, %v21656_v36 }
0x2292   :  { %v21684_v40 = vsel %vm79_vm1, %v21676_v51, 0.0 }
0x2293   :  { %21685 = vadd.xlane.f32.xlu0 %v21684_v40  ;;  %v21678_v39 = vadd.f32 %v21657_v8, %v27392_v55 }
0x2295   :  { %v21690_v11 = vsel %vm79_vm1, %v21678_v39, 0.0 }
0x2296   :  { %21691 = vadd.xlane.f32.xlu1 %v21690_v11 }
0x2297   :  { %21688 = vadd.xlane.f32.xlu0 %v21687_v35 }
0x229a   :  { %21694 = vadd.xlane.f32.xlu1 %v21693_v17 }
0x231c   :  { %v21686_v6 = vpop.xlane.xlu0 %21685 }
0x231d   :  { %v21696_v2 = vmul.f32 0.03125, %v21686_v6 }
0x231f   :  { %v21700_v56 = vsub.f32 %v21676_v51, %v21696_v2  ;;  %v21692_v63 = vpop.xlane.xlu1 %21691 }
0x2320   :  { %v21689_v29 = vpop.xlane.xlu0 %21688  ;;  %v21698_v25 = vmul.f32 0.03125, %v21692_v63 }
0x2321   :  { %v21697_v37 = vmul.f32 0.03125, %v21689_v29  ;;  %v21704_v7 = vmul.f32 %v21700_v56, %v21700_v56 }
0x2322   :  { %v21702_v55 = vsub.f32 %v21678_v39, %v21698_v25 }
0x2323   :  { %v21701_v50 = vsub.f32 %v21677_v44, %v21697_v37  ;;  %v21708_v32 = vsel %vm79_vm1, %v21704_v7, 0.0  ;;  %v21695_v41 = vpop.xlane.xlu1 %21694 }
0x2324   :  { %21709 = vadd.xlane.f32.xlu0 %v21708_v32  ;;  %v21699_v15 = vmul.f32 0.03125, %v21695_v41  ;;  %v21706_v45 = vmul.f32 %v21702_v55, %v21702_v55 }
0x2325   :  { %v21705_v53 = vmul.f32 %v21701_v50, %v21701_v50 }
0x2326   :  { %v21703_v52 = vsub.f32 %v21679_v33, %v21699_v15  ;;  %v21714_v18 = vsel %vm79_vm1, %v21706_v45, 0.0 }
0x2327   :  { %v21711_v13 = vsel %vm73_vm0, %v21705_v53, 0.0  ;;  %21715 = vadd.xlane.f32.xlu1 %v21714_v18 }
0x2328   :  { %21712 = vadd.xlane.f32.xlu0 %v21711_v13  ;;  %v21707_v9 = vmul.f32 %v21703_v52, %v21703_v52 }
0x232a   :  { %v21717_v21 = vsel %vm73_vm0, %v21707_v9, 0.0 }
0x232b   :  { %21718 = vadd.xlane.f32.xlu1 %v21717_v21 }
0x23ad   :  { %v21710_v23 = vpop.xlane.xlu0 %21709 }
0x23ae   :  { %v21720_v57 = vmul.f32 0.03125, %v21710_v23 }
0x23b0   :  { %v21724_v46 = vadd.f32 1e-05, %v21720_v57  ;;  %v21716_v60 = vpop.xlane.xlu1 %21715 }
0x23b1   :  { %v21713_v54 = vpop.xlane.xlu0 %21712  ;;  %v21722_v62 = vmul.f32 0.03125, %v21716_v60 }
0x23b2   :  { %25058 = vrsqrt.f32 %v21724_v46  ;;  %v21721_v48 = vmul.f32 0.03125, %v21713_v54 }
0x23b3   :  { %v21726_v20 = vadd.f32 1e-05, %v21722_v62 }
0x23b4   :  { %v21725_v1 = vadd.f32 1e-05, %v21721_v48  ;;  %v21719_v27 = vpop.xlane.xlu1 %21718 }
0x23b5   :  { %25060 = vrsqrt.f32 %v21726_v20  ;;  %v21723_v4 = vmul.f32 0.03125, %v21719_v27 }
0x23b6   :  { %25062 = vrsqrt.f32 %v21725_v1 }
0x23b7   :  { %v21727_v61 = vadd.f32 1e-05, %v21723_v4 }
0x23b9   :  { %25064 = vrsqrt.f32 %v21727_v61 }
0x23bf   :  { %v25059_v19 = vpop.eup %25058 }
0x23c0   :  { %v21732_v28 = vmul.f32 %v25059_v19, %v21700_v56 }
0x23c2   :  { %v25061_v42 = vpop.eup %25060  ;;  %v21742_v5 = vmul.f32 %v23703_v43, %v21732_v28 }
0x23c3   :  { %v25063_v16 = vpop.eup %25062  ;;  %v21734_v34 = vmul.f32 %v25061_v42, %v21702_v55 }
0x23c4   :  { %v29405_v30 = vadd.f32 %v23704_v59, %v21742_v5  ;;  %v21733_v58 = vmul.f32 %v25063_v16, %v21701_v50 }
0x23c5   :  { %v21744_v26 = vmul.f32 %v23703_v43, %v21734_v34 }
0x23c6   :  { %v25065_v24 = vpop.eup %25064  ;;  %v21772_v38 = vcombine.high %v29405_v30, %v29405_v30  ;;  %v21779_v12 = vrot.slane %v29405_v30, %v25269_v22  ;;  %v21743_v10 = vmul.f32 %v23703_v43, %v21733_v58 }
0x23c7   :  { %v29411_v36 = vadd.f32 %v23704_v59, %v21744_v26  ;;  %v21735_v51 = vmul.f32 %v25065_v24, %v21703_v52 }
0x23c8   :  { %v21786_v8 = vrot.slane %v21772_v38, %v25269_v22  ;;  %v21787_v47 = vcombine.high %v21779_v12, %v21779_v12  ;;  %v29414_v40 = vadd.f32 %v23704_v59, %v21743_v10  ;;  %v21795_v44 = vrot.slane %v21779_v12, %v25269_v22  ;;  %v23725_v38 = vld [vmem:[%s29665_s15 + $0x78] sm:$0xff]  ;;  %v23724_v12 = vld [vmem:[%s29665_s15 + $0x70] sm:$0xff]  ;;  %v23723_v10 = vld [vmem:[%s29665_s15 + $0x68] sm:$0xff] }
0x23c9   :  { %v21835_v39 = vcombine.high %v29411_v36, %v29411_v36  ;;  %v21745_v11 = vmul.f32 %v23703_v43, %v21735_v51  ;;  %v21842_v33 = vrot.slane %v29411_v36, %v25269_v22  ;;  %24885 = vmatpush3.msra.mxu0 %v23725_v38  ;;  %v23722_v51 = vld [vmem:[%s29665_s15 + $0x60] sm:$0xff] }
0x23ca   :  { %v21788_v35 = vcombine.high %v21786_v8, %v21786_v8  ;;  %v21827_v17 = vrot.slane %v29414_v40, %v25269_v22  ;;  %v21802_v6 = vrot.slane %v21786_v8, %v25269_v22  ;;  %v21809_v2 = vrot.slane %v21787_v47, %v25269_v22  ;;  %24886 = vmatprep.subr.mxu0 %v25088_v0  ;;  %v23721_v8 = vld [vmem:[%s29665_s15 + $0x58] sm:$0xff]  ;;  %v23720_v47 = vld [vmem:[%s29665_s15 + $0x50] sm:$0xff] }
0x23cb   :  { %v29425_v56 = vadd.f32 %v23704_v59, %v21745_v11  ;;  %v21849_v63 = vrot.slane %v21835_v39, %v25269_v22  ;;  %v21850_v29 = vcombine.high %v21842_v33, %v21842_v33  ;;  %v21858_v25 = vrot.slane %v21842_v33, %v25269_v22  ;;  %24887 = vmatpush3.msra.mxu0 %v23724_v12  ;;  %v23718_v39 = vld [vmem:[%s29665_s15 + $0x40] sm:$0xff] }
0x23cc   :  { %v21816_v37 = vrot.slane %v21788_v35, %v25269_v22  ;;  %v21947_v7 = vcombine.low %v21795_v44, %v21809_v2  ;;  %v23711_v55 = vcombine.high %v21795_v44, %v21809_v2  ;;  %v21834_v50 = vrot.slane %v21827_v17, %v25269_v22  ;;  %24888 = vmatprep.subr.mxu0 %v25088_v0  ;;  %v23719_v44 = vld [vmem:[%s29665_s15 + $0x48] sm:$0xff]  ;;  %v23710_v11 = vld [vmem:[%s29666_s14 + $0x1] ss:$0 sm:$0xff] }
0x23cd   :  { %v21851_v32 = vcombine.high %v21849_v63, %v21849_v63  ;;  %v21865_v41 = vrot.slane %v21849_v63, %v25269_v22  ;;  %v21872_v15 = vrot.slane %v21850_v29, %v25269_v22  ;;  %v21880_v45 = vcombine.high %v21858_v25, %v21858_v25  ;;  %24889 = vmatpush3.msra.mxu0 %v23723_v10 }
0x23ce   :  { %v21949_v53 = vcombine.low %v21802_v6, %v21816_v37  ;;  %v23712_v52 = vcombine.high %v21802_v6, %v21816_v37  ;;  %v21957_v18 = vrot.slane %v21947_v7, %v25269_v22  ;;  %v21964_v13 = vrot.slane %v23711_v55, %v25269_v22  ;;  %24890 = vmatprep.subr.mxu0 %v25088_v0 }
0x23cf   :  { %v21879_v9 = vrot.slane %v21851_v32, %v25269_v22  ;;  %v21881_v21 = vcombine.high %v21865_v41, %v21865_v41  ;;  %v21882_v49 = vcombine.high %v21872_v15, %v21872_v15  ;;  %v21996_v3 = vcombine.low %v21834_v50, %v21858_v25  ;;  %24891 = vmatpush3.msra.mxu0 %v23722_v51 }
0x23d0   :  { %v21971_v14 = vrot.slane %v21949_v53, %v25269_v22  ;;  %v21978_v31 = vrot.slane %v23712_v52, %v25269_v22  ;;  %v21979_v23 = vcombine.low %v21957_v18, %v21964_v13  ;;  %v21997_v57 = vcombine.low %v21872_v15, %v21880_v45  ;;  %24892 = vmatprep.subr.mxu0 %v25088_v0 }
0x23d1   :  { %v21998_v46 = vcombine.low %v21882_v49, %v21865_v41  ;;  %v21999_v60 = vcombine.low %v21879_v9, %v21881_v21  ;;  %v22006_v54 = vrot.slane %v21996_v3, %v25269_v22  ;;  %v21883_v20 = vcombine.high %v21879_v9, %v21879_v9  ;;  %24893 = vmatpush3.msra.mxu0 %v23721_v8 }
0x23d2   :  { %v21980_v62 = vcombine.low %v21971_v14, %v21978_v31  ;;  %v22013_v48 = vrot.slane %v21997_v57, %v25269_v22  ;;  %v21890_v1 = vrot.slane %v29425_v56, %v25269_v22  ;;  %v21987_v61 = vrot.slane %v21979_v23, %v25269_v22  ;;  %24894 = vmatprep.subr.mxu0 %v25088_v0 }
0x23d3   :  { %v22020_v27 = vrot.slane %v21998_v46, %v25269_v22  ;;  %v22027_v4 = vrot.slane %v21999_v60, %v25269_v22  ;;  %24895 = vmatpush3.msra.mxu0 %v23720_v47  ;;  %v21898_v33 = vcombine.high %v23710_v11, %v23710_v11  ;;  %v21905_v35 = vrot.slane %v23710_v11, %v25269_v22 }
0x23d4   :  { %v21994_v19 = vrot.slane %v21980_v62, %v25269_v22  ;;  %v22028_v43 = vcombine.low %v22006_v54, %v22013_v48  ;;  %v21897_v28 = vrot.slane %v21890_v1, %v25269_v22  ;;  %24896 = vmatprep.subr.mxu0 %v25088_v0 }
0x23d5   :  { %v22029_v59 = vcombine.low %v22020_v27, %v22027_v4  ;;  %24897 = vmatpush3.msra.mxu0 %v23719_v44  ;;  %v21912_v17 = vrot.slane %v21898_v33, %v25269_v22  ;;  %v21913_v6 = vcombine.high %v21905_v35, %v21905_v35  ;;  %v21921_v63 = vrot.slane %v21905_v35, %v25269_v22 }
0x23d6   :  { %v21995_v42 = vcombine.low %v21987_v61, %v21994_v19  ;;  %v22045_v5 = vcombine.low %v21883_v20, %v21897_v28  ;;  %v22036_v16 = vrot.slane %v22028_v43, %v25269_v22  ;;  %24898 = vmatprep.subr.mxu0 %v25088_v0 }
0x23d7   :  { %v22043_v34 = vrot.slane %v22029_v59, %v25269_v22  ;;  %24899 = vmatpush3.msra.mxu0 %v23718_v39  ;;  %v21914_v2 = vcombine.high %v21912_v17, %v21912_v17  ;;  %v21928_v29 = vrot.slane %v21912_v17, %v25269_v22  ;;  %v21935_v25 = vrot.slane %v21913_v6, %v25269_v22 }
0x23d8   :  { %24876 = vmatmul.mubr.msk.f32.vlgmr.msra.gmra.mxu1 %vm79_vm1, %v21995_v42  ;;  %v22052_v26 = vrot.slane %v22045_v5, %v25269_v22  ;;  %v21943_v41 = vcombine.high %v21921_v63, %v21921_v63  ;;  %v22109_v9 = vcombine.low %v21921_v63, %v21921_v63 }
0x23d9   :  { %24878 = vmatprep.mubr.msk.f32.mxu1 %vm25090_vm2, %v25088_v0  ;;  %v22044_v58 = vcombine.low %v22036_v16, %v22043_v34  ;;  %v21942_v37 = vrot.slane %v21914_v2, %v25269_v22  ;;  %v22060_v7 = vcombine.low %v21921_v63, %v21935_v25  ;;  %v23713_v55 = vcombine.high %v21921_v63, %v21935_v25 }
0x23da   :  { %v22059_v24 = vrot.slane %v22052_v26, %v25269_v22  ;;  %v21944_v15 = vcombine.high %v21928_v29, %v21928_v29  ;;  %v21945_v45 = vcombine.high %v21935_v25, %v21935_v25  ;;  %v22110_v21 = vcombine.low %v21935_v25, %v21943_v41 }
0x23db   :  { %v22062_v50 = vcombine.low %v21928_v29, %v21942_v37  ;;  %v23714_v32 = vcombine.high %v21928_v29, %v21942_v37  ;;  %v22070_v53 = vrot.slane %v22060_v7, %v25269_v22  ;;  %v22077_v52 = vrot.slane %v23713_v55, %v25269_v22 }
0x23dc   :  { %24879 = vmatmul.mubr.msk.f32.gmra.mxu1 %vm79_vm1, %v22044_v58  ;;  %v22111_v49 = vcombine.low %v21945_v45, %v21928_v29  ;;  %v22112_v3 = vcombine.low %v21942_v37, %v21944_v15  ;;  %v22119_v23 = vrot.slane %v22109_v9, %v25269_v22  ;;  %v22126_v57 = vrot.slane %v22110_v21, %v25269_v22 }
0x23dd   :  { %24881 = vmatprep.mubr.msk.f32.mxu1 %vm25090_vm2, %v25088_v0  ;;  %v22084_v18 = vrot.slane %v22062_v50, %v25269_v22  ;;  %v22091_v13 = vrot.slane %v23714_v32, %v25269_v22  ;;  %v22092_v14 = vcombine.low %v22070_v53, %v22077_v52  ;;  %v21946_v1 = vcombine.high %v21942_v37, %v21942_v37 }
0x23de   :  { %v22133_v46 = vrot.slane %v22111_v49, %v25269_v22  ;;  %v22140_v60 = vrot.slane %v22112_v3, %v25269_v22  ;;  %v22141_v48 = vcombine.low %v22119_v23, %v22126_v57 }
0x23df   :  { %v22093_v31 = vcombine.low %v22084_v18, %v22091_v13  ;;  %v22100_v54 = vrot.slane %v22092_v14, %v25269_v22  ;;  %v22158_v43 = vcombine.low %v21946_v1, %v21921_v63 }
0x23e0   :  { %24882 = vmatmul.mubr.msk.f32.gmra.mxu1 %vm79_vm1, %v22059_v24  ;;  %v22142_v20 = vcombine.low %v22133_v46, %v22140_v60  ;;  %v22149_v4 = vrot.slane %v22141_v48, %v25269_v22 }
0x23e1   :  { %v22107_v62 = vrot.slane %v22093_v31, %v25269_v22  ;;  %v22165_v58 = vrot.slane %v22158_v43, %v25269_v22 }
0x23e2   :  { %v22156_v61 = vrot.slane %v22142_v20, %v25269_v22 }
0x23e3   :  { %v22108_v27 = vcombine.low %v22100_v54, %v22107_v62  ;;  %v22172_v35 = vrot.slane %v22165_v58, %v25269_v22 }
0x23e4   :  { %v22157_v59 = vcombine.low %v22149_v4, %v22156_v61 }
0x2498   :  { %v22248_v19 = vpop.f32.mrf.mxu1 }
0x2499   :  { %v22249_v28 = vadd.f32 %v22248_v19, %v22108_v27 }
0x249a   :  { %v24877_v42 = vpop.f32.mrf.mxu1 }
0x249b   :  { %v22265_v5 = vcombine.high %v22249_v28, %v22249_v28  ;;  %v22272_v16 = vrot.slane %v22249_v28, %v25269_v22 }
0x249c   :  { %v22253_v34 = vpop.f32.mrf.mxu1 }
0x249d   :  { %v22279_v26 = vrot.slane %v22265_v5, %v25269_v22  ;;  %v22280_v24 = vcombine.high %v22272_v16, %v22272_v16  ;;  %v22288_v38 = vrot.slane %v22272_v16, %v25269_v22  ;;  %v22254_v12 = vadd.f32 %v22253_v34, %v22157_v59 }
0x249e   :  { %v24880_v10 = vpop.f32.mrf.mxu1 }
0x249f   :  { %v22281_v51 = vcombine.high %v22279_v26, %v22279_v26  ;;  %v22295_v8 = vrot.slane %v22279_v26, %v25269_v22  ;;  %v22302_v47 = vrot.slane %v22280_v24, %v25269_v22  ;;  %v22310_v44 = vcombine.high %v22288_v38, %v22288_v38 }
0x24a0   :  { %v22403_v39 = vmax.f32 %v22288_v38, 0.0  ;;  %v22314_v11 = vcombine.high %v22254_v12, %v22254_v12  ;;  %v22321_v33 = vrot.slane %v22254_v12, %v25269_v22  ;;  %v22258_v17 = vpop.f32.mrf.mxu1 }
0x24a1   :  { %v22309_v6 = vrot.slane %v22281_v51, %v25269_v22  ;;  %v22311_v2 = vcombine.high %v22295_v8, %v22295_v8  ;;  %v22312_v63 = vcombine.high %v22302_v47, %v22302_v47  ;;  %v22404_v29 = vmax.f32 %v22302_v47, 0.0 }
0x24a2   :  { %v22405_v25 = vmax.f32 %v22310_v44, 0.0  ;;  %v22407_v37 = vmax.f32 %v22295_v8, 0.0  ;;  %v22328_v7 = vrot.slane %v22314_v11, %v25269_v22  ;;  %v22329_v55 = vcombine.high %v22321_v33, %v22321_v33  ;;  %v24883_v50 = vpop.f32.mrf.mxu1 }
0x24a3   :  { %v22313_v32 = vcombine.high %v22309_v6, %v22309_v6  ;;  %v22406_v41 = vmax.f32 %v22312_v63, 0.0  ;;  %v22408_v15 = vmax.f32 %v22309_v6, 0.0  ;;  %v22409_v45 = vmax.f32 %v22311_v2, 0.0 }
0x24a4   :  { %v22504_v53 = vcombine.low %v22403_v39, %v22404_v29  ;;  %v22330_v52 = vcombine.high %v22328_v7, %v22328_v7  ;;  %v22337_v18 = vrot.slane %v22321_v33, %v25269_v22  ;;  %v22344_v13 = vrot.slane %v22328_v7, %v25269_v22 }
0x24a5   :  { %v22410_v9 = vmax.f32 %v22313_v32, 0.0  ;;  %v22505_v21 = vcombine.low %v22405_v25, %v22406_v41  ;;  %v22506_v49 = vcombine.low %v22407_v37, %v22408_v15  ;;  %v22351_v3 = vrot.slane %v22329_v55, %v25269_v22  ;;  %v23727_v32 = vld [vmem:[%s29667_s16 + $0x1] ss:$0 sm:$0xff] }
0x24a6   :  { %v22514_v14 = vrot.slane %v22504_v53, %v25269_v22  ;;  %v22358_v31 = vrot.slane %v22330_v52, %v25269_v22  ;;  %v22359_v23 = vcombine.high %v22337_v18, %v22337_v18  ;;  %v22360_v57 = vcombine.high %v22344_v13, %v22344_v13 }
0x24a7   :  { %v22507_v46 = vcombine.low %v22409_v45, %v22410_v9  ;;  %v22521_v60 = vrot.slane %v22505_v21, %v25269_v22  ;;  %v22528_v54 = vrot.slane %v22506_v49, %v25269_v22  ;;  %v22361_v62 = vcombine.high %v22351_v3, %v22351_v3 }
0x24a8   :  { %v22362_v48 = vcombine.high %v22358_v31, %v22358_v31  ;;  %v22411_v20 = vmax.f32 %v22337_v18, 0.0  ;;  %v22412_v1 = vmax.f32 %v22351_v3, 0.0  ;;  %v22413_v27 = vmax.f32 %v22359_v23, 0.0 }
0x24a9   :  { %v22535_v4 = vrot.slane %v22507_v46, %v25269_v22  ;;  %v22536_v61 = vcombine.low %v22514_v14, %v22521_v60  ;;  %v22414_v19 = vmax.f32 %v22361_v62, 0.0  ;;  %v22415_v43 = vmax.f32 %v22344_v13, 0.0 }
0x24aa   :  { %v22416_v28 = vmax.f32 %v22358_v31, 0.0  ;;  %v22417_v59 = vmax.f32 %v22360_v57, 0.0  ;;  %v22418_v42 = vmax.f32 %v22362_v48, 0.0  ;;  %v22553_v5 = vcombine.low %v22411_v20, %v22412_v1 }
0x24ab   :  { %v22537_v16 = vcombine.low %v22528_v54, %v22535_v4  ;;  %v22554_v34 = vcombine.low %v22413_v27, %v22414_v19  ;;  %v22259_v58 = vadd.f32 %v22258_v17, %v22172_v35  ;;  %v22544_v26 = vrot.slane %v22536_v61, %v25269_v22 }
0x24ac   :  { %v22555_v24 = vcombine.low %v22415_v43, %v22416_v28  ;;  %v22556_v38 = vcombine.low %v22417_v59, %v22418_v42  ;;  %v22563_v10 = vrot.slane %v22553_v5, %v25269_v22  ;;  %v22437_v41 = vcombine.high %v23727_v32, %v23727_v32 }
0x24ad   :  { %v22551_v12 = vrot.slane %v22537_v16, %v25269_v22  ;;  %v22570_v51 = vrot.slane %v22554_v34, %v25269_v22  ;;  %v22369_v8 = vrot.slane %v22259_v58, %v25269_v22  ;;  %v22444_v15 = vrot.slane %v23727_v32, %v25269_v22 }
0x24ae   :  { %v22577_v47 = vrot.slane %v22555_v24, %v25269_v22  ;;  %v22584_v44 = vrot.slane %v22556_v38, %v25269_v22  ;;  %v22451_v45 = vrot.slane %v22437_v41, %v25269_v22 }
0x24af   :  { %v22552_v39 = vcombine.low %v22544_v26, %v22551_v12  ;;  %v22585_v11 = vcombine.low %v22563_v10, %v22570_v51  ;;  %v22370_v33 = vcombine.high %v22369_v8, %v22369_v8  ;;  %v22377_v35 = vrot.slane %v22369_v8, %v25269_v22 }
0x24b0   :  { %v22586_v17 = vcombine.low %v22577_v47, %v22584_v44  ;;  %v22452_v53 = vcombine.high %v22444_v15, %v22444_v15  ;;  %v22453_v52 = vcombine.high %v22451_v45, %v22451_v45  ;;  %v22460_v18 = vrot.slane %v22444_v15, %v25269_v22 }
0x24b1   :  { %v22384_v6 = vrot.slane %v22370_v33, %v25269_v22  ;;  %24901 = vmatmul.mubr.msk.f32.vlgmr.msra.gmra.mxu0 %vm11196_vm7, %v22552_v39  ;;  %v22593_v2 = vrot.slane %v22585_v11, %v25269_v22  ;;  %v22419_v29 = vmax.f32 %v22377_v35, 0.0  ;;  %v22467_v13 = vrot.slane %v22451_v45, %v25269_v22 }
0x24b2   :  { %24903 = vmatprep.mubr.msk.f32.mxu0 %vm25090_vm2, %v25088_v0  ;;  %v22600_v63 = vrot.slane %v22586_v17, %v25269_v22  ;;  %v22481_v9 = vrot.slane %v22453_v52, %v25269_v22  ;;  %v22482_v31 = vcombine.high %v22460_v18, %v22460_v18  ;;  %v22666_v48 = vcombine.low %v22460_v18, %v22460_v18 }
0x24b3   :  { %v22420_v25 = vmax.f32 %v22384_v6, 0.0  ;;  %v22483_v23 = vcombine.high %v22467_v13, %v22467_v13 }
0x24b4   :  { %v22601_v37 = vcombine.low %v22593_v2, %v22600_v63  ;;  %v22619_v3 = vcombine.low %v22467_v13, %v22481_v9  ;;  %v23729_v14 = vcombine.high %v22467_v13, %v22481_v9  ;;  %v22676_v19 = vrot.slane %v22666_v48, %v25269_v22 }
0x24b5   :  { %v22602_v7 = vcombine.low %v22419_v29, %v22420_v25  ;;  %v22669_v27 = vcombine.low %v22481_v9, %v22483_v23  ;;  %v22485_v58 = vcombine.high %v22481_v9, %v22481_v9 }
0x24b6   :  { %24904 = vmatmul.mubr.msk.f32.gmra.mxu0 %vm11196_vm7, %v22601_v37  ;;  %v22641_v54 = vrot.slane %v22619_v3, %v25269_v22  ;;  %v22648_v62 = vrot.slane %v23729_v14, %v25269_v22 }
0x24b7   :  { %v22609_v55 = vrot.slane %v22602_v7, %v25269_v22  ;;  %24906 = vmatprep.mubr.msk.f32.mxu0 %vm25090_vm2, %v25088_v0  ;;  %v22474_v0 = vrot.slane %v22452_v53, %v25269_v22  ;;  %v22697_v59 = vrot.slane %v22669_v27, %v25269_v22  ;;  %v22715_v10 = vcombine.low %v22485_v58, %v22460_v18 }
0x24b8   :  { %v22650_v61 = vcombine.low %v22641_v54, %v22648_v62 }
0x24b9   :  { %v22616_v50 = vrot.slane %v22609_v55, %v25269_v22  ;;  %v22617_v21 = vcombine.low %v22460_v18, %v22474_v0  ;;  %v23728_v49 = vcombine.high %v22460_v18, %v22474_v0  ;;  %v22484_v57 = vcombine.high %v22474_v0, %v22474_v0 }
0x24ba   :  { %v22667_v20 = vcombine.low %v22474_v0, %v22482_v31  ;;  %v22664_v5 = vrot.slane %v22650_v61, %v25269_v22  ;;  %v22722_v11 = vrot.slane %v22715_v10, %v25269_v22 }
0x24bb   :  { %24907 = vmatmul.mubr.msk.f32.gmra.mxu0 %vm11196_vm7, %v22616_v50  ;;  %v22627_v46 = vrot.slane %v22617_v21, %v25269_v22  ;;  %v22634_v60 = vrot.slane %v23728_v49, %v25269_v22  ;;  %v22668_v1 = vcombine.low %v22484_v57, %v22467_v13 }
0x24bc   :  { %v22683_v43 = vrot.slane %v22667_v20, %v25269_v22  ;;  %v22729_v55 = vrot.slane %v22722_v11, %v25269_v22 }
0x24bd   :  { %v22649_v4 = vcombine.low %v22627_v46, %v22634_v60  ;;  %v22690_v28 = vrot.slane %v22668_v1, %v25269_v22 }
0x24be   :  { %v22698_v16 = vcombine.low %v22676_v19, %v22683_v43 }
0x24bf   :  { %v22657_v42 = vrot.slane %v22649_v4, %v25269_v22  ;;  %v22699_v34 = vcombine.low %v22690_v28, %v22697_v59 }
0x24c0   :  { %v22706_v24 = vrot.slane %v22698_v16, %v25269_v22 }
0x24c1   :  { %v22665_v26 = vcombine.low %v22657_v42, %v22664_v5  ;;  %v22713_v38 = vrot.slane %v22699_v34, %v25269_v22 }
0x24c3   :  { %v22714_v47 = vcombine.low %v22706_v24, %v22713_v38 }
0x2571   :  { %v22805_v12 = vpop.f32.mrf.mxu0 }
0x2572   :  { %v22806_v51 = vadd.f32 %v22805_v12, %v22665_v26 }
0x2573   :  { %v24902_v8 = vpop.f32.mrf.mxu0 }
0x2574   :  { %v22822_v44 = vcombine.high %v22806_v51, %v22806_v51  ;;  %v22829_v39 = vrot.slane %v22806_v51, %v25269_v22 }
0x2576   :  { %v22836_v33 = vrot.slane %v22822_v44, %v25269_v22  ;;  %v22837_v35 = vcombine.high %v22829_v39, %v22829_v39  ;;  %v22810_v17 = vpop.f32.mrf.mxu0  ;;  %v22845_v63 = vrot.slane %v22829_v39, %v25269_v22 }
0x2577   :  { %v22811_v6 = vadd.f32 %v22810_v17, %v22714_v47 }
0x2578   :  { %v22838_v2 = vcombine.high %v22836_v33, %v22836_v33  ;;  %v22859_v29 = vrot.slane %v22837_v35, %v25269_v22  ;;  %v24905_v25 = vpop.f32.mrf.mxu0  ;;  %v22852_v50 = vrot.slane %v22836_v33, %v25269_v22 }
0x2579   :  { %v22871_v37 = vcombine.high %v22811_v6, %v22811_v6  ;;  %v22878_v7 = vrot.slane %v22811_v6, %v25269_v22 }
0x257a   :  { %v22866_v32 = vrot.slane %v22838_v2, %v25269_v22  ;;  %v22942_v41 = vcombine.low %v22845_v63, %v22859_v29  ;;  %v23733_v15 = vcombine.high %v22845_v63, %v22859_v29 }
0x257b   :  { %v22885_v45 = vrot.slane %v22871_v37, %v25269_v22  ;;  %v22886_v53 = vcombine.high %v22878_v7, %v22878_v7  ;;  %v22894_v52 = vrot.slane %v22878_v7, %v25269_v22  ;;  %v22815_v18 = vpop.f32.mrf.mxu0 }
0x257c   :  { %v22944_v13 = vcombine.low %v22852_v50, %v22866_v32  ;;  %v23734_v0 = vcombine.high %v22852_v50, %v22866_v32  ;;  %v22952_v9 = vrot.slane %v22942_v41, %v25269_v22  ;;  %v22959_v21 = vrot.slane %v23733_v15, %v25269_v22 }
0x257d   :  { %v22887_v49 = vcombine.high %v22885_v45, %v22885_v45  ;;  %v22901_v3 = vrot.slane %v22885_v45, %v25269_v22  ;;  %v22908_v14 = vrot.slane %v22886_v53, %v25269_v22  ;;  %v22916_v31 = vcombine.high %v22894_v52, %v22894_v52  ;;  %v24908_v23 = vpop.f32.mrf.mxu0 }
0x257e   :  { %v22816_v57 = vadd.f32 %v22815_v18, %v22729_v55  ;;  %v22997_v46 = vrot.slane %v22894_v52, %v25269_v22  ;;  %v22966_v60 = vrot.slane %v22944_v13, %v25269_v22  ;;  %v22973_v54 = vrot.slane %v23734_v0, %v25269_v22 }
0x257f   :  { %v22915_v62 = vrot.slane %v22887_v49, %v25269_v22  ;;  %v22917_v48 = vcombine.high %v22901_v3, %v22901_v3  ;;  %v22918_v20 = vcombine.high %v22908_v14, %v22908_v14  ;;  %v23005_v1 = vcombine.low %v22908_v14, %v22916_v31 }
0x2580   :  { %v22926_v27 = vrot.slane %v22816_v57, %v25269_v22  ;;  %v23004_v4 = vrot.slane %v22997_v46, %v25269_v22  ;;  %v22974_v61 = vcombine.low %v22952_v9, %v22959_v21  ;;  %v22975_v19 = vcombine.low %v22966_v60, %v22973_v54 }
0x2581   :  { %v23006_v43 = vcombine.low %v22918_v20, %v22901_v3  ;;  %v22919_v28 = vcombine.high %v22915_v62, %v22915_v62  ;;  %v23007_v59 = vcombine.low %v22915_v62, %v22917_v48  ;;  %v23015_v10 = vrot.slane %v23005_v1, %v25269_v22 }
0x2582   :  { %v22927_v42 = vcombine.high %v22926_v27, %v22926_v27  ;;  %v22934_v5 = vrot.slane %v22926_v27, %v25269_v22  ;;  %v23073_v16 = vadd.f32 %v23004_v4, %v29414_v40  ;;  %v22982_v34 = vrot.slane %v22974_v61, %v25269_v22  ;;  %v23737_v61 = vld [vmem:[%s29668_s17 + $0x1] ss:$0 sm:$0xff] }
0x2583   :  { %v22989_v58 = vrot.slane %v22975_v19, %v25269_v22  ;;  %v23022_v26 = vrot.slane %v23006_v43, %v25269_v22  ;;  %v23029_v40 = vrot.slane %v23007_v59, %v25269_v22  ;;  %v23738_v43 = vld [vmem:[%s29669_s18 + $0x1] ss:$0 sm:$0xff] }
0x2584   :  { %v22941_v24 = vrot.slane %v22927_v42, %v25269_v22  ;;  %v23008_v38 = vcombine.low %v22919_v28, %v22934_v5  ;;  %v23083_v12 = vsel %vm73_vm0, %v23073_v16, 0.0 }
0x2585   :  { %23084 = vadd.xlane.f32.xlu1 %v23083_v12  ;;  %v22990_v51 = vcombine.low %v22982_v34, %v22989_v58  ;;  %v23037_v44 = vcombine.low %v23015_v10, %v23022_v26 }
0x2586   :  { %v23036_v8 = vrot.slane %v23008_v38, %v25269_v22  ;;  %v23060_v47 = vrot.slane %v22941_v24, %v25269_v22 }
0x2587   :  { %v23072_v39 = vadd.f32 %v22990_v51, %v29405_v30  ;;  %v23045_v6 = vrot.slane %v23037_v44, %v25269_v22 }
0x2588   :  { %v23067_v11 = vrot.slane %v23060_v47, %v25269_v22  ;;  %v23038_v33 = vcombine.low %v23029_v40, %v23036_v8 }
0x2589   :  { %v23080_v35 = vsel %vm79_vm1, %v23072_v39, 0.0 }
0x258a   :  { %23081 = vadd.xlane.f32.xlu0 %v23080_v35  ;;  %v23075_v17 = vadd.f32 %v23067_v11, %v29425_v56  ;;  %v23052_v2 = vrot.slane %v23038_v33, %v25269_v22 }
0x258c   :  { %v23089_v63 = vsel %vm73_vm0, %v23075_v17, 0.0  ;;  %v23053_v29 = vcombine.low %v23045_v6, %v23052_v2 }
0x258d   :  { %23090 = vadd.xlane.f32.xlu1 %v23089_v63 }
0x258e   :  { %v23074_v25 = vadd.f32 %v23053_v29, %v29411_v36 }
0x2590   :  { %v23086_v30 = vsel %vm79_vm1, %v23074_v25, 0.0 }
0x2591   :  { %23087 = vadd.xlane.f32.xlu0 %v23086_v30 }
0x260e   :  { %v23085_v37 = vpop.xlane.xlu1 %23084 }
0x260f   :  { %v23093_v7 = vmul.f32 0.03125, %v23085_v37 }
0x2611   :  { %v23097_v55 = vsub.f32 %v23073_v16, %v23093_v7 }
0x2613   :  { %v23082_v50 = vpop.xlane.xlu0 %23081  ;;  %v23101_v32 = vmul.f32 %v23097_v55, %v23097_v55 }
0x2614   :  { %v23092_v41 = vmul.f32 0.03125, %v23082_v50 }
0x2615   :  { %v23107_v56 = vsel %vm73_vm0, %v23101_v32, 0.0 }
0x2616   :  { %v23096_v15 = vsub.f32 %v23072_v39, %v23092_v41  ;;  %v23091_v45 = vpop.xlane.xlu1 %23090  ;;  %23108 = vadd.xlane.f32.xlu1 %v23107_v56 }
0x2617   :  { %v23095_v22 = vmul.f32 0.03125, %v23091_v45 }
0x2618   :  { %v23100_v53 = vmul.f32 %v23096_v15, %v23096_v15 }
0x2619   :  { %v23099_v52 = vsub.f32 %v23075_v17, %v23095_v22 }
0x261a   :  { %v23104_v18 = vsel %vm79_vm1, %v23100_v53, 0.0  ;;  %v23088_v36 = vpop.xlane.xlu0 %23087 }
0x261b   :  { %23105 = vadd.xlane.f32.xlu0 %v23104_v18  ;;  %v23094_v13 = vmul.f32 0.03125, %v23088_v36  ;;  %v23103_v0 = vmul.f32 %v23099_v52, %v23099_v52 }
0x261d   :  { %v23098_v9 = vsub.f32 %v23074_v25, %v23094_v13  ;;  %v23113_v21 = vsel %vm73_vm0, %v23103_v0, 0.0 }
0x261e   :  { %23114 = vadd.xlane.f32.xlu1 %v23113_v21 }
0x261f   :  { %v23102_v49 = vmul.f32 %v23098_v9, %v23098_v9 }
0x2621   :  { %v23110_v3 = vsel %vm79_vm1, %v23102_v49, 0.0 }
0x2622   :  { %23111 = vadd.xlane.f32.xlu0 %v23110_v3 }
0x269f   :  { %v23109_v14 = vpop.xlane.xlu1 %23108 }
0x26a0   :  { %v23117_v31 = vmul.f32 0.03125, %v23109_v14 }
0x26a2   :  { %v23121_v23 = vadd.f32 1e-05, %v23117_v31 }
0x26a4   :  { %25066 = vrsqrt.f32 %v23121_v23  ;;  %v23106_v57 = vpop.xlane.xlu0 %23105 }
0x26a5   :  { %v23116_v46 = vmul.f32 0.03125, %v23106_v57  ;;  %v23739_v57 = vld [vmem:[%s29670_s19] ss:$0 sm:$0xff] }
0x26a7   :  { %v23120_v60 = vadd.f32 1e-05, %v23116_v46  ;;  %v23115_v54 = vpop.xlane.xlu1 %23114 }
0x26a8   :  { %v23119_v62 = vmul.f32 0.03125, %v23115_v54 }
0x26a9   :  { %25068 = vrsqrt.f32 %v23120_v60  ;;  %v23740_v60 = vld [vmem:[%s29671_s20] ss:$0 sm:$0xff] }
0x26aa   :  { %v23123_v48 = vadd.f32 1e-05, %v23119_v62 }
0x26ab   :  { %v23112_v20 = vpop.xlane.xlu0 %23111 }
0x26ac   :  { %25070 = vrsqrt.f32 %v23123_v48  ;;  %v23118_v1 = vmul.f32 0.03125, %v23112_v20 }
0x26ae   :  { %v23122_v27 = vadd.f32 1e-05, %v23118_v1 }
0x26b0   :  { %25072 = vrsqrt.f32 %v23122_v27 }
0x26b1   :  { %v25067_v4 = vpop.eup %25066 }
0x26b2   :  { %v23129_v19 = vmul.f32 %v25067_v4, %v23097_v55 }
0x26b4   :  { %v23139_v28 = vmul.f32 %v23737_v61, %v23129_v19 }
0x26b6   :  { %v25069_v59 = vpop.eup %25068  ;;  %v23149_v42 = vadd.f32 %v23738_v43, %v23139_v28 }
0x26b7   :  { %v23128_v5 = vmul.f32 %v25069_v59, %v23096_v15 }
0x26b8   :  { %v23157_v16 = vsel %vm73_vm0, %v23149_v42, 0.0 }
0x26b9   :  { %v25071_v34 = vpop.eup %25070  ;;  %23158 = vadd.xlane.f32.xlu1 %v23157_v16  ;;  %v23138_v58 = vmul.f32 %v23737_v61, %v23128_v5 }
0x26ba   :  { %v23131_v26 = vmul.f32 %v25071_v34, %v23099_v52 }
0x26bb   :  { %v23148_v24 = vadd.f32 %v23738_v43, %v23138_v58 }
0x26bc   :  { %v23141_v38 = vmul.f32 %v23737_v61, %v23131_v26 }
0x26bd   :  { %v25073_v12 = vpop.eup %25072  ;;  %v23154_v10 = vsel %vm79_vm1, %v23148_v24, 0.0 }
0x26be   :  { %23155 = vadd.xlane.f32.xlu0 %v23154_v10  ;;  %v23151_v51 = vadd.f32 %v23738_v43, %v23141_v38  ;;  %v23130_v8 = vmul.f32 %v25073_v12, %v23098_v9 }
0x26c0   :  { %v23163_v47 = vsel %vm73_vm0, %v23151_v51, 0.0  ;;  %v23140_v40 = vmul.f32 %v23737_v61, %v23130_v8 }
0x26c1   :  { %23164 = vadd.xlane.f32.xlu1 %v23163_v47 }
0x26c2   :  { %v23150_v44 = vadd.f32 %v23738_v43, %v23140_v40 }
0x26c4   :  { %v23160_v39 = vsel %vm79_vm1, %v23150_v44, 0.0 }
0x26c5   :  { %23161 = vadd.xlane.f32.xlu0 %v23160_v39 }
0x2742   :  { %v23159_v11 = vpop.xlane.xlu1 %23158 }
0x2743   :  { %v23167_v33 = vmul.f32 0.03125, %v23159_v11 }
0x2745   :  { %v23171_v35 = vsub.f32 %v23149_v42, %v23167_v33 }
0x2747   :  { %v23156_v17 = vpop.xlane.xlu0 %23155  ;;  %v23175_v6 = vmul.f32 %v23171_v35, %v23171_v35 }
0x2748   :  { %v23166_v2 = vmul.f32 0.03125, %v23156_v17 }
0x2749   :  { %v23181_v63 = vsel %vm73_vm0, %v23175_v6, 0.0 }
0x274a   :  { %v23170_v29 = vsub.f32 %v23148_v24, %v23166_v2  ;;  %v23165_v25 = vpop.xlane.xlu1 %23164  ;;  %23182 = vadd.xlane.f32.xlu1 %v23181_v63 }
0x274b   :  { %v23169_v30 = vmul.f32 0.03125, %v23165_v25 }
0x274c   :  { %v23174_v37 = vmul.f32 %v23170_v29, %v23170_v29 }
0x274d   :  { %v23173_v7 = vsub.f32 %v23151_v51, %v23169_v30 }
0x274e   :  { %v23178_v55 = vsel %vm79_vm1, %v23174_v37, 0.0  ;;  %v23162_v50 = vpop.xlane.xlu0 %23161 }
0x274f   :  { %23179 = vadd.xlane.f32.xlu0 %v23178_v55  ;;  %v23168_v32 = vmul.f32 0.03125, %v23162_v50  ;;  %v23177_v41 = vmul.f32 %v23173_v7, %v23173_v7 }
0x2751   :  { %v23172_v56 = vsub.f32 %v23150_v44, %v23168_v32  ;;  %v23187_v15 = vsel %vm73_vm0, %v23177_v41, 0.0 }
0x2752   :  { %23188 = vadd.xlane.f32.xlu1 %v23187_v15 }
0x2753   :  { %v23176_v45 = vmul.f32 %v23172_v56, %v23172_v56 }
0x2755   :  { %v23184_v22 = vsel %vm79_vm1, %v23176_v45, 0.0 }
0x2756   :  { %23185 = vadd.xlane.f32.xlu0 %v23184_v22 }
0x27d3   :  { %v23183_v53 = vpop.xlane.xlu1 %23182 }
0x27d4   :  { %v23191_v52 = vmul.f32 0.03125, %v23183_v53 }
0x27d6   :  { %v23195_v18 = vadd.f32 1e-05, %v23191_v52 }
0x27d8   :  { %25074 = vrsqrt.f32 %v23195_v18  ;;  %v23180_v36 = vpop.xlane.xlu0 %23179 }
0x27d9   :  { %v23190_v13 = vmul.f32 0.03125, %v23180_v36 }
0x27db   :  { %v23194_v0 = vadd.f32 1e-05, %v23190_v13  ;;  %v23189_v9 = vpop.xlane.xlu1 %23188 }
0x27dc   :  { %v23193_v21 = vmul.f32 0.03125, %v23189_v9 }
0x27dd   :  { %25076 = vrsqrt.f32 %v23194_v0 }
0x27de   :  { %v23197_v49 = vadd.f32 1e-05, %v23193_v21 }
0x27df   :  { %v23186_v3 = vpop.xlane.xlu0 %23185 }
0x27e0   :  { %25078 = vrsqrt.f32 %v23197_v49  ;;  %v23192_v14 = vmul.f32 0.03125, %v23186_v3 }
0x27e2   :  { %v23196_v31 = vadd.f32 1e-05, %v23192_v14 }
0x27e4   :  { %25080 = vrsqrt.f32 %v23196_v31 }
0x27e5   :  { %v25075_v23 = vpop.eup %25074 }
0x27e6   :  { %v23203_v46 = vmul.f32 %v25075_v23, %v23171_v35 }
0x27e8   :  { %v23213_v54 = vmul.f32 %v23739_v57, %v23203_v46 }
0x27ea   :  { %v25077_v62 = vpop.eup %25076  ;;  %v23223_v48 = vadd.f32 %v23740_v60, %v23213_v54 }
0x27eb   :  { %v23202_v20 = vmul.f32 %v25077_v62, %v23170_v29 }
0x27ec   :  { %23227 = vst.msk [vmem:[%s29688_s3 + $0x8] sm:$0x1] %vm73_vm0, %v23223_v48 }
0x27ed   :  { %v25079_v1 = vpop.eup %25078  ;;  %v23212_v27 = vmul.f32 %v23739_v57, %v23202_v20 }
0x27ee   :  { %v23205_v4 = vmul.f32 %v25079_v1, %v23173_v7 }
0x27ef   :  { %v23222_v61 = vadd.f32 %v23740_v60, %v23212_v27 }
0x27f0   :  { %v23215_v19 = vmul.f32 %v23739_v57, %v23205_v4 }
0x27f1   :  { %v25081_v43 = vpop.eup %25080  ;;  %23226 = vst.msk [vmem:[%s29688_s3] sm:$0xff] %vm79_vm1, %v23222_v61 }
0x27f2   :  { %v23225_v28 = vadd.f32 %v23740_v60, %v23215_v19  ;;  %v23204_v59 = vmul.f32 %v25081_v43, %v23172_v56 }
0x27f4   :  { %23229 = vst.msk [vmem:[%s29688_s3 + $0x18] sm:$0x1] %vm73_vm0, %v23225_v28  ;;  %v23214_v42 = vmul.f32 %v23739_v57, %v23204_v59 }
0x27f6   :  { %v23224_v5 = vadd.f32 %v23740_v60, %v23214_v42 }
0x27f8   :  { %23228 = vst.msk [vmem:[%s29688_s3 + $0x10] sm:$0xff] %vm79_vm1, %v23224_v5 }

</bundles_post_ra>
